<compile_context>
chip_gen: v5e
topology: v5e:2x2
jax: 0.10.0
libtpu: 0.0.40
codegen_flags: <defaults>
</compile_context>

<pallas_src>
import functools

import numpy as np
import jax
import jax.numpy as jnp
from jax.experimental import pallas as pl
from jax.experimental.pallas import tpu as pltpu


# ----------------------------------------------------------------------------
# Generation-aware VMEM limit (v7x has only 64 MiB physical VMEM per TC).
# ----------------------------------------------------------------------------
def _vmem_limit_bytes():
    try:
        cap = int(pltpu.get_tpu_info().vmem_capacity_bytes)
    except Exception:
        cap = 64 * 1024 * 1024  # conservative fallback (v7x-sized)
    return min((cap * 3) // 4, 96 * 1024 * 1024)


_VMEM_LIMIT = _vmem_limit_bytes()


def _pick_th(H, W, target_rows=512):
    """H-tile so each matmul tile has ~target_rows rows and th divides H."""
    cap = max(1, min(H, target_rows // max(W, 1)))
    for t in range(cap, 0, -1):
        if H % t == 0:
            return t
    return H


def _pick_rows(m, target=1024):
    """Largest 8-aligned row tile <= target that divides m (else m itself)."""
    if m <= target:
        return m
    t = (target // 8) * 8
    while t >= 8:
        if m % t == 0:
            return t
        t -= 8
    return m  # rare fallback: single block


# ----------------------------------------------------------------------------
# Kernel helpers (traced inline into each kernel body)
# ----------------------------------------------------------------------------
def _conv_taps(win, w_ref, b_ref, th, W):
    """3x3 taps of a (th+2, W+2, C) window -> (th*W, O) f32 accumulator."""
    C = win.shape[-1]
    O = w_ref.shape[-1]
    acc = jnp.zeros((th * W, O), jnp.float32)
    for dx in range(3):                               # lane-preserving col shift
        col = win[:, dx:dx + W, :]                    # (th+2, W, C)
        for dy in range(3):                           # row shift: major-dim slice
            patch = col[dy:dy + th].reshape(th * W, C)
            acc = acc + jnp.dot(patch, w_ref[dy * 3 + dx],
                                preferred_element_type=jnp.float32)
    return acc + b_ref[...]                           # (1, O) broadcast


def _write_conv_outputs(acc, y_ref, stats_ref, th, W):
    O = acc.shape[-1]
    s1 = jnp.sum(acc, axis=0, keepdims=True)          # (1, O)
    s2 = jnp.sum(acc * acc, axis=0, keepdims=True)    # (1, O)
    stats_ref[...] = jnp.concatenate([s1, s2], axis=0).reshape(1, 1, 2, O)
    y_ref[...] = acc.reshape(1, th, W, O)


# ----------------------------------------------------------------------------
# Pallas kernels
# ----------------------------------------------------------------------------
def _conv3x3_bias_stats_kernel(x_ref, w_ref, b_ref, y_ref, stats_ref, *, th, W):
    """3x3 conv (pad=1) + bias + per-tile BN stats.

    x_ref:     (1, H+2, W+2, C)  zero-padded input image (resident per batch)
    w_ref:     (9, C, O)         weights, tap index t = dy*3 + dx
    b_ref:     (1, O)            bias
    y_ref:     (1, th, W, O)     conv output tile (pre-BN)
    stats_ref: (1, 1, 2, O)      per-tile [sum, sum_of_squares]
    """
    i = pl.program_id(1)
    h0 = pl.multiple_of(i * th, th)
    win = x_ref[0, pl.ds(h0, th + 2), :, :]           # (th+2, W+2, C)
    acc = _conv_taps(win, w_ref, b_ref, th, W)
    _write_conv_outputs(acc, y_ref, stats_ref, th, W)


def _act_conv3x3_bias_stats_kernel(x_ref, s_ref, t_ref, w_ref, b_ref,
                                   y_ref, stats_ref, *, th, W, H):
    """Fused [BN1-apply + ReLU] -> 3x3 conv + bias + per-tile BN stats.

    x_ref is the *raw* (pre-BN) conv1 output, zero-padded.  The per-channel
    affine + ReLU is applied in-register on the window; an iota mask keeps the
    zero-pad halo at exactly zero (relu(shift) would otherwise leak in).
    """
    i = pl.program_id(1)
    C = x_ref.shape[-1]
    h0 = pl.multiple_of(i * th, th)
    win = x_ref[0, pl.ds(h0, th + 2), :, :]           # (th+2, W+2, C)

    scale = s_ref[...].reshape(1, 1, C)
    shift = t_ref[...].reshape(1, 1, C)
    rows = jax.lax.broadcasted_iota(jnp.int32, (th + 2, W + 2, 1), 0) + h0
    cols = jax.lax.broadcasted_iota(jnp.int32, (th + 2, W + 2, 1), 1)
    interior = (rows >= 1) & (rows <= H) & (cols >= 1) & (cols <= W)
    act = jnp.where(interior,
                    jnp.maximum(win * scale + shift, 0.0),
                    0.0)                              # (th+2, W+2, C)

    acc = _conv_taps(act, w_ref, b_ref, th, W)
    _write_conv_outputs(acc, y_ref, stats_ref, th, W)


def _bn_relu_add_kernel(x_ref, s_ref, t_ref, r_ref, o_ref):
    o_ref[...] = r_ref[...] + jnp.maximum(x_ref[...] * s_ref[...] + t_ref[...], 0.0)


# ----------------------------------------------------------------------------
# Layer wrappers
# ----------------------------------------------------------------------------
def conv3x3_with_stats(x, w, bias, act_scale=None, act_shift=None):
    """x: NHWC f32 (raw image, or raw pre-BN activations when act_* given).
    w: (O, C, 3, 3) torch layout.  pad=1, stride=1.

    Returns (y, stats): y (B, H, W, O) pre-BN conv output; stats (B, nh, 2, O)
    per-tile partial sums / sums-of-squares.
    """
    B, H, W, C = x.shape
    O = w.shape[0]
    th = _pick_th(H, W)
    nh = H // th
    Hp, Wp = H + 2, W + 2

    xp = jnp.pad(x, ((0, 0), (1, 1), (1, 1), (0, 0)))
    wt = jnp.transpose(w, (2, 3, 1, 0)).reshape(9, C, O)   # (tap, cin, cout)

    x_spec = pl.BlockSpec((1, Hp, Wp, C), lambda b, i: (b, 0, 0, 0))
    w_spec = pl.BlockSpec((9, C, O), lambda b, i: (0, 0, 0))
    b_spec = pl.BlockSpec((1, O), lambda b, i: (0, 0))
    vec_spec = pl.BlockSpec((1, C), lambda b, i: (0, 0))
    out_specs = (
        pl.BlockSpec((1, th, W, O), lambda b, i: (b, i, 0, 0)),
        pl.BlockSpec((1, 1, 2, O), lambda b, i: (b, i, 0, 0)),
    )
    out_shape = (
        jax.ShapeDtypeStruct((B, H, W, O), jnp.float32),
        jax.ShapeDtypeStruct((B, nh, 2, O), jnp.float32),
    )
    cp = pltpu.CompilerParams(
        dimension_semantics=("parallel", "parallel"),
        vmem_limit_bytes=_VMEM_LIMIT,
    )

    if act_scale is None:
        return pl.pallas_call(
            functools.partial(_conv3x3_bias_stats_kernel, th=th, W=W),
            out_shape=out_shape,
            grid=(B, nh),
            in_specs=[x_spec, w_spec, b_spec],
            out_specs=out_specs,
            compiler_params=cp,
        )(xp, wt, bias.reshape(1, O))

    return pl.pallas_call(
        functools.partial(_act_conv3x3_bias_stats_kernel, th=th, W=W, H=H),
        out_shape=out_shape,
        grid=(B, nh),
        in_specs=[x_spec, vec_spec, vec_spec, w_spec, b_spec],
        out_specs=out_specs,
        compiler_params=cp,
    )(xp, act_scale.reshape(1, C), act_shift.reshape(1, C),
      wt, bias.reshape(1, O))


def _bn_affine_from_stats(stats, count, gamma, beta, eps=1e-5):
    """Tiny glue: reduce per-tile partial sums -> per-channel scale/shift."""
    s = jnp.sum(stats, axis=(0, 1))                   # (2, C)
    mean = s[0] / count
    var = jnp.maximum(s[1] / count - mean * mean, 0.0)  # biased (training-mode)
    scale = gamma * jax.lax.rsqrt(var + eps)
    shift = beta - mean * scale
    return scale, shift


def bn_relu_add_apply(y, scale, shift, residual):
    """Elementwise residual + relu(y*scale + shift), big row tiles."""
    B, H, W, C = y.shape
    M = B * H * W
    tm = _pick_rows(M, 1024)

    row = pl.BlockSpec((tm, C), lambda i: (i, 0))
    vec = pl.BlockSpec((1, C), lambda i: (0, 0))
    cp = pltpu.CompilerParams(
        dimension_semantics=("parallel",), vmem_limit_bytes=_VMEM_LIMIT)

    out = pl.pallas_call(
        _bn_relu_add_kernel,
        out_shape=jax.ShapeDtypeStruct((M, C), jnp.float32),
        grid=(M // tm,),
        in_specs=[row, vec, vec, row],
        out_specs=row,
        compiler_params=cp,
    )(y.reshape(M, C), scale.reshape(1, C), shift.reshape(1, C),
      residual.reshape(M, C))
    return out.reshape(B, H, W, C)


# ----------------------------------------------------------------------------
# ResidualBlock forward (matches the PyTorch module in training mode)
# ----------------------------------------------------------------------------
def residual_block_forward(params, x_nchw, eps=1e-5):
    x = jnp.transpose(x_nchw, (0, 2, 3, 1)).astype(jnp.float32)  # NCHW -> NHWC
    B, H, W, C = x.shape
    count = B * H * W

    # conv1 (pre-BN) + BN1 stats
    y1, st1 = conv3x3_with_stats(x, params["w1"], params["b1"])
    sc1, sh1 = _bn_affine_from_stats(st1, count, params["g1"], params["bt1"], eps)

    # conv2 with BN1-apply + ReLU fused into its input path (h never hits HBM)
    y2, st2 = conv3x3_with_stats(y1, params["w2"], params["b2"],
                                 act_scale=sc1, act_shift=sh1)
    sc2, sh2 = _bn_affine_from_stats(st2, count, params["g2"], params["bt2"], eps)

    # identity + relu(BN2(y2))
    out = bn_relu_add_apply(y2, sc2, sh2, residual=x)

    return jnp.transpose(out, (0, 3, 1, 2))           # NHWC -> NCHW


# ----------------------------------------------------------------------------
# Parameter init (PyTorch-like fan-in scaling) and pure-JAX reference
# ----------------------------------------------------------------------------
def init_residual_block_params(key, fn):
    k1, k2, k3, k4 = jax.random.split(key, 4)
    bound = 1.0 / np.sqrt(fn * 3 * 3)
    return dict(
        w1=jax.random.uniform(k1, (fn, fn, 3, 3), jnp.float32, -bound, bound),
        b1=jax.random.uniform(k2, (fn,), jnp.float32, -bound, bound),
        w2=jax.random.uniform(k3, (fn, fn, 3, 3), jnp.float32, -bound, bound),
        b2=jax.random.uniform(k4, (fn,), jnp.float32, -bound, bound),
        g1=jnp.ones((fn,), jnp.float32), bt1=jnp.zeros((fn,), jnp.float32),
        g2=jnp.ones((fn,), jnp.float32), bt2=jnp.zeros((fn,), jnp.float32),
    )


def reference_forward(params, x_nchw, eps=1e-5):
    x = jnp.transpose(x_nchw, (0, 2, 3, 1)).astype(jnp.float32)

    def conv(h, w, b):
        return jax.lax.conv_general_dilated(
            h, jnp.transpose(w, (2, 3, 1, 0)), (1, 1), "SAME",
            dimension_numbers=("NHWC", "HWIO", "NHWC"),
            precision=jax.lax.Precision.HIGHEST) + b

    def bn_relu(h, g, bt):
        m = jnp.mean(h, axis=(0, 1, 2))
        v = jnp.mean(jnp.square(h - m), axis=(0, 1, 2))
        return jnp.maximum((h - m) * jax.lax.rsqrt(v + eps) * g + bt, 0.0)

    h = bn_relu(conv(x, params["w1"], params["b1"]), params["g1"], params["bt1"])
    h = bn_relu(conv(h, params["w2"], params["b2"]), params["g2"], params["bt2"])
    return jnp.transpose(x + h, (0, 3, 1, 2))


# ----------------------------------------------------------------------------
if __name__ == "__main__":
    key = jax.random.PRNGKey(0)
    kp, kx = jax.random.split(key)

    B, FN, H, W = 2, 64, 16, 16          # ResidualBlock(fn=64) on a 16x16 map
    params = init_residual_block_params(kp, FN)
    x = jax.random.normal(kx, (B, FN, H, W), jnp.float32)

    fwd = jax.jit(residual_block_forward)
    out = fwd(params, x)
    jax.block_until_ready(out)

    assert out.shape == (B, FN, H, W)
    assert bool(jnp.all(jnp.isfinite(out)))

    ref = reference_forward(params, x)
    max_err = float(jnp.max(jnp.abs(out - ref)))
    assert max_err < 1e-2, f"mismatch vs reference: {max_err}"

    print("KERNEL_OK")
</pallas_src>

<mosaic_0001>
module attributes {stable_mosaic.version = 11 : i64} {
  func.func @_conv3x3_bias_stats_kernel(%arg0: i32, %arg1: i32, %arg2: memref<1x18x18x64xf32, #tpu.memory_space<vmem>>, %arg3: memref<9x64x64xf32, #tpu.memory_space<vmem>>, %arg4: memref<1x64xf32, #tpu.memory_space<vmem>>, %arg5: memref<1x16x16x64xf32, #tpu.memory_space<vmem>>, %arg6: memref<1x1x2x64xf32, #tpu.memory_space<vmem>>) attributes {dimension_semantics = [#tpu.dimension_semantics<parallel>, #tpu.dimension_semantics<parallel>], iteration_bounds = array<i64: 2, 1>, scalar_prefetch = 0 : i64, scratch_operands = 0 : i64, tpu.core_type = #tpu.core_type<tc>, window_params = [{transform_indices = @transform_0, window_bounds = array<i64: 1, 18, 18, 64>}, {pipeline_mode = #tpu.pipeline_mode<synchronous>, transform_indices = @transform_1, window_bounds = array<i64: 9, 64, 64>}, {pipeline_mode = #tpu.pipeline_mode<synchronous>, transform_indices = @transform_2, window_bounds = array<i64: 1, 64>}, {transform_indices = @transform_3, window_bounds = array<i64: 1, 16, 16, 64>}, {transform_indices = @transform_4, window_bounds = array<i64: 1, 1, 2, 64>}]} {
    %c16_i32 = arith.constant 16 : i32
    %0 = arith.muli %arg1, %c16_i32 : i32
    %1 = tpu.assume_multiple %0, 16 : i32
    %c0 = arith.constant 0 : index
    %2 = arith.index_cast %1 : i32 to index
    %c0_0 = arith.constant 0 : index
    %c0_1 = arith.constant 0 : index
    %3 = vector.load %arg2[%c0, %2, %c0_0, %c0_1] : memref<1x18x18x64xf32, #tpu.memory_space<vmem>>, vector<1x18x18x64xf32>
    %4 = vector.shape_cast %3 : vector<1x18x18x64xf32> to vector<18x18x64xf32>
    %cst = arith.constant 0.000000e+00 : f32
    %5 = vector.broadcast %cst : f32 to vector<256x64xf32>
    %6 = vector.extract_strided_slice %4 {offsets = [0, 0, 0], sizes = [18, 16, 64], strides = [1, 1, 1]} : vector<18x18x64xf32> to vector<18x16x64xf32>
    %7 = vector.extract_strided_slice %6 {offsets = [0, 0, 0], sizes = [16, 16, 64], strides = [1, 1, 1]} : vector<18x16x64xf32> to vector<16x16x64xf32>
    %8 = vector.shape_cast %7 : vector<16x16x64xf32> to vector<256x64xf32>
    %c0_2 = arith.constant 0 : index
    %c0_3 = arith.constant 0 : index
    %c0_4 = arith.constant 0 : index
    %9 = vector.load %arg3[%c0_2, %c0_3, %c0_4] : memref<9x64x64xf32, #tpu.memory_space<vmem>>, vector<1x64x64xf32>
    %10 = vector.shape_cast %9 : vector<1x64x64xf32> to vector<64x64xf32>
    %cst_5 = arith.constant dense<0.000000e+00> : vector<256x64xf32>
    %11 = tpu.matmul %8, %10, %cst_5 {dimension_numbers = #tpu.dot_dimension_numbers<[1], [0], [0], [1], [0, 0, 1, 1], [], []>} : vector<256x64xf32>, vector<64x64xf32>, vector<256x64xf32> -> vector<256x64xf32>
    %12 = arith.addf %5, %11 : vector<256x64xf32>
    %13 = vector.extract_strided_slice %6 {offsets = [1, 0, 0], sizes = [16, 16, 64], strides = [1, 1, 1]} : vector<18x16x64xf32> to vector<16x16x64xf32>
    %14 = vector.shape_cast %13 : vector<16x16x64xf32> to vector<256x64xf32>
    %c3 = arith.constant 3 : index
    %c0_6 = arith.constant 0 : index
    %c0_7 = arith.constant 0 : index
    %15 = vector.load %arg3[%c3, %c0_6, %c0_7] : memref<9x64x64xf32, #tpu.memory_space<vmem>>, vector<1x64x64xf32>
    %16 = vector.shape_cast %15 : vector<1x64x64xf32> to vector<64x64xf32>
    %cst_8 = arith.constant dense<0.000000e+00> : vector<256x64xf32>
    %17 = tpu.matmul %14, %16, %cst_8 {dimension_numbers = #tpu.dot_dimension_numbers<[1], [0], [0], [1], [0, 0, 1, 1], [], []>} : vector<256x64xf32>, vector<64x64xf32>, vector<256x64xf32> -> vector<256x64xf32>
    %18 = arith.addf %12, %17 : vector<256x64xf32>
    %19 = vector.extract_strided_slice %6 {offsets = [2, 0, 0], sizes = [16, 16, 64], strides = [1, 1, 1]} : vector<18x16x64xf32> to vector<16x16x64xf32>
    %20 = vector.shape_cast %19 : vector<16x16x64xf32> to vector<256x64xf32>
    %c6 = arith.constant 6 : index
    %c0_9 = arith.constant 0 : index
    %c0_10 = arith.constant 0 : index
    %21 = vector.load %arg3[%c6, %c0_9, %c0_10] : memref<9x64x64xf32, #tpu.memory_space<vmem>>, vector<1x64x64xf32>
    %22 = vector.shape_cast %21 : vector<1x64x64xf32> to vector<64x64xf32>
    %cst_11 = arith.constant dense<0.000000e+00> : vector<256x64xf32>
    %23 = tpu.matmul %20, %22, %cst_11 {dimension_numbers = #tpu.dot_dimension_numbers<[1], [0], [0], [1], [0, 0, 1, 1], [], []>} : vector<256x64xf32>, vector<64x64xf32>, vector<256x64xf32> -> vector<256x64xf32>
    %24 = arith.addf %18, %23 : vector<256x64xf32>
    %25 = vector.extract_strided_slice %4 {offsets = [0, 1, 0], sizes = [18, 16, 64], strides = [1, 1, 1]} : vector<18x18x64xf32> to vector<18x16x64xf32>
    %26 = vector.extract_strided_slice %25 {offsets = [0, 0, 0], sizes = [16, 16, 64], strides = [1, 1, 1]} : vector<18x16x64xf32> to vector<16x16x64xf32>
    %27 = vector.shape_cast %26 : vector<16x16x64xf32> to vector<256x64xf32>
    %c1 = arith.constant 1 : index
    %c0_12 = arith.constant 0 : index
    %c0_13 = arith.constant 0 : index
    %28 = vector.load %arg3[%c1, %c0_12, %c0_13] : memref<9x64x64xf32, #tpu.memory_space<vmem>>, vector<1x64x64xf32>
    %29 = vector.shape_cast %28 : vector<1x64x64xf32> to vector<64x64xf32>
    %cst_14 = arith.constant dense<0.000000e+00> : vector<256x64xf32>
    %30 = tpu.matmul %27, %29, %cst_14 {dimension_numbers = #tpu.dot_dimension_numbers<[1], [0], [0], [1], [0, 0, 1, 1], [], []>} : vector<256x64xf32>, vector<64x64xf32>, vector<256x64xf32> -> vector<256x64xf32>
    %31 = arith.addf %24, %30 : vector<256x64xf32>
    %32 = vector.extract_strided_slice %25 {offsets = [1, 0, 0], sizes = [16, 16, 64], strides = [1, 1, 1]} : vector<18x16x64xf32> to vector<16x16x64xf32>
    %33 = vector.shape_cast %32 : vector<16x16x64xf32> to vector<256x64xf32>
    %c4 = arith.constant 4 : index
    %c0_15 = arith.constant 0 : index
    %c0_16 = arith.constant 0 : index
    %34 = vector.load %arg3[%c4, %c0_15, %c0_16] : memref<9x64x64xf32, #tpu.memory_space<vmem>>, vector<1x64x64xf32>
    %35 = vector.shape_cast %34 : vector<1x64x64xf32> to vector<64x64xf32>
    %cst_17 = arith.constant dense<0.000000e+00> : vector<256x64xf32>
    %36 = tpu.matmul %33, %35, %cst_17 {dimension_numbers = #tpu.dot_dimension_numbers<[1], [0], [0], [1], [0, 0, 1, 1], [], []>} : vector<256x64xf32>, vector<64x64xf32>, vector<256x64xf32> -> vector<256x64xf32>
    %37 = arith.addf %31, %36 : vector<256x64xf32>
    %38 = vector.extract_strided_slice %25 {offsets = [2, 0, 0], sizes = [16, 16, 64], strides = [1, 1, 1]} : vector<18x16x64xf32> to vector<16x16x64xf32>
    %39 = vector.shape_cast %38 : vector<16x16x64xf32> to vector<256x64xf32>
    %c7 = arith.constant 7 : index
    %c0_18 = arith.constant 0 : index
    %c0_19 = arith.constant 0 : index
    %40 = vector.load %arg3[%c7, %c0_18, %c0_19] : memref<9x64x64xf32, #tpu.memory_space<vmem>>, vector<1x64x64xf32>
    %41 = vector.shape_cast %40 : vector<1x64x64xf32> to vector<64x64xf32>
    %cst_20 = arith.constant dense<0.000000e+00> : vector<256x64xf32>
    %42 = tpu.matmul %39, %41, %cst_20 {dimension_numbers = #tpu.dot_dimension_numbers<[1], [0], [0], [1], [0, 0, 1, 1], [], []>} : vector<256x64xf32>, vector<64x64xf32>, vector<256x64xf32> -> vector<256x64xf32>
    %43 = arith.addf %37, %42 : vector<256x64xf32>
    %44 = vector.extract_strided_slice %4 {offsets = [0, 2, 0], sizes = [18, 16, 64], strides = [1, 1, 1]} : vector<18x18x64xf32> to vector<18x16x64xf32>
    %45 = vector.extract_strided_slice %44 {offsets = [0, 0, 0], sizes = [16, 16, 64], strides = [1, 1, 1]} : vector<18x16x64xf32> to vector<16x16x64xf32>
    %46 = vector.shape_cast %45 : vector<16x16x64xf32> to vector<256x64xf32>
    %c2 = arith.constant 2 : index
    %c0_21 = arith.constant 0 : index
    %c0_22 = arith.constant 0 : index
    %47 = vector.load %arg3[%c2, %c0_21, %c0_22] : memref<9x64x64xf32, #tpu.memory_space<vmem>>, vector<1x64x64xf32>
    %48 = vector.shape_cast %47 : vector<1x64x64xf32> to vector<64x64xf32>
    %cst_23 = arith.constant dense<0.000000e+00> : vector<256x64xf32>
    %49 = tpu.matmul %46, %48, %cst_23 {dimension_numbers = #tpu.dot_dimension_numbers<[1], [0], [0], [1], [0, 0, 1, 1], [], []>} : vector<256x64xf32>, vector<64x64xf32>, vector<256x64xf32> -> vector<256x64xf32>
    %50 = arith.addf %43, %49 : vector<256x64xf32>
    %51 = vector.extract_strided_slice %44 {offsets = [1, 0, 0], sizes = [16, 16, 64], strides = [1, 1, 1]} : vector<18x16x64xf32> to vector<16x16x64xf32>
    %52 = vector.shape_cast %51 : vector<16x16x64xf32> to vector<256x64xf32>
    %c5 = arith.constant 5 : index
    %c0_24 = arith.constant 0 : index
    %c0_25 = arith.constant 0 : index
    %53 = vector.load %arg3[%c5, %c0_24, %c0_25] : memref<9x64x64xf32, #tpu.memory_space<vmem>>, vector<1x64x64xf32>
    %54 = vector.shape_cast %53 : vector<1x64x64xf32> to vector<64x64xf32>
    %cst_26 = arith.constant dense<0.000000e+00> : vector<256x64xf32>
    %55 = tpu.matmul %52, %54, %cst_26 {dimension_numbers = #tpu.dot_dimension_numbers<[1], [0], [0], [1], [0, 0, 1, 1], [], []>} : vector<256x64xf32>, vector<64x64xf32>, vector<256x64xf32> -> vector<256x64xf32>
    %56 = arith.addf %50, %55 : vector<256x64xf32>
    %57 = vector.extract_strided_slice %44 {offsets = [2, 0, 0], sizes = [16, 16, 64], strides = [1, 1, 1]} : vector<18x16x64xf32> to vector<16x16x64xf32>
    %58 = vector.shape_cast %57 : vector<16x16x64xf32> to vector<256x64xf32>
    %c8 = arith.constant 8 : index
    %c0_27 = arith.constant 0 : index
    %c0_28 = arith.constant 0 : index
    %59 = vector.load %arg3[%c8, %c0_27, %c0_28] : memref<9x64x64xf32, #tpu.memory_space<vmem>>, vector<1x64x64xf32>
    %60 = vector.shape_cast %59 : vector<1x64x64xf32> to vector<64x64xf32>
    %cst_29 = arith.constant dense<0.000000e+00> : vector<256x64xf32>
    %61 = tpu.matmul %58, %60, %cst_29 {dimension_numbers = #tpu.dot_dimension_numbers<[1], [0], [0], [1], [0, 0, 1, 1], [], []>} : vector<256x64xf32>, vector<64x64xf32>, vector<256x64xf32> -> vector<256x64xf32>
    %62 = arith.addf %56, %61 : vector<256x64xf32>
    %c0_30 = arith.constant 0 : index
    %c0_31 = arith.constant 0 : index
    %63 = vector.load %arg4[%c0_30, %c0_31] : memref<1x64xf32, #tpu.memory_space<vmem>>, vector<1x64xf32>
    %64 = vector.broadcast %63 : vector<1x64xf32> to vector<256x64xf32>
    %65 = arith.addf %62, %64 : vector<256x64xf32>
    %cst_32 = arith.constant dense<0.000000e+00> : vector<64xf32>
    %66 = vector.multi_reduction <add>, %65, %cst_32 [0] : vector<256x64xf32> to vector<64xf32>
    %67 = vector.shape_cast %66 : vector<64xf32> to vector<1x64xf32>
    %68 = arith.mulf %65, %65 : vector<256x64xf32>
    %cst_33 = arith.constant dense<0.000000e+00> : vector<64xf32>
    %69 = vector.multi_reduction <add>, %68, %cst_33 [0] : vector<256x64xf32> to vector<64xf32>
    %70 = vector.shape_cast %69 : vector<64xf32> to vector<1x64xf32>
    %71 = tpu.concatenate %67, %70 in 0 : vector<1x64xf32>, vector<1x64xf32> -> vector<2x64xf32>
    %72 = vector.shape_cast %71 : vector<2x64xf32> to vector<1x1x2x64xf32>
    %c0_34 = arith.constant 0 : index
    %c0_35 = arith.constant 0 : index
    %c0_36 = arith.constant 0 : index
    %c0_37 = arith.constant 0 : index
    %73 = vector.load %arg6[%c0_34, %c0_35, %c0_36, %c0_37] : memref<1x1x2x64xf32, #tpu.memory_space<vmem>>, vector<1x1x2x64xf32>
    tpu.vector_store %arg6[%c0_34, %c0_35, %c0_36, %c0_37], %72 {strides = array<i32>} : memref<1x1x2x64xf32, #tpu.memory_space<vmem>>, vector<1x1x2x64xf32>,
    %74 = vector.shape_cast %65 : vector<256x64xf32> to vector<1x16x16x64xf32>
    %c0_38 = arith.constant 0 : index
    %c0_39 = arith.constant 0 : index
    %c0_40 = arith.constant 0 : index
    %c0_41 = arith.constant 0 : index
    %75 = vector.load %arg5[%c0_38, %c0_39, %c0_40, %c0_41] : memref<1x16x16x64xf32, #tpu.memory_space<vmem>>, vector<1x16x16x64xf32>
    tpu.vector_store %arg5[%c0_38, %c0_39, %c0_40, %c0_41], %74 {strides = array<i32>} : memref<1x16x16x64xf32, #tpu.memory_space<vmem>>, vector<1x16x16x64xf32>,
    return
  }
  func.func @transform_0(%arg0: i32, %arg1: i32) -> (i32, i32, i32, i32) {
    %c0_i32 = arith.constant 0 : i32
    %c0_i32_0 = arith.constant 0 : i32
    %c0_i32_1 = arith.constant 0 : i32
    %c0_i32_2 = arith.constant 0 : i32
    return %arg0, %c0_i32, %c0_i32_0, %c0_i32_1 : i32, i32, i32, i32
  }
  func.func @transform_1(%arg0: i32, %arg1: i32) -> (i32, i32, i32) {
    %c0_i32 = arith.constant 0 : i32
    %c0_i32_0 = arith.constant 0 : i32
    %c0_i32_1 = arith.constant 0 : i32
    %c0_i32_2 = arith.constant 0 : i32
    return %c0_i32, %c0_i32_0, %c0_i32_1 : i32, i32, i32
  }
  func.func @transform_2(%arg0: i32, %arg1: i32) -> (i32, i32) {
    %c0_i32 = arith.constant 0 : i32
    %c0_i32_0 = arith.constant 0 : i32
    %c0_i32_1 = arith.constant 0 : i32
    return %c0_i32, %c0_i32_0 : i32, i32
  }
  func.func @transform_3(%arg0: i32, %arg1: i32) -> (i32, i32, i32, i32) {
    %c0_i32 = arith.constant 0 : i32
    %c0_i32_0 = arith.constant 0 : i32
    %c0_i32_1 = arith.constant 0 : i32
    return %arg0, %arg1, %c0_i32, %c0_i32_0 : i32, i32, i32, i32
  }
  func.func @transform_4(%arg0: i32, %arg1: i32) -> (i32, i32, i32, i32) {
    %c0_i32 = arith.constant 0 : i32
    %c0_i32_0 = arith.constant 0 : i32
    %c0_i32_1 = arith.constant 0 : i32
    return %arg0, %arg1, %c0_i32, %c0_i32_0 : i32, i32, i32, i32
  }
}

module attributes {stable_mosaic.version = 11 : i64} {
  func.func @_bn_relu_add_kernel(%arg0: i32, %arg1: memref<512x64xf32, #tpu.memory_space<vmem>>, %arg2: memref<1x64xf32, #tpu.memory_space<vmem>>, %arg3: memref<1x64xf32, #tpu.memory_space<vmem>>, %arg4: memref<512x64xf32, #tpu.memory_space<vmem>>, %arg5: memref<512x64xf32, #tpu.memory_space<vmem>>) attributes {dimension_semantics = [#tpu.dimension_semantics<parallel>], iteration_bounds = array<i64: 1>, scalar_prefetch = 0 : i64, scratch_operands = 0 : i64, tpu.core_type = #tpu.core_type<tc>, window_params = [{transform_indices = @transform_0, window_bounds = array<i64: 512, 64>}, {pipeline_mode = #tpu.pipeline_mode<synchronous>, transform_indices = @transform_1, window_bounds = array<i64: 1, 64>}, {pipeline_mode = #tpu.pipeline_mode<synchronous>, transform_indices = @transform_2, window_bounds = array<i64: 1, 64>}, {transform_indices = @transform_3, window_bounds = array<i64: 512, 64>}, {transform_indices = @transform_4, window_bounds = array<i64: 512, 64>}]} {
    %c0 = arith.constant 0 : index
    %c0_0 = arith.constant 0 : index
    %0 = vector.load %arg4[%c0, %c0_0] : memref<512x64xf32, #tpu.memory_space<vmem>>, vector<512x64xf32>
    %c0_1 = arith.constant 0 : index
    %c0_2 = arith.constant 0 : index
    %1 = vector.load %arg1[%c0_1, %c0_2] : memref<512x64xf32, #tpu.memory_space<vmem>>, vector<512x64xf32>
    %c0_3 = arith.constant 0 : index
    %c0_4 = arith.constant 0 : index
    %2 = vector.load %arg2[%c0_3, %c0_4] : memref<1x64xf32, #tpu.memory_space<vmem>>, vector<1x64xf32>
    %3 = vector.broadcast %2 : vector<1x64xf32> to vector<512x64xf32>
    %4 = arith.mulf %1, %3 : vector<512x64xf32>
    %c0_5 = arith.constant 0 : index
    %c0_6 = arith.constant 0 : index
    %5 = vector.load %arg3[%c0_5, %c0_6] : memref<1x64xf32, #tpu.memory_space<vmem>>, vector<1x64xf32>
    %6 = vector.broadcast %5 : vector<1x64xf32> to vector<512x64xf32>
    %7 = arith.addf %4, %6 : vector<512x64xf32>
    %cst = arith.constant 0.000000e+00 : f32
    %8 = vector.broadcast %cst : f32 to vector<512x64xf32>
    %9 = arith.maximumf %7, %8 : vector<512x64xf32>
    %10 = arith.addf %0, %9 : vector<512x64xf32>
    %c0_7 = arith.constant 0 : index
    %c0_8 = arith.constant 0 : index
    %11 = vector.load %arg5[%c0_7, %c0_8] : memref<512x64xf32, #tpu.memory_space<vmem>>, vector<512x64xf32>
    tpu.vector_store %arg5[%c0_7, %c0_8], %10 {strides = array<i32>} : memref<512x64xf32, #tpu.memory_space<vmem>>, vector<512x64xf32>,
    return
  }
  func.func @transform_0(%arg0: i32) -> (i32, i32) {
    %c0_i32 = arith.constant 0 : i32
    %c0_i32_0 = arith.constant 0 : i32
    return %arg0, %c0_i32 : i32, i32
  }
  func.func @transform_1(%arg0: i32) -> (i32, i32) {
    %c0_i32 = arith.constant 0 : i32
    %c0_i32_0 = arith.constant 0 : i32
    %c0_i32_1 = arith.constant 0 : i32
    return %c0_i32, %c0_i32_0 : i32, i32
  }
  func.func @transform_2(%arg0: i32) -> (i32, i32) {
    %c0_i32 = arith.constant 0 : i32
    %c0_i32_0 = arith.constant 0 : i32
    %c0_i32_1 = arith.constant 0 : i32
    return %c0_i32, %c0_i32_0 : i32, i32
  }
  func.func @transform_3(%arg0: i32) -> (i32, i32) {
    %c0_i32 = arith.constant 0 : i32
    %c0_i32_0 = arith.constant 0 : i32
    return %arg0, %c0_i32 : i32, i32
  }
  func.func @transform_4(%arg0: i32) -> (i32, i32) {
    %c0_i32 = arith.constant 0 : i32
    %c0_i32_0 = arith.constant 0 : i32
    return %arg0, %c0_i32 : i32, i32
  }
}

module attributes {stable_mosaic.version = 11 : i64} {
  func.func @_act_conv3x3_bias_stats_kernel(%arg0: i32, %arg1: i32, %arg2: memref<1x18x18x64xf32, #tpu.memory_space<vmem>>, %arg3: memref<1x64xf32, #tpu.memory_space<vmem>>, %arg4: memref<1x64xf32, #tpu.memory_space<vmem>>, %arg5: memref<9x64x64xf32, #tpu.memory_space<vmem>>, %arg6: memref<1x64xf32, #tpu.memory_space<vmem>>, %arg7: memref<1x16x16x64xf32, #tpu.memory_space<vmem>>, %arg8: memref<1x1x2x64xf32, #tpu.memory_space<vmem>>) attributes {dimension_semantics = [#tpu.dimension_semantics<parallel>, #tpu.dimension_semantics<parallel>], iteration_bounds = array<i64: 2, 1>, scalar_prefetch = 0 : i64, scratch_operands = 0 : i64, tpu.core_type = #tpu.core_type<tc>, window_params = [{transform_indices = @transform_0, window_bounds = array<i64: 1, 18, 18, 64>}, {pipeline_mode = #tpu.pipeline_mode<synchronous>, transform_indices = @transform_1, window_bounds = array<i64: 1, 64>}, {pipeline_mode = #tpu.pipeline_mode<synchronous>, transform_indices = @transform_2, window_bounds = array<i64: 1, 64>}, {pipeline_mode = #tpu.pipeline_mode<synchronous>, transform_indices = @transform_3, window_bounds = array<i64: 9, 64, 64>}, {pipeline_mode = #tpu.pipeline_mode<synchronous>, transform_indices = @transform_4, window_bounds = array<i64: 1, 64>}, {transform_indices = @transform_5, window_bounds = array<i64: 1, 16, 16, 64>}, {transform_indices = @transform_6, window_bounds = array<i64: 1, 1, 2, 64>}]} {
    %c16_i32 = arith.constant 16 : i32
    %0 = arith.muli %arg1, %c16_i32 : i32
    %1 = tpu.assume_multiple %0, 16 : i32
    %c0 = arith.constant 0 : index
    %2 = arith.index_cast %1 : i32 to index
    %c0_0 = arith.constant 0 : index
    %c0_1 = arith.constant 0 : index
    %3 = vector.load %arg2[%c0, %2, %c0_0, %c0_1] : memref<1x18x18x64xf32, #tpu.memory_space<vmem>>, vector<1x18x18x64xf32>
    %4 = vector.shape_cast %3 : vector<1x18x18x64xf32> to vector<18x18x64xf32>
    %c0_2 = arith.constant 0 : index
    %c0_3 = arith.constant 0 : index
    %5 = vector.load %arg3[%c0_2, %c0_3] : memref<1x64xf32, #tpu.memory_space<vmem>>, vector<1x64xf32>
    %6 = vector.shape_cast %5 : vector<1x64xf32> to vector<1x1x64xf32>
    %c0_4 = arith.constant 0 : index
    %c0_5 = arith.constant 0 : index
    %7 = vector.load %arg4[%c0_4, %c0_5] : memref<1x64xf32, #tpu.memory_space<vmem>>, vector<1x64xf32>
    %8 = vector.shape_cast %7 : vector<1x64xf32> to vector<1x1x64xf32>
    %9 = tpu.iota {dimensions = array<i32: 0>} : vector<18x18x1xi32>
    %10 = vector.broadcast %1 : i32 to vector<18x18x1xi32>
    %11 = arith.addi %9, %10 : vector<18x18x1xi32>
    %12 = tpu.iota {dimensions = array<i32: 1>} : vector<18x18x1xi32>
    %c1_i32 = arith.constant 1 : i32
    %13 = vector.broadcast %c1_i32 : i32 to vector<18x18x1xi32>
    %14 = arith.cmpi sge, %11, %13 : vector<18x18x1xi32>
    %c16_i32_6 = arith.constant 16 : i32
    %15 = vector.broadcast %c16_i32_6 : i32 to vector<18x18x1xi32>
    %16 = arith.cmpi sle, %11, %15 : vector<18x18x1xi32>
    %17 = arith.andi %14, %16 : vector<18x18x1xi1>
    %c1_i32_7 = arith.constant 1 : i32
    %18 = vector.broadcast %c1_i32_7 : i32 to vector<18x18x1xi32>
    %19 = arith.cmpi sge, %12, %18 : vector<18x18x1xi32>
    %20 = arith.andi %17, %19 : vector<18x18x1xi1>
    %c16_i32_8 = arith.constant 16 : i32
    %21 = vector.broadcast %c16_i32_8 : i32 to vector<18x18x1xi32>
    %22 = arith.cmpi sle, %12, %21 : vector<18x18x1xi32>
    %23 = arith.andi %20, %22 : vector<18x18x1xi1>
    %24 = vector.broadcast %6 : vector<1x1x64xf32> to vector<18x18x64xf32>
    %25 = arith.mulf %4, %24 : vector<18x18x64xf32>
    %26 = vector.broadcast %8 : vector<1x1x64xf32> to vector<18x18x64xf32>
    %27 = arith.addf %25, %26 : vector<18x18x64xf32>
    %cst = arith.constant 0.000000e+00 : f32
    %28 = vector.broadcast %cst : f32 to vector<18x18x64xf32>
    %29 = arith.maximumf %27, %28 : vector<18x18x64xf32>
    %cst_9 = arith.constant 0.000000e+00 : f32
    %30 = vector.shape_cast %23 : vector<18x18x1xi1> to vector<18x18x1xi1>
    %31 = vector.broadcast %30 : vector<18x18x1xi1> to vector<18x18x64xi1>
    %32 = vector.broadcast %cst_9 : f32 to vector<18x18x64xf32>
    %33 = arith.select %31, %29, %32 : vector<18x18x64xi1>, vector<18x18x64xf32>
    %cst_10 = arith.constant 0.000000e+00 : f32
    %34 = vector.broadcast %cst_10 : f32 to vector<256x64xf32>
    %35 = vector.extract_strided_slice %33 {offsets = [0, 0, 0], sizes = [18, 16, 64], strides = [1, 1, 1]} : vector<18x18x64xf32> to vector<18x16x64xf32>
    %36 = vector.extract_strided_slice %35 {offsets = [0, 0, 0], sizes = [16, 16, 64], strides = [1, 1, 1]} : vector<18x16x64xf32> to vector<16x16x64xf32>
    %37 = vector.shape_cast %36 : vector<16x16x64xf32> to vector<256x64xf32>
    %c0_11 = arith.constant 0 : index
    %c0_12 = arith.constant 0 : index
    %c0_13 = arith.constant 0 : index
    %38 = vector.load %arg5[%c0_11, %c0_12, %c0_13] : memref<9x64x64xf32, #tpu.memory_space<vmem>>, vector<1x64x64xf32>
    %39 = vector.shape_cast %38 : vector<1x64x64xf32> to vector<64x64xf32>
    %cst_14 = arith.constant dense<0.000000e+00> : vector<256x64xf32>
    %40 = tpu.matmul %37, %39, %cst_14 {dimension_numbers = #tpu.dot_dimension_numbers<[1], [0], [0], [1], [0, 0, 1, 1], [], []>} : vector<256x64xf32>, vector<64x64xf32>, vector<256x64xf32> -> vector<256x64xf32>
    %41 = arith.addf %34, %40 : vector<256x64xf32>
    %42 = vector.extract_strided_slice %35 {offsets = [1, 0, 0], sizes = [16, 16, 64], strides = [1, 1, 1]} : vector<18x16x64xf32> to vector<16x16x64xf32>
    %43 = vector.shape_cast %42 : vector<16x16x64xf32> to vector<256x64xf32>
    %c3 = arith.constant 3 : index
    %c0_15 = arith.constant 0 : index
    %c0_16 = arith.constant 0 : index
    %44 = vector.load %arg5[%c3, %c0_15, %c0_16] : memref<9x64x64xf32, #tpu.memory_space<vmem>>, vector<1x64x64xf32>
    %45 = vector.shape_cast %44 : vector<1x64x64xf32> to vector<64x64xf32>
    %cst_17 = arith.constant dense<0.000000e+00> : vector<256x64xf32>
    %46 = tpu.matmul %43, %45, %cst_17 {dimension_numbers = #tpu.dot_dimension_numbers<[1], [0], [0], [1], [0, 0, 1, 1], [], []>} : vector<256x64xf32>, vector<64x64xf32>, vector<256x64xf32> -> vector<256x64xf32>
    %47 = arith.addf %41, %46 : vector<256x64xf32>
    %48 = vector.extract_strided_slice %35 {offsets = [2, 0, 0], sizes = [16, 16, 64], strides = [1, 1, 1]} : vector<18x16x64xf32> to vector<16x16x64xf32>
    %49 = vector.shape_cast %48 : vector<16x16x64xf32> to vector<256x64xf32>
    %c6 = arith.constant 6 : index
    %c0_18 = arith.constant 0 : index
    %c0_19 = arith.constant 0 : index
    %50 = vector.load %arg5[%c6, %c0_18, %c0_19] : memref<9x64x64xf32, #tpu.memory_space<vmem>>, vector<1x64x64xf32>
    %51 = vector.shape_cast %50 : vector<1x64x64xf32> to vector<64x64xf32>
    %cst_20 = arith.constant dense<0.000000e+00> : vector<256x64xf32>
    %52 = tpu.matmul %49, %51, %cst_20 {dimension_numbers = #tpu.dot_dimension_numbers<[1], [0], [0], [1], [0, 0, 1, 1], [], []>} : vector<256x64xf32>, vector<64x64xf32>, vector<256x64xf32> -> vector<256x64xf32>
    %53 = arith.addf %47, %52 : vector<256x64xf32>
    %54 = vector.extract_strided_slice %33 {offsets = [0, 1, 0], sizes = [18, 16, 64], strides = [1, 1, 1]} : vector<18x18x64xf32> to vector<18x16x64xf32>
    %55 = vector.extract_strided_slice %54 {offsets = [0, 0, 0], sizes = [16, 16, 64], strides = [1, 1, 1]} : vector<18x16x64xf32> to vector<16x16x64xf32>
    %56 = vector.shape_cast %55 : vector<16x16x64xf32> to vector<256x64xf32>
    %c1 = arith.constant 1 : index
    %c0_21 = arith.constant 0 : index
    %c0_22 = arith.constant 0 : index
    %57 = vector.load %arg5[%c1, %c0_21, %c0_22] : memref<9x64x64xf32, #tpu.memory_space<vmem>>, vector<1x64x64xf32>
    %58 = vector.shape_cast %57 : vector<1x64x64xf32> to vector<64x64xf32>
    %cst_23 = arith.constant dense<0.000000e+00> : vector<256x64xf32>
    %59 = tpu.matmul %56, %58, %cst_23 {dimension_numbers = #tpu.dot_dimension_numbers<[1], [0], [0], [1], [0, 0, 1, 1], [], []>} : vector<256x64xf32>, vector<64x64xf32>, vector<256x64xf32> -> vector<256x64xf32>
    %60 = arith.addf %53, %59 : vector<256x64xf32>
    %61 = vector.extract_strided_slice %54 {offsets = [1, 0, 0], sizes = [16, 16, 64], strides = [1, 1, 1]} : vector<18x16x64xf32> to vector<16x16x64xf32>
    %62 = vector.shape_cast %61 : vector<16x16x64xf32> to vector<256x64xf32>
    %c4 = arith.constant 4 : index
    %c0_24 = arith.constant 0 : index
    %c0_25 = arith.constant 0 : index
    %63 = vector.load %arg5[%c4, %c0_24, %c0_25] : memref<9x64x64xf32, #tpu.memory_space<vmem>>, vector<1x64x64xf32>
    %64 = vector.shape_cast %63 : vector<1x64x64xf32> to vector<64x64xf32>
    %cst_26 = arith.constant dense<0.000000e+00> : vector<256x64xf32>
    %65 = tpu.matmul %62, %64, %cst_26 {dimension_numbers = #tpu.dot_dimension_numbers<[1], [0], [0], [1], [0, 0, 1, 1], [], []>} : vector<256x64xf32>, vector<64x64xf32>, vector<256x64xf32> -> vector<256x64xf32>
    %66 = arith.addf %60, %65 : vector<256x64xf32>
    %67 = vector.extract_strided_slice %54 {offsets = [2, 0, 0], sizes = [16, 16, 64], strides = [1, 1, 1]} : vector<18x16x64xf32> to vector<16x16x64xf32>
    %68 = vector.shape_cast %67 : vector<16x16x64xf32> to vector<256x64xf32>
    %c7 = arith.constant 7 : index
    %c0_27 = arith.constant 0 : index
    %c0_28 = arith.constant 0 : index
    %69 = vector.load %arg5[%c7, %c0_27, %c0_28] : memref<9x64x64xf32, #tpu.memory_space<vmem>>, vector<1x64x64xf32>
    %70 = vector.shape_cast %69 : vector<1x64x64xf32> to vector<64x64xf32>
    %cst_29 = arith.constant dense<0.000000e+00> : vector<256x64xf32>
    %71 = tpu.matmul %68, %70, %cst_29 {dimension_numbers = #tpu.dot_dimension_numbers<[1], [0], [0], [1], [0, 0, 1, 1], [], []>} : vector<256x64xf32>, vector<64x64xf32>, vector<256x64xf32> -> vector<256x64xf32>
    %72 = arith.addf %66, %71 : vector<256x64xf32>
    %73 = vector.extract_strided_slice %33 {offsets = [0, 2, 0], sizes = [18, 16, 64], strides = [1, 1, 1]} : vector<18x18x64xf32> to vector<18x16x64xf32>
    %74 = vector.extract_strided_slice %73 {offsets = [0, 0, 0], sizes = [16, 16, 64], strides = [1, 1, 1]} : vector<18x16x64xf32> to vector<16x16x64xf32>
    %75 = vector.shape_cast %74 : vector<16x16x64xf32> to vector<256x64xf32>
    %c2 = arith.constant 2 : index
    %c0_30 = arith.constant 0 : index
    %c0_31 = arith.constant 0 : index
    %76 = vector.load %arg5[%c2, %c0_30, %c0_31] : memref<9x64x64xf32, #tpu.memory_space<vmem>>, vector<1x64x64xf32>
    %77 = vector.shape_cast %76 : vector<1x64x64xf32> to vector<64x64xf32>
    %cst_32 = arith.constant dense<0.000000e+00> : vector<256x64xf32>
    %78 = tpu.matmul %75, %77, %cst_32 {dimension_numbers = #tpu.dot_dimension_numbers<[1], [0], [0], [1], [0, 0, 1, 1], [], []>} : vector<256x64xf32>, vector<64x64xf32>, vector<256x64xf32> -> vector<256x64xf32>
    %79 = arith.addf %72, %78 : vector<256x64xf32>
    %80 = vector.extract_strided_slice %73 {offsets = [1, 0, 0], sizes = [16, 16, 64], strides = [1, 1, 1]} : vector<18x16x64xf32> to vector<16x16x64xf32>
    %81 = vector.shape_cast %80 : vector<16x16x64xf32> to vector<256x64xf32>
    %c5 = arith.constant 5 : index
    %c0_33 = arith.constant 0 : index
    %c0_34 = arith.constant 0 : index
    %82 = vector.load %arg5[%c5, %c0_33, %c0_34] : memref<9x64x64xf32, #tpu.memory_space<vmem>>, vector<1x64x64xf32>
    %83 = vector.shape_cast %82 : vector<1x64x64xf32> to vector<64x64xf32>
    %cst_35 = arith.constant dense<0.000000e+00> : vector<256x64xf32>
    %84 = tpu.matmul %81, %83, %cst_35 {dimension_numbers = #tpu.dot_dimension_numbers<[1], [0], [0], [1], [0, 0, 1, 1], [], []>} : vector<256x64xf32>, vector<64x64xf32>, vector<256x64xf32> -> vector<256x64xf32>
    %85 = arith.addf %79, %84 : vector<256x64xf32>
    %86 = vector.extract_strided_slice %73 {offsets = [2, 0, 0], sizes = [16, 16, 64], strides = [1, 1, 1]} : vector<18x16x64xf32> to vector<16x16x64xf32>
    %87 = vector.shape_cast %86 : vector<16x16x64xf32> to vector<256x64xf32>
    %c8 = arith.constant 8 : index
    %c0_36 = arith.constant 0 : index
    %c0_37 = arith.constant 0 : index
    %88 = vector.load %arg5[%c8, %c0_36, %c0_37] : memref<9x64x64xf32, #tpu.memory_space<vmem>>, vector<1x64x64xf32>
    %89 = vector.shape_cast %88 : vector<1x64x64xf32> to vector<64x64xf32>
    %cst_38 = arith.constant dense<0.000000e+00> : vector<256x64xf32>
    %90 = tpu.matmul %87, %89, %cst_38 {dimension_numbers = #tpu.dot_dimension_numbers<[1], [0], [0], [1], [0, 0, 1, 1], [], []>} : vector<256x64xf32>, vector<64x64xf32>, vector<256x64xf32> -> vector<256x64xf32>
    %91 = arith.addf %85, %90 : vector<256x64xf32>
    %c0_39 = arith.constant 0 : index
    %c0_40 = arith.constant 0 : index
    %92 = vector.load %arg6[%c0_39, %c0_40] : memref<1x64xf32, #tpu.memory_space<vmem>>, vector<1x64xf32>
    %93 = vector.broadcast %92 : vector<1x64xf32> to vector<256x64xf32>
    %94 = arith.addf %91, %93 : vector<256x64xf32>
    %cst_41 = arith.constant dense<0.000000e+00> : vector<64xf32>
    %95 = vector.multi_reduction <add>, %94, %cst_41 [0] : vector<256x64xf32> to vector<64xf32>
    %96 = vector.shape_cast %95 : vector<64xf32> to vector<1x64xf32>
    %97 = arith.mulf %94, %94 : vector<256x64xf32>
    %cst_42 = arith.constant dense<0.000000e+00> : vector<64xf32>
    %98 = vector.multi_reduction <add>, %97, %cst_42 [0] : vector<256x64xf32> to vector<64xf32>
    %99 = vector.shape_cast %98 : vector<64xf32> to vector<1x64xf32>
    %100 = tpu.concatenate %96, %99 in 0 : vector<1x64xf32>, vector<1x64xf32> -> vector<2x64xf32>
    %101 = vector.shape_cast %100 : vector<2x64xf32> to vector<1x1x2x64xf32>
    %c0_43 = arith.constant 0 : index
    %c0_44 = arith.constant 0 : index
    %c0_45 = arith.constant 0 : index
    %c0_46 = arith.constant 0 : index
    %102 = vector.load %arg8[%c0_43, %c0_44, %c0_45, %c0_46] : memref<1x1x2x64xf32, #tpu.memory_space<vmem>>, vector<1x1x2x64xf32>
    tpu.vector_store %arg8[%c0_43, %c0_44, %c0_45, %c0_46], %101 {strides = array<i32>} : memref<1x1x2x64xf32, #tpu.memory_space<vmem>>, vector<1x1x2x64xf32>,
    %103 = vector.shape_cast %94 : vector<256x64xf32> to vector<1x16x16x64xf32>
    %c0_47 = arith.constant 0 : index
    %c0_48 = arith.constant 0 : index
    %c0_49 = arith.constant 0 : index
    %c0_50 = arith.constant 0 : index
    %104 = vector.load %arg7[%c0_47, %c0_48, %c0_49, %c0_50] : memref<1x16x16x64xf32, #tpu.memory_space<vmem>>, vector<1x16x16x64xf32>
    tpu.vector_store %arg7[%c0_47, %c0_48, %c0_49, %c0_50], %103 {strides = array<i32>} : memref<1x16x16x64xf32, #tpu.memory_space<vmem>>, vector<1x16x16x64xf32>,
    return
  }
  func.func @transform_0(%arg0: i32, %arg1: i32) -> (i32, i32, i32, i32) {
    %c0_i32 = arith.constant 0 : i32
    %c0_i32_0 = arith.constant 0 : i32
    %c0_i32_1 = arith.constant 0 : i32
    %c0_i32_2 = arith.constant 0 : i32
    return %arg0, %c0_i32, %c0_i32_0, %c0_i32_1 : i32, i32, i32, i32
  }
  func.func @transform_1(%arg0: i32, %arg1: i32) -> (i32, i32) {
    %c0_i32 = arith.constant 0 : i32
    %c0_i32_0 = arith.constant 0 : i32
    %c0_i32_1 = arith.constant 0 : i32
    return %c0_i32, %c0_i32_0 : i32, i32
  }
  func.func @transform_2(%arg0: i32, %arg1: i32) -> (i32, i32) {
    %c0_i32 = arith.constant 0 : i32
    %c0_i32_0 = arith.constant 0 : i32
    %c0_i32_1 = arith.constant 0 : i32
    return %c0_i32, %c0_i32_0 : i32, i32
  }
  func.func @transform_3(%arg0: i32, %arg1: i32) -> (i32, i32, i32) {
    %c0_i32 = arith.constant 0 : i32
    %c0_i32_0 = arith.constant 0 : i32
    %c0_i32_1 = arith.constant 0 : i32
    %c0_i32_2 = arith.constant 0 : i32
    return %c0_i32, %c0_i32_0, %c0_i32_1 : i32, i32, i32
  }
  func.func @transform_4(%arg0: i32, %arg1: i32) -> (i32, i32) {
    %c0_i32 = arith.constant 0 : i32
    %c0_i32_0 = arith.constant 0 : i32
    %c0_i32_1 = arith.constant 0 : i32
    return %c0_i32, %c0_i32_0 : i32, i32
  }
  func.func @transform_5(%arg0: i32, %arg1: i32) -> (i32, i32, i32, i32) {
    %c0_i32 = arith.constant 0 : i32
    %c0_i32_0 = arith.constant 0 : i32
    %c0_i32_1 = arith.constant 0 : i32
    return %arg0, %arg1, %c0_i32, %c0_i32_0 : i32, i32, i32, i32
  }
  func.func @transform_6(%arg0: i32, %arg1: i32) -> (i32, i32, i32, i32) {
    %c0_i32 = arith.constant 0 : i32
    %c0_i32_0 = arith.constant 0 : i32
    %c0_i32_1 = arith.constant 0 : i32
    return %arg0, %arg1, %c0_i32, %c0_i32_0 : i32, i32, i32, i32
  }
}

</mosaic_0001>

<bundles_post_ra>
// kernel: residual_block_forward.5
= control target key start
LH: loop header
LB: loop body
LE: loop exit
PB: predicated region body
PF: predicated region fallthrough
CT: control target
= control target key end

     0   :  { %vm410_vm0 = vcmask 523264   ;;  %s1141_s0 = inlined_call_operand.vmem [shape: f32[512,64], index: 0, kind: input, shape index: {}]   ;;  %s1142_s1 = inlined_call_operand.vmem [shape: f32[1,64], index: 1, kind: input, shape index: {}]   ;;  %s1143_s2 = inlined_call_operand.vmem [shape: f32[1,64], index: 2, kind: input, shape index: {}]   ;;  %s1144_s3 = inlined_call_operand.vmem [shape: f32[512,64], index: 3, kind: input, shape index: {}]   ;;  %s1145_s4 = inlined_call_operand.hbm [shape: f32[512,64], index: 4, kind: output, shape index: {}]  }
   0x1   :  { %v82_v0 = vld [vmem:[%s1141_s0] sm:$0xff]  ;;  %v83_v3 = vld [vmem:[%s1141_s0 + $0x8] sm:$0xff]  ;;  %v84_v6 = vld [vmem:[%s1141_s0 + $0x10] sm:$0xff] }
   0x2   :  { %v558_v1 = vld [vmem:[%s1142_s1] ss:$0 sm:$0xff]  ;;  %v85_v7 = vld [vmem:[%s1141_s0 + $0x18] sm:$0xff]  ;;  %v87_v14 = vld [vmem:[%s1141_s0 + $0x28] sm:$0xff] }
   0x3   :  { %v563_v2 = vld [vmem:[%s1143_s2] ss:$0 sm:$0xff]  ;;  %v150_v4 = vmul.f32 %v558_v1, %v82_v0  ;;  %v151_v5 = vmul.f32 %v558_v1, %v83_v3  ;;  %v152_v8 = vmul.f32 %v558_v1, %v84_v6  ;;  %v153_v9 = vmul.f32 %v558_v1, %v85_v7  ;;  %v88_v15 = vld [vmem:[%s1141_s0 + $0x30] sm:$0xff]  ;;  %v19_v17 = vld [vmem:[%s1144_s3 + $0x8] sm:$0xff] }
   0x4   :  { %v86_v10 = vld [vmem:[%s1141_s0 + $0x20] sm:$0xff]  ;;  %v155_v20 = vmul.f32 %v558_v1, %v87_v14  ;;  %v156_v21 = vmul.f32 %v558_v1, %v88_v15  ;;  %v89_v22 = vld [vmem:[%s1141_s0 + $0x38] sm:$0xff]  ;;  %v20_v25 = vld [vmem:[%s1144_s3 + $0x10] sm:$0xff] }
   0x5   :  { %v218_v11 = vadd.f32 %v563_v2, %v150_v4  ;;  %v219_v12 = vadd.f32 %v563_v2, %v151_v5  ;;  %v154_v13 = vmul.f32 %v558_v1, %v86_v10  ;;  %v18_v16 = vld [vmem:[%s1144_s3] sm:$0xff]  ;;  %v220_v18 = vadd.f32 %v563_v2, %v152_v8  ;;  %v21_v26 = vld [vmem:[%s1144_s3 + $0x18] sm:$0xff]  ;;  %v23_v32 = vld [vmem:[%s1144_s3 + $0x28] sm:$0xff] }
   0x6   :  { %v221_v19 = vadd.f32 %v563_v2, %v153_v9  ;;  %v22_v27 = vld [vmem:[%s1144_s3 + $0x20] sm:$0xff]  ;;  %v157_v29 = vmul.f32 %v558_v1, %v89_v22  ;;  %v223_v33 = vadd.f32 %v563_v2, %v155_v20  ;;  %v224_v34 = vadd.f32 %v563_v2, %v156_v21  ;;  %v91_v36 = vld [vmem:[%s1141_s0 + $0x48] sm:$0xff]  ;;  %v24_v40 = vld [vmem:[%s1144_s3 + $0x30] sm:$0xff] }
   0x7   :  { %v282_v23 = vmax.f32 %v218_v11, 0.0  ;;  %v283_v24 = vmax.f32 %v219_v12, 0.0  ;;  %v222_v28 = vadd.f32 %v563_v2, %v154_v13  ;;  %v284_v30 = vmax.f32 %v220_v18, 0.0  ;;  %v90_v35 = vld [vmem:[%s1141_s0 + $0x40] sm:$0xff]  ;;  %v92_v42 = vld [vmem:[%s1141_s0 + $0x50] sm:$0xff]  ;;  %v93_v43 = vld [vmem:[%s1141_s0 + $0x58] sm:$0xff] }
   0x8   :  { %v285_v31 = vmax.f32 %v221_v19, 0.0  ;;  %v225_v41 = vadd.f32 %v563_v2, %v157_v29  ;;  %v287_v46 = vmax.f32 %v223_v33, 0.0  ;;  %v288_v47 = vmax.f32 %v224_v34, 0.0  ;;  %v25_v48 = vld [vmem:[%s1144_s3 + $0x38] sm:$0xff]  ;;  %v94_v49 = vld [vmem:[%s1141_s0 + $0x60] sm:$0xff]  ;;  %v95_v54 = vld [vmem:[%s1141_s0 + $0x68] sm:$0xff] }
   0x9   :  { %v346_v37 = vadd.f32 %v282_v23, %v18_v16  ;;  %v347_v38 = vadd.f32 %v283_v24, %v19_v17  ;;  %v286_v39 = vmax.f32 %v222_v28, 0.0  ;;  %v348_v44 = vadd.f32 %v284_v30, %v20_v25  ;;  %v96_v55 = vld [vmem:[%s1141_s0 + $0x70] sm:$0xff]  ;;  %v97_v60 = vld [vmem:[%s1141_s0 + $0x78] sm:$0xff]  ;;  %v26_v3 = vld [vmem:[%s1144_s3 + $0x40] sm:$0xff] }
   0xa   :  { %v349_v45 = vadd.f32 %v285_v31, %v21_v26  ;;  %v289_v51 = vmax.f32 %v225_v41, 0.0  ;;  %v158_v52 = vmul.f32 %v558_v1, %v90_v35  ;;  %v159_v53 = vmul.f32 %v558_v1, %v91_v36  ;;  %v27_v4 = vld [vmem:[%s1144_s3 + $0x48] sm:$0xff]  ;;  %v28_v11 = vld [vmem:[%s1144_s3 + $0x50] sm:$0xff]  ;;  %v29_v12 = vld [vmem:[%s1144_s3 + $0x58] sm:$0xff] }
   0xb   :  { %411 = vst.msk [vmem:[#allocation2] sm:$0xff] %vm410_vm0, %v346_v37  ;;  %v350_v50 = vadd.f32 %v286_v39, %v22_v27  ;;  %v351_v56 = vadd.f32 %v287_v46, %v23_v32  ;;  %v352_v57 = vadd.f32 %v288_v47, %v24_v40  ;;  %v160_v58 = vmul.f32 %v558_v1, %v92_v42  ;;  %v30_v13 = vld [vmem:[%s1144_s3 + $0x60] sm:$0xff]  ;;  %v31_v18 = vld [vmem:[%s1144_s3 + $0x68] sm:$0xff]  ;;  %v32_v26 = vld [vmem:[%s1144_s3 + $0x70] sm:$0xff] }
   0xc   :  { %412 = vst.msk [vmem:[#allocation2 + $0x8] sm:$0xff] %vm410_vm0, %v347_v38  ;;  %v161_v59 = vmul.f32 %v558_v1, %v93_v43  ;;  %v353_v61 = vadd.f32 %v289_v51, %v25_v48  ;;  %v226_v62 = vadd.f32 %v563_v2, %v158_v52  ;;  %v227_v63 = vadd.f32 %v563_v2, %v159_v53  ;;  %v98_v21 = vld [vmem:[%s1141_s0 + $0x80] sm:$0xff]  ;;  %v99_v22 = vld [vmem:[%s1141_s0 + $0x88] sm:$0xff]  ;;  %v100_v28 = vld [vmem:[%s1141_s0 + $0x90] sm:$0xff] }
   0xd   :  { %413 = vst.msk [vmem:[#allocation2 + $0x10] sm:$0xff] %vm410_vm0, %v348_v44  ;;  %v162_v0 = vmul.f32 %v558_v1, %v94_v49  ;;  %v228_v5 = vadd.f32 %v563_v2, %v160_v58  ;;  %v163_v7 = vmul.f32 %v558_v1, %v95_v54  ;;  %v164_v8 = vmul.f32 %v558_v1, %v96_v55  ;;  %v101_v29 = vld [vmem:[%s1141_s0 + $0x98] sm:$0xff]  ;;  %v102_v35 = vld [vmem:[%s1141_s0 + $0xa0] sm:$0xff]  ;;  %v103_v40 = vld [vmem:[%s1141_s0 + $0xa8] sm:$0xff] }
   0xe   :  { %414 = vst.msk [vmem:[#allocation2 + $0x18] sm:$0xff] %vm410_vm0, %v349_v45  ;;  %v229_v6 = vadd.f32 %v563_v2, %v161_v59  ;;  %v290_v9 = vmax.f32 %v226_v62, 0.0  ;;  %v291_v10 = vmax.f32 %v227_v63, 0.0  ;;  %v165_v15 = vmul.f32 %v558_v1, %v97_v60  ;;  %v33_v34 = vld [vmem:[%s1144_s3 + $0x78] sm:$0xff]  ;;  %v104_v41 = vld [vmem:[%s1141_s0 + $0xb0] sm:$0xff]  ;;  %v34_v51 = vld [vmem:[%s1144_s3 + $0x80] sm:$0xff] }
   0xf   :  { %415 = vst.msk [vmem:[#allocation2 + $0x20] sm:$0xff] %vm410_vm0, %v350_v50  ;;  %v230_v14 = vadd.f32 %v563_v2, %v162_v0  ;;  %v292_v16 = vmax.f32 %v228_v5, 0.0  ;;  %v231_v19 = vadd.f32 %v563_v2, %v163_v7  ;;  %v232_v20 = vadd.f32 %v563_v2, %v164_v8  ;;  %v105_v46 = vld [vmem:[%s1141_s0 + $0xb8] sm:$0xff]  ;;  %v35_v52 = vld [vmem:[%s1144_s3 + $0x88] sm:$0xff]  ;;  %v36_v59 = vld [vmem:[%s1144_s3 + $0x90] sm:$0xff] }
  0x10   :  { %416 = vst.msk [vmem:[#allocation2 + $0x28] sm:$0xff] %vm410_vm0, %v351_v56  ;;  %v293_v17 = vmax.f32 %v229_v6, 0.0  ;;  %v354_v23 = vadd.f32 %v290_v9, %v26_v3  ;;  %v355_v24 = vadd.f32 %v291_v10, %v27_v4  ;;  %v233_v27 = vadd.f32 %v563_v2, %v165_v15  ;;  %v37_v60 = vld [vmem:[%s1144_s3 + $0x98] sm:$0xff]  ;;  %v39_v4 = vld [vmem:[%s1144_s3 + $0xa8] sm:$0xff]  ;;  %v106_v7 = vld [vmem:[%s1141_s0 + $0xc0] sm:$0xff] }
  0x11   :  { %417 = vst.msk [vmem:[#allocation2 + $0x30] sm:$0xff] %vm410_vm0, %v352_v57  ;;  %v294_v25 = vmax.f32 %v230_v14, 0.0  ;;  %v356_v30 = vadd.f32 %v292_v16, %v28_v11  ;;  %v295_v32 = vmax.f32 %v231_v19, 0.0  ;;  %v296_v33 = vmax.f32 %v232_v20, 0.0  ;;  %v107_v8 = vld [vmem:[%s1141_s0 + $0xc8] sm:$0xff]  ;;  %v108_v14 = vld [vmem:[%s1141_s0 + $0xd0] sm:$0xff] }
  0x12   :  { %418 = vst.msk [vmem:[#allocation2 + $0x38] sm:$0xff] %vm410_vm0, %v353_v61  ;;  %v357_v31 = vadd.f32 %v293_v17, %v29_v12  ;;  %v297_v37 = vmax.f32 %v233_v27, 0.0  ;;  %v166_v38 = vmul.f32 %v558_v1, %v98_v21  ;;  %v167_v39 = vmul.f32 %v558_v1, %v99_v22  ;;  %v38_v61 = vld [vmem:[%s1144_s3 + $0xa0] sm:$0xff]  ;;  %v40_v12 = vld [vmem:[%s1144_s3 + $0xb0] sm:$0xff]  ;;  %v109_v15 = vld [vmem:[%s1141_s0 + $0xd8] sm:$0xff] }
  0x13   :  { %419 = vst.msk [vmem:[#allocation2 + $0x40] sm:$0xff] %vm410_vm0, %v354_v23  ;;  %v358_v36 = vadd.f32 %v294_v25, %v30_v13  ;;  %v359_v42 = vadd.f32 %v295_v32, %v31_v18  ;;  %v360_v43 = vadd.f32 %v296_v33, %v32_v26  ;;  %v168_v44 = vmul.f32 %v558_v1, %v100_v28  ;;  %v41_v20 = vld [vmem:[%s1144_s3 + $0xb8] sm:$0xff]  ;;  %v110_v21 = vld [vmem:[%s1141_s0 + $0xe0] sm:$0xff]  ;;  %v111_v26 = vld [vmem:[%s1141_s0 + $0xe8] sm:$0xff] }
  0x14   :  { %420 = vst.msk [vmem:[#allocation2 + $0x48] sm:$0xff] %vm410_vm0, %v355_v24  ;;  %v169_v45 = vmul.f32 %v558_v1, %v101_v29  ;;  %v361_v47 = vadd.f32 %v297_v37, %v33_v34  ;;  %v234_v48 = vadd.f32 %v563_v2, %v166_v38  ;;  %v235_v49 = vadd.f32 %v563_v2, %v167_v39  ;;  %v112_v27 = vld [vmem:[%s1141_s0 + $0xf0] sm:$0xff]  ;;  %v113_v32 = vld [vmem:[%s1141_s0 + $0xf8] sm:$0xff]  ;;  %v42_v37 = vld [vmem:[%s1144_s3 + $0xc0] sm:$0xff] }
  0x15   :  { %421 = vst.msk [vmem:[#allocation2 + $0x50] sm:$0xff] %vm410_vm0, %v356_v30  ;;  %v170_v50 = vmul.f32 %v558_v1, %v102_v35  ;;  %v236_v53 = vadd.f32 %v563_v2, %v168_v44  ;;  %v171_v55 = vmul.f32 %v558_v1, %v103_v40  ;;  %v172_v56 = vmul.f32 %v558_v1, %v104_v41  ;;  %v43_v38 = vld [vmem:[%s1144_s3 + $0xc8] sm:$0xff] }
  0x16   :  { %422 = vst.msk [vmem:[#allocation2 + $0x58] sm:$0xff] %vm410_vm0, %v357_v31  ;;  %v237_v54 = vadd.f32 %v563_v2, %v169_v45  ;;  %v298_v57 = vmax.f32 %v234_v48, 0.0  ;;  %v299_v58 = vmax.f32 %v235_v49, 0.0  ;;  %v173_v63 = vmul.f32 %v558_v1, %v105_v46  ;;  %v44_v45 = vld [vmem:[%s1144_s3 + $0xd0] sm:$0xff]  ;;  %v45_v46 = vld [vmem:[%s1144_s3 + $0xd8] sm:$0xff] }
  0x17   :  { %423 = vst.msk [vmem:[#allocation2 + $0x60] sm:$0xff] %vm410_vm0, %v358_v36  ;;  %v238_v62 = vadd.f32 %v563_v2, %v170_v50  ;;  %v300_v0 = vmax.f32 %v236_v53, 0.0  ;;  %v239_v5 = vadd.f32 %v563_v2, %v171_v55  ;;  %v240_v6 = vadd.f32 %v563_v2, %v172_v56  ;;  %v114_v55 = vld [vmem:[%s1141_s0 + $0x100] sm:$0xff]  ;;  %v115_v56 = vld [vmem:[%s1141_s0 + $0x108] sm:$0xff] }
  0x18   :  { %424 = vst.msk [vmem:[#allocation2 + $0x68] sm:$0xff] %vm410_vm0, %v359_v42  ;;  %v301_v3 = vmax.f32 %v237_v54, 0.0  ;;  %v362_v9 = vadd.f32 %v298_v57, %v34_v51  ;;  %v363_v10 = vadd.f32 %v299_v58, %v35_v52  ;;  %v241_v13 = vadd.f32 %v563_v2, %v173_v63  ;;  %v47_v52 = vld [vmem:[%s1144_s3 + $0xe8] sm:$0xff]  ;;  %v117_v63 = vld [vmem:[%s1141_s0 + $0x118] sm:$0xff] }
  0x19   :  { %425 = vst.msk [vmem:[#allocation2 + $0x70] sm:$0xff] %vm410_vm0, %v360_v43  ;;  %v302_v11 = vmax.f32 %v238_v62, 0.0  ;;  %v364_v16 = vadd.f32 %v300_v0, %v36_v59  ;;  %v303_v18 = vmax.f32 %v239_v5, 0.0  ;;  %v304_v19 = vmax.f32 %v240_v6, 0.0  ;;  %v116_v62 = vld [vmem:[%s1141_s0 + $0x110] sm:$0xff]  ;;  %v49_v6 = vld [vmem:[%s1144_s3 + $0xf8] sm:$0xff] }
  0x1a   :  { %426 = vst.msk [vmem:[#allocation2 + $0x78] sm:$0xff] %vm410_vm0, %v361_v47  ;;  %v365_v17 = vadd.f32 %v301_v3, %v37_v60  ;;  %v305_v23 = vmax.f32 %v241_v13, 0.0  ;;  %v174_v24 = vmul.f32 %v558_v1, %v106_v7  ;;  %v175_v25 = vmul.f32 %v558_v1, %v107_v8  ;;  %v46_v47 = vld [vmem:[%s1144_s3 + $0xe0] sm:$0xff]  ;;  %v48_v60 = vld [vmem:[%s1144_s3 + $0xf0] sm:$0xff] }
  0x1b   :  { %427 = vst.msk [vmem:[#allocation2 + $0x80] sm:$0xff] %vm410_vm0, %v362_v9  ;;  %v366_v22 = vadd.f32 %v302_v11, %v38_v61  ;;  %v367_v28 = vadd.f32 %v303_v18, %v39_v4  ;;  %v368_v29 = vadd.f32 %v304_v19, %v40_v12  ;;  %v176_v30 = vmul.f32 %v558_v1, %v108_v14  ;;  %v118_v7 = vld [vmem:[%s1141_s0 + $0x120] sm:$0xff]  ;;  %v119_v12 = vld [vmem:[%s1141_s0 + $0x128] sm:$0xff]  ;;  %v120_v13 = vld [vmem:[%s1141_s0 + $0x130] sm:$0xff] }
  0x1c   :  { %428 = vst.msk [vmem:[#allocation2 + $0x88] sm:$0xff] %vm410_vm0, %v363_v10  ;;  %v177_v31 = vmul.f32 %v558_v1, %v109_v15  ;;  %v369_v33 = vadd.f32 %v305_v23, %v41_v20  ;;  %v242_v34 = vadd.f32 %v563_v2, %v174_v24  ;;  %v243_v35 = vadd.f32 %v563_v2, %v175_v25  ;;  %v121_v18 = vld [vmem:[%s1141_s0 + $0x138] sm:$0xff]  ;;  %v50_v23 = vld [vmem:[%s1144_s3 + $0x100] sm:$0xff]  ;;  %v51_v24 = vld [vmem:[%s1144_s3 + $0x108] sm:$0xff] }
  0x1d   :  { %429 = vst.msk [vmem:[#allocation2 + $0x90] sm:$0xff] %vm410_vm0, %v364_v16  ;;  %v178_v36 = vmul.f32 %v558_v1, %v110_v21  ;;  %v244_v39 = vadd.f32 %v563_v2, %v176_v30  ;;  %v179_v41 = vmul.f32 %v558_v1, %v111_v26  ;;  %v180_v42 = vmul.f32 %v558_v1, %v112_v27 }
  0x1e   :  { %430 = vst.msk [vmem:[#allocation2 + $0x98] sm:$0xff] %vm410_vm0, %v365_v17  ;;  %v245_v40 = vadd.f32 %v563_v2, %v177_v31  ;;  %v306_v43 = vmax.f32 %v242_v34, 0.0  ;;  %v307_v44 = vmax.f32 %v243_v35, 0.0  ;;  %v181_v49 = vmul.f32 %v558_v1, %v113_v32  ;;  %v52_v31 = vld [vmem:[%s1144_s3 + $0x110] sm:$0xff]  ;;  %v53_v32 = vld [vmem:[%s1144_s3 + $0x118] sm:$0xff] }
  0x1f   :  { %431 = vst.msk [vmem:[#allocation2 + $0xa0] sm:$0xff] %vm410_vm0, %v366_v22  ;;  %v246_v48 = vadd.f32 %v563_v2, %v178_v36  ;;  %v308_v50 = vmax.f32 %v244_v39, 0.0  ;;  %v247_v53 = vadd.f32 %v563_v2, %v179_v41  ;;  %v248_v54 = vadd.f32 %v563_v2, %v180_v42  ;;  %v122_v41 = vld [vmem:[%s1141_s0 + $0x140] sm:$0xff]  ;;  %v123_v42 = vld [vmem:[%s1141_s0 + $0x148] sm:$0xff] }
  0x20   :  { %432 = vst.msk [vmem:[#allocation2 + $0xa8] sm:$0xff] %vm410_vm0, %v367_v28  ;;  %v309_v51 = vmax.f32 %v245_v40, 0.0  ;;  %v370_v57 = vadd.f32 %v306_v43, %v42_v37  ;;  %v371_v58 = vadd.f32 %v307_v44, %v43_v38  ;;  %v249_v61 = vadd.f32 %v563_v2, %v181_v49  ;;  %v55_v38 = vld [vmem:[%s1144_s3 + $0x128] sm:$0xff]  ;;  %v125_v49 = vld [vmem:[%s1141_s0 + $0x158] sm:$0xff] }
  0x21   :  { %433 = vst.msk [vmem:[#allocation2 + $0xb0] sm:$0xff] %vm410_vm0, %v368_v29  ;;  %v310_v59 = vmax.f32 %v246_v48, 0.0  ;;  %v372_v0 = vadd.f32 %v308_v50, %v44_v45  ;;  %v311_v4 = vmax.f32 %v247_v53, 0.0  ;;  %v312_v5 = vmax.f32 %v248_v54, 0.0  ;;  %v124_v48 = vld [vmem:[%s1141_s0 + $0x150] sm:$0xff]  ;;  %v57_v54 = vld [vmem:[%s1144_s3 + $0x138] sm:$0xff] }
  0x22   :  { %434 = vst.msk [vmem:[#allocation2 + $0xb8] sm:$0xff] %vm410_vm0, %v369_v33  ;;  %v373_v3 = vadd.f32 %v309_v51, %v45_v46  ;;  %v313_v9 = vmax.f32 %v249_v61, 0.0  ;;  %v182_v10 = vmul.f32 %v558_v1, %v114_v55  ;;  %v183_v11 = vmul.f32 %v558_v1, %v115_v56  ;;  %v54_v33 = vld [vmem:[%s1144_s3 + $0x120] sm:$0xff]  ;;  %v56_v46 = vld [vmem:[%s1144_s3 + $0x130] sm:$0xff] }
  0x23   :  { %435 = vst.msk [vmem:[#allocation2 + $0xc0] sm:$0xff] %vm410_vm0, %v370_v57  ;;  %v374_v8 = vadd.f32 %v310_v59, %v46_v47  ;;  %v375_v14 = vadd.f32 %v311_v4, %v47_v52  ;;  %v376_v15 = vadd.f32 %v312_v5, %v48_v60  ;;  %v184_v16 = vmul.f32 %v558_v1, %v116_v62  ;;  %v126_v55 = vld [vmem:[%s1141_s0 + $0x160] sm:$0xff]  ;;  %v127_v60 = vld [vmem:[%s1141_s0 + $0x168] sm:$0xff]  ;;  %v128_v61 = vld [vmem:[%s1141_s0 + $0x170] sm:$0xff] }
  0x24   :  { %436 = vst.msk [vmem:[#allocation2 + $0xc8] sm:$0xff] %vm410_vm0, %v371_v58  ;;  %v185_v17 = vmul.f32 %v558_v1, %v117_v63  ;;  %v377_v19 = vadd.f32 %v313_v9, %v49_v6  ;;  %v250_v20 = vadd.f32 %v563_v2, %v182_v10  ;;  %v251_v21 = vadd.f32 %v563_v2, %v183_v11  ;;  %v129_v4 = vld [vmem:[%s1141_s0 + $0x178] sm:$0xff] }
  0x25   :  { %437 = vst.msk [vmem:[#allocation2 + $0xd0] sm:$0xff] %vm410_vm0, %v372_v0  ;;  %v186_v22 = vmul.f32 %v558_v1, %v118_v7  ;;  %v252_v25 = vadd.f32 %v563_v2, %v184_v16  ;;  %v187_v27 = vmul.f32 %v558_v1, %v119_v12  ;;  %v188_v28 = vmul.f32 %v558_v1, %v120_v13 }
  0x26   :  { %438 = vst.msk [vmem:[#allocation2 + $0xd8] sm:$0xff] %vm410_vm0, %v373_v3  ;;  %v253_v26 = vadd.f32 %v563_v2, %v185_v17  ;;  %v314_v29 = vmax.f32 %v250_v20, 0.0  ;;  %v315_v30 = vmax.f32 %v251_v21, 0.0  ;;  %v189_v35 = vmul.f32 %v558_v1, %v121_v18 }
  0x27   :  { %439 = vst.msk [vmem:[#allocation2 + $0xe0] sm:$0xff] %vm410_vm0, %v374_v8  ;;  %v254_v34 = vadd.f32 %v563_v2, %v186_v22  ;;  %v316_v36 = vmax.f32 %v252_v25, 0.0  ;;  %v255_v39 = vadd.f32 %v563_v2, %v187_v27  ;;  %v256_v40 = vadd.f32 %v563_v2, %v188_v28 }
  0x28   :  { %440 = vst.msk [vmem:[#allocation2 + $0xe8] sm:$0xff] %vm410_vm0, %v375_v14  ;;  %v317_v37 = vmax.f32 %v253_v26, 0.0  ;;  %v378_v43 = vadd.f32 %v314_v29, %v50_v23  ;;  %v379_v44 = vadd.f32 %v315_v30, %v51_v24  ;;  %v257_v47 = vadd.f32 %v563_v2, %v189_v35 }
  0x29   :  { %441 = vst.msk [vmem:[#allocation2 + $0xf0] sm:$0xff] %vm410_vm0, %v376_v15  ;;  %v318_v45 = vmax.f32 %v254_v34, 0.0  ;;  %v380_v50 = vadd.f32 %v316_v36, %v52_v31  ;;  %v319_v52 = vmax.f32 %v255_v39, 0.0  ;;  %v320_v53 = vmax.f32 %v256_v40, 0.0 }
  0x2a   :  { %442 = vst.msk [vmem:[#allocation2 + $0xf8] sm:$0xff] %vm410_vm0, %v377_v19  ;;  %v381_v51 = vadd.f32 %v317_v37, %v53_v32  ;;  %v321_v57 = vmax.f32 %v257_v47, 0.0  ;;  %v190_v58 = vmul.f32 %v558_v1, %v122_v41  ;;  %v191_v59 = vmul.f32 %v558_v1, %v123_v42 }
  0x2b   :  { %443 = vst.msk [vmem:[#allocation2 + $0x100] sm:$0xff] %vm410_vm0, %v378_v43  ;;  %v382_v56 = vadd.f32 %v318_v45, %v54_v33  ;;  %v383_v62 = vadd.f32 %v319_v52, %v55_v38  ;;  %v384_v63 = vadd.f32 %v320_v53, %v56_v46  ;;  %v192_v0 = vmul.f32 %v558_v1, %v124_v48 }
  0x2c   :  { %444 = vst.msk [vmem:[#allocation2 + $0x108] sm:$0xff] %vm410_vm0, %v379_v44  ;;  %v193_v3 = vmul.f32 %v558_v1, %v125_v49 }
  0x2d   :  { %9 = vsyncpa [#allocation3], 0  ;;  %445 = vst.msk [vmem:[#allocation2 + $0x110] sm:$0xff] %vm410_vm0, %v380_v50  ;;  %v385_v5 = vadd.f32 %v321_v57, %v57_v54  ;;  %v258_v6 = vadd.f32 %v563_v2, %v190_v58  ;;  %v259_v7 = vadd.f32 %v563_v2, %v191_v59  ;;  %v194_v8 = vmul.f32 %v558_v1, %v126_v55  ;;  %v58_v9 = vld [vmem:[%s1144_s3 + $0x140] sm:$0xff]  ;;  %v59_v10 = vld [vmem:[%s1144_s3 + $0x148] sm:$0xff]  ;;  %s524_s22 = smov [#allocation2]  }
  0x2e   :  { %446 = vst.msk [vmem:[#allocation2 + $0x118] sm:$0xff] %vm410_vm0, %v381_v51  ;;  %v260_v11 = vadd.f32 %v563_v2, %v192_v0  ;;  %v261_v12 = vadd.f32 %v563_v2, %v193_v3  ;;  %v195_v13 = vmul.f32 %v558_v1, %v127_v60  ;;  %v196_v14 = vmul.f32 %v558_v1, %v128_v61  ;;  %v60_v17 = vld [vmem:[%s1144_s3 + $0x150] sm:$0xff]  ;;  %v61_v18 = vld [vmem:[%s1144_s3 + $0x158] sm:$0xff]  ;;  %v62_v19 = vld [vmem:[%s1144_s3 + $0x160] sm:$0xff]  ;;  %s479_s23 = sshll.u32 %s524_s22, 4  ;;  %s481_s1 = sshll.u32 %s1145_s4, 4  ;;  %s480_s23 = int_to_ptr.vmem [resolvable:$true] %s479_s23  ;;  %s482_s1 = int_to_ptr.hbm [resolvable:$true] %s481_s1 }
  0x2f   :  { %447 = vst.msk [vmem:[#allocation2 + $0x120] sm:$0xff] %vm410_vm0, %v382_v56  ;;  %v322_v15 = vmax.f32 %v258_v6, 0.0  ;;  %v323_v16 = vmax.f32 %v259_v7, 0.0  ;;  %v262_v20 = vadd.f32 %v563_v2, %v194_v8  ;;  %v197_v21 = vmul.f32 %v558_v1, %v129_v4  ;;  %v63_v24 = vld [vmem:[%s1144_s3 + $0x168] sm:$0xff]  ;;  %v130_v27 = vld [vmem:[%s1141_s0 + $0x180] sm:$0xff]  ;;  %v64_v32 = vld [vmem:[%s1144_s3 + $0x170] sm:$0xff] }
  0x30   :  { %448 = vst.msk [vmem:[#allocation2 + $0x128] sm:$0xff] %vm410_vm0, %v383_v62  ;;  %v324_v22 = vmax.f32 %v260_v11, 0.0  ;;  %v325_v23 = vmax.f32 %v261_v12, 0.0  ;;  %v263_v25 = vadd.f32 %v563_v2, %v195_v13  ;;  %v264_v26 = vadd.f32 %v563_v2, %v196_v14  ;;  %v131_v28 = vld [vmem:[%s1141_s0 + $0x188] sm:$0xff]  ;;  %v132_v34 = vld [vmem:[%s1141_s0 + $0x190] sm:$0xff]  ;;  %v133_v35 = vld [vmem:[%s1141_s0 + $0x198] sm:$0xff] }
  0x31   :  { %449 = vst.msk [vmem:[#allocation2 + $0x130] sm:$0xff] %vm410_vm0, %v384_v63  ;;  %v386_v29 = vadd.f32 %v322_v15, %v58_v9  ;;  %v387_v30 = vadd.f32 %v323_v16, %v59_v10  ;;  %v326_v31 = vmax.f32 %v262_v20, 0.0  ;;  %v265_v33 = vadd.f32 %v563_v2, %v197_v21  ;;  %v65_v40 = vld [vmem:[%s1144_s3 + $0x178] sm:$0xff]  ;;  %v134_v41 = vld [vmem:[%s1141_s0 + $0x1a0] sm:$0xff]  ;;  %v135_v46 = vld [vmem:[%s1141_s0 + $0x1a8] sm:$0xff]  ;;  %s526_s2 = smov 8  }
  0x32   :  { %450 = vst.msk [vmem:[#allocation2 + $0x138] sm:$0xff] %vm410_vm0, %v385_v5  ;;  %v388_v36 = vadd.f32 %v324_v22, %v60_v17  ;;  %v389_v37 = vadd.f32 %v325_v23, %v61_v18  ;;  %v327_v38 = vmax.f32 %v263_v25, 0.0  ;;  %v328_v39 = vmax.f32 %v264_v26, 0.0  ;;  %v136_v47 = vld [vmem:[%s1141_s0 + $0x1b0] sm:$0xff]  ;;  %v137_v52 = vld [vmem:[%s1141_s0 + $0x1b8] sm:$0xff]  ;;  %v66_v57 = vld [vmem:[%s1144_s3 + $0x180] sm:$0xff] }
  0x33   :  { %451 = vst.msk [vmem:[#allocation2 + $0x140] sm:$0xff] %vm410_vm0, %v386_v29  ;;  %v390_v42 = vadd.f32 %v326_v31, %v62_v19  ;;  %v329_v43 = vmax.f32 %v265_v33, 0.0  ;;  %v198_v44 = vmul.f32 %v558_v1, %v130_v27  ;;  %v199_v45 = vmul.f32 %v558_v1, %v131_v28  ;;  %v67_v58 = vld [vmem:[%s1144_s3 + $0x188] sm:$0xff]  ;;  %v68_v3 = vld [vmem:[%s1144_s3 + $0x190] sm:$0xff]  ;;  %v69_v4 = vld [vmem:[%s1144_s3 + $0x198] sm:$0xff] }
  0x34   :  { %452 = vst.msk [vmem:[#allocation2 + $0x148] sm:$0xff] %vm410_vm0, %v387_v30  ;;  %v391_v48 = vadd.f32 %v327_v38, %v63_v24  ;;  %v392_v49 = vadd.f32 %v328_v39, %v64_v32  ;;  %v200_v50 = vmul.f32 %v558_v1, %v132_v34  ;;  %v201_v51 = vmul.f32 %v558_v1, %v133_v35  ;;  %v70_v5 = vld [vmem:[%s1144_s3 + $0x1a0] sm:$0xff]  ;;  %v71_v10 = vld [vmem:[%s1144_s3 + $0x1a8] sm:$0xff]  ;;  %v72_v18 = vld [vmem:[%s1144_s3 + $0x1b0] sm:$0xff] }
  0x35   :  { %453 = vst.msk [vmem:[#allocation2 + $0x150] sm:$0xff] %vm410_vm0, %v388_v36  ;;  %v393_v53 = vadd.f32 %v329_v43, %v65_v40  ;;  %v266_v54 = vadd.f32 %v563_v2, %v198_v44  ;;  %v267_v55 = vadd.f32 %v563_v2, %v199_v45  ;;  %v202_v56 = vmul.f32 %v558_v1, %v134_v41  ;;  %v138_v13 = vld [vmem:[%s1141_s0 + $0x1c0] sm:$0xff]  ;;  %v139_v14 = vld [vmem:[%s1141_s0 + $0x1c8] sm:$0xff]  ;;  %v140_v20 = vld [vmem:[%s1141_s0 + $0x1d0] sm:$0xff] }
  0x36   :  { %454 = vst.msk [vmem:[#allocation2 + $0x158] sm:$0xff] %vm410_vm0, %v389_v37  ;;  %v268_v59 = vadd.f32 %v563_v2, %v200_v50  ;;  %v269_v60 = vadd.f32 %v563_v2, %v201_v51  ;;  %v203_v61 = vmul.f32 %v558_v1, %v135_v46  ;;  %v204_v62 = vmul.f32 %v558_v1, %v136_v47  ;;  %v141_v21 = vld [vmem:[%s1141_s0 + $0x1d8] sm:$0xff]  ;;  %v142_v27 = vld [vmem:[%s1141_s0 + $0x1e0] sm:$0xff]  ;;  %v143_v32 = vld [vmem:[%s1141_s0 + $0x1e8] sm:$0xff] }
  0x37   :  { %455 = vst.msk [vmem:[#allocation2 + $0x160] sm:$0xff] %vm410_vm0, %v390_v42  ;;  %v330_v63 = vmax.f32 %v266_v54, 0.0  ;;  %v331_v0 = vmax.f32 %v267_v55, 0.0  ;;  %v270_v6 = vadd.f32 %v563_v2, %v202_v56  ;;  %v205_v7 = vmul.f32 %v558_v1, %v137_v52  ;;  %v73_v26 = vld [vmem:[%s1144_s3 + $0x1b8] sm:$0xff]  ;;  %v144_v33 = vld [vmem:[%s1141_s0 + $0x1f0] sm:$0xff]  ;;  %v74_v43 = vld [vmem:[%s1144_s3 + $0x1c0] sm:$0xff] }
  0x38   :  { %456 = vst.msk [vmem:[#allocation2 + $0x168] sm:$0xff] %vm410_vm0, %v391_v48  ;;  %v332_v8 = vmax.f32 %v268_v59, 0.0  ;;  %v333_v9 = vmax.f32 %v269_v60, 0.0  ;;  %v271_v11 = vadd.f32 %v563_v2, %v203_v61  ;;  %v272_v12 = vadd.f32 %v563_v2, %v204_v62  ;;  %v145_v38 = vld [vmem:[%s1141_s0 + $0x1f8] sm:$0xff]  ;;  %v75_v44 = vld [vmem:[%s1144_s3 + $0x1c8] sm:$0xff]  ;;  %v76_v51 = vld [vmem:[%s1144_s3 + $0x1d0] sm:$0xff] }
  0x39   :  { %457 = vst.msk [vmem:[#allocation2 + $0x170] sm:$0xff] %vm410_vm0, %v392_v49  ;;  %v394_v15 = vadd.f32 %v330_v63, %v66_v57  ;;  %v395_v16 = vadd.f32 %v331_v0, %v67_v58  ;;  %v334_v17 = vmax.f32 %v270_v6, 0.0  ;;  %v273_v19 = vadd.f32 %v563_v2, %v205_v7  ;;  %v77_v52 = vld [vmem:[%s1144_s3 + $0x1d8] sm:$0xff]  ;;  %v78_v57 = vld [vmem:[%s1144_s3 + $0x1e0] sm:$0xff] }
  0x3a   :  { %458 = vst.msk [vmem:[#allocation2 + $0x178] sm:$0xff] %vm410_vm0, %v393_v53  ;;  %v396_v22 = vadd.f32 %v332_v8, %v68_v3  ;;  %v397_v23 = vadd.f32 %v333_v9, %v69_v4  ;;  %v335_v24 = vmax.f32 %v271_v11, 0.0  ;;  %v336_v25 = vmax.f32 %v272_v12, 0.0  ;;  %v81_v8 = vld [vmem:[%s1144_s3 + $0x1f8] sm:$0xff] }
  0x3b   :  { %459 = vst.msk [vmem:[#allocation2 + $0x180] sm:$0xff] %vm410_vm0, %v394_v15  ;;  %v398_v28 = vadd.f32 %v334_v17, %v70_v5  ;;  %v337_v29 = vmax.f32 %v273_v19, 0.0  ;;  %v206_v30 = vmul.f32 %v558_v1, %v138_v13  ;;  %v207_v31 = vmul.f32 %v558_v1, %v139_v14  ;;  %v80_v5 = vld [vmem:[%s1144_s3 + $0x1f0] sm:$0xff] }
  0x3c   :  { %460 = vst.msk [vmem:[#allocation2 + $0x188] sm:$0xff] %vm410_vm0, %v395_v16  ;;  %v399_v34 = vadd.f32 %v335_v24, %v71_v10  ;;  %v400_v35 = vadd.f32 %v336_v25, %v72_v18  ;;  %v208_v36 = vmul.f32 %v558_v1, %v140_v20  ;;  %v209_v37 = vmul.f32 %v558_v1, %v141_v21 }
  0x3d   :  { %461 = vst.msk [vmem:[#allocation2 + $0x190] sm:$0xff] %vm410_vm0, %v396_v22  ;;  %v401_v39 = vadd.f32 %v337_v29, %v73_v26  ;;  %v274_v40 = vadd.f32 %v563_v2, %v206_v30  ;;  %v275_v41 = vadd.f32 %v563_v2, %v207_v31  ;;  %v210_v42 = vmul.f32 %v558_v1, %v142_v27 }
  0x3e   :  { %462 = vst.msk [vmem:[#allocation2 + $0x198] sm:$0xff] %vm410_vm0, %v397_v23  ;;  %v276_v45 = vadd.f32 %v563_v2, %v208_v36  ;;  %v277_v46 = vadd.f32 %v563_v2, %v209_v37  ;;  %v211_v47 = vmul.f32 %v558_v1, %v143_v32  ;;  %v212_v48 = vmul.f32 %v558_v1, %v144_v33 }
  0x3f   :  { %463 = vst.msk [vmem:[#allocation2 + $0x1a0] sm:$0xff] %vm410_vm0, %v398_v28  ;;  %v338_v49 = vmax.f32 %v274_v40, 0.0  ;;  %v339_v50 = vmax.f32 %v275_v41, 0.0  ;;  %v278_v53 = vadd.f32 %v563_v2, %v210_v42  ;;  %v213_v54 = vmul.f32 %v558_v1, %v145_v38  ;;  %v79_v1 = vld [vmem:[%s1144_s3 + $0x1e8] sm:$0xff]  ;;  %s525_s3 = smov 128  }
  0x40   :  { %464 = vst.msk [vmem:[#allocation2 + $0x1a8] sm:$0xff] %vm410_vm0, %v399_v34  ;;  %v340_v55 = vmax.f32 %v276_v45, 0.0  ;;  %v341_v56 = vmax.f32 %v277_v46, 0.0  ;;  %v279_v58 = vadd.f32 %v563_v2, %v211_v47  ;;  %v280_v59 = vadd.f32 %v563_v2, %v212_v48 }
  0x41   :  { %465 = vst.msk [vmem:[#allocation2 + $0x1b0] sm:$0xff] %vm410_vm0, %v400_v35  ;;  %v402_v60 = vadd.f32 %v338_v49, %v74_v43  ;;  %v403_v61 = vadd.f32 %v339_v50, %v75_v44  ;;  %v342_v62 = vmax.f32 %v278_v53, 0.0  ;;  %v281_v63 = vadd.f32 %v563_v2, %v213_v54 }
  0x42   :  { %466 = vst.msk [vmem:[#allocation2 + $0x1b8] sm:$0xff] %vm410_vm0, %v401_v39  ;;  %v404_v0 = vadd.f32 %v340_v55, %v76_v51  ;;  %v405_v3 = vadd.f32 %v341_v56, %v77_v52  ;;  %v343_v4 = vmax.f32 %v279_v58, 0.0  ;;  %v344_v6 = vmax.f32 %v280_v59, 0.0 }
  0x43   :  { %467 = vst.msk [vmem:[#allocation2 + $0x1c0] sm:$0xff] %vm410_vm0, %v402_v60  ;;  %v406_v7 = vadd.f32 %v342_v62, %v78_v57  ;;  %v345_v9 = vmax.f32 %v281_v63, 0.0 }
  0x44   :  { %468 = vst.msk [vmem:[#allocation2 + $0x1c8] sm:$0xff] %vm410_vm0, %v403_v61  ;;  %v407_v2 = vadd.f32 %v343_v4, %v79_v1  ;;  %v408_v10 = vadd.f32 %v344_v6, %v80_v5 }
  0x45   :  { %469 = vst.msk [vmem:[#allocation2 + $0x1d0] sm:$0xff] %vm410_vm0, %v404_v0  ;;  %v409_v11 = vadd.f32 %v345_v9, %v81_v8 }
  0x46   :  { %470 = vst.msk [vmem:[#allocation2 + $0x1d8] sm:$0xff] %vm410_vm0, %v405_v3 }
  0x47   :  { %471 = vst.msk [vmem:[#allocation2 + $0x1e0] sm:$0xff] %vm410_vm0, %v406_v7 }
  0x48   :  { %472 = vst.msk [vmem:[#allocation2 + $0x1e8] sm:$0xff] %vm410_vm0, %v407_v2 }
  0x49   :  { %473 = vst.msk [vmem:[#allocation2 + $0x1f0] sm:$0xff] %vm410_vm0, %v408_v10 }
  0x4a   :  { %474 = vst.msk [vmem:[#allocation2 + $0x1f8] sm:$0xff] %vm410_vm0, %v409_v11 }
  0x4b   :  { %487 = dma.vmem_to_hbm [thread:$0]  %s480_s23, 8192, %s482_s1, [#allocation3], %s525_s3, %s525_s3, %s526_s2  }
  0x4c   :  { %522 = dma.done.wait [#allocation3], 8192  }
  0x4d   :  { %523 = vsyncadd [#allocation3], 4294959104 }
  0x4e   :  { %492 = vsyncpa [#allocation3], 1 }

// kernel: residual_block_forward.3
= control target key start
LH: loop header
LB: loop body
LE: loop exit
PB: predicated region body
PF: predicated region fallthrough
CT: control target
= control target key end

     0   :  { %s2943_s15 = smov 0   ;;  %s2945_s16 = smov 0   ;;  %s4512_s0 = inlined_call_operand.vmem [shape: f32[2,18,18,64], index: 0, kind: input, shape index: {}]   ;;  %s4513_s1 = inlined_call_operand.vmem [shape: f32[9,64,64], index: 1, kind: input, shape index: {}]   ;;  %s4514_s2 = inlined_call_operand.vmem [shape: f32[1,64], index: 2, kind: input, shape index: {}]   ;;  %s4515_s3 = inlined_call_operand.vmem [shape: f32[2,16,16,64], index: 3, kind: output, shape index: {0}]   ;;  %s4516_s4 = inlined_call_operand.vmem [shape: f32[2,1,2,64], index: 4, kind: output, shape index: {1}]  }
   0x1   :  { %s2947_s17 = smov 0  }
   0x2 LB: > { %s27_s18 = sadd.s32 1, %s2912_s16  ;;  %p2449_p0 = scmp.ge.s32.totalorder %s2916_s17, 1  ;;  %s2916_s17 = sphi %s2947_s17, %s15_s17   ;;  %s2912_s16 = sphi %s2945_s16, %s4599_s16   ;;  %s2908_s15 = sphi %s2943_s15, %s4598_s15  }
   0x3   : > { %p29_p1 = scmp.ge.s32.totalorder %s27_s18, 2  ;;  %p181_p2 = scmp.lt.s32.totalorder %s2916_s17, 3 }
   0x5   : > { %s4601_s18 = smov (%p29_p1, %s27_s18), 0  ;;  %p182_p3 = pnand %p2449_p0, %p181_p2 }
   0x7   : > { %185 = sbr.rel (%p182_p3) target bundleno = 755 (0x2f3), region = 32 }
   0xc   : > { %v2461_v0 = vld [vmem:[%s4513_s1 + $0xf8] sm:$0xff]  ;;  %v2460_v1 = vld [vmem:[%s4513_s1 + $0xf0] sm:$0xff]  ;;  %p219_p4 = scmp.lt.s32.totalorder %s2908_s15, 1  ;;  %v2459_v2 = vld [vmem:[%s4513_s1 + $0xe8] sm:$0xff]  ;;  %vm316_vm0 = vcmask 523264   ;;  %vm821_vm1 = vcmask 1046528  }
   0xd   : > { %2809 = vmatpush.msra.mxu1 %v2461_v0  ;;  %2810 = vmatpush.msra.mxu2 %v2461_v0  ;;  %v2458_v3 = vld [vmem:[%s4513_s1 + $0xe0] sm:$0xff]  ;;  %v2457_v4 = vld [vmem:[%s4513_s1 + $0xd8] sm:$0xff]  ;;  %v2456_v5 = vld [vmem:[%s4513_s1 + $0xd0] sm:$0xff]  ;;  %vm1448_vm2 = vcmask 1045504   ;;  %vm2279_vm3 = vcmask 1040384   ;;  %vm2281_vm4 = vcmask 517120  }
   0xe   : > { %2811 = vmatpush.msra.mxu3 %v2461_v0  ;;  %421 = vmatpush.msra.mxu0 %v2461_v0  ;;  %s4603_s15 = smov (!%p219_p4, %s2908_s15), 1  ;;  %v2455_v6 = vld [vmem:[%s4513_s1 + $0xc8] sm:$0xff]  ;;  %v2454_v7 = vld [vmem:[%s4513_s1 + $0xc0] sm:$0xff]  ;;  %v2533_v10 = vld [vmem:[%s4513_s1 + $0x1b8] sm:$0xff] }
   0xf   : > { %2812 = vmatpush.msra.mxu1 %v2460_v1  ;;  %2813 = vmatpush.msra.mxu2 %v2460_v1  ;;  %s2833_s29 = smul.u32 432, %s4603_s15  ;;  %v306_v12 = vld [vmem:[%s4513_s1 + $0x38] sm:$0xff]  ;;  %v2532_v14 = vld [vmem:[%s4513_s1 + $0x1b0] sm:$0xff]  ;;  %v2531_v19 = vld [vmem:[%s4513_s1 + $0x1a8] sm:$0xff]  ;;  %s2808_s19 = sshll.u32 %s4603_s15, 8 }
  0x10   : > { %2814 = vmatpush.msra.mxu3 %v2460_v1  ;;  %422 = vmatpush.msra.mxu0 %v2460_v1  ;;  %v2573_v13 = vld [vmem:[%s4513_s1 + $0x78] sm:$0xff]  ;;  %v305_v15 = vld [vmem:[%s4513_s1 + $0x30] sm:$0xff]  ;;  %v2571_v20 = vld [vmem:[%s4513_s1 + $0x68] sm:$0xff]  ;;  %s4123_s24 = scalar_lea.vmem %s4515_s3, %s2808_s19  ;;  %s2453_s26 = sshll.u32 %s4603_s15, 1 }
  0x11   : > { %2815 = vmatpush.msra.mxu1 %v2459_v2  ;;  %2816 = vmatpush.msra.mxu2 %v2459_v2  ;;  %s2988_s10 = scalar_lea.vmem %s4512_s0, %s2833_s29  ;;  %v2572_v17 = vld [vmem:[%s4513_s1 + $0x70] sm:$0xff]  ;;  %v2613_v18 = vld [vmem:[%s4513_s1 + $0x138] sm:$0xff]  ;;  %v304_v21 = vld [vmem:[%s4513_s1 + $0x28] sm:$0xff]  ;;  %s241_s29 = scalar_lea.vmem %s4516_s4, %s2453_s26 }
  0x12   : > { %2817 = vmatpush.msra.mxu3 %v2459_v2  ;;  %423 = vmatpush.msra.mxu0 %v2459_v2  ;;  %v2994_v8 = vld [vmem:[%s2988_s10 + $0x78] sm:$0xff]  ;;  %v3042_v22 = vld [vmem:[%s2988_s10 + $0x80] sm:$0xff]  ;;  %v2612_v24 = vld [vmem:[%s4513_s1 + $0x130] sm:$0xff] }
  0x13   : > { %2818 = vmatpush.msra.mxu1 %v2458_v3  ;;  %2819 = vmatpush.msra.mxu2 %v2458_v3  ;;  %v2997_v9 = vld [vmem:[%s2988_s10 + $0xd8] sm:$0xff]  ;;  %v3045_v23 = vld [vmem:[%s2988_s10 + $0xe0] sm:$0xff]  ;;  %v2611_v29 = vld [vmem:[%s4513_s1 + $0x128] sm:$0xff] }
  0x14   : > { %2820 = vmatpush.msra.mxu3 %v2458_v3  ;;  %424 = vmatpush.msra.mxu0 %v2458_v3  ;;  %v3003_v11 = vld [vmem:[%s2988_s10 + $0x138] sm:$0xff]  ;;  %v2530_v25 = vld [vmem:[%s4513_s1 + $0x1a0] sm:$0xff]  ;;  %v2528_v35 = vld [vmem:[%s4513_s1 + $0x190] sm:$0xff] }
  0x15   : > { %2821 = vmatpush.msra.mxu1 %v2457_v4  ;;  %2822 = vmatpush.msra.mxu2 %v2457_v4  ;;  %v3024_v16 = vld [vmem:[%s2988_s10 + $0x18] sm:$0xff]  ;;  %v3056_v26 = vld [vmem:[%s2988_s10 + $0x140] sm:$0xff]  ;;  %v2568_v36 = vld [vmem:[%s4513_s1 + $0x50] sm:$0xff] }
  0x16   : > { %2823 = vmatpush.msra.mxu3 %v2457_v4  ;;  %425 = vmatpush.msra.mxu0 %v2457_v4  ;;  %v303_v27 = vld [vmem:[%s4513_s1 + $0x20] sm:$0xff]  ;;  %v2529_v30 = vld [vmem:[%s4513_s1 + $0x198] sm:$0xff]  ;;  %v301_v37 = vld [vmem:[%s4513_s1 + $0x10] sm:$0xff] }
  0x17   : > { %2824 = vmatpush.msra.mxu1 %v2456_v5  ;;  %2825 = vmatpush.msra.mxu2 %v2456_v5  ;;  %v2570_v28 = vld [vmem:[%s4513_s1 + $0x60] sm:$0xff]  ;;  %v302_v31 = vld [vmem:[%s4513_s1 + $0x18] sm:$0xff]  ;;  %v3098_v38 = vld [vmem:[%s2988_s10 + $0x90] sm:$0xff] }
  0x18   : > { %2826 = vmatpush.msra.mxu3 %v2456_v5  ;;  %426 = vmatpush.msra.mxu0 %v2456_v5  ;;  %v3080_v32 = vld [vmem:[%s2988_s10 + $0x20] sm:$0xff]  ;;  %v2569_v33 = vld [vmem:[%s4513_s1 + $0x58] sm:$0xff]  ;;  %v3101_v39 = vld [vmem:[%s2988_s10 + $0xf0] sm:$0xff] }
  0x19   : > { %2827 = vmatpush.msra.mxu1 %v2455_v6  ;;  %2828 = vmatpush.msra.mxu2 %v2455_v6  ;;  %v2610_v34 = vld [vmem:[%s4513_s1 + $0x120] sm:$0xff]  ;;  %v2609_v40 = vld [vmem:[%s4513_s1 + $0x118] sm:$0xff]  ;;  %v3109_v41 = vld [vmem:[%s2988_s10 + $0x150] sm:$0xff] }
  0x1a   : > { %2829 = vmatpush.msra.mxu3 %v2455_v6  ;;  %427 = vmatpush.msra.mxu0 %v2455_v6  ;;  %v2527_v42 = vld [vmem:[%s4513_s1 + $0x188] sm:$0xff]  ;;  %v3119_v43 = vld [vmem:[%s2988_s10 + $0x30] sm:$0xff]  ;;  %v3133_v47 = vld [vmem:[%s2988_s10 + $0x98] sm:$0xff] }
  0x1b   : > { %2830 = vmatpush.msra.mxu1 %v2454_v7  ;;  %2831 = vmatpush.msra.mxu2 %v2454_v7  ;;  %v2567_v44 = vld [vmem:[%s4513_s1 + $0x48] sm:$0xff]  ;;  %v2608_v45 = vld [vmem:[%s4513_s1 + $0x110] sm:$0xff]  ;;  %v3136_v48 = vld [vmem:[%s2988_s10 + $0xf8] sm:$0xff] }
  0x1c   : > { %2470 = vmatmul.msk.f32.vlgmr.msra.gmra.mxu1 %vm316_vm0, %v2994_v8  ;;  %2478 = vmatmul.msk.f32.vlgmr.msra.gmra.mxu2 %vm316_vm0, %v2997_v9  ;;  %v300_v46 = vld [vmem:[%s4513_s1 + $0x8] sm:$0xff]  ;;  %v3141_v49 = vld [vmem:[%s2988_s10 + $0x158] sm:$0xff]  ;;  %v2526_v50 = vld [vmem:[%s4513_s1 + $0x180] sm:$0xff] }
  0x1d   : > { %668 = vmatpush.msrb.mxu2 %v2533_v10  ;;  %2832 = vmatpush.msra.mxu3 %v2454_v7  ;;  %v3151_v51 = vld [vmem:[%s2988_s10 + $0x38] sm:$0xff]  ;;  %v2566_v52 = vld [vmem:[%s4513_s1 + $0x40] sm:$0xff]  ;;  %v2607_v53 = vld [vmem:[%s4513_s1 + $0x108] sm:$0xff] }
  0x1e   : > { %2486 = vmatmul.msk.f32.vlgmr.msra.gmra.mxu3 %vm316_vm0, %v3003_v11  ;;  %540 = vmatpush.msrb.mxu1 %v306_v12  ;;  %v299_v54 = vld [vmem:[%s4513_s1] sm:$0xff]  ;;  %v3165_v55 = vld [vmem:[%s2988_s10 + $0xa8] sm:$0xff]  ;;  %v2693_v58 = vld [vmem:[%s4513_s1 + $0xb8] sm:$0xff] }
  0x1f   : > { %983 = vmatpush.msrb.mxu3 %v2573_v13  ;;  %669 = vmatpush.msrb.mxu2 %v2532_v14  ;;  %v3168_v56 = vld [vmem:[%s2988_s10 + $0x108] sm:$0xff]  ;;  %v2606_v60 = vld [vmem:[%s4513_s1 + $0x100] sm:$0xff]  ;;  %v2733_v61 = vld [vmem:[%s4513_s1 + $0x178] sm:$0xff] }
  0x20   : > { %428 = vmatpush.msra.mxu0 %v2454_v7  ;;  %541 = vmatpush.msrb.mxu1 %v305_v15  ;;  %v3173_v57 = vld [vmem:[%s2988_s10 + $0x168] sm:$0xff]  ;;  %v2653_v62 = vld [vmem:[%s4513_s1 + $0x1f8] sm:$0xff]  ;;  %v3197_v63 = vld [vmem:[%s2988_s10 + $0xb0] sm:$0xff] }
  0x21   : > { %2462 = vmatmul.msk.f32.vlgmr.msra.gmra.mxu0 %vm316_vm0, %v3024_v16  ;;  %984 = vmatpush.msrb.mxu3 %v2572_v17  ;;  %v3183_v59 = vld [vmem:[%s2988_s10 + $0x48] sm:$0xff]  ;;  %v3200_v0 = vld [vmem:[%s2988_s10 + $0x110] sm:$0xff]  ;;  %v2773_v3 = vld [vmem:[%s4513_s1 + $0x238] sm:$0xff] }
  0x22   : > { %1147 = vmatpush.msrb.mxu0 %v2613_v18  ;;  %670 = vmatpush.msrb.mxu2 %v2531_v19  ;;  %v3205_v1 = vld [vmem:[%s2988_s10 + $0x170] sm:$0xff]  ;;  %v3220_v4 = vld [vmem:[%s2988_s10 + $0xc0] sm:$0xff]  ;;  %v3240_v10 = vld [vmem:[%s2988_s10 + $0xc8] sm:$0xff] }
  0x23   : > { %985 = vmatpush.msrb.mxu3 %v2571_v20  ;;  %542 = vmatpush.msrb.mxu1 %v304_v21  ;;  %v3214_v2 = vld [vmem:[%s2988_s10 + $0x50] sm:$0xff]  ;;  %v3223_v5 = vld [vmem:[%s2988_s10 + $0x120] sm:$0xff]  ;;  %v3243_v12 = vld [vmem:[%s2988_s10 + $0x128] sm:$0xff]  ;;  %v827_v20 = vrot.slane %v3024_v16, 1  ;;  %v828_v21 = vrot.slane %v3080_v32, 1 }
  0x24   : > { %2471 = vmatmul.msk.f32.gmra.mxu1 %vm316_vm0, %v3042_v22  ;;  %2479 = vmatmul.msk.f32.gmra.mxu2 %vm316_vm0, %v3045_v23  ;;  %v3228_v6 = vld [vmem:[%s2988_s10 + $0x180] sm:$0xff]  ;;  %v3248_v13 = vld [vmem:[%s2988_s10 + $0x188] sm:$0xff] }
  0x25   : > { %1148 = vmatpush.msrb.mxu0 %v2612_v24  ;;  %671 = vmatpush.msrb.mxu2 %v2530_v25  ;;  %v3237_v7 = vld [vmem:[%s2988_s10 + $0x60] sm:$0xff]  ;;  %v3258_v15 = vld [vmem:[%s2988_s10 + $0x8] sm:$0xff]  ;;  %v3277_v25 = vld [vmem:[%s2988_s10 + $0x10] sm:$0x3] }
  0x26   : > { %2487 = vmatmul.msk.f32.gmra.mxu3 %vm316_vm0, %v3056_v26  ;;  %543 = vmatpush.msrb.mxu1 %v303_v27  ;;  %v3255_v14 = vld [vmem:[%s2988_s10] sm:$0xff]  ;;  %v3263_v17 = vld [vmem:[%s2988_s10 + $0x68] sm:$0xff]  ;;  %v823_v19 = vrot.slane %v3258_v15, 1  ;;  %v2692_v27 = vld [vmem:[%s4513_s1 + $0xb0] sm:$0xff] }
  0x27   : > { %986 = vmatpush.msrb.mxu3 %v2570_v28  ;;  %1149 = vmatpush.msrb.mxu0 %v2611_v29  ;;  %v822_v18 = vrot.slane %v3255_v14, 1  ;;  %v829_v28 = vsel %vm821_vm1, %v827_v20, %v828_v21  ;;  %v2732_v29 = vld [vmem:[%s4513_s1 + $0x170] sm:$0xff] }
  0x28   : > { %672 = vmatpush.msrb.mxu2 %v2529_v30  ;;  %544 = vmatpush.msrb.mxu1 %v302_v31  ;;  %v2652_v30 = vld [vmem:[%s4513_s1 + $0x1f0] sm:$0xff]  ;;  %v825_v31 = vrot.slane %v3277_v25, 1 }
  0x29   : > { %2463 = vmatmul.msk.f32.gmra.mxu0 %vm316_vm0, %v3080_v32  ;;  %987 = vmatpush.msrb.mxu3 %v2569_v33  ;;  %v824_v24 = vsel %vm821_vm1, %v822_v18, %v823_v19  ;;  %v3292_v33 = vld [vmem:[%s2988_s10 + $0x28] sm:$0x3]  ;;  %v843_v18 = vrot.slane %v3263_v17, 1  ;;  %v3385_v20 = vld [vmem:[%s2988_s10 + $0x70] sm:$0x3] }
  0x2a   : > { %1150 = vmatpush.msrb.mxu0 %v2610_v34  ;;  %673 = vmatpush.msrb.mxu2 %v2528_v35  ;;  %v830_v34 = vrot.slane %v3292_v33, 1  ;;  %v826_v35 = vsel %vm821_vm1, %v823_v19, %v825_v31  ;;  %4531 = vst [vmem:[#allocation2_spill] sm:$0xff] %v3385_v20 }
  0x2b   : > { %988 = vmatpush.msrb.mxu3 %v2568_v36  ;;  %545 = vmatpush.msrb.mxu1 %v301_v37  ;;  %v2772_v37 = vld [vmem:[%s4513_s1 + $0x230] sm:$0xff] }
  0x2c   : > { %2472 = vmatmul.msk.f32.gmra.mxu1 %vm316_vm0, %v3098_v38  ;;  %2480 = vmatmul.msk.f32.gmra.mxu2 %vm316_vm0, %v3101_v39  ;;  %v831_v36 = vsel %vm821_vm1, %v828_v21, %v830_v34  ;;  %v845_v21 = vrot.slane %v3385_v20, 1  ;;  %v3425_v34 = vld [vmem:[%s2988_s10 + $0x88] sm:$0x3] }
  0x2d   : > { %1151 = vmatpush.msrb.mxu0 %v2609_v40  ;;  %674 = vmatpush.msrb.mxu2 %v2527_v42  ;;  %v832_v40 = vrot.slane %v3119_v43, 1  ;;  %v833_v42 = vrot.slane %v3151_v51, 1  ;;  %4534 = vst [vmem:[#allocation5_spill] sm:$0xff] %v3425_v34 }
  0x2e   : > { %2488 = vmatmul.msk.f32.gmra.mxu3 %vm316_vm0, %v3109_v41  ;;  %546 = vmatpush.msrb.mxu1 %v300_v46 }
  0x2f   : > { %989 = vmatpush.msrb.mxu3 %v2567_v44  ;;  %1152 = vmatpush.msrb.mxu0 %v2608_v45  ;;  %v3315_v44 = vsel %vm821_vm1, %v832_v40, %v833_v42  ;;  %v3318_v45 = vld [vmem:[%s2988_s10 + $0x40] sm:$0x3]  ;;  %v850_v40 = vrot.slane %v3425_v34, 1 }
  0x30   : > { %675 = vmatpush.msrb.mxu2 %v2526_v50  ;;  %547 = vmatpush.msrb.mxu1 %v299_v54  ;;  %v835_v46 = vrot.slane %v3318_v45, 1  ;;  %v837_v50 = vrot.slane %v3183_v59, 1  ;;  %v2731_v54 = vld [vmem:[%s4513_s1 + $0x168] sm:$0xff] }
  0x31   : > { %2464 = vmatmul.msk.f32.gmra.mxu0 %vm316_vm0, %v3119_v43  ;;  %990 = vmatpush.msrb.mxu3 %v2566_v52  ;;  %v838_v52 = vrot.slane %v3214_v2, 1 }
  0x32   : > { %1153 = vmatpush.msrb.mxu0 %v2607_v53  ;;  %1610 = vmatpush.msra.mxu2 %v2693_v58  ;;  %v3351_v58 = vld [vmem:[%s2988_s10 + $0x58] sm:$0x3] }
  0x33   : > { %1773 = vmatpush.msra.mxu3 %v2733_v61  ;;  %1311 = vmatpush.msra.mxu1 %v2653_v62  ;;  %v3345_v53 = vsel %vm821_vm1, %v837_v50, %v838_v52  ;;  %v2771_v62 = vld [vmem:[%s4513_s1 + $0x228] sm:$0xff]  ;;  %v2770_v50 = vld [vmem:[%s4513_s1 + $0x220] sm:$0xff] }
  0x34   : > { %2473 = vmatmul.msk.f32.gmra.mxu1 %vm316_vm0, %v3133_v47  ;;  %2481 = vmatmul.msk.f32.gmra.mxu2 %vm316_vm0, %v3136_v48 }
  0x35   : > { %1154 = vmatpush.msrb.mxu0 %v2606_v60  ;;  %1611 = vmatpush.msra.mxu2 %v2692_v27  ;;  %v840_v60 = vrot.slane %v3351_v58, 1  ;;  %v847_v27 = vrot.slane %v2994_v8, 1 }
  0x36   : > { %2489 = vmatmul.msk.f32.gmra.mxu3 %vm316_vm0, %v3141_v49  ;;  %1312 = vmatpush.msra.mxu1 %v2652_v30 }
  0x37   : > { %1936 = vmatpush.msra.mxu0 %v2773_v3  ;;  %1774 = vmatpush.msra.mxu3 %v2732_v29  ;;  %v3366_v61 = vsel %vm821_vm1, %v838_v52, %v840_v60  ;;  %v842_v3 = vrot.slane %v3237_v7, 1 }
  0x39   : > { %2465 = vmatmul.msk.f32.gmra.mxu0 %vm316_vm0, %v3151_v51  ;;  %1775 = vmatpush.msra.mxu3 %v2731_v54  ;;  %v3382_v19 = vsel %vm821_vm1, %v842_v3, %v843_v18  ;;  %v852_v54 = vrot.slane %v3098_v38, 1 }
  0x3a   : > { %1937 = vmatpush.msra.mxu0 %v2772_v37 }
  0x3c   : > { %2474 = vmatmul.msk.f32.gmra.mxu1 %vm316_vm0, %v3165_v55  ;;  %2482 = vmatmul.msk.f32.gmra.mxu2 %vm316_vm0, %v3168_v56 }
  0x3d   : > { %1938 = vmatpush.msra.mxu0 %v2771_v62 }
  0x3e   : > { %2490 = vmatmul.msk.f32.gmra.mxu3 %vm316_vm0, %v3173_v57 }
  0x3f   : > { %1939 = vmatpush.msra.mxu0 %v2770_v50  ;;  %v858_v50 = vrot.slane %v3197_v63, 1 }
  0x41   : > { %2466 = vmatmul.msk.f32.gmra.mxu0 %vm316_vm0, %v3183_v59 }
  0x44   : > { %2475 = vmatmul.msk.f32.gmra.mxu1 %vm316_vm0, %v3197_v63  ;;  %2483 = vmatmul.msk.f32.gmra.mxu2 %vm316_vm0, %v3200_v0 }
  0x46   : > { %2491 = vmatmul.msk.f32.gmra.mxu3 %vm316_vm0, %v3205_v1 }
  0x49   : > { %2467 = vmatmul.msk.f32.gmra.mxu0 %vm316_vm0, %v3214_v2 }
  0x4c   : > { %2476 = vmatmul.msk.f32.gmra.mxu1 %vm316_vm0, %v3220_v4  ;;  %2484 = vmatmul.msk.f32.gmra.mxu2 %vm316_vm0, %v3223_v5 }
  0x4e   : > { %2492 = vmatmul.msk.f32.gmra.mxu3 %vm316_vm0, %v3228_v6 }
  0x51   : > { %2468 = vmatmul.msk.f32.gmra.mxu0 %vm316_vm0, %v3237_v7 }
  0x54   : > { %2477 = vmatmul.msk.f32.gmra.mxu1 %vm316_vm0, %v3240_v10  ;;  %2485 = vmatmul.msk.f32.gmra.mxu2 %vm316_vm0, %v3243_v12 }
  0x56   : > { %2493 = vmatmul.msk.f32.gmra.mxu3 %vm316_vm0, %v3248_v13 }
  0x59   : > { %2469 = vmatmul.msk.f32.gmra.mxu0 %vm316_vm0, %v3263_v17 }
  0x5c   : > { %2494 = vmatmul.msk.f32.vlgmr.msrb.gmra.mxu1 %vm316_vm0, %v3255_v14  ;;  %2534 = vmatmul.msk.f32.vlgmr.msrb.gmra.mxu2 %vm316_vm0, %v3119_v43 }
  0x5e   : > { %2574 = vmatmul.msk.f32.vlgmr.msrb.gmra.mxu3 %vm316_vm0, %v824_v24 }
  0x61   : > { %2614 = vmatmul.msk.f32.vlgmr.msrb.gmra.mxu0 %vm316_vm0, %v829_v28 }
  0x64   : > { %2495 = vmatmul.msk.f32.gmra.mxu1 %vm316_vm0, %v3258_v15  ;;  %2535 = vmatmul.msk.f32.gmra.mxu2 %vm316_vm0, %v3151_v51 }
  0x66   : > { %2575 = vmatmul.msk.f32.gmra.mxu3 %vm316_vm0, %v826_v35  ;;  %v2650_v35 = vld [vmem:[%s4513_s1 + $0x1e0] sm:$0xff] }
  0x69   : > { %2615 = vmatmul.msk.f32.gmra.mxu0 %vm316_vm0, %v831_v36 }
  0x6c   : > { %2496 = vmatmul.msk.f32.gmra.mxu1 %vm316_vm0, %v3024_v16  ;;  %2536 = vmatmul.msk.f32.gmra.mxu2 %vm316_vm0, %v3183_v59  ;;  %v3329_v16 = vsel %vm821_vm1, %v833_v42, %v835_v46 }
  0x6e   : > { %2576 = vmatmul.msk.f32.gmra.mxu3 %vm316_vm0, %v829_v28  ;;  %v848_v28 = vrot.slane %v3042_v22, 1 }
  0x70   : > { %v3417_v30 = vsel %vm821_vm1, %v847_v27, %v848_v28  ;;  %v3446_v46 = vsel %vm821_vm1, %v848_v28, %v850_v40 }
  0x71   : > { %2616 = vmatmul.msk.f32.gmra.mxu0 %vm316_vm0, %v3315_v44  ;;  %4533 = vst [vmem:[#allocation4_spill] sm:$0xff] %v3417_v30 }
  0x72   : > { %4536 = vst [vmem:[#allocation7_spill] sm:$0xff] %v3446_v46 }
  0x74   : > { %2497 = vmatmul.msk.f32.gmra.mxu1 %vm316_vm0, %v3080_v32  ;;  %2537 = vmatmul.msk.f32.gmra.mxu2 %vm316_vm0, %v3214_v2  ;;  %v2691_v32 = vld [vmem:[%s4513_s1 + $0xa8] sm:$0xff] }
  0x75   : > { %1612 = vmatpush.msra.mxu2 %v2691_v32 }
  0x76   : > { %2577 = vmatmul.msk.f32.gmra.mxu3 %vm316_vm0, %v831_v36 }
  0x79   : > { %2617 = vmatmul.msk.f32.gmra.mxu0 %vm316_vm0, %v3329_v16 }
  0x7c   : > { %2498 = vmatmul.msk.f32.gmra.mxu1 %vm316_vm0, %v3119_v43  ;;  %2538 = vmatmul.msk.f32.gmra.mxu2 %vm316_vm0, %v3237_v7  ;;  %v2651_v43 = vld [vmem:[%s4513_s1 + $0x1e8] sm:$0xff] }
  0x7d   : > { %1313 = vmatpush.msra.mxu1 %v2651_v43  ;;  %v853_v43 = vrot.slane %v3133_v47, 1 }
  0x7e   : > { %2578 = vmatmul.msk.f32.gmra.mxu3 %vm316_vm0, %v3315_v44 }
  0x7f   : > { %1314 = vmatpush.msra.mxu1 %v2650_v35  ;;  %v3470_v62 = vsel %vm821_vm1, %v852_v54, %v853_v43  ;;  %v2689_v54 = vld [vmem:[%s4513_s1 + $0x98] sm:$0xff] }
  0x80   : > { %4538 = vst [vmem:[#allocation9_spill] sm:$0xff] %v3470_v62 }
  0x81   : > { %2618 = vmatmul.msk.f32.gmra.mxu0 %vm316_vm0, %v3345_v53 }
  0x84   : > { %2499 = vmatmul.msk.f32.gmra.mxu1 %vm316_vm0, %v3151_v51  ;;  %2539 = vmatmul.msk.f32.gmra.mxu2 %vm316_vm0, %v3263_v17 }
  0x86   : > { %2579 = vmatmul.msk.f32.gmra.mxu3 %vm316_vm0, %v3329_v16 }
  0x89   : > { %2619 = vmatmul.msk.f32.gmra.mxu0 %vm316_vm0, %v3366_v61 }
  0x8c   : > { %2500 = vmatmul.msk.f32.gmra.mxu1 %vm316_vm0, %v3183_v59  ;;  %2540 = vmatmul.msk.f32.gmra.mxu2 %vm316_vm0, %v2994_v8  ;;  %v3397_v59 = vsel %vm821_vm1, %v843_v18, %v845_v21  ;;  %v3475_v18 = vld [vmem:[%s2988_s10 + $0xa0] sm:$0x3] }
  0x8d   : > { %4532 = vst [vmem:[#allocation3_spill] sm:$0xff] %v3397_v59 }
  0x8e   : > { %2580 = vmatmul.msk.f32.gmra.mxu3 %vm316_vm0, %v3345_v53  ;;  %4539 = vst [vmem:[#allocation10_spill] sm:$0xff] %v3475_v18 }
  0x91   : > { %2620 = vmatmul.msk.f32.gmra.mxu0 %vm316_vm0, %v3382_v19 }
  0x94   : > { %2501 = vmatmul.msk.f32.gmra.mxu1 %vm316_vm0, %v3214_v2  ;;  %2541 = vmatmul.msk.f32.gmra.mxu2 %vm316_vm0, %v3042_v22  ;;  %v2690_v2 = vld [vmem:[%s4513_s1 + $0xa0] sm:$0xff] }
  0x95   : > { %1613 = vmatpush.msra.mxu2 %v2690_v2 }
  0x96   : > { %2581 = vmatmul.msk.f32.gmra.mxu3 %vm316_vm0, %v3366_v61 }
  0x97   : > { %1614 = vmatpush.msra.mxu2 %v2689_v54  ;;  %v2649_v54 = vld [vmem:[%s4513_s1 + $0x1d8] sm:$0xff] }
  0x98   : > { %1315 = vmatpush.msra.mxu1 %v2649_v54  ;;  %v2769_v54 = vld [vmem:[%s4513_s1 + $0x218] sm:$0xff] }
  0x99   : > { %v3399_v24 = vpop.f32.mrf.mxu1  ;;  %2621 = vmatmul.msk.f32.gmra.mxu0 %vm316_vm0, %v3397_v59 }
  0x9a   : > { %1940 = vmatpush.msra.mxu0 %v2769_v54 }
  0x9c   : > { %2502 = vmatmul.msk.f32.gmra.mxu1 %vm316_vm0, %v3237_v7  ;;  %2542 = vmatmul.msk.f32.gmra.mxu2 %vm316_vm0, %v3098_v38  ;;  %v2730_v7 = vld [vmem:[%s4513_s1 + $0x160] sm:$0xff] }
  0x9d   : > { %1776 = vmatpush.msra.mxu3 %v2730_v7 }
  0x9e   : > { %2582 = vmatmul.msk.f32.gmra.mxu3 %vm316_vm0, %v3382_v19  ;;  %v3414_v29 = vpop.f32.mrf.mxu0 }
  0x9f   : > { %v3422_v31 = vpop.f32.mrf.mxu2 }
  0xa1   : > { %v3430_v36 = vpop.f32.mrf.mxu1  ;;  %v3432_v37 = vpop.f32.mrf.mxu3  ;;  %2622 = vmatmul.msk.f32.gmra.mxu0 %vm316_vm0, %v3417_v30 }
  0xa2   : > { %4535 = vst [vmem:[#allocation6_spill] sm:$0xff] %v3432_v37 }
  0xa4   : > { %2503 = vmatmul.msk.f32.gmra.mxu1 %vm316_vm0, %v3263_v17  ;;  %2543 = vmatmul.msk.f32.gmra.mxu2 %vm316_vm0, %v3133_v47 }
  0xa6   : > { %2583 = vmatmul.msk.f32.gmra.mxu3 %vm316_vm0, %v3397_v59  ;;  %v3443_v42 = vpop.f32.mrf.mxu0 }
  0xa7   : > { %v3451_v52 = vpop.f32.mrf.mxu2 }
  0xa9   : > { %v3453_v17 = vpop.f32.mrf.mxu1  ;;  %v3455_v32 = vpop.f32.mrf.mxu3  ;;  %2623 = vmatmul.msk.f32.gmra.mxu0 %vm316_vm0, %v3446_v46 }
  0xaa   : > { %4537 = vst [vmem:[#allocation8_spill] sm:$0xff] %v3455_v32 }
  0xac   : > { %2504 = vmatmul.msk.f32.gmra.mxu1 %vm316_vm0, %v2994_v8  ;;  %2544 = vmatmul.msk.f32.gmra.mxu2 %vm316_vm0, %v3165_v55  ;;  %v855_v8 = vrot.slane %v3475_v18, 1 }
  0xae   : > { %2584 = vmatmul.msk.f32.gmra.mxu3 %vm316_vm0, %v3417_v30  ;;  %v3467_v60 = vpop.f32.mrf.mxu0  ;;  %v3493_v2 = vsel %vm821_vm1, %v853_v43, %v855_v8  ;;  %v868_v30 = vrot.slane %v3045_v23, 1 }
  0xaf   : > { %v3472_v3 = vpop.f32.mrf.mxu2  ;;  %4541 = vst [vmem:[#allocation12_spill] sm:$0xff] %v3493_v2 }
  0xb1   : > { %v3477_v21 = vpop.f32.mrf.mxu1  ;;  %v3479_v27 = vpop.f32.mrf.mxu3  ;;  %2624 = vmatmul.msk.f32.gmra.mxu0 %vm316_vm0, %v3470_v62 }
  0xb2   : > { %4540 = vst [vmem:[#allocation11_spill] sm:$0xff] %v3479_v27  ;;  %v3525_v27 = vld [vmem:[%s2988_s10 + $0xb8] sm:$0x3] }
  0xb3   : > { %4544 = vst [vmem:[#allocation15_spill] sm:$0xff] %v3525_v27 }
  0xb4   : > { %2505 = vmatmul.msk.f32.gmra.mxu1 %vm316_vm0, %v3042_v22  ;;  %2545 = vmatmul.msk.f32.gmra.mxu2 %vm316_vm0, %v3197_v63  ;;  %v857_v22 = vrot.slane %v3165_v55, 1 }
  0xb6   : > { %2585 = vmatmul.msk.f32.gmra.mxu3 %vm316_vm0, %v3446_v46  ;;  %v3490_v28 = vpop.f32.mrf.mxu0  ;;  %v3517_v8 = vsel %vm821_vm1, %v857_v22, %v858_v50  ;;  %v860_v22 = vrot.slane %v3525_v27, 1 }
  0xb7   : > { %v3495_v7 = vpop.f32.mrf.mxu2  ;;  %4543 = vst [vmem:[#allocation14_spill] sm:$0xff] %v3517_v8 }
  0xb9   : > { %v3497_v35 = vpop.f32.mrf.mxu1  ;;  %v3499_v40 = vpop.f32.mrf.mxu3  ;;  %2625 = vmatmul.msk.f32.gmra.mxu0 %vm316_vm0, %v3493_v2 }
  0xba   : > { %4542 = vst [vmem:[#allocation13_spill] sm:$0xff] %v3499_v40 }
  0xbc   : > { %2506 = vmatmul.msk.f32.gmra.mxu1 %vm316_vm0, %v3098_v38  ;;  %2546 = vmatmul.msk.f32.gmra.mxu2 %vm316_vm0, %v3220_v4  ;;  %v2729_v38 = vld [vmem:[%s4513_s1 + $0x158] sm:$0xff] }
  0xbd   : > { %1777 = vmatpush.msra.mxu3 %v2729_v38 }
  0xbe   : > { %2586 = vmatmul.msk.f32.gmra.mxu3 %vm316_vm0, %v3470_v62  ;;  %v3514_v43 = vpop.f32.mrf.mxu0  ;;  %v863_v62 = vrot.slane %v3240_v10, 1 }
  0xbf   : > { %v3522_v40 = vpop.f32.mrf.mxu2 }
  0xc1   : > { %v3530_v32 = vpop.f32.mrf.mxu1  ;;  %v3532_v18 = vpop.f32.mrf.mxu3  ;;  %2626 = vmatmul.msk.f32.gmra.mxu0 %vm316_vm0, %v3517_v8 }
  0xc2   : > { %4545 = vst [vmem:[#allocation16_spill] sm:$0xff] %v3532_v18  ;;  %v3546_v18 = vsel %vm821_vm1, %v858_v50, %v860_v22 }
  0xc3   : > { %4546 = vst [vmem:[#allocation17_spill] sm:$0xff] %v3546_v18 }
  0xc4   : > { %2507 = vmatmul.msk.f32.gmra.mxu1 %vm316_vm0, %v3133_v47  ;;  %2547 = vmatmul.msk.f32.gmra.mxu2 %vm316_vm0, %v3240_v10 }
  0xc6   : > { %2587 = vmatmul.msk.f32.gmra.mxu3 %vm316_vm0, %v3493_v2  ;;  %v3543_v38 = vpop.f32.mrf.mxu0  ;;  %v862_v2 = vrot.slane %v3220_v4, 1 }
  0xc7   : > { %v3551_v27 = vpop.f32.mrf.mxu2 }
  0xc8   : > { %4547 = vst [vmem:[#allocation18_spill] sm:$0xff] %v3551_v27  ;;  %v3570_v22 = vsel %vm821_vm1, %v862_v2, %v863_v62  ;;  %v3620_v27 = vld [vmem:[%s2988_s10 + $0xe8] sm:$0x3] }
  0xc9   : > { %v3553_v47 = vpop.f32.mrf.mxu1  ;;  %v3555_v37 = vpop.f32.mrf.mxu3  ;;  %2627 = vmatmul.msk.f32.gmra.mxu0 %vm316_vm0, %v3546_v18  ;;  %4549 = vst [vmem:[#allocation20_spill] sm:$0xff] %v3570_v22 }
  0xca   : > { %4548 = vst [vmem:[#allocation19_spill] sm:$0xff] %v3555_v37  ;;  %v3575_v37 = vld [vmem:[%s2988_s10 + $0xd0] sm:$0x3] }
  0xcb   : > { %4551 = vst [vmem:[#allocation22_spill] sm:$0xff] %v3575_v37 }
  0xcc   : > { %2508 = vmatmul.msk.f32.gmra.mxu1 %vm316_vm0, %v3165_v55  ;;  %2548 = vmatmul.msk.f32.gmra.mxu2 %vm316_vm0, %v2997_v9  ;;  %v865_v55 = vrot.slane %v3575_v37, 1 }
  0xce   : > { %2588 = vmatmul.msk.f32.gmra.mxu3 %vm316_vm0, %v3517_v8  ;;  %v3567_v50 = vpop.f32.mrf.mxu0  ;;  %v3593_v8 = vsel %vm821_vm1, %v863_v62, %v865_v55  ;;  %v2688_v62 = vld [vmem:[%s4513_s1 + $0x90] sm:$0xff] }
  0xcf   : > { %v3572_v54 = vpop.f32.mrf.mxu2  ;;  %1615 = vmatpush.msra.mxu2 %v2688_v62 }
  0xd0   : > { %4550 = vst [vmem:[#allocation21_spill] sm:$0xff] %v3572_v54 }
  0xd1   : > { %v3577_v46 = vpop.f32.mrf.mxu1  ;;  %v3579_v34 = vpop.f32.mrf.mxu3  ;;  %2628 = vmatmul.msk.f32.gmra.mxu0 %vm316_vm0, %v3570_v22 }
  0xd2   : > { %4552 = vst [vmem:[#allocation23_spill] sm:$0xff] %v3579_v34 }
  0xd4   : > { %2509 = vmatmul.msk.f32.gmra.mxu1 %vm316_vm0, %v3197_v63  ;;  %2549 = vmatmul.msk.f32.gmra.mxu2 %vm316_vm0, %v3045_v23  ;;  %v867_v63 = vrot.slane %v2997_v9, 1 }
  0xd6   : > { %2589 = vmatmul.msk.f32.gmra.mxu3 %vm316_vm0, %v3546_v18  ;;  %v3590_v2 = vpop.f32.mrf.mxu0  ;;  %v3614_v18 = vsel %vm821_vm1, %v867_v63, %v868_v30 }
  0xd7   : > { %v3595_v34 = vpop.f32.mrf.mxu2 }
  0xd8   : > { %4553 = vst [vmem:[#allocation24_spill] sm:$0xff] %v3595_v34 }
  0xd9   : > { %v3597_v54 = vpop.f32.mrf.mxu3  ;;  %v549_v37 = vpop.f32.mrf.mxu1  ;;  %2629 = vmatmul.msk.f32.gmra.mxu0 %vm316_vm0, %v3593_v8 }
  0xda   : > { %4554 = vst [vmem:[#allocation25_spill] sm:$0xff] %v3597_v54  ;;  %v550_v55 = vadd.f32 %v549_v37, %v3414_v29  ;;  %v2648_v29 = vld [vmem:[%s4513_s1 + $0x1d0] sm:$0xff] }
  0xdb   : > { %1316 = vmatpush.msra.mxu1 %v2648_v29 }
  0xdc   : > { %2510 = vmatmul.msk.f32.gmra.mxu1 %vm316_vm0, %v3220_v4  ;;  %2550 = vmatmul.msk.f32.gmra.mxu2 %vm316_vm0, %v3101_v39  ;;  %v2728_v4 = vld [vmem:[%s4513_s1 + $0x150] sm:$0xff] }
  0xdd   : > { %1778 = vmatpush.msra.mxu3 %v2728_v4 }
  0xde   : > { %2590 = vmatmul.msk.f32.gmra.mxu3 %vm316_vm0, %v3570_v22  ;;  %v1156_v54 = vpop.f32.mrf.mxu0  ;;  %v870_v22 = vrot.slane %v3620_v27, 1 }
  0xdf   : > { %v677_v34 = vpop.f32.mrf.mxu2 }
  0xe0   : > { %v773_v59 = vadd.f32 %v677_v34, %v550_v55  ;;  %v3638_v4 = vsel %vm821_vm1, %v868_v30, %v870_v22 }
  0xe1   : > { %v552_v37 = vpop.f32.mrf.mxu1  ;;  %v992_v62 = vpop.f32.mrf.mxu3  ;;  %2630 = vmatmul.msk.f32.gmra.mxu0 %vm316_vm0, %v3614_v18 }
  0xe2   : > { %v1088_v63 = vadd.f32 %v992_v62, %v773_v59  ;;  %v553_v34 = vadd.f32 %v552_v37, %v3443_v42  ;;  %v2768_v59 = vld [vmem:[%s4513_s1 + $0x210] sm:$0xff]  ;;  %v872_v37 = vrot.slane %v3101_v39, 1 }
  0xe3   : > { %1941 = vmatpush.msra.mxu0 %v2768_v59 }
  0xe4   : > { %v3628_v20 = vadd.f32 %v1156_v54, %v1088_v63  ;;  %2511 = vmatmul.msk.f32.gmra.mxu1 %vm316_vm0, %v3240_v10  ;;  %2551 = vmatmul.msk.f32.gmra.mxu2 %vm316_vm0, %v3136_v48  ;;  %v873_v63 = vrot.slane %v3136_v48, 1 }
  0xe6   : > { %2591 = vmatmul.msk.f32.gmra.mxu3 %vm316_vm0, %v3593_v8  ;;  %v1159_v55 = vpop.f32.mrf.mxu0  ;;  %v3657_v59 = vsel %vm821_vm1, %v872_v37, %v873_v63 }
  0xe7   : > { %v680_v54 = vpop.f32.mrf.mxu2 }
  0xe8   : > { %v774_v10 = vadd.f32 %v680_v54, %v553_v34 }
  0xe9   : > { %v555_v29 = vpop.f32.mrf.mxu1  ;;  %v995_v62 = vpop.f32.mrf.mxu3  ;;  %2631 = vmatmul.msk.f32.gmra.mxu0 %vm316_vm0, %v3638_v4 }
  0xea   : > { %v1089_v42 = vadd.f32 %v995_v62, %v774_v10  ;;  %v556_v22 = vadd.f32 %v555_v29, %v3467_v60  ;;  %v3660_v10 = vld [vmem:[%s2988_s10 + $0x100] sm:$0x3] }
  0xec   : > { %v3647_v30 = vadd.f32 %v1159_v55, %v1089_v42  ;;  %2512 = vmatmul.msk.f32.gmra.mxu1 %vm316_vm0, %v2997_v9  ;;  %2552 = vmatmul.msk.f32.gmra.mxu2 %vm316_vm0, %v3168_v56 }
  0xee   : > { %4555 = vst [vmem:[#allocation26_spill] sm:$0xff] %v3647_v30  ;;  %2592 = vmatmul.msk.f32.gmra.mxu3 %vm316_vm0, %v3614_v18  ;;  %v1162_v34 = vpop.f32.mrf.mxu0  ;;  %v875_v30 = vrot.slane %v3660_v10, 1 }
  0xef   : > { %v683_v54 = vpop.f32.mrf.mxu2 }
  0xf0   : > { %v775_v55 = vadd.f32 %v683_v54, %v556_v22  ;;  %v3675_v22 = vsel %vm821_vm1, %v873_v63, %v875_v30  ;;  %v2687_v63 = vld [vmem:[%s4513_s1 + $0x88] sm:$0xff] }
  0xf1   : > { %v558_v62 = vpop.f32.mrf.mxu1  ;;  %v998_v42 = vpop.f32.mrf.mxu3  ;;  %2632 = vmatmul.msk.f32.gmra.mxu0 %vm316_vm0, %v3657_v59  ;;  %1616 = vmatpush.msra.mxu2 %v2687_v63 }
  0xf2   : > { %v1090_v9 = vadd.f32 %v998_v42, %v775_v55  ;;  %v559_v29 = vadd.f32 %v558_v62, %v3490_v28  ;;  %v878_v28 = vrot.slane %v3200_v0, 1 }
  0xf4   : > { %v3665_v60 = vadd.f32 %v1162_v34, %v1090_v9  ;;  %2513 = vmatmul.msk.f32.gmra.mxu1 %vm316_vm0, %v3045_v23  ;;  %2553 = vmatmul.msk.f32.gmra.mxu2 %vm316_vm0, %v3200_v0  ;;  %v877_v9 = vrot.slane %v3168_v56, 1 }
  0xf6   : > { %2593 = vmatmul.msk.f32.gmra.mxu3 %vm316_vm0, %v3638_v4  ;;  %v1165_v37 = vpop.f32.mrf.mxu0 }
  0xf7   : > { %v686_v54 = vpop.f32.mrf.mxu2 }
  0xf8   : > { %v776_v55 = vadd.f32 %v686_v54, %v559_v29 }
  0xf9   : > { %v561_v42 = vpop.f32.mrf.mxu1  ;;  %v1001_v34 = vpop.f32.mrf.mxu3  ;;  %2633 = vmatmul.msk.f32.gmra.mxu0 %vm316_vm0, %v3675_v22 }
  0xfa   : > { %v1091_v23 = vadd.f32 %v1001_v34, %v776_v55  ;;  %v562_v30 = vadd.f32 %v561_v42, %v3514_v43  ;;  %v3700_v55 = vld [vmem:[%s2988_s10 + $0x118] sm:$0x3]  ;;  %v2647_v43 = vld [vmem:[%s4513_s1 + $0x1c8] sm:$0xff] }
  0xfb   : > { %1317 = vmatpush.msra.mxu1 %v2647_v43  ;;  %v880_v63 = vrot.slane %v3700_v55, 1 }
  0xfc   : > { %v3681_v62 = vadd.f32 %v1165_v37, %v1091_v23  ;;  %2514 = vmatmul.msk.f32.gmra.mxu1 %vm316_vm0, %v3101_v39  ;;  %2554 = vmatmul.msk.f32.gmra.mxu2 %vm316_vm0, %v3223_v5  ;;  %v3694_v37 = vsel %vm821_vm1, %v877_v9, %v878_v28  ;;  %v2727_v39 = vld [vmem:[%s4513_s1 + $0x148] sm:$0xff] }
  0xfd   : > { %1779 = vmatpush.msra.mxu3 %v2727_v39 }
  0xfe   : > { %4556 = vst [vmem:[#allocation27_spill] sm:$0xff] %v3681_v62  ;;  %2594 = vmatmul.msk.f32.gmra.mxu3 %vm316_vm0, %v3657_v59  ;;  %v1168_v29 = vpop.f32.mrf.mxu0 }
  0xff   : > { %v689_v54 = vpop.f32.mrf.mxu2 }
 0x100   : > { %v777_v34 = vadd.f32 %v689_v54, %v562_v30  ;;  %v3718_v54 = vsel %vm821_vm1, %v878_v28, %v880_v63 }
 0x101   : > { %v564_v42 = vpop.f32.mrf.mxu1  ;;  %v1004_v23 = vpop.f32.mrf.mxu3  ;;  %2634 = vmatmul.msk.f32.gmra.mxu0 %vm316_vm0, %v3694_v37 }
 0x102   : > { %v1092_v9 = vadd.f32 %v1004_v23, %v777_v34  ;;  %v565_v30 = vadd.f32 %v564_v42, %v3543_v38  ;;  %v882_v42 = vrot.slane %v3223_v5, 1 }
 0x104   : > { %v3708_v62 = vadd.f32 %v1168_v29, %v1092_v9  ;;  %2515 = vmatmul.msk.f32.gmra.mxu1 %vm316_vm0, %v3136_v48  ;;  %2555 = vmatmul.msk.f32.gmra.mxu2 %vm316_vm0, %v3243_v12  ;;  %v2767_v29 = vld [vmem:[%s4513_s1 + $0x208] sm:$0xff]  ;;  %v883_v9 = vrot.slane %v3243_v12, 1 }
 0x105   : > { %1942 = vmatpush.msra.mxu0 %v2767_v29 }
 0x106   : > { %2595 = vmatmul.msk.f32.gmra.mxu3 %vm316_vm0, %v3675_v22  ;;  %v1171_v39 = vpop.f32.mrf.mxu0  ;;  %v3737_v29 = vsel %vm821_vm1, %v882_v42, %v883_v9 }
 0x107   : > { %v692_v34 = vpop.f32.mrf.mxu2 }
 0x108   : > { %v778_v48 = vadd.f32 %v692_v34, %v565_v30 }
 0x109   : > { %v567_v43 = vpop.f32.mrf.mxu1  ;;  %v1007_v23 = vpop.f32.mrf.mxu3  ;;  %2635 = vmatmul.msk.f32.gmra.mxu0 %vm316_vm0, %v3718_v54 }
 0x10a   : > { %v1093_v38 = vadd.f32 %v1007_v23, %v778_v48  ;;  %v568_v63 = vadd.f32 %v567_v43, %v3567_v50  ;;  %v3740_v48 = vld [vmem:[%s2988_s10 + $0x130] sm:$0x3] }
 0x10c   : > { %v3727_v28 = vadd.f32 %v1171_v39, %v1093_v38  ;;  %2516 = vmatmul.msk.f32.gmra.mxu1 %vm316_vm0, %v3168_v56  ;;  %2556 = vmatmul.msk.f32.gmra.mxu2 %vm316_vm0, %v3003_v11 }
 0x10e   : > { %4557 = vst [vmem:[#allocation28_spill] sm:$0xff] %v3727_v28  ;;  %2596 = vmatmul.msk.f32.gmra.mxu3 %vm316_vm0, %v3694_v37  ;;  %v1174_v30 = vpop.f32.mrf.mxu0  ;;  %v885_v28 = vrot.slane %v3740_v48, 1 }
 0x10f   : > { %v695_v34 = vpop.f32.mrf.mxu2 }
 0x110   : > { %v779_v39 = vadd.f32 %v695_v34, %v568_v63  ;;  %v3755_v63 = vsel %vm821_vm1, %v883_v9, %v885_v28  ;;  %v2686_v9 = vld [vmem:[%s4513_s1 + $0x80] sm:$0xff] }
 0x111   : > { %v570_v23 = vpop.f32.mrf.mxu1  ;;  %v1010_v38 = vpop.f32.mrf.mxu3  ;;  %2636 = vmatmul.msk.f32.gmra.mxu0 %vm316_vm0, %v3737_v29  ;;  %1617 = vmatpush.msra.mxu2 %v2686_v9 }
 0x112   : > { %v1094_v56 = vadd.f32 %v1010_v38, %v779_v39  ;;  %v571_v43 = vadd.f32 %v570_v23, %v3590_v2  ;;  %v888_v2 = vrot.slane %v3056_v26, 1 }
 0x114   : > { %v3745_v50 = vadd.f32 %v1174_v30, %v1094_v56  ;;  %2517 = vmatmul.msk.f32.gmra.mxu1 %vm316_vm0, %v3200_v0  ;;  %2557 = vmatmul.msk.f32.gmra.mxu2 %vm316_vm0, %v3056_v26  ;;  %v887_v56 = vrot.slane %v3003_v11, 1 }
 0x116   : > { %2597 = vmatmul.msk.f32.gmra.mxu3 %vm316_vm0, %v3718_v54  ;;  %v1177_v42 = vpop.f32.mrf.mxu0 }
 0x117   : > { %v698_v34 = vpop.f32.mrf.mxu2 }
 0x118   : > { %v780_v39 = vadd.f32 %v698_v34, %v571_v43 }
 0x119   : > { %v573_v38 = vpop.f32.mrf.mxu1  ;;  %v1013_v30 = vpop.f32.mrf.mxu3  ;;  %2637 = vmatmul.msk.f32.gmra.mxu0 %vm316_vm0, %v3755_v63 }
 0x11a   : > { %v1095_v0 = vadd.f32 %v1013_v30, %v780_v39  ;;  %v574_v28 = vadd.f32 %v573_v38, %v3399_v24  ;;  %v3780_v39 = vld [vmem:[%s2988_s10 + $0x148] sm:$0x3]  ;;  %v2646_v24 = vld [vmem:[%s4513_s1 + $0x1c0] sm:$0xff] }
 0x11b   : > { %1318 = vmatpush.msra.mxu1 %v2646_v24  ;;  %v890_v9 = vrot.slane %v3780_v39, 1 }
 0x11c   : > { %v3761_v23 = vadd.f32 %v1177_v42, %v1095_v0  ;;  %2518 = vmatmul.msk.f32.gmra.mxu1 %vm316_vm0, %v3223_v5  ;;  %2558 = vmatmul.msk.f32.gmra.mxu2 %vm316_vm0, %v3109_v41  ;;  %v3774_v42 = vsel %vm821_vm1, %v887_v56, %v888_v2  ;;  %v2726_v5 = vld [vmem:[%s4513_s1 + $0x140] sm:$0xff] }
 0x11d   : > { %1780 = vmatpush.msra.mxu3 %v2726_v5 }
 0x11e   : > { %4558 = vst [vmem:[#allocation29_spill] sm:$0xff] %v3761_v23  ;;  %2598 = vmatmul.msk.f32.gmra.mxu3 %vm316_vm0, %v3737_v29  ;;  %v1180_v43 = vpop.f32.mrf.mxu0 }
 0x11f   : > { %v701_v34 = vpop.f32.mrf.mxu2 }
 0x120   : > { %v781_v30 = vadd.f32 %v701_v34, %v574_v28  ;;  %v3798_v34 = vsel %vm821_vm1, %v888_v2, %v890_v9 }
 0x121   : > { %v576_v38 = vpop.f32.mrf.mxu1  ;;  %v1016_v0 = vpop.f32.mrf.mxu3  ;;  %2638 = vmatmul.msk.f32.gmra.mxu0 %vm316_vm0, %v3774_v42 }
 0x122   : > { %v1096_v56 = vadd.f32 %v1016_v0, %v781_v30  ;;  %v577_v28 = vadd.f32 %v576_v38, %v3430_v36  ;;  %v892_v38 = vrot.slane %v3109_v41, 1 }
 0x124   : > { %v3788_v23 = vadd.f32 %v1180_v43, %v1096_v56  ;;  %2519 = vmatmul.msk.f32.gmra.mxu1 %vm316_vm0, %v3243_v12  ;;  %2559 = vmatmul.msk.f32.gmra.mxu2 %vm316_vm0, %v3141_v49  ;;  %v2766_v43 = vld [vmem:[%s4513_s1 + $0x200] sm:$0xff]  ;;  %v893_v56 = vrot.slane %v3141_v49, 1 }
 0x125   : > { %1943 = vmatpush.msra.mxu0 %v2766_v43 }
 0x126   : > { %4559 = vst [vmem:[#allocation30_spill] sm:$0xff] %v3788_v23  ;;  %2599 = vmatmul.msk.f32.gmra.mxu3 %vm316_vm0, %v3755_v63  ;;  %v1183_v5 = vpop.f32.mrf.mxu0  ;;  %v3817_v43 = vsel %vm821_vm1, %v892_v38, %v893_v56 }
 0x127   : > { %v704_v30 = vpop.f32.mrf.mxu2 }
 0x128   : > { %v782_v12 = vadd.f32 %v704_v30, %v577_v28 }
 0x129   : > { %v579_v24 = vpop.f32.mrf.mxu1  ;;  %v1019_v0 = vpop.f32.mrf.mxu3  ;;  %2639 = vmatmul.msk.f32.gmra.mxu0 %vm316_vm0, %v3798_v34 }
 0x12a   : > { %v1097_v36 = vadd.f32 %v1019_v0, %v782_v12  ;;  %v580_v9 = vadd.f32 %v579_v24, %v3453_v17  ;;  %v289_v12 = vld [vmem:[%s2988_s10 + $0x160] sm:$0x3] }
 0x12c   : > { %v3807_v2 = vadd.f32 %v1183_v5, %v1097_v36  ;;  %2520 = vmatmul.msk.f32.gmra.mxu1 %vm316_vm0, %v3003_v11  ;;  %2560 = vmatmul.msk.f32.gmra.mxu2 %vm316_vm0, %v3173_v57 }
 0x12e   : > { %4560 = vst [vmem:[#allocation31_spill] sm:$0xff] %v3807_v2  ;;  %2600 = vmatmul.msk.f32.gmra.mxu3 %vm316_vm0, %v3774_v42  ;;  %v1186_v28 = vpop.f32.mrf.mxu0  ;;  %v895_v2 = vrot.slane %v289_v12, 1 }
 0x12f   : > { %v707_v30 = vpop.f32.mrf.mxu2 }
 0x130   : > { %v783_v0 = vadd.f32 %v707_v30, %v580_v9  ;;  %v3832_v38 = vsel %vm821_vm1, %v893_v56, %v895_v2  ;;  %v1449_v9 = vrot.slane %v3255_v14, 2 }
 0x131   : > { %v582_v5 = vpop.f32.mrf.mxu1  ;;  %v1022_v36 = vpop.f32.mrf.mxu3  ;;  %2640 = vmatmul.msk.f32.gmra.mxu0 %vm316_vm0, %v3817_v43 }
 0x132   : > { %v1098_v11 = vadd.f32 %v1022_v36, %v783_v0  ;;  %v583_v17 = vadd.f32 %v582_v5, %v3477_v21  ;;  %v897_v5 = vrot.slane %v3173_v57, 1  ;;  %v898_v36 = vrot.slane %v3205_v1, 1 }
 0x134   : > { %v3822_v23 = vadd.f32 %v1186_v28, %v1098_v11  ;;  %2521 = vmatmul.msk.f32.gmra.mxu1 %vm316_vm0, %v3056_v26  ;;  %2561 = vmatmul.msk.f32.gmra.mxu2 %vm316_vm0, %v3205_v1  ;;  %v4530_v28 = vrot.slane %v3258_v15, 2 }
 0x136   : > { %2601 = vmatmul.msk.f32.gmra.mxu3 %vm316_vm0, %v3798_v34  ;;  %v1189_v24 = vpop.f32.mrf.mxu0  ;;  %v3843_v14 = vsel %vm1448_vm2, %v1449_v9, %v4530_v28  ;;  %v292_v9 = vld [vmem:[%s2988_s10 + $0x178] sm:$0x3] }
 0x137   : > { %v710_v30 = vpop.f32.mrf.mxu2 }
 0x138   : > { %v784_v12 = vadd.f32 %v710_v30, %v583_v17  ;;  %v3855_v17 = vsel %vm821_vm1, %v897_v5, %v898_v36 }
 0x139   : > { %v585_v0 = vpop.f32.mrf.mxu1  ;;  %v1025_v26 = vpop.f32.mrf.mxu3  ;;  %2641 = vmatmul.msk.f32.gmra.mxu0 %vm316_vm0, %v3832_v38 }
 0x13a   : > { %v1099_v21 = vadd.f32 %v1025_v26, %v784_v12  ;;  %v586_v2 = vadd.f32 %v585_v0, %v3497_v35 }
 0x13c   : > { %v3845_v56 = vadd.f32 %v1189_v24, %v1099_v21  ;;  %2522 = vmatmul.msk.f32.gmra.mxu1 %vm316_vm0, %v3109_v41  ;;  %2562 = vmatmul.msk.f32.gmra.mxu2 %vm316_vm0, %v3228_v6  ;;  %v900_v21 = vrot.slane %v292_v9, 1 }
 0x13e   : > { %2602 = vmatmul.msk.f32.gmra.mxu3 %vm316_vm0, %v3817_v43  ;;  %v1192_v11 = vpop.f32.mrf.mxu0  ;;  %v3870_v5 = vsel %vm821_vm1, %v898_v36, %v900_v21 }
 0x13f   : > { %v713_v30 = vpop.f32.mrf.mxu2 }
 0x140   : > { %v785_v12 = vadd.f32 %v713_v30, %v586_v2 }
 0x141   : > { %v588_v24 = vpop.f32.mrf.mxu1  ;;  %v1028_v26 = vpop.f32.mrf.mxu3  ;;  %2642 = vmatmul.msk.f32.gmra.mxu0 %vm316_vm0, %v3855_v17 }
 0x142   : > { %v1100_v41 = vadd.f32 %v1028_v26, %v785_v12  ;;  %v589_v35 = vadd.f32 %v588_v24, %v3530_v32  ;;  %v3873_v12 = vld [vmem:[%s2988_s10 + $0x198] sm:$0xff]  ;;  %v1122_v32 = vrot.slane %v3248_v13, 1 }
 0x144   : > { %v3860_v28 = vadd.f32 %v1192_v11, %v1100_v41  ;;  %2523 = vmatmul.msk.f32.gmra.mxu1 %vm316_vm0, %v3141_v49  ;;  %2563 = vmatmul.msk.f32.gmra.mxu2 %vm316_vm0, %v3248_v13  ;;  %v1121_v49 = vrot.slane %v3228_v6, 1  ;;  %v295_v13 = vld [vmem:[%s2988_s10 + $0x190] sm:$0x3] }
 0x146   : > { %4561 = vst [vmem:[#allocation32_spill] sm:$0xff] %v3860_v28  ;;  %2603 = vmatmul.msk.f32.gmra.mxu3 %vm316_vm0, %v3832_v38  ;;  %v1195_v0 = vpop.f32.mrf.mxu0  ;;  %v3889_v21 = vsel %vm821_vm1, %v1121_v49, %v1122_v32 }
 0x147   : > { %v716_v2 = vpop.f32.mrf.mxu2 }
 0x148   : > { %v786_v30 = vadd.f32 %v716_v2, %v589_v35 }
 0x149   : > { %v591_v11 = vpop.f32.mrf.mxu1  ;;  %v1031_v9 = vpop.f32.mrf.mxu3  ;;  %2643 = vmatmul.msk.f32.gmra.mxu0 %vm316_vm0, %v3870_v5 }
 0x14a   : > { %v1101_v24 = vadd.f32 %v1031_v9, %v786_v30  ;;  %v592_v36 = vadd.f32 %v591_v11, %v3553_v47  ;;  %v1124_v30 = vrot.slane %v295_v13, 1 }
 0x14c   : > { %v3879_v26 = vadd.f32 %v1195_v0, %v1101_v24  ;;  %2524 = vmatmul.msk.f32.gmra.mxu1 %vm316_vm0, %v3173_v57  ;;  %2564 = vmatmul.msk.f32.gmra.mxu2 %vm316_vm0, %v3873_v12  ;;  %v3893_v57 = vld [vmem:[%s2988_s10 + $0x1a0] sm:$0xff]  ;;  %v3907_v24 = vsel %vm821_vm1, %v1122_v32, %v1124_v30  ;;  %v1452_v30 = vrot.slane %v3277_v25, 2 }
 0x14e   : > { %4562 = vst [vmem:[#allocation33_spill] sm:$0xff] %v3879_v26  ;;  %2604 = vmatmul.msk.f32.gmra.mxu3 %vm316_vm0, %v3855_v17  ;;  %v1198_v41 = vpop.f32.mrf.mxu0 }
 0x14f   : > { %v719_v6 = vpop.f32.mrf.mxu2 }
 0x150   : > { %v787_v35 = vadd.f32 %v719_v6, %v592_v36  ;;  %v2859_v36 = vld [vmem:[%s2988_s10 + $0x18] sm:$0xff] }
 0x151   : > { %v594_v0 = vpop.f32.mrf.mxu1  ;;  %v1034_v2 = vpop.f32.mrf.mxu3  ;;  %2644 = vmatmul.msk.f32.gmra.mxu0 %vm316_vm0, %v3889_v21  ;;  %v1454_v6 = vrot.slane %v2859_v36, 2 }
 0x152   : > { %v1102_v47 = vadd.f32 %v1034_v2, %v787_v35  ;;  %v595_v9 = vadd.f32 %v594_v0, %v3577_v46  ;;  %v1460_v0 = vrot.slane %v3151_v51, 2 }
 0x154   : > { %v3897_v11 = vadd.f32 %v1198_v41, %v1102_v47  ;;  %2525 = vmatmul.msk.f32.gmra.mxu1 %vm316_vm0, %v3205_v1  ;;  %2565 = vmatmul.msk.f32.gmra.mxu2 %vm316_vm0, %v3893_v57  ;;  %v2860_v41 = vld [vmem:[%s2988_s10 + $0x20] sm:$0xff] }
 0x155   : > { %v1455_v13 = vrot.slane %v2860_v41, 2 }
 0x156   : > { %4563 = vst [vmem:[#allocation34_spill] sm:$0xff] %v3897_v11  ;;  %2605 = vmatmul.msk.f32.gmra.mxu3 %vm316_vm0, %v3870_v5  ;;  %v1201_v49 = vpop.f32.mrf.mxu0  ;;  %v2861_v11 = vld [vmem:[%s2988_s10 + $0x30] sm:$0xff] }
 0x157   : > { %v722_v35 = vpop.f32.mrf.mxu2  ;;  %v1459_v46 = vrot.slane %v2861_v11, 2  ;;  %v1456_v28 = vsel %vm1448_vm2, %v1454_v6, %v1455_v13  ;;  %v1457_v6 = vrot.slane %v3292_v33, 2 }
 0x158   : > { %v788_v2 = vadd.f32 %v722_v35, %v595_v9 }
 0x159   : > { %v597_v47 = vpop.f32.mrf.mxu1  ;;  %v1037_v1 = vpop.f32.mrf.mxu3  ;;  %2645 = vmatmul.msk.f32.gmra.mxu0 %vm316_vm0, %v3907_v24  ;;  %v1461_v51 = vsel %vm1448_vm2, %v1459_v46, %v1460_v0 }
 0x15a   : > { %v1103_v26 = vadd.f32 %v1037_v1, %v788_v2  ;;  %v598_v9 = vadd.f32 %v597_v47, %v3422_v31  ;;  %v1462_v31 = vrot.slane %v3318_v45, 2 }
 0x15c   : > { %v3916_v32 = vadd.f32 %v1201_v49, %v1103_v26  ;;  %2654 = vmatmul.msk.f32.vlgmr.msra.gmra.mxu1 %vm316_vm0, %v3315_v44  ;;  %2694 = vmatmul.msk.f32.vlgmr.msra.gmra.mxu2 %vm316_vm0, %v3843_v14  ;;  %v4564_v44 = vrot.slane %v3258_v15, 2  ;;  %v1458_v14 = vsel %vm1448_vm2, %v1455_v13, %v1457_v6  ;;  %v1463_v47 = vsel %vm1448_vm2, %v1460_v0, %v1462_v31 }
 0x15d   : > { %v1467_v31 = vrot.slane %v3351_v58, 2 }
 0x15e   : > { %2734 = vmatmul.msk.f32.vlgmr.msra.gmra.mxu3 %vm316_vm0, %v1456_v28  ;;  %v1204_v11 = vpop.f32.mrf.mxu0  ;;  %v1453_v35 = vsel %vm1448_vm2, %v4564_v44, %v1452_v30 }
 0x15f   : > { %v725_v36 = vpop.f32.mrf.mxu2 }
 0x160   : > { %v789_v26 = vadd.f32 %v725_v36, %v598_v9  ;;  %v2862_v9 = vld [vmem:[%s2988_s10 + $0x48] sm:$0xff]  ;;  %v2863_v36 = vld [vmem:[%s2988_s10 + $0x50] sm:$0xff] }
 0x161   : > { %v600_v49 = vpop.f32.mrf.mxu1  ;;  %v1040_v41 = vpop.f32.mrf.mxu3  ;;  %2774 = vmatmul.msk.f32.vlgmr.msra.gmra.mxu0 %vm316_vm0, %v1461_v51 }
 0x162   : > { %v1104_v25 = vadd.f32 %v1040_v41, %v789_v26  ;;  %v601_v15 = vadd.f32 %v600_v49, %v3451_v52 }
 0x164   : > { %v3933_v2 = vadd.f32 %v1204_v11, %v1104_v25  ;;  %2655 = vmatmul.msk.f32.gmra.mxu1 %vm316_vm0, %v3329_v16  ;;  %2695 = vmatmul.msk.f32.gmra.mxu2 %vm316_vm0, %v1453_v35  ;;  %v1464_v11 = vrot.slane %v2862_v9, 2  ;;  %v1465_v16 = vrot.slane %v2863_v36, 2  ;;  %v2865_v9 = vld [vmem:[%s2988_s10 + $0x68] sm:$0xff] }
 0x166   : > { %2735 = vmatmul.msk.f32.gmra.mxu3 %vm316_vm0, %v1458_v14  ;;  %v1207_v33 = vpop.f32.mrf.mxu0  ;;  %v1466_v26 = vsel %vm1448_vm2, %v1464_v11, %v1465_v16 }
 0x167   : > { %v728_v1 = vpop.f32.mrf.mxu2 }
 0x168   : > { %v790_v46 = vadd.f32 %v728_v1, %v601_v15  ;;  %v1468_v15 = vsel %vm1448_vm2, %v1465_v16, %v1467_v31 }
 0x169   : > { %v603_v45 = vpop.f32.mrf.mxu1  ;;  %v1043_v30 = vpop.f32.mrf.mxu3  ;;  %2775 = vmatmul.msk.f32.gmra.mxu0 %vm316_vm0, %v1463_v47 }
 0x16a   : > { %v1105_v13 = vadd.f32 %v1043_v30, %v790_v46  ;;  %v604_v52 = vadd.f32 %v603_v45, %v3472_v3  ;;  %v2864_v30 = vld [vmem:[%s2988_s10 + $0x60] sm:$0xff] }
 0x16c   : > { %v3944_v6 = vadd.f32 %v1207_v33, %v1105_v13  ;;  %2656 = vmatmul.msk.f32.gmra.mxu1 %vm316_vm0, %v3345_v53  ;;  %2696 = vmatmul.msk.f32.gmra.mxu2 %vm316_vm0, %v1456_v28  ;;  %v1469_v13 = vrot.slane %v2864_v30, 2 }
 0x16e   : > { %2736 = vmatmul.msk.f32.gmra.mxu3 %vm316_vm0, %v1461_v51  ;;  %v1210_v0 = vpop.f32.mrf.mxu0 }
 0x16f   : > { %v731_v49 = vpop.f32.mrf.mxu2 }
 0x170   : > { %v791_v41 = vadd.f32 %v731_v49, %v604_v52 }
 0x171   : > { %v606_v44 = vpop.f32.mrf.mxu1  ;;  %v1046_v35 = vpop.f32.mrf.mxu3  ;;  %2776 = vmatmul.msk.f32.gmra.mxu0 %vm316_vm0, %v1466_v26 }
 0x172   : > { %v1106_v25 = vadd.f32 %v1046_v35, %v791_v41  ;;  %v607_v3 = vadd.f32 %v606_v44, %v3495_v7  ;;  %v4565_v44 = vld [vmem:[#allocation2_spill] sm:$0xff] }
 0x173   : > { %v1472_v35 = vrot.slane %v4565_v44, 2 }
 0x174   : > { %v3954_v53 = vadd.f32 %v1210_v0, %v1106_v25  ;;  %2657 = vmatmul.msk.f32.gmra.mxu1 %vm316_vm0, %v3366_v61  ;;  %2697 = vmatmul.msk.f32.gmra.mxu2 %vm316_vm0, %v1458_v14  ;;  %v1470_v61 = vrot.slane %v2865_v9, 2 }
 0x176   : > { %2737 = vmatmul.msk.f32.gmra.mxu3 %vm316_vm0, %v1463_v47  ;;  %v1213_v28 = vpop.f32.mrf.mxu0  ;;  %v1471_v36 = vsel %vm1448_vm2, %v1469_v13, %v1470_v61  ;;  %v2867_v13 = vld [vmem:[%s2988_s10 + $0x80] sm:$0xff] }
 0x177   : > { %v734_v33 = vpop.f32.mrf.mxu2  ;;  %v1475_v9 = vrot.slane %v2867_v13, 2 }
 0x178   : > { %v792_v1 = vadd.f32 %v734_v33, %v607_v3  ;;  %v1473_v3 = vsel %vm1448_vm2, %v1470_v61, %v1472_v35 }
 0x179   : > { %v609_v46 = vpop.f32.mrf.mxu1  ;;  %v1049_v45 = vpop.f32.mrf.mxu3  ;;  %2777 = vmatmul.msk.f32.gmra.mxu0 %vm316_vm0, %v1468_v15 }
 0x17a   : > { %v1107_v58 = vadd.f32 %v1049_v45, %v792_v1  ;;  %v610_v7 = vadd.f32 %v609_v46, %v3522_v40  ;;  %v4567_v40 = vld [vmem:[#allocation18_spill] sm:$0xff] }
 0x17c   : > { %v3965_v11 = vadd.f32 %v1213_v28, %v1107_v58  ;;  %2658 = vmatmul.msk.f32.gmra.mxu1 %vm316_vm0, %v3382_v19  ;;  %2698 = vmatmul.msk.f32.gmra.mxu2 %vm316_vm0, %v1461_v51  ;;  %v4566_v51 = vld [vmem:[#allocation3_spill] sm:$0xff]  ;;  %v2866_v58 = vld [vmem:[%s2988_s10 + $0x78] sm:$0xff] }
 0x17d   : > { %v1474_v30 = vrot.slane %v2866_v58, 2 }
 0x17e   : > { %2738 = vmatmul.msk.f32.gmra.mxu3 %vm316_vm0, %v1466_v26  ;;  %v1216_v14 = vpop.f32.mrf.mxu0 }
 0x17f   : > { %v737_v16 = vpop.f32.mrf.mxu2 }
 0x180   : > { %v793_v52 = vadd.f32 %v737_v16, %v610_v7 }
 0x181   : > { %v612_v0 = vpop.f32.mrf.mxu1  ;;  %v1052_v49 = vpop.f32.mrf.mxu3  ;;  %2778 = vmatmul.msk.f32.gmra.mxu0 %vm316_vm0, %v1471_v36 }
 0x182   : > { %v1108_v41 = vadd.f32 %v1052_v49, %v793_v52  ;;  %v613_v25 = vadd.f32 %v612_v0, %v4567_v40  ;;  %v1476_v52 = vsel %vm1448_vm2, %v1474_v30, %v1475_v9 }
 0x184   : > { %v3975_v19 = vadd.f32 %v1216_v14, %v1108_v41  ;;  %2659 = vmatmul.msk.f32.gmra.mxu1 %vm316_vm0, %v4566_v51  ;;  %2699 = vmatmul.msk.f32.gmra.mxu2 %vm316_vm0, %v1463_v47  ;;  %v4568_v47 = vld [vmem:[#allocation4_spill] sm:$0xff]  ;;  %v4569_v14 = vld [vmem:[#allocation21_spill] sm:$0xff] }
 0x185   : > { %v4570_v51 = vld [vmem:[#allocation5_spill] sm:$0xff] }
 0x186   : > { %2739 = vmatmul.msk.f32.gmra.mxu3 %vm316_vm0, %v1468_v15  ;;  %v1219_v31 = vpop.f32.mrf.mxu0  ;;  %v1477_v40 = vrot.slane %v4570_v51, 2 }
 0x187   : > { %v740_v28 = vpop.f32.mrf.mxu2 }
 0x188   : > { %v794_v33 = vadd.f32 %v740_v28, %v613_v25 }
 0x189   : > { %v615_v1 = vpop.f32.mrf.mxu1  ;;  %v1055_v46 = vpop.f32.mrf.mxu3  ;;  %2779 = vmatmul.msk.f32.gmra.mxu0 %vm316_vm0, %v1473_v3 }
 0x18a   : > { %v1109_v45 = vadd.f32 %v1055_v46, %v794_v33  ;;  %v616_v61 = vadd.f32 %v615_v1, %v4569_v14  ;;  %v1478_v1 = vsel %vm1448_vm2, %v1475_v9, %v1477_v40 }
 0x18c   : > { %v3986_v7 = vadd.f32 %v1219_v31, %v1109_v45  ;;  %2660 = vmatmul.msk.f32.gmra.mxu1 %vm316_vm0, %v4568_v47  ;;  %2700 = vmatmul.msk.f32.gmra.mxu2 %vm316_vm0, %v1466_v26  ;;  %v4571_v26 = vld [vmem:[#allocation7_spill] sm:$0xff]  ;;  %v4572_v31 = vld [vmem:[#allocation24_spill] sm:$0xff] }
 0x18d   : > { %v2868_v47 = vld [vmem:[%s2988_s10 + $0x90] sm:$0xff] }
 0x18e   : > { %2740 = vmatmul.msk.f32.gmra.mxu3 %vm316_vm0, %v1471_v36  ;;  %v1222_v16 = vpop.f32.mrf.mxu0  ;;  %v1479_v14 = vrot.slane %v2868_v47, 2 }
 0x18f   : > { %v743_v0 = vpop.f32.mrf.mxu2 }
 0x190   : > { %v795_v49 = vadd.f32 %v743_v0, %v616_v61  ;;  %v2869_v61 = vld [vmem:[%s2988_s10 + $0x98] sm:$0xff] }
 0x191   : > { %v618_v41 = vpop.f32.mrf.mxu1  ;;  %v1058_v44 = vpop.f32.mrf.mxu3  ;;  %2780 = vmatmul.msk.f32.gmra.mxu0 %vm316_vm0, %v1476_v52 }
 0x192   : > { %v1110_v35 = vadd.f32 %v1058_v44, %v795_v49  ;;  %v619_v28 = vadd.f32 %v618_v41, %v4572_v31  ;;  %v4574_v49 = vld [vmem:[#allocation6_spill] sm:$0xff] }
 0x194   : > { %v3996_v25 = vadd.f32 %v1222_v16, %v1110_v35  ;;  %2661 = vmatmul.msk.f32.gmra.mxu1 %vm316_vm0, %v4571_v26  ;;  %2701 = vmatmul.msk.f32.gmra.mxu2 %vm316_vm0, %v1468_v15  ;;  %v1480_v16 = vrot.slane %v2869_v61, 2  ;;  %v4573_v15 = vld [vmem:[#allocation9_spill] sm:$0xff] }
 0x196   : > { %2741 = vmatmul.msk.f32.gmra.mxu3 %vm316_vm0, %v1473_v3  ;;  %v1225_v33 = vpop.f32.mrf.mxu0  ;;  %v1481_v44 = vsel %vm1448_vm2, %v1479_v14, %v1480_v16 }
 0x197   : > { %v746_v46 = vpop.f32.mrf.mxu2 }
 0x198   : > { %v796_v45 = vadd.f32 %v746_v46, %v619_v28  ;;  %v4575_v28 = vld [vmem:[#allocation10_spill] sm:$0xff] }
 0x199   : > { %v621_v58 = vpop.f32.mrf.mxu1  ;;  %v1061_v30 = vpop.f32.mrf.mxu3  ;;  %2781 = vmatmul.msk.f32.gmra.mxu0 %vm316_vm0, %v1478_v1 }
 0x19a   : > { %v1111_v13 = vadd.f32 %v1061_v30, %v796_v45  ;;  %v622_v9 = vadd.f32 %v621_v58, %v4574_v49  ;;  %v4577_v45 = vld [vmem:[#allocation8_spill] sm:$0xff] }
 0x19c   : > { %v4007_v0 = vadd.f32 %v1225_v33, %v1111_v13  ;;  %2662 = vmatmul.msk.f32.gmra.mxu1 %vm316_vm0, %v4573_v15  ;;  %2702 = vmatmul.msk.f32.gmra.mxu2 %vm316_vm0, %v1471_v36  ;;  %v1482_v33 = vrot.slane %v4575_v28, 2  ;;  %v4576_v36 = vld [vmem:[#allocation12_spill] sm:$0xff] }
 0x19e   : > { %2742 = vmatmul.msk.f32.gmra.mxu3 %vm316_vm0, %v1476_v52  ;;  %v1228_v41 = vpop.f32.mrf.mxu0  ;;  %v1483_v13 = vsel %vm1448_vm2, %v1480_v16, %v1482_v33 }
 0x19f   : > { %v749_v35 = vpop.f32.mrf.mxu2 }
 0x1a0   : > { %v797_v51 = vadd.f32 %v749_v35, %v622_v9  ;;  %v2870_v9 = vld [vmem:[%s2988_s10 + $0xa8] sm:$0xff]  ;;  %v2871_v35 = vld [vmem:[%s2988_s10 + $0xb0] sm:$0xff] }
 0x1a1   : > { %v624_v40 = vpop.f32.mrf.mxu1  ;;  %v1064_v26 = vpop.f32.mrf.mxu3  ;;  %2782 = vmatmul.msk.f32.gmra.mxu0 %vm316_vm0, %v1481_v44 }
 0x1a2   : > { %v1112_v31 = vadd.f32 %v1064_v26, %v797_v51  ;;  %v625_v58 = vadd.f32 %v624_v40, %v4577_v45  ;;  %v1485_v51 = vrot.slane %v2871_v35, 2  ;;  %v4579_v40 = vld [vmem:[#allocation11_spill] sm:$0xff] }
 0x1a4   : > { %v4017_v46 = vadd.f32 %v1228_v41, %v1112_v31  ;;  %2663 = vmatmul.msk.f32.gmra.mxu1 %vm316_vm0, %v4576_v36  ;;  %2703 = vmatmul.msk.f32.gmra.mxu2 %vm316_vm0, %v1473_v3  ;;  %v1484_v41 = vrot.slane %v2870_v9, 2  ;;  %v4578_v3 = vld [vmem:[#allocation14_spill] sm:$0xff] }
 0x1a6   : > { %2743 = vmatmul.msk.f32.gmra.mxu3 %vm316_vm0, %v1478_v1  ;;  %v1231_v30 = vpop.f32.mrf.mxu0  ;;  %v1486_v28 = vsel %vm1448_vm2, %v1484_v41, %v1485_v51 }
 0x1a7   : > { %v752_v47 = vpop.f32.mrf.mxu2 }
 0x1a8   : > { %v798_v14 = vadd.f32 %v752_v47, %v625_v58  ;;  %v4580_v47 = vld [vmem:[#allocation15_spill] sm:$0xff] }
 0x1a9   : > { %v627_v61 = vpop.f32.mrf.mxu1  ;;  %v1067_v15 = vpop.f32.mrf.mxu3  ;;  %2783 = vmatmul.msk.f32.gmra.mxu0 %vm316_vm0, %v1483_v13 }
 0x1aa   : > { %v1113_v49 = vadd.f32 %v1067_v15, %v798_v14  ;;  %v628_v16 = vadd.f32 %v627_v61, %v4579_v40  ;;  %v1487_v14 = vrot.slane %v4580_v47, 2  ;;  %v4582_v61 = vld [vmem:[#allocation13_spill] sm:$0xff] }
 0x1ac   : > { %v4028_v26 = vadd.f32 %v1231_v30, %v1113_v49  ;;  %2664 = vmatmul.msk.f32.gmra.mxu1 %vm316_vm0, %v4578_v3  ;;  %2704 = vmatmul.msk.f32.gmra.mxu2 %vm316_vm0, %v1476_v52  ;;  %v4581_v52 = vld [vmem:[#allocation17_spill] sm:$0xff]  ;;  %v1488_v41 = vsel %vm1448_vm2, %v1485_v51, %v1487_v14 }
 0x1ae   : > { %2744 = vmatmul.msk.f32.gmra.mxu3 %vm316_vm0, %v1481_v44  ;;  %v1234_v31 = vpop.f32.mrf.mxu0 }
 0x1af   : > { %v755_v33 = vpop.f32.mrf.mxu2 }
 0x1b0   : > { %v799_v36 = vadd.f32 %v755_v33, %v628_v16  ;;  %v2872_v33 = vld [vmem:[%s2988_s10 + $0xc0] sm:$0xff] }
 0x1b1   : > { %v630_v45 = vpop.f32.mrf.mxu1  ;;  %v1070_v58 = vpop.f32.mrf.mxu3  ;;  %2784 = vmatmul.msk.f32.gmra.mxu0 %vm316_vm0, %v1486_v28 }
 0x1b2   : > { %v1114_v30 = vadd.f32 %v1070_v58, %v799_v36  ;;  %v631_v49 = vadd.f32 %v630_v45, %v4582_v61  ;;  %v1489_v36 = vrot.slane %v2872_v33, 2  ;;  %v2873_v58 = vld [vmem:[%s2988_s10 + $0xc8] sm:$0xff]  ;;  %v4584_v45 = vld [vmem:[#allocation16_spill] sm:$0xff] }
 0x1b4   : > { %v4038_v15 = vadd.f32 %v1234_v31, %v1114_v30  ;;  %2665 = vmatmul.msk.f32.gmra.mxu1 %vm316_vm0, %v4581_v52  ;;  %2705 = vmatmul.msk.f32.gmra.mxu2 %vm316_vm0, %v1478_v1  ;;  %v1490_v30 = vrot.slane %v2873_v58, 2  ;;  %v4583_v1 = vld [vmem:[#allocation20_spill] sm:$0xff] }
 0x1b6   : > { %2745 = vmatmul.msk.f32.gmra.mxu3 %vm316_vm0, %v1483_v13  ;;  %v1237_v9 = vpop.f32.mrf.mxu0  ;;  %v1491_v52 = vsel %vm1448_vm2, %v1489_v36, %v1490_v30 }
 0x1b7   : > { %v758_v35 = vpop.f32.mrf.mxu2 }
 0x1b8   : > { %v800_v3 = vadd.f32 %v758_v35, %v631_v49 }
 0x1b9   : > { %v633_v40 = vpop.f32.mrf.mxu1  ;;  %v1073_v16 = vpop.f32.mrf.mxu3  ;;  %2785 = vmatmul.msk.f32.gmra.mxu0 %vm316_vm0, %v1488_v41 }
 0x1ba   : > { %v1115_v31 = vadd.f32 %v1073_v16, %v800_v3  ;;  %v634_v51 = vadd.f32 %v633_v40, %v4584_v45  ;;  %v4585_v16 = vld [vmem:[#allocation22_spill] sm:$0xff] }
 0x1bc   : > { %v4049_v47 = vadd.f32 %v1237_v9, %v1115_v31  ;;  %2666 = vmatmul.msk.f32.gmra.mxu1 %vm316_vm0, %v4583_v1  ;;  %2706 = vmatmul.msk.f32.gmra.mxu2 %vm316_vm0, %v1481_v44  ;;  %v1492_v31 = vrot.slane %v4585_v16, 2  ;;  %v4586_v44 = vld [vmem:[#allocation19_spill] sm:$0xff] }
 0x1be   : > { %2746 = vmatmul.msk.f32.gmra.mxu3 %vm316_vm0, %v1486_v28  ;;  %v1240_v14 = vpop.f32.mrf.mxu0  ;;  %v1493_v58 = vsel %vm1448_vm2, %v1490_v30, %v1492_v31 }
 0x1bf   : > { %v761_v61 = vpop.f32.mrf.mxu2 }
 0x1c0   : > { %v801_v49 = vadd.f32 %v761_v61, %v634_v51 }
 0x1c1   : > { %v636_v35 = vpop.f32.mrf.mxu1  ;;  %v1076_v3 = vpop.f32.mrf.mxu3  ;;  %2786 = vmatmul.msk.f32.gmra.mxu0 %vm316_vm0, %v1491_v52 }
 0x1c2   : > { %v1116_v9 = vadd.f32 %v1076_v3, %v801_v49  ;;  %v637_v40 = vadd.f32 %v636_v35, %v4586_v44  ;;  %v2874_v49 = vld [vmem:[%s2988_s10 + $0xd8] sm:$0xff] }
 0x1c3   : > { %v1494_v3 = vrot.slane %v2874_v49, 2 }
 0x1c4   : > { %v4059_v33 = vadd.f32 %v1240_v14, %v1116_v9  ;;  %2667 = vmatmul.msk.f32.gmra.mxu1 %vm316_vm0, %v3593_v8  ;;  %2707 = vmatmul.msk.f32.gmra.mxu2 %vm316_vm0, %v1483_v13  ;;  %v2875_v9 = vld [vmem:[%s2988_s10 + $0xe0] sm:$0xff]  ;;  %v4587_v13 = vld [vmem:[#allocation23_spill] sm:$0xff] }
 0x1c5   : > { %v1495_v8 = vrot.slane %v2875_v9, 2 }
 0x1c6   : > { %2747 = vmatmul.msk.f32.gmra.mxu3 %vm316_vm0, %v1488_v41  ;;  %v1243_v36 = vpop.f32.mrf.mxu0 }
 0x1c7   : > { %v764_v1 = vpop.f32.mrf.mxu2  ;;  %v4078_v31 = vsel %vm1448_vm2, %v1494_v3, %v1495_v8 }
 0x1c8   : > { %v802_v45 = vadd.f32 %v764_v1, %v637_v40 }
 0x1c9   : > { %v639_v51 = vpop.f32.mrf.mxu1  ;;  %v1079_v61 = vpop.f32.mrf.mxu3  ;;  %2787 = vmatmul.msk.f32.gmra.mxu0 %vm316_vm0, %v1493_v58 }
 0x1ca   : > { %v1117_v14 = vadd.f32 %v1079_v61, %v802_v45  ;;  %v640_v30 = vadd.f32 %v639_v51, %v4587_v13  ;;  %v4588_v51 = vld [vmem:[#allocation25_spill] sm:$0xff] }
 0x1cc   : > { %v4070_v16 = vadd.f32 %v1243_v36, %v1117_v14  ;;  %2668 = vmatmul.msk.f32.gmra.mxu1 %vm316_vm0, %v3614_v18  ;;  %2708 = vmatmul.msk.f32.gmra.mxu2 %vm316_vm0, %v1486_v28  ;;  %v1497_v18 = vrot.slane %v3620_v27, 2 }
 0x1ce   : > { %2748 = vmatmul.msk.f32.gmra.mxu3 %vm316_vm0, %v1491_v52  ;;  %v1246_v35 = vpop.f32.mrf.mxu0  ;;  %v4091_v49 = vsel %vm1448_vm2, %v1495_v8, %v1497_v18 }
 0x1cf   : > { %v767_v44 = vpop.f32.mrf.mxu2 }
 0x1d0   : > { %v803_v40 = vadd.f32 %v767_v44, %v640_v30 }
 0x1d1   : > { %v642_v1 = vpop.f32.mrf.mxu1  ;;  %v1082_v45 = vpop.f32.mrf.mxu3  ;;  %2788 = vmatmul.msk.f32.gmra.mxu0 %vm316_vm0, %v4078_v31 }
 0x1d2   : > { %v1118_v36 = vadd.f32 %v1082_v45, %v803_v40  ;;  %v643_v61 = vadd.f32 %v642_v1, %v4588_v51 }
 0x1d4   : > { %v4083_v28 = vadd.f32 %v1246_v35, %v1118_v36  ;;  %2669 = vmatmul.msk.f32.gmra.mxu1 %vm316_vm0, %v3638_v4  ;;  %2709 = vmatmul.msk.f32.gmra.mxu2 %vm316_vm0, %v1488_v41  ;;  %v2876_v35 = vld [vmem:[%s2988_s10 + $0xf0] sm:$0xff]  ;;  %v2877_v41 = vld [vmem:[%s2988_s10 + $0xf8] sm:$0xff] }
 0x1d5   : > { %v1499_v4 = vrot.slane %v2876_v35, 2  ;;  %v1500_v44 = vrot.slane %v2877_v41, 2  ;;  %v2878_v41 = vld [vmem:[%s2988_s10 + $0x108] sm:$0xff] }
 0x1d6   : > { %2749 = vmatmul.msk.f32.gmra.mxu3 %vm316_vm0, %v1493_v58  ;;  %v1249_v14 = vpop.f32.mrf.mxu0 }
 0x1d7   : > { %v770_v3 = vpop.f32.mrf.mxu2  ;;  %v4106_v45 = vsel %vm1448_vm2, %v1499_v4, %v1500_v44 }
 0x1d8   : > { %v804_v9 = vadd.f32 %v770_v3, %v643_v61  ;;  %v4589_v3 = vld [vmem:[#allocation26_spill] sm:$0xff] }
 0x1d9   : > { %v1085_v13 = vpop.f32.mrf.mxu3  ;;  %v1320_v27 = vpop.f32.mrf.mxu1  ;;  %2789 = vmatmul.msk.f32.gmra.mxu0 %vm316_vm0, %v4091_v49 }
 0x1da   : > { %v1119_v30 = vadd.f32 %v1085_v13, %v804_v9  ;;  %v1416_v8 = vadd.f32 %v1320_v27, %v3628_v20  ;;  %v4114_v20 = vld [vmem:[%s4514_s2] ss:$0 sm:$0xff] }
 0x1dc   : > { %v4097_v40 = vadd.f32 %v1249_v14, %v1119_v30  ;;  %2670 = vmatmul.msk.f32.gmra.mxu1 %vm316_vm0, %v3657_v59  ;;  %2710 = vmatmul.msk.f32.gmra.mxu2 %vm316_vm0, %v1491_v52  ;;  %v1502_v59 = vrot.slane %v3660_v10, 2 }
 0x1de   : > { %2750 = vmatmul.msk.f32.gmra.mxu3 %vm316_vm0, %v4078_v31  ;;  %v1945_v1 = vpop.f32.mrf.mxu0  ;;  %v4130_v27 = vsel %vm1448_vm2, %v1500_v44, %v1502_v59 }
 0x1df   : > { %v1619_v36 = vpop.f32.mrf.mxu2 }
 0x1e0   : > { %v1715_v18 = vadd.f32 %v1619_v36, %v1416_v8  ;;  %v1504_v8 = vrot.slane %v2878_v41, 2 }
 0x1e1   : > { %v1323_v51 = vpop.f32.mrf.mxu1  ;;  %v1782_v61 = vpop.f32.mrf.mxu3  ;;  %2790 = vmatmul.msk.f32.gmra.mxu0 %vm316_vm0, %v4106_v45 }
 0x1e2   : > { %v1878_v14 = vadd.f32 %v1782_v61, %v1715_v18  ;;  %v1417_v9 = vadd.f32 %v1323_v51, %v4589_v3 }
 0x1e4   : > { %v2041_v52 = vadd.f32 %v1945_v1, %v1878_v14  ;;  %2671 = vmatmul.msk.f32.gmra.mxu1 %vm316_vm0, %v3675_v22  ;;  %2711 = vmatmul.msk.f32.gmra.mxu2 %vm316_vm0, %v1493_v58  ;;  %v2879_v1 = vld [vmem:[%s2988_s10 + $0x110] sm:$0xff] }
 0x1e5   : > { %v1505_v36 = vrot.slane %v2879_v1, 2 }
 0x1e6   : > { %v2077_v13 = vadd.f32 %v4114_v20, %v2041_v52  ;;  %2751 = vmatmul.msk.f32.gmra.mxu3 %vm316_vm0, %v4091_v49  ;;  %v1948_v10 = vpop.f32.mrf.mxu0 }
 0x1e7   : > { %v1622_v22 = vpop.f32.mrf.mxu2  ;;  %v4147_v59 = vsel %vm1448_vm2, %v1504_v8, %v1505_v36  ;;  %v4590_v8 = vld [vmem:[#allocation27_spill] sm:$0xff] }
 0x1e8   : > { %2283 = vst.msk [vmem:[%s4123_s24] sm:$0xff] %vm316_vm0, %v2077_v13  ;;  %v1716_v58 = vadd.f32 %v1622_v22, %v1417_v9  ;;  %v2178_v44 = vmul.f32 %v2077_v13, %v2077_v13  ;;  %v2109_v3 = vsel %vm316_vm0, %v2077_v13, 0.0  ;;  %v1507_v13 = vrot.slane %v3700_v55, 2 }
 0x1e9   : > { %v1326_v30 = vpop.f32.mrf.mxu1  ;;  %v1785_v35 = vpop.f32.mrf.mxu3  ;;  %2791 = vmatmul.msk.f32.gmra.mxu0 %vm316_vm0, %v4130_v27 }
 0x1ea   : > { %v1879_v4 = vadd.f32 %v1785_v35, %v1716_v58  ;;  %v1418_v51 = vadd.f32 %v1326_v30, %v3665_v60  ;;  %v2210_v58 = vsel %vm316_vm0, %v2178_v44, 0.0  ;;  %v4167_v55 = vsel %vm1448_vm2, %v1505_v36, %v1507_v13 }
 0x1ec   : > { %v2042_v18 = vadd.f32 %v1948_v10, %v1879_v4  ;;  %2672 = vmatmul.msk.f32.gmra.mxu1 %vm316_vm0, %v3694_v37  ;;  %2712 = vmatmul.msk.f32.gmra.mxu2 %vm316_vm0, %v4078_v31 }
 0x1ee   : > { %v2078_v61 = vadd.f32 %v4114_v20, %v2042_v18  ;;  %2752 = vmatmul.msk.f32.gmra.mxu3 %vm316_vm0, %v4106_v45  ;;  %v1951_v14 = vpop.f32.mrf.mxu0 }
 0x1ef   : > { %v1625_v52 = vpop.f32.mrf.mxu2 }
 0x1f0   : > { %v2110_v37 = vsel %vm316_vm0, %v2078_v61, 0.0  ;;  %v2179_v9 = vmul.f32 %v2078_v61, %v2078_v61  ;;  %2284 = vst.msk [vmem:[%s4123_s24 + $0x8] sm:$0xff] %vm316_vm0, %v2078_v61  ;;  %v1717_v31 = vadd.f32 %v1625_v52, %v1418_v51 }
 0x1f1   : > { %v2111_v10 = vadd.f32 %v2110_v37, %v2109_v3  ;;  %v1329_v60 = vpop.f32.mrf.mxu1  ;;  %v1788_v22 = vpop.f32.mrf.mxu3  ;;  %2792 = vmatmul.msk.f32.gmra.mxu0 %vm316_vm0, %v4147_v59 }
 0x1f2   : > { %v2211_v30 = vsel %vm316_vm0, %v2179_v9, 0.0  ;;  %v1880_v35 = vadd.f32 %v1788_v22, %v1717_v31  ;;  %v1419_v1 = vadd.f32 %v1329_v60, %v4590_v8  ;;  %v2880_v31 = vld [vmem:[%s2988_s10 + $0x120] sm:$0xff]  ;;  %v2881_v60 = vld [vmem:[%s2988_s10 + $0x128] sm:$0xff] }
 0x1f3   : > { %v2212_v4 = vadd.f32 %v2211_v30, %v2210_v58  ;;  %v1509_v36 = vrot.slane %v2880_v31, 2  ;;  %v1510_v22 = vrot.slane %v2881_v60, 2 }
 0x1f4   : > { %v2043_v41 = vadd.f32 %v1951_v14, %v1880_v35  ;;  %2673 = vmatmul.msk.f32.gmra.mxu1 %vm316_vm0, %v3718_v54  ;;  %2713 = vmatmul.msk.f32.gmra.mxu2 %vm316_vm0, %v4091_v49 }
 0x1f6   : > { %v2079_v18 = vadd.f32 %v4114_v20, %v2043_v41  ;;  %2753 = vmatmul.msk.f32.gmra.mxu3 %vm316_vm0, %v4130_v27  ;;  %v1954_v44 = vpop.f32.mrf.mxu0  ;;  %v4186_v41 = vsel %vm1448_vm2, %v1509_v36, %v1510_v22 }
 0x1f7   : > { %v1628_v51 = vpop.f32.mrf.mxu2 }
 0x1f8   : > { %v2112_v61 = vsel %vm316_vm0, %v2079_v18, 0.0  ;;  %v2180_v54 = vmul.f32 %v2079_v18, %v2079_v18  ;;  %2285 = vst.msk [vmem:[%s4123_s24 + $0x10] sm:$0xff] %vm316_vm0, %v2079_v18  ;;  %v1718_v49 = vadd.f32 %v1628_v51, %v1419_v1 }
 0x1f9   : > { %v2113_v14 = vadd.f32 %v2112_v61, %v2111_v10  ;;  %v1332_v52 = vpop.f32.mrf.mxu1  ;;  %v1791_v3 = vpop.f32.mrf.mxu3  ;;  %2793 = vmatmul.msk.f32.gmra.mxu0 %vm316_vm0, %v4167_v55  ;;  %v1512_v61 = vrot.slane %v3740_v48, 2 }
 0x1fa   : > { %v2213_v37 = vsel %vm316_vm0, %v2180_v54, 0.0  ;;  %v1881_v9 = vadd.f32 %v1791_v3, %v1718_v49  ;;  %v1420_v10 = vadd.f32 %v1332_v52, %v3708_v62 }
 0x1fb   : > { %v2214_v58 = vadd.f32 %v2213_v37, %v2212_v4  ;;  %v4204_v48 = vsel %vm1448_vm2, %v1510_v22, %v1512_v61 }
 0x1fc   : > { %v2044_v30 = vadd.f32 %v1954_v44, %v1881_v9  ;;  %2674 = vmatmul.msk.f32.gmra.mxu1 %vm316_vm0, %v3737_v29  ;;  %2714 = vmatmul.msk.f32.gmra.mxu2 %vm316_vm0, %v4106_v45 }
 0x1fe   : > { %v2080_v35 = vadd.f32 %v4114_v20, %v2044_v30  ;;  %2754 = vmatmul.msk.f32.gmra.mxu3 %vm316_vm0, %v4147_v59  ;;  %v1957_v13 = vpop.f32.mrf.mxu0 }
 0x1ff   : > { %v1631_v8 = vpop.f32.mrf.mxu2 }
 0x200   : > { %v2114_v4 = vsel %vm316_vm0, %v2080_v35, 0.0  ;;  %v2181_v1 = vmul.f32 %v2080_v35, %v2080_v35  ;;  %2286 = vst.msk [vmem:[%s4123_s24 + $0x18] sm:$0xff] %vm316_vm0, %v2080_v35  ;;  %v1719_v29 = vadd.f32 %v1631_v8, %v1420_v10  ;;  %v2882_v35 = vld [vmem:[%s2988_s10 + $0x138] sm:$0xff] }
 0x201   : > { %v2115_v18 = vadd.f32 %v2114_v4, %v2113_v14  ;;  %v1335_v45 = vpop.f32.mrf.mxu1  ;;  %v1794_v44 = vpop.f32.mrf.mxu3  ;;  %2794 = vmatmul.msk.f32.gmra.mxu0 %vm316_vm0, %v4186_v41  ;;  %v4591_v14 = vld [vmem:[#allocation28_spill] sm:$0xff]  ;;  %v1514_v22 = vrot.slane %v2882_v35, 2 }
 0x202   : > { %v2215_v62 = vsel %vm316_vm0, %v2181_v1, 0.0  ;;  %v1882_v51 = vadd.f32 %v1794_v44, %v1719_v29  ;;  %v1421_v52 = vadd.f32 %v1335_v45, %v4591_v14 }
 0x203   : > { %v2216_v54 = vadd.f32 %v2215_v62, %v2214_v58 }
 0x204   : > { %v2045_v49 = vadd.f32 %v1957_v13, %v1882_v51  ;;  %2675 = vmatmul.msk.f32.gmra.mxu1 %vm316_vm0, %v3755_v63  ;;  %2715 = vmatmul.msk.f32.gmra.mxu2 %vm316_vm0, %v4130_v27  ;;  %v2883_v13 = vld [vmem:[%s2988_s10 + $0x140] sm:$0xff] }
 0x205   : > { %v1515_v8 = vrot.slane %v2883_v13, 2  ;;  %v2884_v13 = vld [vmem:[%s2988_s10 + $0x150] sm:$0xff] }
 0x206   : > { %v2081_v3 = vadd.f32 %v4114_v20, %v2045_v49  ;;  %2755 = vmatmul.msk.f32.gmra.mxu3 %vm316_vm0, %v4167_v55  ;;  %v1960_v37 = vpop.f32.mrf.mxu0 }
 0x207   : > { %v1634_v9 = vpop.f32.mrf.mxu2  ;;  %v4223_v44 = vsel %vm1448_vm2, %v1514_v22, %v1515_v8 }
 0x208   : > { %v2116_v31 = vsel %vm316_vm0, %v2081_v3, 0.0  ;;  %v2182_v63 = vmul.f32 %v2081_v3, %v2081_v3  ;;  %2287 = vst.msk [vmem:[%s4123_s24 + $0x20] sm:$0xff] %vm316_vm0, %v2081_v3  ;;  %v1720_v27 = vadd.f32 %v1634_v9, %v1421_v52  ;;  %v1517_v52 = vrot.slane %v3780_v39, 2  ;;  %v4592_v9 = vld [vmem:[#allocation29_spill] sm:$0xff] }
 0x209   : > { %v2117_v36 = vadd.f32 %v2116_v31, %v2115_v18  ;;  %v1338_v60 = vpop.f32.mrf.mxu1  ;;  %v1797_v58 = vpop.f32.mrf.mxu3  ;;  %2795 = vmatmul.msk.f32.gmra.mxu0 %vm316_vm0, %v4204_v48 }
 0x20a   : > { %v2217_v30 = vsel %vm316_vm0, %v2182_v63, 0.0  ;;  %v1883_v10 = vadd.f32 %v1797_v58, %v1720_v27  ;;  %v1422_v29 = vadd.f32 %v1338_v60, %v3745_v50  ;;  %v4241_v39 = vsel %vm1448_vm2, %v1515_v8, %v1517_v52 }
 0x20b   : > { %v2218_v4 = vadd.f32 %v2217_v30, %v2216_v54  ;;  %v1519_v8 = vrot.slane %v2884_v13, 2 }
 0x20c   : > { %v2046_v1 = vadd.f32 %v1960_v37, %v1883_v10  ;;  %2676 = vmatmul.msk.f32.gmra.mxu1 %vm316_vm0, %v3774_v42  ;;  %2716 = vmatmul.msk.f32.gmra.mxu2 %vm316_vm0, %v4147_v59 }
 0x20e   : > { %v2082_v18 = vadd.f32 %v4114_v20, %v2046_v1  ;;  %2756 = vmatmul.msk.f32.gmra.mxu3 %vm316_vm0, %v4186_v41  ;;  %v1963_v45 = vpop.f32.mrf.mxu0 }
 0x20f   : > { %v1637_v62 = vpop.f32.mrf.mxu2 }
 0x210   : > { %v2118_v51 = vsel %vm316_vm0, %v2082_v18, 0.0  ;;  %v2183_v61 = vmul.f32 %v2082_v18, %v2082_v18  ;;  %2288 = vst.msk [vmem:[%s4123_s24 + $0x28] sm:$0xff] %vm316_vm0, %v2082_v18  ;;  %v1721_v42 = vadd.f32 %v1637_v62, %v1422_v29 }
 0x211   : > { %v2119_v54 = vadd.f32 %v2118_v51, %v2117_v36  ;;  %v1341_v59 = vpop.f32.mrf.mxu1  ;;  %v1800_v49 = vpop.f32.mrf.mxu3  ;;  %2796 = vmatmul.msk.f32.gmra.mxu0 %vm316_vm0, %v4223_v44 }
 0x212   : > { %v2219_v50 = vsel %vm316_vm0, %v2183_v61, 0.0  ;;  %v1884_v14 = vadd.f32 %v1800_v49, %v1721_v42  ;;  %v1423_v31 = vadd.f32 %v1341_v59, %v4592_v9 }
 0x213   : > { %v2220_v3 = vadd.f32 %v2219_v50, %v2218_v4  ;;  %v2885_v4 = vld [vmem:[%s2988_s10 + $0x158] sm:$0xff] }
 0x214   : > { %v2047_v37 = vadd.f32 %v1963_v45, %v1884_v14  ;;  %2677 = vmatmul.msk.f32.gmra.mxu1 %vm316_vm0, %v3798_v34  ;;  %2717 = vmatmul.msk.f32.gmra.mxu2 %vm316_vm0, %v4167_v55  ;;  %v1520_v1 = vrot.slane %v2885_v4, 2  ;;  %v4593_v45 = vld [vmem:[#allocation30_spill] sm:$0xff] }
 0x216   : > { %v2083_v63 = vadd.f32 %v4114_v20, %v2047_v37  ;;  %2757 = vmatmul.msk.f32.gmra.mxu3 %vm316_vm0, %v4204_v48  ;;  %v1966_v27 = vpop.f32.mrf.mxu0  ;;  %v4260_v42 = vsel %vm1448_vm2, %v1519_v8, %v1520_v1  ;;  %v2886_v37 = vld [vmem:[%s2988_s10 + $0x160] sm:$0x3] }
 0x217   : > { %v1640_v36 = vpop.f32.mrf.mxu2  ;;  %v1522_v9 = vrot.slane %v2886_v37, 2 }
 0x218   : > { %v2120_v60 = vsel %vm316_vm0, %v2083_v63, 0.0  ;;  %v2184_v34 = vmul.f32 %v2083_v63, %v2083_v63  ;;  %2289 = vst.msk [vmem:[%s4123_s24 + $0x30] sm:$0xff] %vm316_vm0, %v2083_v63  ;;  %v1722_v55 = vadd.f32 %v1640_v36, %v1423_v31 }
 0x219   : > { %v2121_v58 = vadd.f32 %v2120_v60, %v2119_v54  ;;  %v1344_v30 = vpop.f32.mrf.mxu1  ;;  %v1803_v10 = vpop.f32.mrf.mxu3  ;;  %2797 = vmatmul.msk.f32.gmra.mxu0 %vm316_vm0, %v4241_v39 }
 0x21a   : > { %v2221_v35 = vsel %vm316_vm0, %v2184_v34, 0.0  ;;  %v1885_v22 = vadd.f32 %v1803_v10, %v1722_v55  ;;  %v1424_v62 = vadd.f32 %v1344_v30, %v4593_v45  ;;  %v4278_v55 = vsel %vm1448_vm2, %v1520_v1, %v1522_v9  ;;  %v2888_v45 = vld [vmem:[%s2988_s10 + $0x170] sm:$0xff] }
 0x21b   : > { %v2222_v29 = vadd.f32 %v2221_v35, %v2220_v3 }
 0x21c   : > { %v2048_v18 = vadd.f32 %v1966_v27, %v1885_v22  ;;  %2678 = vmatmul.msk.f32.gmra.mxu1 %vm316_vm0, %v3817_v43  ;;  %2718 = vmatmul.msk.f32.gmra.mxu2 %vm316_vm0, %v4186_v41  ;;  %v4594_v27 = vld [vmem:[#allocation31_spill] sm:$0xff] }
 0x21e   : > { %v2084_v51 = vadd.f32 %v4114_v20, %v2048_v18  ;;  %2758 = vmatmul.msk.f32.gmra.mxu3 %vm316_vm0, %v4223_v44  ;;  %v1969_v61 = vpop.f32.mrf.mxu0 }
 0x21f   : > { %v1643_v54 = vpop.f32.mrf.mxu2 }
 0x220   : > { %v2122_v59 = vsel %vm316_vm0, %v2084_v51, 0.0  ;;  %v2185_v49 = vmul.f32 %v2084_v51, %v2084_v51  ;;  %2290 = vst.msk [vmem:[%s4123_s24 + $0x38] sm:$0xff] %vm316_vm0, %v2084_v51  ;;  %v1723_v43 = vadd.f32 %v1643_v54, %v1424_v62  ;;  %v1525_v62 = vrot.slane %v2888_v45, 2 }
 0x221   : > { %v2123_v41 = vadd.f32 %v2122_v59, %v2121_v58  ;;  %v1347_v50 = vpop.f32.mrf.mxu1  ;;  %v1806_v14 = vpop.f32.mrf.mxu3  ;;  %2798 = vmatmul.msk.f32.gmra.mxu0 %vm316_vm0, %v4260_v42  ;;  %v1285_v58 = vrot.slane %v3873_v12, 1 }
 0x222   : > { %v2223_v52 = vsel %vm316_vm0, %v2185_v49, 0.0  ;;  %v1886_v3 = vadd.f32 %v1806_v14, %v1723_v43  ;;  %v1425_v36 = vadd.f32 %v1347_v50, %v4594_v27  ;;  %v2889_v27 = vld [vmem:[%s2988_s10 + $0x178] sm:$0x3] }
 0x223   : > { %v2224_v31 = vadd.f32 %v2223_v52, %v2222_v29  ;;  %v2887_v29 = vld [vmem:[%s2988_s10 + $0x168] sm:$0xff] }
 0x224   : > { %v2049_v63 = vadd.f32 %v1969_v61, %v1886_v3  ;;  %2679 = vmatmul.msk.f32.gmra.mxu1 %vm316_vm0, %v3832_v38  ;;  %2719 = vmatmul.msk.f32.gmra.mxu2 %vm316_vm0, %v4204_v48  ;;  %v1286_v38 = vrot.slane %v3893_v57, 1  ;;  %v1524_v18 = vrot.slane %v2887_v29, 2  ;;  %v2891_v29 = vld [vmem:[%s2988_s10 + $0x188] sm:$0xff] }
 0x226   : > { %v2085_v60 = vadd.f32 %v4114_v20, %v2049_v63  ;;  %2759 = vmatmul.msk.f32.gmra.mxu3 %vm316_vm0, %v4241_v39  ;;  %v1972_v34 = vpop.f32.mrf.mxu0  ;;  %v4293_v61 = vsel %vm821_vm1, %v1285_v58, %v1286_v38 }
 0x227   : > { %v1646_v30 = vpop.f32.mrf.mxu2 }
 0x228   : > { %v2124_v48 = vsel %vm316_vm0, %v2085_v60, 0.0  ;;  %v2186_v10 = vmul.f32 %v2085_v60, %v2085_v60  ;;  %2291 = vst.msk [vmem:[%s4123_s24 + $0x40] sm:$0xff] %vm316_vm0, %v2085_v60  ;;  %v1724_v35 = vadd.f32 %v1646_v30, %v1425_v36  ;;  %v1527_v36 = vrot.slane %v2889_v27, 2 }
 0x229   : > { %v2125_v22 = vadd.f32 %v2124_v48, %v2123_v41  ;;  %v1350_v13 = vpop.f32.mrf.mxu1  ;;  %v1809_v8 = vpop.f32.mrf.mxu3  ;;  %2799 = vmatmul.msk.f32.gmra.mxu0 %vm316_vm0, %v4278_v55  ;;  %v4304_v41 = vsel %vm1448_vm2, %v1524_v18, %v1525_v62  ;;  %v1748_v18 = vrot.slane %v2891_v29, 2 }
 0x22a   : > { %v2225_v4 = vsel %vm316_vm0, %v2186_v10, 0.0  ;;  %v1887_v1 = vadd.f32 %v1809_v8, %v1724_v35  ;;  %v1426_v59 = vadd.f32 %v1350_v13, %v3822_v23  ;;  %v1911_v23 = vrot.slane %v3893_v57, 2 }
 0x22b   : > { %v2226_v51 = vadd.f32 %v2225_v4, %v2224_v31  ;;  %v2890_v4 = vld [vmem:[%s2988_s10 + $0x180] sm:$0xff] }
 0x22c   : > { %v2050_v54 = vadd.f32 %v1972_v34, %v1887_v1  ;;  %2680 = vmatmul.msk.f32.gmra.mxu1 %vm316_vm0, %v3855_v17  ;;  %2720 = vmatmul.msk.f32.gmra.mxu2 %vm316_vm0, %v4223_v44  ;;  %v1910_v44 = vrot.slane %v3873_v12, 2  ;;  %v1747_v1 = vrot.slane %v2890_v4, 2 }
 0x22e   : > { %v2086_v49 = vadd.f32 %v4114_v20, %v2050_v54  ;;  %2760 = vmatmul.msk.f32.gmra.mxu3 %vm316_vm0, %v4260_v42  ;;  %v1975_v43 = vpop.f32.mrf.mxu0  ;;  %v4322_v12 = vsel %vm1448_vm2, %v1910_v44, %v1911_v23 }
 0x22f   : > { %v1649_v50 = vpop.f32.mrf.mxu2 }
 0x230   : > { %v2126_v14 = vsel %vm316_vm0, %v2086_v49, 0.0  ;;  %v2187_v52 = vmul.f32 %v2086_v49, %v2086_v49  ;;  %2292 = vst.msk [vmem:[%s4123_s24 + $0x48] sm:$0xff] %vm316_vm0, %v2086_v49  ;;  %v1725_v17 = vadd.f32 %v1649_v50, %v1426_v59  ;;  %v4595_v59 = vld [vmem:[#allocation32_spill] sm:$0xff] }
 0x231   : > { %v2127_v3 = vadd.f32 %v2126_v14, %v2125_v22  ;;  %v1353_v37 = vpop.f32.mrf.mxu1  ;;  %v1812_v9 = vpop.f32.mrf.mxu3  ;;  %2800 = vmatmul.msk.f32.gmra.mxu0 %vm316_vm0, %v4304_v41  ;;  %v1749_v14 = vsel %vm1448_vm2, %v1747_v1, %v1748_v18  ;;  %v298_v1 = vld [vmem:[%s2988_s10 + $0x1a8] sm:$0x3] }
 0x232   : > { %v2227_v31 = vsel %vm316_vm0, %v2187_v52, 0.0  ;;  %v1888_v63 = vadd.f32 %v1812_v9, %v1725_v17  ;;  %v1427_v58 = vadd.f32 %v1353_v37, %v3845_v56 }
 0x233   : > { %v2228_v60 = vadd.f32 %v2227_v31, %v2226_v51 }
 0x234   : > { %v2051_v34 = vadd.f32 %v1975_v43, %v1888_v63  ;;  %2681 = vmatmul.msk.f32.gmra.mxu1 %vm316_vm0, %v3870_v5  ;;  %2721 = vmatmul.msk.f32.gmra.mxu2 %vm316_vm0, %v4241_v39  ;;  %v4329_v5 = vsel %vm1448_vm2, %v1525_v62, %v1527_v36  ;;  %v2892_v63 = vld [vmem:[%s2988_s10 + $0x190] sm:$0x3] }
 0x235   : > { %v1750_v27 = vrot.slane %v2892_v63, 2 }
 0x236   : > { %v2087_v30 = vadd.f32 %v4114_v20, %v2051_v34  ;;  %2761 = vmatmul.msk.f32.gmra.mxu3 %vm316_vm0, %v4278_v55  ;;  %v1978_v48 = vpop.f32.mrf.mxu0  ;;  %v4596_v34 = vld [vmem:[#allocation33_spill] sm:$0xff] }
 0x237   : > { %v1652_v10 = vpop.f32.mrf.mxu2 }
 0x238   : > { %v2128_v39 = vsel %vm316_vm0, %v2087_v30, 0.0  ;;  %v2188_v35 = vmul.f32 %v2087_v30, %v2087_v30  ;;  %2293 = vst.msk [vmem:[%s4123_s24 + $0x50] sm:$0xff] %vm316_vm0, %v2087_v30  ;;  %v1726_v22 = vadd.f32 %v1652_v10, %v1427_v58  ;;  %v1751_v10 = vsel %vm1448_vm2, %v1748_v18, %v1750_v27 }
 0x239   : > { %v2129_v13 = vadd.f32 %v2128_v39, %v2127_v3  ;;  %v1356_v8 = vpop.f32.mrf.mxu1  ;;  %v1815_v56 = vpop.f32.mrf.mxu3  ;;  %2801 = vmatmul.msk.f32.gmra.mxu0 %vm316_vm0, %v4329_v5  ;;  %v1288_v18 = vrot.slane %v298_v1, 1 }
 0x23a   : > { %v2229_v45 = vsel %vm316_vm0, %v2188_v35, 0.0  ;;  %v1889_v62 = vadd.f32 %v1815_v56, %v1726_v22  ;;  %v1428_v49 = vadd.f32 %v1356_v8, %v4595_v59 }
 0x23b   : > { %v2230_v51 = vadd.f32 %v2229_v45, %v2228_v60 }
 0x23c   : > { %v2052_v54 = vadd.f32 %v1978_v48, %v1889_v62  ;;  %2682 = vmatmul.msk.f32.gmra.mxu1 %vm316_vm0, %v3889_v21  ;;  %2722 = vmatmul.msk.f32.gmra.mxu2 %vm316_vm0, %v4260_v42  ;;  %v4597_v62 = vld [vmem:[#allocation34_spill] sm:$0xff] }
 0x23e   : > { %v2088_v43 = vadd.f32 %v4114_v20, %v2052_v54  ;;  %2762 = vmatmul.msk.f32.gmra.mxu3 %vm316_vm0, %v4304_v41  ;;  %v1981_v50 = vpop.f32.mrf.mxu0 }
 0x23f   : > { %v1655_v52 = vpop.f32.mrf.mxu2 }
 0x240   : > { %v2130_v17 = vsel %vm316_vm0, %v2088_v43, 0.0  ;;  %v2189_v44 = vmul.f32 %v2088_v43, %v2088_v43  ;;  %2294 = vst.msk [vmem:[%s4123_s24 + $0x58] sm:$0xff] %vm316_vm0, %v2088_v43  ;;  %v1727_v21 = vadd.f32 %v1655_v52, %v1428_v49 }
 0x241   : > { %v2131_v3 = vadd.f32 %v2130_v17, %v2129_v13  ;;  %v1359_v42 = vpop.f32.mrf.mxu1  ;;  %v1818_v37 = vpop.f32.mrf.mxu3  ;;  %2802 = vmatmul.msk.f32.gmra.mxu0 %vm316_vm0, %v1749_v14 }
 0x242   : > { %v2231_v9 = vsel %vm316_vm0, %v2189_v44, 0.0  ;;  %v1890_v31 = vadd.f32 %v1818_v37, %v1727_v21  ;;  %v1429_v58 = vadd.f32 %v1359_v42, %v4596_v34 }
 0x243   : > { %v2232_v36 = vadd.f32 %v2231_v9, %v2230_v51 }
 0x244   : > { %v2053_v60 = vadd.f32 %v1981_v50, %v1890_v31  ;;  %2683 = vmatmul.msk.f32.gmra.mxu1 %vm316_vm0, %v3907_v24  ;;  %2723 = vmatmul.msk.f32.gmra.mxu2 %vm316_vm0, %v4278_v55 }
 0x246   : > { %v2089_v30 = vadd.f32 %v4114_v20, %v2053_v60  ;;  %2763 = vmatmul.msk.f32.gmra.mxu3 %vm316_vm0, %v4329_v5  ;;  %v1984_v48 = vpop.f32.mrf.mxu0 }
 0x247   : > { %v1658_v39 = vpop.f32.mrf.mxu2 }
 0x248   : > { %v2132_v35 = vsel %vm316_vm0, %v2089_v30, 0.0  ;;  %v2190_v22 = vmul.f32 %v2089_v30, %v2089_v30  ;;  %2295 = vst.msk [vmem:[%s4123_s24 + $0x60] sm:$0xff] %vm316_vm0, %v2089_v30  ;;  %v1728_v24 = vadd.f32 %v1658_v39, %v1429_v58 }
 0x249   : > { %v2133_v13 = vadd.f32 %v2132_v35, %v2131_v3  ;;  %v1362_v55 = vpop.f32.mrf.mxu1  ;;  %v1821_v8 = vpop.f32.mrf.mxu3  ;;  %2803 = vmatmul.msk.f32.gmra.mxu0 %vm316_vm0, %v1751_v10  ;;  %v1913_v3 = vrot.slane %v298_v1, 2 }
 0x24a   : > { %v2233_v56 = vsel %vm316_vm0, %v2190_v22, 0.0  ;;  %v1891_v4 = vadd.f32 %v1821_v8, %v1728_v24  ;;  %v1430_v51 = vadd.f32 %v1362_v55, %v4597_v62 }
 0x24b   : > { %v2234_v29 = vadd.f32 %v2233_v56, %v2232_v36 }
 0x24c   : > { %v2054_v45 = vadd.f32 %v1984_v48, %v1891_v4  ;;  %2684 = vmatmul.msk.f32.gmra.mxu1 %vm316_vm0, %v4293_v61  ;;  %2724 = vmatmul.msk.f32.gmra.mxu2 %vm316_vm0, %v4304_v41  ;;  %v1289_v41 = vsel %vm821_vm1, %v1286_v38, %v1288_v18 }
 0x24e   : > { %v2090_v54 = vadd.f32 %v4114_v20, %v2054_v45  ;;  %2764 = vmatmul.msk.f32.gmra.mxu3 %vm316_vm0, %v1749_v14  ;;  %v1987_v59 = vpop.f32.mrf.mxu0 }
 0x24f   : > { %v1661_v49 = vpop.f32.mrf.mxu2 }
 0x250   : > { %v2134_v43 = vsel %vm316_vm0, %v2090_v54, 0.0  ;;  %v2191_v50 = vmul.f32 %v2090_v54, %v2090_v54  ;;  %2296 = vst.msk [vmem:[%s4123_s24 + $0x68] sm:$0xff] %vm316_vm0, %v2090_v54  ;;  %v1729_v52 = vadd.f32 %v1661_v49, %v1430_v51 }
 0x251   : > { %v2135_v17 = vadd.f32 %v2134_v43, %v2133_v13  ;;  %v1365_v61 = vpop.f32.mrf.mxu1  ;;  %v1824_v44 = vpop.f32.mrf.mxu3  ;;  %2804 = vmatmul.msk.f32.gmra.mxu0 %vm316_vm0, %v4322_v12  ;;  %v1914_v12 = vsel %vm1448_vm2, %v1911_v23, %v1913_v3 }
 0x252   : > { %v2235_v14 = vsel %vm316_vm0, %v2191_v50, 0.0  ;;  %v1892_v21 = vadd.f32 %v1824_v44, %v1729_v52  ;;  %v1431_v9 = vadd.f32 %v1365_v61, %v3916_v32 }
 0x253   : > { %v2236_v42 = vadd.f32 %v2235_v14, %v2234_v29 }
 0x254   : > { %v2055_v37 = vadd.f32 %v1987_v59, %v1892_v21  ;;  %2685 = vmatmul.msk.f32.gmra.mxu1 %vm316_vm0, %v1289_v41  ;;  %2725 = vmatmul.msk.f32.gmra.mxu2 %vm316_vm0, %v4329_v5 }
 0x256   : > { %v2091_v31 = vadd.f32 %v4114_v20, %v2055_v37  ;;  %2765 = vmatmul.msk.f32.gmra.mxu3 %vm316_vm0, %v1751_v10  ;;  %v1990_v38 = vpop.f32.mrf.mxu0 }
 0x257   : > { %v1664_v63 = vpop.f32.mrf.mxu2 }
 0x258   : > { %v2136_v27 = vsel %vm316_vm0, %v2091_v31, 0.0  ;;  %v2192_v36 = vmul.f32 %v2091_v31, %v2091_v31  ;;  %2297 = vst.msk [vmem:[%s4123_s24 + $0x70] sm:$0xff] %vm316_vm0, %v2091_v31  ;;  %v1730_v60 = vadd.f32 %v1664_v63, %v1431_v9 }
 0x259   : > { %v2137_v5 = vadd.f32 %v2136_v27, %v2135_v17  ;;  %v1368_v34 = vpop.f32.mrf.mxu1  ;;  %v1827_v32 = vpop.f32.mrf.mxu3  ;;  %2805 = vmatmul.msk.f32.gmra.mxu0 %vm316_vm0, %v1914_v12 }
 0x25a   : > { %v2237_v58 = vsel %vm316_vm0, %v2192_v36, 0.0  ;;  %v1893_v30 = vadd.f32 %v1827_v32, %v1730_v60  ;;  %v1432_v23 = vadd.f32 %v1368_v34, %v3933_v2 }
 0x25b   : > { %v2238_v48 = vadd.f32 %v2237_v58, %v2236_v42 }
 0x25c   : > { %v2056_v57 = vadd.f32 %v1990_v38, %v1893_v30 }
 0x25e   : > { %v2092_v10 = vadd.f32 %v4114_v20, %v2056_v57  ;;  %v1993_v39 = vpop.f32.mrf.mxu0 }
 0x25f   : > { %v1667_v35 = vpop.f32.mrf.mxu2 }
 0x260   : > { %v2138_v22 = vsel %vm316_vm0, %v2092_v10, 0.0  ;;  %v2193_v24 = vmul.f32 %v2092_v10, %v2092_v10  ;;  %2298 = vst.msk [vmem:[%s4123_s24 + $0x78] sm:$0xff] %vm316_vm0, %v2092_v10  ;;  %v1731_v13 = vadd.f32 %v1667_v35, %v1432_v23 }
 0x261   : > { %v2139_v55 = vadd.f32 %v2138_v22, %v2137_v5  ;;  %v1371_v8 = vpop.f32.mrf.mxu1  ;;  %v1830_v56 = vpop.f32.mrf.mxu3 }
 0x262   : > { %v2239_v4 = vsel %vm316_vm0, %v2193_v24, 0.0  ;;  %v1894_v1 = vadd.f32 %v1830_v56, %v1731_v13  ;;  %v1433_v2 = vadd.f32 %v1371_v8, %v3944_v6 }
 0x263   : > { %v2240_v29 = vadd.f32 %v2239_v4, %v2238_v48 }
 0x264   : > { %v2057_v45 = vadd.f32 %v1993_v39, %v1894_v1 }
 0x266   : > { %v2093_v18 = vadd.f32 %v4114_v20, %v2057_v45  ;;  %v1996_v62 = vpop.f32.mrf.mxu0 }
 0x267   : > { %v1670_v51 = vpop.f32.mrf.mxu2 }
 0x268   : > { %v2140_v54 = vsel %vm316_vm0, %v2093_v18, 0.0  ;;  %v2194_v59 = vmul.f32 %v2093_v18, %v2093_v18  ;;  %2299 = vst.msk [vmem:[%s4123_s24 + $0x80] sm:$0xff] %vm316_vm0, %v2093_v18  ;;  %v1732_v49 = vadd.f32 %v1670_v51, %v1433_v2 }
 0x269   : > { %v2141_v43 = vadd.f32 %v2140_v54, %v2139_v55  ;;  %v1374_v50 = vpop.f32.mrf.mxu1  ;;  %v1833_v52 = vpop.f32.mrf.mxu3 }
 0x26a   : > { %v2241_v17 = vsel %vm316_vm0, %v2194_v59, 0.0  ;;  %v1895_v61 = vadd.f32 %v1833_v52, %v1732_v49  ;;  %v1434_v6 = vadd.f32 %v1374_v50, %v3954_v53 }
 0x26b   : > { %v2242_v44 = vadd.f32 %v2241_v17, %v2240_v29 }
 0x26c   : > { %v2058_v41 = vadd.f32 %v1996_v62, %v1895_v61 }
 0x26e   : > { %v2094_v14 = vadd.f32 %v4114_v20, %v2058_v41  ;;  %v1999_v21 = vpop.f32.mrf.mxu0 }
 0x26f   : > { %v1673_v3 = vpop.f32.mrf.mxu2 }
 0x270   : > { %v2142_v42 = vsel %vm316_vm0, %v2094_v14, 0.0  ;;  %v2195_v37 = vmul.f32 %v2094_v14, %v2094_v14  ;;  %2300 = vst.msk [vmem:[%s4123_s24 + $0x88] sm:$0xff] %vm316_vm0, %v2094_v14  ;;  %v1733_v9 = vadd.f32 %v1673_v3, %v1434_v6 }
 0x271   : > { %v2143_v31 = vadd.f32 %v2142_v42, %v2141_v43  ;;  %v1377_v38 = vpop.f32.mrf.mxu1  ;;  %v1836_v12 = vpop.f32.mrf.mxu3 }
 0x272   : > { %v2243_v63 = vsel %vm316_vm0, %v2195_v37, 0.0  ;;  %v1896_v27 = vadd.f32 %v1836_v12, %v1733_v9  ;;  %v1435_v53 = vadd.f32 %v1377_v38, %v3965_v11 }
 0x273   : > { %v2244_v36 = vadd.f32 %v2243_v63, %v2242_v44 }
 0x274   : > { %v2059_v60 = vadd.f32 %v1999_v21, %v1896_v27 }
 0x276   : > { %v2095_v5 = vadd.f32 %v4114_v20, %v2059_v60  ;;  %v2002_v34 = vpop.f32.mrf.mxu0 }
 0x277   : > { %v1676_v32 = vpop.f32.mrf.mxu2 }
 0x278   : > { %v2144_v58 = vsel %vm316_vm0, %v2095_v5, 0.0  ;;  %v2196_v30 = vmul.f32 %v2095_v5, %v2095_v5  ;;  %2301 = vst.msk [vmem:[%s4123_s24 + $0x90] sm:$0xff] %vm316_vm0, %v2095_v5  ;;  %v1734_v48 = vadd.f32 %v1676_v32, %v1435_v53 }
 0x279   : > { %v2145_v57 = vadd.f32 %v2144_v58, %v2143_v31  ;;  %v1380_v23 = vpop.f32.mrf.mxu1  ;;  %v1839_v10 = vpop.f32.mrf.mxu3 }
 0x27a   : > { %v2245_v39 = vsel %vm316_vm0, %v2196_v30, 0.0  ;;  %v1897_v35 = vadd.f32 %v1839_v10, %v1734_v48  ;;  %v1436_v11 = vadd.f32 %v1380_v23, %v3975_v19 }
 0x27b   : > { %v2246_v22 = vadd.f32 %v2245_v39, %v2244_v36 }
 0x27c   : > { %v2060_v24 = vadd.f32 %v2002_v34, %v1897_v35 }
 0x27e   : > { %v2096_v13 = vadd.f32 %v4114_v20, %v2060_v24  ;;  %v2005_v55 = vpop.f32.mrf.mxu0 }
 0x27f   : > { %v1679_v8 = vpop.f32.mrf.mxu2 }
 0x280   : > { %v2146_v56 = vsel %vm316_vm0, %v2096_v13, 0.0  ;;  %v2197_v4 = vmul.f32 %v2096_v13, %v2096_v13  ;;  %2302 = vst.msk [vmem:[%s4123_s24 + $0x98] sm:$0xff] %vm316_vm0, %v2096_v13  ;;  %v1735_v1 = vadd.f32 %v1679_v8, %v1436_v11 }
 0x281   : > { %v2147_v29 = vadd.f32 %v2146_v56, %v2145_v57  ;;  %v1383_v45 = vpop.f32.mrf.mxu1  ;;  %v1842_v2 = vpop.f32.mrf.mxu3 }
 0x282   : > { %v2247_v18 = vsel %vm316_vm0, %v2197_v4, 0.0  ;;  %v1898_v62 = vadd.f32 %v1842_v2, %v1735_v1  ;;  %v1437_v19 = vadd.f32 %v1383_v45, %v3986_v7 }
 0x283   : > { %v2248_v51 = vadd.f32 %v2247_v18, %v2246_v22 }
 0x284   : > { %v2061_v54 = vadd.f32 %v2005_v55, %v1898_v62 }
 0x286   : > { %v2097_v59 = vadd.f32 %v4114_v20, %v2061_v54  ;;  %v2008_v49 = vpop.f32.mrf.mxu0 }
 0x287   : > { %v1682_v43 = vpop.f32.mrf.mxu2 }
 0x288   : > { %v2148_v50 = vsel %vm316_vm0, %v2097_v59, 0.0  ;;  %v2198_v52 = vmul.f32 %v2097_v59, %v2097_v59  ;;  %2303 = vst.msk [vmem:[%s4123_s24 + $0xa0] sm:$0xff] %vm316_vm0, %v2097_v59  ;;  %v1736_v17 = vadd.f32 %v1682_v43, %v1437_v19 }
 0x289   : > { %v2149_v61 = vadd.f32 %v2148_v50, %v2147_v29  ;;  %v1386_v44 = vpop.f32.mrf.mxu1  ;;  %v1845_v41 = vpop.f32.mrf.mxu3 }
 0x28a   : > { %v2249_v6 = vsel %vm316_vm0, %v2198_v52, 0.0  ;;  %v1899_v14 = vadd.f32 %v1845_v41, %v1736_v17  ;;  %v1438_v7 = vadd.f32 %v1386_v44, %v3996_v25 }
 0x28b   : > { %v2250_v21 = vadd.f32 %v2249_v6, %v2248_v51 }
 0x28c   : > { %v2062_v3 = vadd.f32 %v2008_v49, %v1899_v14 }
 0x28e   : > { %v2098_v42 = vadd.f32 %v4114_v20, %v2062_v3  ;;  %v2011_v37 = vpop.f32.mrf.mxu0 }
 0x28f   : > { %v1685_v9 = vpop.f32.mrf.mxu2 }
 0x290   : > { %v2150_v31 = vsel %vm316_vm0, %v2098_v42, 0.0  ;;  %v2199_v38 = vmul.f32 %v2098_v42, %v2098_v42  ;;  %2304 = vst.msk [vmem:[%s4123_s24 + $0xa8] sm:$0xff] %vm316_vm0, %v2098_v42  ;;  %v1737_v12 = vadd.f32 %v1685_v9, %v1438_v7 }
 0x291   : > { %v2151_v63 = vadd.f32 %v2150_v31, %v2149_v61  ;;  %v1389_v27 = vpop.f32.mrf.mxu1  ;;  %v1848_v36 = vpop.f32.mrf.mxu3 }
 0x292   : > { %v2251_v60 = vsel %vm316_vm0, %v2199_v38, 0.0  ;;  %v1900_v53 = vadd.f32 %v1848_v36, %v1737_v12  ;;  %v1439_v25 = vadd.f32 %v1389_v27, %v4007_v0 }
 0x293   : > { %v2252_v5 = vadd.f32 %v2251_v60, %v2250_v21 }
 0x294   : > { %v2063_v34 = vadd.f32 %v2011_v37, %v1900_v53 }
 0x296   : > { %v2099_v32 = vadd.f32 %v4114_v20, %v2063_v34  ;;  %v2014_v58 = vpop.f32.mrf.mxu0 }
 0x297   : > { %v1688_v30 = vpop.f32.mrf.mxu2 }
 0x298   : > { %v2152_v48 = vsel %vm316_vm0, %v2099_v32, 0.0  ;;  %v2200_v57 = vmul.f32 %v2099_v32, %v2099_v32  ;;  %2305 = vst.msk [vmem:[%s4123_s24 + $0xb0] sm:$0xff] %vm316_vm0, %v2099_v32  ;;  %v1738_v23 = vadd.f32 %v1688_v30, %v1439_v25 }
 0x299   : > { %v2153_v10 = vadd.f32 %v2152_v48, %v2151_v63  ;;  %v1392_v39 = vpop.f32.mrf.mxu1  ;;  %v1851_v35 = vpop.f32.mrf.mxu3 }
 0x29a   : > { %v2253_v22 = vsel %vm316_vm0, %v2200_v57, 0.0  ;;  %v1901_v24 = vadd.f32 %v1851_v35, %v1738_v23  ;;  %v1440_v0 = vadd.f32 %v1392_v39, %v4017_v46 }
 0x29b   : > { %v2254_v11 = vadd.f32 %v2253_v22, %v2252_v5 }
 0x29c   : > { %v2064_v13 = vadd.f32 %v2014_v58, %v1901_v24 }
 0x29e   : > { %v2100_v55 = vadd.f32 %v4114_v20, %v2064_v13  ;;  %v2017_v8 = vpop.f32.mrf.mxu0 }
 0x29f   : > { %v1691_v56 = vpop.f32.mrf.mxu2 }
 0x2a0   : > { %v2154_v4 = vsel %vm316_vm0, %v2100_v55, 0.0  ;;  %v2201_v1 = vmul.f32 %v2100_v55, %v2100_v55  ;;  %2306 = vst.msk [vmem:[%s4123_s24 + $0xb8] sm:$0xff] %vm316_vm0, %v2100_v55  ;;  %v1739_v29 = vadd.f32 %v1691_v56, %v1440_v0 }
 0x2a1   : > { %v2155_v45 = vadd.f32 %v2154_v4, %v2153_v10  ;;  %v1395_v2 = vpop.f32.mrf.mxu1  ;;  %v1854_v18 = vpop.f32.mrf.mxu3 }
 0x2a2   : > { %v2255_v62 = vsel %vm316_vm0, %v2201_v1, 0.0  ;;  %v1902_v51 = vadd.f32 %v1854_v18, %v1739_v29  ;;  %v1441_v46 = vadd.f32 %v1395_v2, %v4028_v26 }
 0x2a3   : > { %v2256_v54 = vadd.f32 %v2255_v62, %v2254_v11 }
 0x2a4   : > { %v2065_v19 = vadd.f32 %v2017_v8, %v1902_v51 }
 0x2a6   : > { %v2101_v59 = vadd.f32 %v4114_v20, %v2065_v19  ;;  %v2020_v49 = vpop.f32.mrf.mxu0 }
 0x2a7   : > { %v1694_v43 = vpop.f32.mrf.mxu2 }
 0x2a8   : > { %v2156_v50 = vsel %vm316_vm0, %v2101_v59, 0.0  ;;  %v2202_v52 = vmul.f32 %v2101_v59, %v2101_v59  ;;  %2307 = vst.msk [vmem:[%s4123_s24 + $0xc0] sm:$0xff] %vm316_vm0, %v2101_v59  ;;  %v1740_v17 = vadd.f32 %v1694_v43, %v1441_v46 }
 0x2a9   : > { %v2157_v61 = vadd.f32 %v2156_v50, %v2155_v45  ;;  %v1398_v44 = vpop.f32.mrf.mxu1  ;;  %v1857_v41 = vpop.f32.mrf.mxu3 }
 0x2aa   : > { %v2257_v6 = vsel %vm316_vm0, %v2202_v52, 0.0  ;;  %v1903_v14 = vadd.f32 %v1857_v41, %v1740_v17  ;;  %v1442_v26 = vadd.f32 %v1398_v44, %v4038_v15 }
 0x2ab   : > { %v2258_v21 = vadd.f32 %v2257_v6, %v2256_v54 }
 0x2ac   : > { %v2066_v3 = vadd.f32 %v2020_v49, %v1903_v14 }
 0x2ae   : > { %v2102_v7 = vadd.f32 %v4114_v20, %v2066_v3  ;;  %v2023_v42 = vpop.f32.mrf.mxu0 }
 0x2af   : > { %v1697_v37 = vpop.f32.mrf.mxu2 }
 0x2b0   : > { %v2158_v9 = vsel %vm316_vm0, %v2102_v7, 0.0  ;;  %v2203_v31 = vmul.f32 %v2102_v7, %v2102_v7  ;;  %2308 = vst.msk [vmem:[%s4123_s24 + $0xc8] sm:$0xff] %vm316_vm0, %v2102_v7  ;;  %v1741_v38 = vadd.f32 %v1697_v37, %v1442_v26 }
 0x2b1   : > { %v2159_v12 = vadd.f32 %v2158_v9, %v2157_v61  ;;  %v1401_v63 = vpop.f32.mrf.mxu1  ;;  %v1860_v27 = vpop.f32.mrf.mxu3 }
 0x2b2   : > { %v2259_v36 = vsel %vm316_vm0, %v2203_v31, 0.0  ;;  %v1904_v60 = vadd.f32 %v1860_v27, %v1741_v38  ;;  %v1443_v15 = vadd.f32 %v1401_v63, %v4049_v47 }
 0x2b3   : > { %v2260_v53 = vadd.f32 %v2259_v36, %v2258_v21 }
 0x2b4   : > { %v2067_v5 = vadd.f32 %v2023_v42, %v1904_v60 }
 0x2b6   : > { %v2103_v34 = vadd.f32 %v4114_v20, %v2067_v5  ;;  %v2026_v25 = vpop.f32.mrf.mxu0 }
 0x2b7   : > { %v1700_v32 = vpop.f32.mrf.mxu2 }
 0x2b8   : > { %v2160_v58 = vsel %vm316_vm0, %v2103_v34, 0.0  ;;  %v2204_v30 = vmul.f32 %v2103_v34, %v2103_v34  ;;  %2309 = vst.msk [vmem:[%s4123_s24 + $0xd0] sm:$0xff] %vm316_vm0, %v2103_v34  ;;  %v1742_v48 = vadd.f32 %v1700_v32, %v1443_v15 }
 0x2b9   : > { %v2161_v57 = vadd.f32 %v2160_v58, %v2159_v12  ;;  %v1404_v23 = vpop.f32.mrf.mxu1  ;;  %v1863_v10 = vpop.f32.mrf.mxu3 }
 0x2ba   : > { %v2261_v39 = vsel %vm316_vm0, %v2204_v30, 0.0  ;;  %v1905_v35 = vadd.f32 %v1863_v10, %v1742_v48  ;;  %v1444_v47 = vadd.f32 %v1404_v23, %v4059_v33 }
 0x2bb   : > { %v2262_v22 = vadd.f32 %v2261_v39, %v2260_v53 }
 0x2bc   : > { %v2068_v24 = vadd.f32 %v2026_v25, %v1905_v35 }
 0x2be   : > { %v2104_v11 = vadd.f32 %v4114_v20, %v2068_v24  ;;  %v2029_v13 = vpop.f32.mrf.mxu0  ;;  %v2893_v20 = vld [vmem:[%s4514_s2] ss:$0 sm:$0xff] }
 0x2bf   : > { %v1703_v0 = vpop.f32.mrf.mxu2 }
 0x2c0   : > { %v2162_v55 = vsel %vm316_vm0, %v2104_v11, 0.0  ;;  %v2205_v8 = vmul.f32 %v2104_v11, %v2104_v11  ;;  %2310 = vst.msk [vmem:[%s4123_s24 + $0xd8] sm:$0xff] %vm316_vm0, %v2104_v11  ;;  %v1743_v56 = vadd.f32 %v1703_v0, %v1444_v47 }
 0x2c1   : > { %v2163_v4 = vadd.f32 %v2162_v55, %v2161_v57  ;;  %v1407_v1 = vpop.f32.mrf.mxu1  ;;  %v1866_v29 = vpop.f32.mrf.mxu3 }
 0x2c2   : > { %v2263_v45 = vsel %vm316_vm0, %v2205_v8, 0.0  ;;  %v1906_v2 = vadd.f32 %v1866_v29, %v1743_v56  ;;  %v1445_v33 = vadd.f32 %v1407_v1, %v4070_v16 }
 0x2c3   : > { %v2264_v18 = vadd.f32 %v2263_v45, %v2262_v22 }
 0x2c4   : > { %v2069_v62 = vadd.f32 %v2029_v13, %v1906_v2 }
 0x2c6   : > { %v2105_v51 = vadd.f32 %v2893_v20, %v2069_v62  ;;  %v2032_v54 = vpop.f32.mrf.mxu0 }
 0x2c7   : > { %v1706_v19 = vpop.f32.mrf.mxu2 }
 0x2c8   : > { %v2164_v46 = vsel %vm316_vm0, %v2105_v51, 0.0  ;;  %v2206_v59 = vmul.f32 %v2105_v51, %v2105_v51  ;;  %2311 = vst.msk [vmem:[%s4123_s24 + $0xe0] sm:$0xff] %vm316_vm0, %v2105_v51  ;;  %v1744_v49 = vadd.f32 %v1706_v19, %v1445_v33 }
 0x2c9   : > { %v2165_v43 = vadd.f32 %v2164_v46, %v2163_v4  ;;  %v1410_v50 = vpop.f32.mrf.mxu1  ;;  %v1869_v52 = vpop.f32.mrf.mxu3 }
 0x2ca   : > { %v2265_v17 = vsel %vm316_vm0, %v2206_v59, 0.0  ;;  %v1907_v16 = vadd.f32 %v1869_v52, %v1744_v49  ;;  %v1446_v41 = vadd.f32 %v1410_v50, %v4083_v28 }
 0x2cb   : > { %v2266_v61 = vadd.f32 %v2265_v17, %v2264_v18 }
 0x2cc   : > { %v2070_v44 = vadd.f32 %v2032_v54, %v1907_v16 }
 0x2ce   : > { %v2106_v6 = vadd.f32 %v2893_v20, %v2070_v44  ;;  %v2035_v21 = vpop.f32.mrf.mxu0 }
 0x2cf   : > { %v1709_v14 = vpop.f32.mrf.mxu2 }
 0x2d0   : > { %v2166_v3 = vsel %vm316_vm0, %v2106_v6, 0.0  ;;  %v2207_v26 = vmul.f32 %v2106_v6, %v2106_v6  ;;  %2312 = vst.msk [vmem:[%s4123_s24 + $0xe8] sm:$0xff] %vm316_vm0, %v2106_v6  ;;  %v1745_v7 = vadd.f32 %v1709_v14, %v1446_v41 }
 0x2d1   : > { %v2167_v42 = vadd.f32 %v2166_v3, %v2165_v43  ;;  %v1872_v37 = vpop.f32.mrf.mxu3  ;;  %v1413_v12 = vpop.f32.mrf.mxu1 }
 0x2d2   : > { %v2267_v9 = vsel %vm316_vm0, %v2207_v26, 0.0  ;;  %v1908_v31 = vadd.f32 %v1872_v37, %v1745_v7  ;;  %v1447_v28 = vadd.f32 %v1413_v12, %v4097_v40 }
 0x2d3   : > { %v2268_v38 = vadd.f32 %v2267_v9, %v2266_v61 }
 0x2d4   : > { %v2071_v63 = vadd.f32 %v2035_v21, %v1908_v31 }
 0x2d6   : > { %v2107_v27 = vadd.f32 %v2893_v20, %v2071_v63  ;;  %v2038_v25 = vpop.f32.mrf.mxu0 }
 0x2d7   : > { %v1712_v36 = vpop.f32.mrf.mxu2 }
 0x2d8   : > { %v2168_v60 = vsel %vm316_vm0, %v2107_v27, 0.0  ;;  %v2208_v53 = vmul.f32 %v2107_v27, %v2107_v27  ;;  %2313 = vst.msk [vmem:[%s4123_s24 + $0xf0] sm:$0xff] %vm316_vm0, %v2107_v27  ;;  %v1746_v5 = vadd.f32 %v1712_v36, %v1447_v28 }
 0x2d9   : > { %v2169_v15 = vadd.f32 %v2168_v60, %v2167_v42  ;;  %v1875_v34 = vpop.f32.mrf.mxu3 }
 0x2da   : > { %v2269_v32 = vsel %vm316_vm0, %v2208_v53, 0.0  ;;  %v1909_v58 = vadd.f32 %v1875_v34, %v1746_v5 }
 0x2db   : > { %v2270_v30 = vadd.f32 %v2269_v32, %v2268_v38 }
 0x2dc   : > { %v2072_v48 = vadd.f32 %v2038_v25, %v1909_v58 }
 0x2de   : > { %v2108_v57 = vadd.f32 %v2893_v20, %v2072_v48 }
 0x2e0   : > { %v2170_v40 = vsel %vm316_vm0, %v2108_v57, 0.0  ;;  %v2209_v23 = vmul.f32 %v2108_v57, %v2108_v57  ;;  %2314 = vst.msk [vmem:[%s4123_s24 + $0xf8] sm:$0xff] %vm316_vm0, %v2108_v57 }
 0x2e1   : > { %v2171_v10 = vadd.f32 %v2170_v40, %v2169_v15 }
 0x2e2   : > { %v2271_v39 = vsel %vm316_vm0, %v2209_v23, 0.0 }
 0x2e3   : > { %v2172_v35 = vrot.slane %v2171_v10, 4  ;;  %v2272_v22 = vadd.f32 %v2271_v39, %v2270_v30 }
 0x2e5   : > { %v2173_v24 = vadd.f32 %v2172_v35, %v2171_v10  ;;  %v2273_v47 = vrot.slane %v2272_v22, 4 }
 0x2e7   : > { %v2174_v11 = vrot.slane %v2173_v24, 2  ;;  %v2274_v13 = vadd.f32 %v2273_v47, %v2272_v22 }
 0x2e9   : > { %v2175_v0 = vadd.f32 %v2174_v11, %v2173_v24  ;;  %v2275_v55 = vrot.slane %v2274_v13, 2 }
 0x2eb   : > { %v2176_v8 = vrot.slane %v2175_v0, 1  ;;  %v2276_v56 = vadd.f32 %v2275_v55, %v2274_v13 }
 0x2ed   : > { %v2277_v4 = vrot.slane %v2276_v56, 1  ;;  %v2177_v1 = vadd.f32 %v2176_v8, %v2175_v0 }
 0x2ef   : > { %v2278_v29 = vadd.f32 %v2277_v4, %v2276_v56 }
 0x2f1   : > { %v2280_v45 = vsel %vm2279_vm3, %v2177_v1, %v2278_v29 }
 0x2f2   : > { %2282 = vst.msk [vmem:[%s241_s29] sm:$0x3] %vm2281_vm4, %v2280_v45 }
 0x2f3 PF: > { %s15_s17 = sadd.s32 1, %s2916_s17   ;;  %s4598_s15 = smov %s2912_s16 }
 0x2f4   : > { %p12_p5 = scmp.ge.s32.totalorder %s15_s17, 4   ;;  %s4599_s16 = smov %s4601_s18 }
 0x2f6   :  { %14 = sbr.rel (!%p12_p5) target bundleno = 2 (0x2), region = 83 }

// kernel: residual_block_forward.4
= control target key start
LH: loop header
LB: loop body
LE: loop exit
PB: predicated region body
PF: predicated region fallthrough
CT: control target
= control target key end

     0   :  { %s3497_s21 = smov 0   ;;  %s3499_s22 = smov 0   ;;  %s5212_s0 = inlined_call_operand.vmem [shape: f32[2,18,18,64], index: 0, kind: input, shape index: {}]   ;;  %s5213_s1 = inlined_call_operand.vmem [shape: f32[1,64], index: 1, kind: input, shape index: {}]   ;;  %s5214_s2 = inlined_call_operand.vmem [shape: f32[1,64], index: 2, kind: input, shape index: {}]   ;;  %s5215_s3 = inlined_call_operand.vmem [shape: f32[9,64,64], index: 3, kind: input, shape index: {}]   ;;  %s5216_s4 = inlined_call_operand.vmem [shape: f32[1,64], index: 4, kind: input, shape index: {}]   ;;  %s5217_s5 = inlined_call_operand.vmem [shape: f32[2,16,16,64], index: 5, kind: output, shape index: {0}]   ;;  %s5218_s6 = inlined_call_operand.vmem [shape: f32[2,1,2,64], index: 6, kind: output, shape index: {1}]  }
   0x1   :  { %s3501_s23 = smov 0  }
   0x2 LB: > { %s29_s24 = sadd.s32 1, %s3455_s22  ;;  %p3025_p0 = scmp.ge.s32.totalorder %s3459_s23, 1  ;;  %s3459_s23 = sphi %s3501_s23, %s17_s23   ;;  %s3455_s22 = sphi %s3499_s22, %s5390_s22   ;;  %s3451_s21 = sphi %s3497_s21, %s5389_s21  }
   0x3   : > { %p31_p1 = scmp.ge.s32.totalorder %s29_s24, 2  ;;  %p231_p2 = scmp.lt.s32.totalorder %s3459_s23, 3 }
   0x5   : > { %s5392_s24 = smov (%p31_p1, %s29_s24), 0  ;;  %p232_p3 = pnand %p3025_p0, %p231_p2 }
   0x7   : > { %235 = sbr.rel (%p232_p3) target bundleno = 755 (0x2f3), region = 40 }
   0xc   : > { %v3037_v0 = vld [vmem:[%s5215_s3 + $0xf8] sm:$0xff]  ;;  %v3036_v1 = vld [vmem:[%s5215_s3 + $0xf0] sm:$0xff]  ;;  %p273_p4 = scmp.lt.s32.totalorder %s3451_s21, 1  ;;  %v3035_v2 = vld [vmem:[%s5215_s3 + $0xe8] sm:$0xff]  ;;  %v373_v3 = vlaneseq  ;;  %vm892_vm1 = vcmask 523264   ;;  %vm1397_vm2 = vcmask 1046528  }
   0xd   : > { %3381 = vmatpush.msra.mxu1 %v3037_v0  ;;  %3382 = vmatpush.msra.mxu2 %v3037_v0  ;;  %v3034_v4 = vld [vmem:[%s5215_s3 + $0xe0] sm:$0xff]  ;;  %v3033_v6 = vld [vmem:[%s5215_s3 + $0xd8] sm:$0xff]  ;;  %v3032_v12 = vld [vmem:[%s5215_s3 + $0xd0] sm:$0xff]  ;;  %vm2024_vm4 = vcmask 1045504   ;;  %vm2855_vm5 = vcmask 1040384   ;;  %vm2857_vm6 = vcmask 517120  }
   0xe   : > { %3383 = vmatpush.msra.mxu3 %v3037_v0  ;;  %997 = vmatpush.msra.mxu0 %v3037_v0  ;;  %s5394_s21 = smov (!%p273_p4, %s3451_s21), 1  ;;  %v3533_v5 = vld [vmem:[%s5213_s1] ss:$0 sm:$0xff]  ;;  %v3549_v9 = vshrl.u32 %v373_v3, 7  ;;  %v3031_v20 = vld [vmem:[%s5215_s3 + $0xc8] sm:$0xff]  ;;  %v3107_v32 = vld [vmem:[%s5215_s3 + $0x1b8] sm:$0xff] }
   0xf   : > { %3384 = vmatpush.msra.mxu1 %v3036_v1  ;;  %3385 = vmatpush.msra.mxu2 %v3036_v1  ;;  %s3405_s9 = smul.u32 432, %s5394_s21  ;;  %v3546_v7 = vld [vmem:[%s5214_s2] ss:$0 sm:$0xff]  ;;  %v882_v41 = vld [vmem:[%s5215_s3 + $0x38] sm:$0xff]  ;;  %v3106_v45 = vld [vmem:[%s5215_s3 + $0x1b0] sm:$0xff]  ;;  %s3029_s11 = sshll.u32 %s5394_s21, 1 }
  0x10   : > { %3386 = vmatpush.msra.mxu3 %v3036_v1  ;;  %998 = vmatpush.msra.mxu0 %v3036_v1  ;;  %vm431_vm0 = vcmp.ge.s32.totalorder %v3549_v9, 1  ;;  %v3030_v27 = vld [vmem:[%s5215_s3 + $0xc0] sm:$0xff]  ;;  %v3145_v42 = vld [vmem:[%s5215_s3 + $0x78] sm:$0xff]  ;;  %v881_v47 = vld [vmem:[%s5215_s3 + $0x30] sm:$0xff]  ;;  %s295_s14 = scalar_lea.vmem %s5218_s6, %s3029_s11 }
  0x11   : > { %3387 = vmatpush.msra.mxu1 %v3035_v2  ;;  %3388 = vmatpush.msra.mxu2 %v3035_v2  ;;  %s3541_s16 = scalar_lea.vmem %s5212_s0, %s3405_s9  ;;  %v3144_v53 = vld [vmem:[%s5215_s3 + $0x70] sm:$0xff]  ;;  %v3185_v54 = vld [vmem:[%s5215_s3 + $0x138] sm:$0xff]  ;;  %v3105_v55 = vld [vmem:[%s5215_s3 + $0x1a8] sm:$0xff] }
  0x12   : > { %3389 = vmatpush.msra.mxu3 %v3035_v2  ;;  %999 = vmatpush.msra.mxu0 %v3035_v2  ;;  %v314_v8 = vld [vmem:[%s3541_s16 + $0x78] sm:$0xff]  ;;  %v315_v16 = vld [vmem:[%s3541_s16 + $0x80] sm:$0xff]  ;;  %v317_v37 = vld [vmem:[%s3541_s16 + $0x90] sm:$0xff] }
  0x13   : > { %3390 = vmatpush.msra.mxu1 %v3034_v4  ;;  %3391 = vmatpush.msra.mxu2 %v3034_v4  ;;  %v326_v10 = vld [vmem:[%s3541_s16 + $0xd8] sm:$0xff]  ;;  %v563_v13 = vmul.f32 %v3533_v5, %v314_v8  ;;  %v327_v18 = vld [vmem:[%s3541_s16 + $0xe0] sm:$0xff]  ;;  %v564_v24 = vmul.f32 %v3533_v5, %v315_v16  ;;  %v329_v38 = vld [vmem:[%s3541_s16 + $0xf0] sm:$0xff]  ;;  %v566_v48 = vmul.f32 %v3533_v5, %v317_v37 }
  0x14   : > { %v338_v11 = vld [vmem:[%s3541_s16 + $0x138] sm:$0xff]  ;;  %3392 = vmatpush.msra.mxu3 %v3034_v4  ;;  %v575_v14 = vmul.f32 %v3533_v5, %v326_v10  ;;  %1000 = vmatpush.msra.mxu0 %v3034_v4  ;;  %v339_v26 = vld [vmem:[%s3541_s16 + $0x140] sm:$0xff]  ;;  %v576_v31 = vmul.f32 %v3533_v5, %v327_v18  ;;  %v341_v46 = vld [vmem:[%s3541_s16 + $0x150] sm:$0xff]  ;;  %v578_v49 = vmul.f32 %v3533_v5, %v329_v38 }
  0x15   : > { %v587_v15 = vmul.f32 %v3533_v5, %v338_v11  ;;  %v302_v17 = vld [vmem:[%s3541_s16 + $0x18] sm:$0xff]  ;;  %3393 = vmatpush.msra.mxu1 %v3033_v6  ;;  %3394 = vmatpush.msra.mxu2 %v3033_v6  ;;  %v620_v21 = vadd.f32 %v3546_v7, %v563_v13  ;;  %v588_v36 = vmul.f32 %v3533_v5, %v339_v26  ;;  %v303_v39 = vld [vmem:[%s3541_s16 + $0x20] sm:$0xff]  ;;  %v305_v57 = vld [vmem:[%s3541_s16 + $0x30] sm:$0xff] }
  0x16   : > { %v551_v19 = vmul.f32 %v3533_v5, %v302_v17  ;;  %3395 = vmatpush.msra.mxu3 %v3033_v6  ;;  %v632_v22 = vadd.f32 %v3546_v7, %v575_v14  ;;  %1001 = vmatpush.msra.mxu0 %v3033_v6  ;;  %v621_v43 = vadd.f32 %v3546_v7, %v564_v24  ;;  %v3143_v60 = vld [vmem:[%s5215_s3 + $0x68] sm:$0xff]  ;;  %v3184_v2 = vld [vmem:[%s5215_s3 + $0x130] sm:$0xff]  ;;  %v3104_v3 = vld [vmem:[%s5215_s3 + $0x1a0] sm:$0xff] }
  0x17   : > { %v644_v23 = vadd.f32 %v3546_v7, %v587_v15  ;;  %3396 = vmatpush.msra.mxu1 %v3032_v12  ;;  %3397 = vmatpush.msra.mxu2 %v3032_v12  ;;  %v674_v28 = vmax.f32 %v620_v21, 0.0  ;;  %v633_v44 = vadd.f32 %v3546_v7, %v576_v31  ;;  %v552_v50 = vmul.f32 %v3533_v5, %v303_v39  ;;  %v880_v61 = vld [vmem:[%s5215_s3 + $0x28] sm:$0xff]  ;;  %v879_v8 = vld [vmem:[%s5215_s3 + $0x20] sm:$0xff]  ;;  %v318_v10 = vld [vmem:[%s3541_s16 + $0x98] sm:$0xff] }
  0x18   : > { %v608_v25 = vadd.f32 %v3546_v7, %v551_v19  ;;  %3398 = vmatpush.msra.mxu3 %v3032_v12  ;;  %v686_v29 = vmax.f32 %v632_v22, 0.0  ;;  %1002 = vmatpush.msra.mxu0 %v3032_v12  ;;  %v645_v52 = vadd.f32 %v3546_v7, %v588_v36  ;;  %v590_v56 = vmul.f32 %v3533_v5, %v341_v46  ;;  %v3142_v11 = vld [vmem:[%s5215_s3 + $0x60] sm:$0xff]  ;;  %v3183_v12 = vld [vmem:[%s5215_s3 + $0x128] sm:$0xff]  ;;  %v330_v16 = vld [vmem:[%s3541_s16 + $0xf8] sm:$0xff] }
  0x19   : > { %v698_v30 = vmax.f32 %v644_v23, 0.0  ;;  %3399 = vmatpush.msra.mxu1 %v3031_v20  ;;  %3400 = vmatpush.msra.mxu2 %v3031_v20  ;;  %v3582_v33 = vsel %vm431_vm0, %v674_v28, 0.0  ;;  %v3636_v58 = vmax.f32 %v621_v43, 0.0  ;;  %v3638_v59 = vmax.f32 %v633_v44, 0.0  ;;  %v3103_v17 = vld [vmem:[%s5215_s3 + $0x198] sm:$0xff]  ;;  %v3182_v23 = vld [vmem:[%s5215_s3 + $0x120] sm:$0xff] }
  0x1a   : > { %3401 = vmatpush.msra.mxu3 %v3031_v20  ;;  %5256 = vst [vmem:[#allocation2_spill] sm:$0xff] %v3582_v33  ;;  %v3586_v34 = vsel %vm431_vm0, %v686_v29, 0.0  ;;  %1003 = vmatpush.msra.mxu0 %v3031_v20  ;;  %v662_v35 = vmax.f32 %v608_v25, 0.0  ;;  %v623_v62 = vadd.f32 %v3546_v7, %v566_v48  ;;  %v635_v63 = vadd.f32 %v3546_v7, %v578_v49  ;;  %v878_v18 = vld [vmem:[%s5215_s3 + $0x18] sm:$0xff]  ;;  %v3102_v24 = vld [vmem:[%s5215_s3 + $0x190] sm:$0xff]  ;;  %v320_v31 = vld [vmem:[%s3541_s16 + $0xa8] sm:$0xff] }
  0x1b   : > { %3402 = vmatpush.msra.mxu1 %v3030_v27  ;;  %3403 = vmatpush.msra.mxu2 %v3030_v27  ;;  %v3594_v40 = vsel %vm431_vm0, %v698_v30, 0.0  ;;  %5257 = vst [vmem:[#allocation3_spill] sm:$0xff] %v3636_v58  ;;  %v609_v0 = vadd.f32 %v3546_v7, %v552_v50  ;;  %v3651_v1 = vmax.f32 %v645_v52, 0.0  ;;  %v554_v4 = vmul.f32 %v3533_v5, %v305_v57  ;;  %v3141_v20 = vld [vmem:[%s5215_s3 + $0x58] sm:$0xff]  ;;  %v877_v28 = vld [vmem:[%s5215_s3 + $0x10] sm:$0xff]  ;;  %v332_v36 = vld [vmem:[%s3541_s16 + $0x108] sm:$0xff] }
  0x1c   : > { %3046 = vmatmul.msk.f32.vlgmr.msra.gmra.mxu1 %vm892_vm1, %v3582_v33  ;;  %3054 = vmatmul.msk.f32.vlgmr.msra.gmra.mxu2 %vm892_vm1, %v3586_v34  ;;  %v3622_v51 = vsel %vm431_vm0, %v662_v35, 0.0  ;;  %v647_v6 = vadd.f32 %v3546_v7, %v590_v56  ;;  %v677_v13 = vmax.f32 %v623_v62, 0.0  ;;  %v689_v14 = vmax.f32 %v635_v63, 0.0  ;;  %v342_v22 = vld [vmem:[%s3541_s16 + $0x158] sm:$0xff]  ;;  %v344_v43 = vld [vmem:[%s3541_s16 + $0x168] sm:$0xff]  ;;  %v3180_v52 = vld [vmem:[%s5215_s3 + $0x110] sm:$0xff] }
  0x1d   : > { %1244 = vmatpush.msrb.mxu2 %v3107_v32  ;;  %3404 = vmatpush.msra.mxu3 %v3030_v27  ;;  %v3675_v15 = vmax.f32 %v609_v0, 0.0  ;;  %v611_v19 = vadd.f32 %v3546_v7, %v554_v4  ;;  %v567_v25 = vmul.f32 %v3533_v5, %v318_v10  ;;  %v579_v26 = vmul.f32 %v3533_v5, %v330_v16  ;;  %v306_v37 = vld [vmem:[%s3541_s16 + $0x38] sm:$0xff]  ;;  %v3101_v44 = vld [vmem:[%s5215_s3 + $0x188] sm:$0xff]  ;;  %v321_v10 = vld [vmem:[%s3541_s16 + $0xb0] sm:$0xff] }
  0x1e   : > { %3062 = vmatmul.msk.f32.vlgmr.msra.gmra.mxu3 %vm892_vm1, %v3594_v40  ;;  %1116 = vmatpush.msrb.mxu1 %v882_v41  ;;  %v701_v21 = vmax.f32 %v647_v6, 0.0  ;;  %v3707_v29 = vsel %vm431_vm0, %v677_v13, 0.0  ;;  %v3711_v30 = vsel %vm431_vm0, %v689_v14, 0.0  ;;  %v591_v35 = vmul.f32 %v3533_v5, %v342_v22  ;;  %v3181_v38 = vld [vmem:[%s5215_s3 + $0x118] sm:$0xff]  ;;  %v3139_v50 = vld [vmem:[%s5215_s3 + $0x48] sm:$0xff]  ;;  %v3138_v13 = vld [vmem:[%s5215_s3 + $0x40] sm:$0xff] }
  0x1f   : > { %1559 = vmatpush.msrb.mxu3 %v3145_v42  ;;  %1245 = vmatpush.msrb.mxu2 %v3106_v45  ;;  %5258 = vst [vmem:[#allocation4_spill] sm:$0xff] %v3707_v29  ;;  %v665_v32 = vmax.f32 %v611_v19, 0.0  ;;  %v624_v41 = vadd.f32 %v3546_v7, %v567_v25  ;;  %v636_v42 = vadd.f32 %v3546_v7, %v579_v26  ;;  %v3179_v14 = vld [vmem:[%s5215_s3 + $0x108] sm:$0xff]  ;;  %v875_v16 = vld [vmem:[%s5215_s3] sm:$0xff] }
  0x20   : > { %1004 = vmatpush.msra.mxu0 %v3030_v27  ;;  %1117 = vmatpush.msrb.mxu1 %v881_v47  ;;  %v3140_v27 = vld [vmem:[%s5215_s3 + $0x50] sm:$0xff]  ;;  %v3724_v39 = vsel %vm431_vm0, %v701_v21, 0.0  ;;  %v569_v45 = vmul.f32 %v3533_v5, %v320_v31  ;;  %v581_v46 = vmul.f32 %v3533_v5, %v332_v36  ;;  %v555_v47 = vmul.f32 %v3533_v5, %v306_v37  ;;  %v323_v25 = vld [vmem:[%s3541_s16 + $0xc0] sm:$0xff]  ;;  %v3265_v36 = vld [vmem:[%s5215_s3 + $0xb8] sm:$0xff] }
  0x21   : > { %3038 = vmatmul.msk.f32.vlgmr.msra.gmra.mxu0 %vm892_vm1, %v3622_v51  ;;  %1560 = vmatpush.msrb.mxu3 %v3144_v53  ;;  %v3743_v48 = vsel %vm431_vm0, %v665_v32, 0.0  ;;  %v648_v49 = vadd.f32 %v3546_v7, %v591_v35  ;;  %v876_v53 = vld [vmem:[%s5215_s3 + $0x8] sm:$0xff]  ;;  %v3757_v56 = vmax.f32 %v624_v41, 0.0  ;;  %v3759_v57 = vmax.f32 %v636_v42, 0.0  ;;  %v335_v26 = vld [vmem:[%s3541_s16 + $0x120] sm:$0xff] }
  0x22   : > { %1723 = vmatpush.msrb.mxu0 %v3185_v54  ;;  %1246 = vmatpush.msrb.mxu2 %v3105_v55  ;;  %v593_v54 = vmul.f32 %v3533_v5, %v344_v43  ;;  %v308_v55 = vld [vmem:[%s3541_s16 + $0x48] sm:$0xff]  ;;  %v612_v62 = vadd.f32 %v3546_v7, %v555_v47  ;;  %v570_v19 = vmul.f32 %v3533_v5, %v321_v10  ;;  %v347_v35 = vld [vmem:[%s3541_s16 + $0x180] sm:$0xff] }
  0x23   : > { %1561 = vmatpush.msrb.mxu3 %v3143_v60  ;;  %1118 = vmatpush.msrb.mxu1 %v880_v61  ;;  %5259 = vst [vmem:[#allocation5_spill] sm:$0xff] %v3757_v56  ;;  %v626_v60 = vadd.f32 %v3546_v7, %v569_v45  ;;  %v638_v61 = vadd.f32 %v3546_v7, %v581_v46  ;;  %v3766_v63 = vmax.f32 %v648_v49, 0.0  ;;  %v3305_v45 = vld [vmem:[%s5215_s3 + $0x178] sm:$0xff]  ;;  %v311_v49 = vld [vmem:[%s3541_s16 + $0x60] sm:$0xff] }
  0x24   : > { %3047 = vmatmul.msk.f32.gmra.mxu1 %vm892_vm1, %v3636_v58  ;;  %3055 = vmatmul.msk.f32.gmra.mxu2 %vm892_vm1, %v3638_v59  ;;  %v557_v0 = vmul.f32 %v3533_v5, %v308_v55  ;;  %v627_v31 = vadd.f32 %v3546_v7, %v570_v19  ;;  %v572_v37 = vmul.f32 %v3533_v5, %v323_v25  ;;  %v3225_v46 = vld [vmem:[%s5215_s3 + $0x1f8] sm:$0xff] }
  0x25   : > { %1724 = vmatpush.msrb.mxu0 %v3184_v2  ;;  %1247 = vmatpush.msrb.mxu2 %v3104_v3  ;;  %v650_v2 = vadd.f32 %v3546_v7, %v593_v54  ;;  %v3100_v3 = vld [vmem:[%s5215_s3 + $0x180] sm:$0xff]  ;;  %v680_v4 = vmax.f32 %v626_v60, 0.0  ;;  %v692_v6 = vmax.f32 %v638_v61, 0.0  ;;  %v596_v47 = vmul.f32 %v3533_v5, %v347_v35 }
  0x26   : > { %3063 = vmatmul.msk.f32.gmra.mxu3 %vm892_vm1, %v3651_v1  ;;  %1119 = vmatpush.msrb.mxu1 %v879_v8  ;;  %v3777_v8 = vmax.f32 %v612_v62, 0.0  ;;  %v560_v61 = vmul.f32 %v3533_v5, %v311_v49  ;;  %v5219_v49 = vmov 0.0  }
  0x27   : > { %1562 = vmatpush.msrb.mxu3 %v3142_v11  ;;  %1725 = vmatpush.msrb.mxu0 %v3183_v12  ;;  %v333_v11 = vld [vmem:[%s3541_s16 + $0x110] sm:$0xff]  ;;  %v614_v12 = vadd.f32 %v3546_v7, %v557_v0  ;;  %v3798_v21 = vsel %vm431_vm0, %v680_v4, 0.0  ;;  %v3802_v22 = vsel %vm431_vm0, %v692_v6, 0.0  ;;  %v653_v62 = vadd.f32 %v3546_v7, %v596_v47  ;;  %v324_v4 = vld [vmem:[%s3541_s16 + $0xc8] sm:$0xff] }
  0x28   : > { %1248 = vmatpush.msrb.mxu2 %v3103_v17  ;;  %1120 = vmatpush.msrb.mxu1 %v878_v18  ;;  %v704_v17 = vmax.f32 %v650_v2, 0.0  ;;  %v345_v18 = vld [vmem:[%s3541_s16 + $0x170] sm:$0xff]  ;;  %5260 = vst [vmem:[#allocation6_spill] sm:$0xff] %v3798_v21  ;;  %v336_v6 = vld [vmem:[%s3541_s16 + $0x128] sm:$0xff]  ;;  %v617_v10 = vadd.f32 %v3546_v7, %v560_v61  ;;  %v1403_v47 = vrot.slane %v3622_v51, 1 }
  0x29   : > { %3039 = vmatmul.msk.f32.gmra.mxu0 %vm892_vm1, %v3675_v15  ;;  %1563 = vmatpush.msrb.mxu3 %v3141_v20  ;;  %v582_v20 = vmul.f32 %v3533_v5, %v333_v11  ;;  %v3345_v11 = vld [vmem:[%s5215_s3 + $0x238] sm:$0xff] }
  0x2a   : > { %1726 = vmatpush.msrb.mxu0 %v3182_v23  ;;  %1249 = vmatpush.msrb.mxu2 %v3102_v24  ;;  %v668_v23 = vmax.f32 %v614_v12, 0.0  ;;  %v594_v24 = vmul.f32 %v3533_v5, %v345_v18  ;;  %v707_v12 = vmax.f32 %v653_v62, 0.0  ;;  %v671_v19 = vmax.f32 %v617_v10, 0.0  ;;  %v3304_v62 = vld [vmem:[%s5215_s3 + $0x170] sm:$0xff] }
  0x2b   : > { %1564 = vmatpush.msrb.mxu3 %v3140_v27  ;;  %1121 = vmatpush.msrb.mxu1 %v877_v28  ;;  %v309_v27 = vld [vmem:[%s3541_s16 + $0x50] sm:$0xff]  ;;  %v3812_v28 = vsel %vm431_vm0, %v704_v17, 0.0  ;;  %v639_v32 = vadd.f32 %v3546_v7, %v582_v20 }
  0x2c   : > { %3048 = vmatmul.msk.f32.gmra.mxu1 %vm892_vm1, %v3707_v29  ;;  %3056 = vmatmul.msk.f32.gmra.mxu2 %vm892_vm1, %v3711_v30  ;;  %v558_v41 = vmul.f32 %v3533_v5, %v309_v27  ;;  %v3831_v42 = vsel %vm431_vm0, %v668_v23, 0.0  ;;  %v651_v43 = vadd.f32 %v3546_v7, %v594_v24  ;;  %v312_v23 = vld [vmem:[%s3541_s16 + $0x68] sm:$0xff]  ;;  %v3889_v24 = vsel %vm431_vm0, %v707_v12, 0.0  ;;  %v3344_v12 = vld [vmem:[%s5215_s3 + $0x230] sm:$0xff] }
  0x2d   : > { %1727 = vmatpush.msrb.mxu0 %v3181_v38  ;;  %1250 = vmatpush.msrb.mxu2 %v3101_v44  ;;  %v584_v38 = vmul.f32 %v3533_v5, %v335_v26  ;;  %v3178_v44 = vld [vmem:[%s5215_s3 + $0x100] sm:$0xff]  ;;  %v561_v27 = vmul.f32 %v3533_v5, %v312_v23 }
  0x2e   : > { %3064 = vmatmul.msk.f32.gmra.mxu3 %vm892_vm1, %v3724_v39  ;;  %1122 = vmatpush.msrb.mxu1 %v876_v53  ;;  %v629_v53 = vadd.f32 %v3546_v7, %v572_v37  ;;  %v615_v55 = vadd.f32 %v3546_v7, %v558_v41  ;;  %v3854_v60 = vmax.f32 %v651_v43, 0.0  ;;  %v304_v37 = vld [vmem:[%s3541_s16 + $0x28] sm:$0x3] }
  0x2f   : > { %1565 = vmatpush.msrb.mxu3 %v3139_v50  ;;  %1728 = vmatpush.msrb.mxu0 %v3180_v52  ;;  %v3845_v50 = vmax.f32 %v627_v31, 0.0  ;;  %v3847_v52 = vmax.f32 %v639_v32, 0.0  ;;  %v641_v54 = vadd.f32 %v3546_v7, %v584_v38  ;;  %v3902_v31 = vsel %vm431_vm0, %v671_v19, 0.0 }
  0x30   : > { %1251 = vmatpush.msrb.mxu2 %v3100_v3  ;;  %1123 = vmatpush.msrb.mxu1 %v875_v16  ;;  %v683_v0 = vmax.f32 %v629_v53, 0.0  ;;  %v3862_v3 = vmax.f32 %v615_v55, 0.0  ;;  %v585_v16 = vmul.f32 %v3533_v5, %v336_v6  ;;  %5263 = vst [vmem:[#allocation9_spill] sm:$0xff] %v3902_v31  ;;  %v618_v38 = vadd.f32 %v3546_v7, %v561_v27 }
  0x31   : > { %3040 = vmatmul.msk.f32.gmra.mxu0 %vm892_vm1, %v3743_v48  ;;  %1566 = vmatpush.msrb.mxu3 %v3138_v13  ;;  %5261 = vst [vmem:[#allocation7_spill] sm:$0xff] %v3845_v50  ;;  %v695_v2 = vmax.f32 %v641_v54, 0.0  ;;  %v348_v13 = vld [vmem:[%s3541_s16 + $0x188] sm:$0xff]  ;;  %v553_v43 = vmul.f32 %v3533_v5, %v304_v37  ;;  %v3932_v53 = vrot.slane %v5219_v49, 1  ;;  %v1404_v54 = vrot.slane %v3675_v15, 1 }
  0x32   : > { %1729 = vmatpush.msrb.mxu0 %v3179_v14  ;;  %2186 = vmatpush.msra.mxu2 %v3265_v36  ;;  %v573_v14 = vmul.f32 %v3533_v5, %v324_v4  ;;  %v3877_v17 = vsel %vm431_vm0, %v683_v0, 0.0  ;;  %v597_v20 = vmul.f32 %v3533_v5, %v348_v13  ;;  %v642_v26 = vadd.f32 %v3546_v7, %v585_v16  ;;  %v3224_v0 = vld [vmem:[%s5215_s3 + $0x1f0] sm:$0xff]  ;;  %v307_v4 = vld [vmem:[%s3541_s16 + $0x40] sm:$0x3] }
  0x33   : > { %2349 = vmatpush.msra.mxu3 %v3305_v45  ;;  %1887 = vmatpush.msra.mxu1 %v3225_v46  ;;  %5262 = vst [vmem:[#allocation8_spill] sm:$0xff] %v3877_v17  ;;  %v3881_v18 = vsel %vm431_vm0, %v695_v2, 0.0  ;;  %v610_v45 = vadd.f32 %v3546_v7, %v553_v43  ;;  %v3926_v46 = vadd.s32 16, %v3549_v9  ;;  %v3264_v9 = vld [vmem:[%s5215_s3 + $0xb0] sm:$0xff]  ;;  %v1405_v61 = vsel %vm1397_vm2, %v1403_v47, %v1404_v54  ;;  %v3263_v47 = vld [vmem:[%s5215_s3 + $0xa8] sm:$0xff] }
  0x34   : > { %3049 = vmatmul.msk.f32.gmra.mxu1 %vm892_vm1, %v3757_v56  ;;  %3057 = vmatmul.msk.f32.gmra.mxu2 %vm892_vm1, %v3759_v57  ;;  %v630_v25 = vadd.f32 %v3546_v7, %v573_v14  ;;  %v654_v32 = vadd.f32 %v3546_v7, %v597_v20  ;;  %v3907_v36 = vmax.f32 %v642_v26, 0.0  ;;  %5266 = vst [vmem:[#allocation12_spill] sm:$0xff] %v3932_v53  ;;  %v1408_v14 = vrot.slane %v3743_v48, 1 }
  0x35   : > { %1730 = vmatpush.msrb.mxu0 %v3178_v44  ;;  %v3920_v44 = vmax.f32 %v618_v38, 0.0  ;;  %v664_v55 = vmax.f32 %v610_v45, 0.0  ;;  %vm490_vm3 = vcmp.le.s32.totalorder %v3926_v46, 16  ;;  %2187 = vmatpush.msra.mxu2 %v3264_v9  ;;  %v556_v10 = vmul.f32 %v3533_v5, %v307_v4 }
  0x36   : > { %3065 = vmatmul.msk.f32.gmra.mxu3 %vm892_vm1, %v3766_v63  ;;  %v3905_v35 = vmax.f32 %v630_v25, 0.0  ;;  %v3913_v41 = vmax.f32 %v654_v32, 0.0  ;;  %1888 = vmatpush.msra.mxu1 %v3224_v0  ;;  %v1409_v16 = vrot.slane %v3777_v8, 1  ;;  %v310_v25 = vld [vmem:[%s3541_s16 + $0x58] sm:$0x3]  ;;  %v1413_v38 = vrot.slane %v3831_v42, 1 }
  0x37   : > { %2512 = vmatpush.msra.mxu0 %v3345_v11  ;;  %5265 = vst [vmem:[#allocation11_spill] sm:$0xff] %v3920_v44  ;;  %v3953_v2 = vsel %vm490_vm3, %v664_v55, 0.0  ;;  %2350 = vmatpush.msra.mxu3 %v3304_v62  ;;  %v613_v13 = vadd.f32 %v3546_v7, %v556_v10  ;;  %v559_v27 = vmul.f32 %v3533_v5, %v310_v25  ;;  %v1414_v43 = vrot.slane %v3862_v3, 1  ;;  %v3303_v55 = vld [vmem:[%s5215_s3 + $0x168] sm:$0xff]  ;;  %v313_v62 = vld [vmem:[%s3541_s16 + $0x70] sm:$0x3] }
  0x38   : > { %5264 = vst [vmem:[#allocation10_spill] sm:$0xff] %v3905_v35  ;;  %v1406_v6 = vrot.slane %v3953_v2, 1  ;;  %v3978_v20 = vsel %vm1397_vm2, %v1408_v14, %v1409_v16  ;;  %2188 = vmatpush.msra.mxu2 %v3263_v47  ;;  %v562_v4 = vmul.f32 %v3533_v5, %v313_v62  ;;  %v3343_v10 = vld [vmem:[%s5215_s3 + $0x228] sm:$0xff]  ;;  %v1424_v47 = vrot.slane %v3636_v58, 1 }
  0x39   : > { %3041 = vmatmul.msk.f32.gmra.mxu0 %vm892_vm1, %v3777_v8  ;;  %v667_v19 = vmax.f32 %v613_v13, 0.0  ;;  %v616_v37 = vadd.f32 %v3546_v7, %v559_v27  ;;  %2351 = vmatpush.msra.mxu3 %v3303_v55  ;;  %v1419_v13 = vrot.slane %v3920_v44, 1  ;;  %v316_v25 = vld [vmem:[%s3541_s16 + $0x88] sm:$0x3] }
  0x3a   : > { %v1407_v11 = vsel %vm1397_vm2, %v1404_v54, %v1406_v6  ;;  %2513 = vmatpush.msra.mxu0 %v3344_v12  ;;  %v4012_v54 = vsel %vm1397_vm2, %v1413_v38, %v1414_v43  ;;  %v1418_v12 = vrot.slane %v3902_v31, 1  ;;  %v565_v27 = vmul.f32 %v3533_v5, %v316_v25 }
  0x3b   : > { %v3982_v23 = vsel %vm490_vm3, %v667_v19, 0.0  ;;  %v670_v45 = vmax.f32 %v616_v37, 0.0 }
  0x3c   : > { %3050 = vmatmul.msk.f32.gmra.mxu1 %vm892_vm1, %v3798_v21  ;;  %3058 = vmatmul.msk.f32.gmra.mxu2 %vm892_vm1, %v3802_v22  ;;  %v1411_v26 = vrot.slane %v3982_v23, 1  ;;  %v622_v38 = vadd.f32 %v3546_v7, %v565_v27 }
  0x3d   : > { %v4019_v9 = vsel %vm490_vm3, %v670_v45, 0.0  ;;  %2514 = vmatpush.msra.mxu0 %v3343_v10  ;;  %v1423_v45 = vrot.slane %v3582_v33, 1 }
  0x3e   : > { %3066 = vmatmul.msk.f32.gmra.mxu3 %vm892_vm1, %v3812_v28  ;;  %v3995_v32 = vsel %vm1397_vm2, %v1409_v16, %v1411_v26  ;;  %v1416_v0 = vrot.slane %v4019_v9, 1  ;;  %v4053_v16 = vsel %vm1397_vm2, %v1418_v12, %v1419_v13  ;;  %v676_v55 = vmax.f32 %v622_v38, 0.0  ;;  %v3222_v12 = vld [vmem:[%s5215_s3 + $0x1e0] sm:$0xff] }
  0x3f   : > { %5268 = vst [vmem:[#allocation14_spill] sm:$0xff] %v4053_v16 }
  0x40   : > { %v4036_v6 = vsel %vm1397_vm2, %v1414_v43, %v1416_v0  ;;  %v4092_v0 = vsel %vm1397_vm2, %v1423_v45, %v1424_v47 }
  0x41   : > { %3042 = vmatmul.msk.f32.gmra.mxu0 %vm892_vm1, %v3831_v42  ;;  %5267 = vst [vmem:[#allocation13_spill] sm:$0xff] %v4036_v6 }
  0x42   : > { %5271 = vst [vmem:[#allocation17_spill] sm:$0xff] %v4092_v0 }
  0x44   : > { %3051 = vmatmul.msk.f32.gmra.mxu1 %vm892_vm1, %v3845_v50  ;;  %3059 = vmatmul.msk.f32.gmra.mxu2 %vm892_vm1, %v3847_v52 }
  0x46   : > { %3067 = vmatmul.msk.f32.gmra.mxu3 %vm892_vm1, %v3854_v60 }
  0x49   : > { %3043 = vmatmul.msk.f32.gmra.mxu0 %vm892_vm1, %v3862_v3 }
  0x4c   : > { %3052 = vmatmul.msk.f32.gmra.mxu1 %vm892_vm1, %v3877_v17  ;;  %3060 = vmatmul.msk.f32.gmra.mxu2 %vm892_vm1, %v3881_v18 }
  0x4e   : > { %3068 = vmatmul.msk.f32.gmra.mxu3 %vm892_vm1, %v3889_v24 }
  0x51   : > { %3044 = vmatmul.msk.f32.gmra.mxu0 %vm892_vm1, %v3902_v31 }
  0x54   : > { %3053 = vmatmul.msk.f32.gmra.mxu1 %vm892_vm1, %v3905_v35  ;;  %3061 = vmatmul.msk.f32.gmra.mxu2 %vm892_vm1, %v3907_v36 }
  0x56   : > { %3069 = vmatmul.msk.f32.gmra.mxu3 %vm892_vm1, %v3913_v41 }
  0x59   : > { %3045 = vmatmul.msk.f32.gmra.mxu0 %vm892_vm1, %v3920_v44 }
  0x5c   : > { %1124 = vmatmul.f32.vlgmr.msrb.gmra.mxu1 %v5219_v49  ;;  %3108 = vmatmul.msk.f32.vlgmr.msrb.gmra.mxu2 %vm892_vm1, %v3743_v48 }
  0x5e   : > { %3146 = vmatmul.msk.f32.vlgmr.msrb.gmra.mxu3 %vm892_vm1, %v3932_v53 }
  0x61   : > { %3186 = vmatmul.msk.f32.vlgmr.msrb.gmra.mxu0 %vm892_vm1, %v1405_v61 }
  0x64   : > { %1127 = vmatmul.f32.gmra.mxu1 %v5219_v49  ;;  %3109 = vmatmul.msk.f32.gmra.mxu2 %vm892_vm1, %v3777_v8 }
  0x66   : > { %3147 = vmatmul.msk.f32.gmra.mxu3 %vm892_vm1, %v3932_v53 }
  0x69   : > { %3187 = vmatmul.msk.f32.gmra.mxu0 %vm892_vm1, %v1407_v11 }
  0x6c   : > { %3070 = vmatmul.msk.f32.gmra.mxu1 %vm892_vm1, %v3622_v51  ;;  %3110 = vmatmul.msk.f32.gmra.mxu2 %vm892_vm1, %v3831_v42 }
  0x6e   : > { %3148 = vmatmul.msk.f32.gmra.mxu3 %vm892_vm1, %v1405_v61  ;;  %v3223_v61 = vld [vmem:[%s5215_s3 + $0x1e8] sm:$0xff] }
  0x6f   : > { %1889 = vmatpush.msra.mxu1 %v3223_v61  ;;  %v3262_v61 = vld [vmem:[%s5215_s3 + $0xa0] sm:$0xff] }
  0x70   : > { %2189 = vmatpush.msra.mxu2 %v3262_v61 }
  0x71   : > { %3188 = vmatmul.msk.f32.gmra.mxu0 %vm892_vm1, %v3978_v20  ;;  %1890 = vmatpush.msra.mxu1 %v3222_v12 }
  0x74   : > { %3071 = vmatmul.msk.f32.gmra.mxu1 %vm892_vm1, %v3675_v15  ;;  %3111 = vmatmul.msk.f32.gmra.mxu2 %vm892_vm1, %v3862_v3 }
  0x76   : > { %3149 = vmatmul.msk.f32.gmra.mxu3 %vm892_vm1, %v1407_v11  ;;  %v619_v11 = vadd.f32 %v3546_v7, %v562_v4  ;;  %v3302_v4 = vld [vmem:[%s5215_s3 + $0x160] sm:$0xff] }
  0x77   : > { %2352 = vmatpush.msra.mxu3 %v3302_v4 }
  0x78   : > { %v673_v14 = vmax.f32 %v619_v11, 0.0  ;;  %v4101_v11 = vsel %vm490_vm3, %v676_v55, 0.0  ;;  %v3342_v55 = vld [vmem:[%s5215_s3 + $0x220] sm:$0xff] }
  0x79   : > { %3189 = vmatmul.msk.f32.gmra.mxu0 %vm892_vm1, %v3995_v32  ;;  %5272 = vst [vmem:[#allocation18_spill] sm:$0xff] %v4101_v11 }
  0x7a   : > { %v4057_v19 = vsel %vm490_vm3, %v673_v14, 0.0  ;;  %2515 = vmatpush.msra.mxu0 %v3342_v55 }
  0x7b   : > { %5269 = vst [vmem:[#allocation15_spill] sm:$0xff] %v4057_v19  ;;  %v1421_v26 = vrot.slane %v4057_v19, 1 }
  0x7c   : > { %3072 = vmatmul.msk.f32.gmra.mxu1 %vm892_vm1, %v3743_v48  ;;  %3112 = vmatmul.msk.f32.gmra.mxu2 %vm892_vm1, %v3902_v31 }
  0x7d   : > { %v4071_v37 = vsel %vm1397_vm2, %v1419_v13, %v1421_v26  ;;  %v319_v13 = vld [vmem:[%s3541_s16 + $0xa0] sm:$0x3]  ;;  %v1426_v26 = vrot.slane %v4101_v11, 1 }
  0x7e   : > { %3150 = vmatmul.msk.f32.gmra.mxu3 %vm892_vm1, %v3978_v20  ;;  %5270 = vst [vmem:[#allocation16_spill] sm:$0xff] %v4071_v37  ;;  %v568_v27 = vmul.f32 %v3533_v5, %v319_v13 }
  0x7f   : > { %v4124_v45 = vsel %vm1397_vm2, %v1424_v47, %v1426_v26  ;;  %v1428_v47 = vrot.slane %v3707_v29, 1  ;;  %v1429_v26 = vrot.slane %v3757_v56, 1 }
  0x80   : > { %5274 = vst [vmem:[#allocation20_spill] sm:$0xff] %v4124_v45  ;;  %v625_v4 = vadd.f32 %v3546_v7, %v568_v27 }
  0x81   : > { %3190 = vmatmul.msk.f32.gmra.mxu0 %vm892_vm1, %v4012_v54  ;;  %v4149_v55 = vsel %vm1397_vm2, %v1428_v47, %v1429_v26 }
  0x82   : > { %v679_v49 = vmax.f32 %v625_v4, 0.0  ;;  %5276 = vst [vmem:[#allocation22_spill] sm:$0xff] %v4149_v55  ;;  %v322_v4 = vld [vmem:[%s3541_s16 + $0xb8] sm:$0x3] }
  0x84   : > { %3073 = vmatmul.msk.f32.gmra.mxu1 %vm892_vm1, %v3777_v8  ;;  %3113 = vmatmul.msk.f32.gmra.mxu2 %vm892_vm1, %v3920_v44 }
  0x86   : > { %3151 = vmatmul.msk.f32.gmra.mxu3 %vm892_vm1, %v3995_v32 }
  0x89   : > { %3191 = vmatmul.msk.f32.gmra.mxu0 %vm892_vm1, %v4036_v6 }
  0x8c   : > { %3074 = vmatmul.msk.f32.gmra.mxu1 %vm892_vm1, %v3831_v42  ;;  %3114 = vmatmul.msk.f32.gmra.mxu2 %vm892_vm1, %v3582_v33 }
  0x8e   : > { %3152 = vmatmul.msk.f32.gmra.mxu3 %vm892_vm1, %v4012_v54 }
  0x91   : > { %3192 = vmatmul.msk.f32.gmra.mxu0 %vm892_vm1, %v4053_v16 }
  0x94   : > { %3075 = vmatmul.msk.f32.gmra.mxu1 %vm892_vm1, %v3862_v3  ;;  %3115 = vmatmul.msk.f32.gmra.mxu2 %vm892_vm1, %v3636_v58 }
  0x96   : > { %3153 = vmatmul.msk.f32.gmra.mxu3 %vm892_vm1, %v4036_v6 }
  0x99   : > { %v4074_v43 = vpop.f32.mrf.mxu1  ;;  %3193 = vmatmul.msk.f32.gmra.mxu0 %vm892_vm1, %v4071_v37 }
  0x9c   : > { %3076 = vmatmul.msk.f32.gmra.mxu1 %vm892_vm1, %v3902_v31  ;;  %3116 = vmatmul.msk.f32.gmra.mxu2 %vm892_vm1, %v3707_v29 }
  0x9e   : > { %3154 = vmatmul.msk.f32.gmra.mxu3 %vm892_vm1, %v4053_v16  ;;  %v4089_v62 = vpop.f32.mrf.mxu0 }
  0x9f   : > { %v4097_v10 = vpop.f32.mrf.mxu2 }
  0xa1   : > { %v4107_v14 = vpop.f32.mrf.mxu1  ;;  %v4109_v25 = vpop.f32.mrf.mxu3  ;;  %3194 = vmatmul.msk.f32.gmra.mxu0 %vm892_vm1, %v4092_v0 }
  0xa2   : > { %5273 = vst [vmem:[#allocation19_spill] sm:$0xff] %v4109_v25 }
  0xa4   : > { %3077 = vmatmul.msk.f32.gmra.mxu1 %vm892_vm1, %v3920_v44  ;;  %3117 = vmatmul.msk.f32.gmra.mxu2 %vm892_vm1, %v3757_v56 }
  0xa6   : > { %3155 = vmatmul.msk.f32.gmra.mxu3 %vm892_vm1, %v4071_v37  ;;  %v4121_v38 = vpop.f32.mrf.mxu0 }
  0xa7   : > { %v4129_v61 = vpop.f32.mrf.mxu2 }
  0xa9   : > { %v4132_v12 = vpop.f32.mrf.mxu1  ;;  %v4134_v13 = vpop.f32.mrf.mxu3  ;;  %3195 = vmatmul.msk.f32.gmra.mxu0 %vm892_vm1, %v4124_v45 }
  0xaa   : > { %5275 = vst [vmem:[#allocation21_spill] sm:$0xff] %v4134_v13  ;;  %v4155_v13 = vsel %vm490_vm3, %v679_v49, 0.0 }
  0xab   : > { %5277 = vst [vmem:[#allocation23_spill] sm:$0xff] %v4155_v13 }
  0xac   : > { %3078 = vmatmul.msk.f32.gmra.mxu1 %vm892_vm1, %v3582_v33  ;;  %3118 = vmatmul.msk.f32.gmra.mxu2 %vm892_vm1, %v3798_v21  ;;  %v571_v33 = vmul.f32 %v3533_v5, %v322_v4 }
  0xae   : > { %3156 = vmatmul.msk.f32.gmra.mxu3 %vm892_vm1, %v4092_v0  ;;  %v4146_v27 = vpop.f32.mrf.mxu0  ;;  %v1431_v0 = vrot.slane %v4155_v13, 1  ;;  %v628_v13 = vadd.f32 %v3546_v7, %v571_v33  ;;  %v3261_v33 = vld [vmem:[%s5215_s3 + $0x98] sm:$0xff] }
  0xaf   : > { %v4151_v53 = vpop.f32.mrf.mxu2  ;;  %2190 = vmatpush.msra.mxu2 %v3261_v33  ;;  %v325_v33 = vld [vmem:[%s3541_s16 + $0xd0] sm:$0x3] }
  0xb0   : > { %v4175_v47 = vsel %vm1397_vm2, %v1429_v26, %v1431_v0  ;;  %v682_v19 = vmax.f32 %v628_v13, 0.0  ;;  %v3301_v13 = vld [vmem:[%s5215_s3 + $0x158] sm:$0xff]  ;;  %v574_v44 = vmul.f32 %v3533_v5, %v325_v33 }
  0xb1   : > { %v4158_v25 = vpop.f32.mrf.mxu1  ;;  %v4160_v11 = vpop.f32.mrf.mxu3  ;;  %3196 = vmatmul.msk.f32.gmra.mxu0 %vm892_vm1, %v4149_v55  ;;  %5279 = vst [vmem:[#allocation25_spill] sm:$0xff] %v4175_v47  ;;  %2353 = vmatpush.msra.mxu3 %v3301_v13 }
  0xb2   : > { %5278 = vst [vmem:[#allocation24_spill] sm:$0xff] %v4160_v11  ;;  %v631_v33 = vadd.f32 %v3546_v7, %v574_v44 }
  0xb4   : > { %3079 = vmatmul.msk.f32.gmra.mxu1 %vm892_vm1, %v3636_v58  ;;  %3119 = vmatmul.msk.f32.gmra.mxu2 %vm892_vm1, %v3845_v50  ;;  %v1433_v58 = vrot.slane %v3798_v21, 1 }
  0xb6   : > { %3157 = vmatmul.msk.f32.gmra.mxu3 %vm892_vm1, %v4124_v45  ;;  %v4172_v49 = vpop.f32.mrf.mxu0  ;;  %v1434_v45 = vrot.slane %v3845_v50, 1 }
  0xb7   : > { %v4177_v11 = vpop.f32.mrf.mxu2 }
  0xb8   : > { %5280 = vst [vmem:[#allocation26_spill] sm:$0xff] %v4177_v11  ;;  %v4200_v26 = vsel %vm1397_vm2, %v1433_v58, %v1434_v45 }
  0xb9   : > { %v4180_v37 = vpop.f32.mrf.mxu1  ;;  %v4182_v4 = vpop.f32.mrf.mxu3  ;;  %3197 = vmatmul.msk.f32.gmra.mxu0 %vm892_vm1, %v4175_v47  ;;  %5282 = vst [vmem:[#allocation28_spill] sm:$0xff] %v4200_v26 }
  0xba   : > { %5281 = vst [vmem:[#allocation27_spill] sm:$0xff] %v4182_v4 }
  0xbc   : > { %3080 = vmatmul.msk.f32.gmra.mxu1 %vm892_vm1, %v3707_v29  ;;  %3120 = vmatmul.msk.f32.gmra.mxu2 %vm892_vm1, %v3877_v17  ;;  %v4209_v29 = vsel %vm490_vm3, %v682_v19, 0.0 }
  0xbd   : > { %5284 = vst [vmem:[#allocation30_spill] sm:$0xff] %v4209_v29 }
  0xbe   : > { %3158 = vmatmul.msk.f32.gmra.mxu3 %vm892_vm1, %v4149_v55  ;;  %v4197_v0 = vpop.f32.mrf.mxu0  ;;  %v3221_v55 = vld [vmem:[%s5215_s3 + $0x1d8] sm:$0xff] }
  0xbf   : > { %v4205_v4 = vpop.f32.mrf.mxu2  ;;  %1891 = vmatpush.msra.mxu1 %v3221_v55  ;;  %v3341_v55 = vld [vmem:[%s5215_s3 + $0x218] sm:$0xff] }
  0xc0   : > { %5283 = vst [vmem:[#allocation29_spill] sm:$0xff] %v4205_v4  ;;  %v1436_v4 = vrot.slane %v4209_v29, 1  ;;  %2516 = vmatpush.msra.mxu0 %v3341_v55 }
  0xc1   : > { %v4215_v16 = vpop.f32.mrf.mxu1  ;;  %v4217_v58 = vpop.f32.mrf.mxu3  ;;  %3198 = vmatmul.msk.f32.gmra.mxu0 %vm892_vm1, %v4200_v26 }
  0xc2   : > { %5285 = vst [vmem:[#allocation31_spill] sm:$0xff] %v4217_v58  ;;  %v4232_v13 = vsel %vm1397_vm2, %v1434_v45, %v1436_v4  ;;  %v1438_v45 = vrot.slane %v3877_v17, 1  ;;  %v1439_v4 = vrot.slane %v3905_v35, 1 }
  0xc3   : > { %5286 = vst [vmem:[#allocation32_spill] sm:$0xff] %v4232_v13 }
  0xc4   : > { %3081 = vmatmul.msk.f32.gmra.mxu1 %vm892_vm1, %v3757_v56  ;;  %3121 = vmatmul.msk.f32.gmra.mxu2 %vm892_vm1, %v3905_v35  ;;  %v4257_v55 = vsel %vm1397_vm2, %v1438_v45, %v1439_v4 }
  0xc5   : > { %5289 = vst [vmem:[#allocation35_spill] sm:$0xff] %v4257_v55 }
  0xc6   : > { %3159 = vmatmul.msk.f32.gmra.mxu3 %vm892_vm1, %v4175_v47  ;;  %v4229_v19 = vpop.f32.mrf.mxu0  ;;  %v685_v47 = vmax.f32 %v631_v33, 0.0  ;;  %v328_v33 = vld [vmem:[%s3541_s16 + $0xe8] sm:$0x3] }
  0xc7   : > { %v4237_v58 = vpop.f32.mrf.mxu2  ;;  %v577_v11 = vmul.f32 %v3533_v5, %v328_v33  ;;  %v1443_v33 = vrot.slane %v3586_v34, 1 }
  0xc8   : > { %5287 = vst [vmem:[#allocation33_spill] sm:$0xff] %v4237_v58  ;;  %v4263_v58 = vsel %vm490_vm3, %v685_v47, 0.0 }
  0xc9   : > { %v4240_v29 = vpop.f32.mrf.mxu1  ;;  %v4242_v56 = vpop.f32.mrf.mxu3  ;;  %3199 = vmatmul.msk.f32.gmra.mxu0 %vm892_vm1, %v4232_v13  ;;  %5291 = vst [vmem:[#allocation37_spill] sm:$0xff] %v4263_v58 }
  0xca   : > { %5288 = vst [vmem:[#allocation34_spill] sm:$0xff] %v4242_v56 }
  0xcc   : > { %3082 = vmatmul.msk.f32.gmra.mxu1 %vm892_vm1, %v3798_v21  ;;  %3122 = vmatmul.msk.f32.gmra.mxu2 %vm892_vm1, %v3586_v34 }
  0xce   : > { %3160 = vmatmul.msk.f32.gmra.mxu3 %vm892_vm1, %v4200_v26  ;;  %v4254_v44 = vpop.f32.mrf.mxu0  ;;  %v1441_v26 = vrot.slane %v4263_v58, 1  ;;  %v634_v58 = vadd.f32 %v3546_v7, %v577_v11  ;;  %v3260_v7 = vld [vmem:[%s5215_s3 + $0x90] sm:$0xff] }
  0xcf   : > { %v4259_v56 = vpop.f32.mrf.mxu2  ;;  %2191 = vmatpush.msra.mxu2 %v3260_v7 }
  0xd0   : > { %5290 = vst [vmem:[#allocation36_spill] sm:$0xff] %v4259_v56  ;;  %v4283_v45 = vsel %vm1397_vm2, %v1439_v4, %v1441_v26 }
  0xd1   : > { %v4266_v31 = vpop.f32.mrf.mxu1  ;;  %v4268_v21 = vpop.f32.mrf.mxu3  ;;  %3200 = vmatmul.msk.f32.gmra.mxu0 %vm892_vm1, %v4257_v55  ;;  %5293 = vst [vmem:[#allocation39_spill] sm:$0xff] %v4283_v45 }
  0xd2   : > { %5292 = vst [vmem:[#allocation38_spill] sm:$0xff] %v4268_v21 }
  0xd4   : > { %3083 = vmatmul.msk.f32.gmra.mxu1 %vm892_vm1, %v3845_v50  ;;  %3123 = vmatmul.msk.f32.gmra.mxu2 %vm892_vm1, %v3638_v59  ;;  %v688_v50 = vmax.f32 %v634_v58, 0.0  ;;  %v3300_v58 = vld [vmem:[%s5215_s3 + $0x150] sm:$0xff] }
  0xd5   : > { %2354 = vmatpush.msra.mxu3 %v3300_v58 }
  0xd6   : > { %3161 = vmatmul.msk.f32.gmra.mxu3 %vm892_vm1, %v4232_v13  ;;  %v4280_v47 = vpop.f32.mrf.mxu0  ;;  %v1444_v13 = vrot.slane %v3638_v59, 1 }
  0xd7   : > { %v4285_v21 = vpop.f32.mrf.mxu2 }
  0xd8   : > { %5294 = vst [vmem:[#allocation40_spill] sm:$0xff] %v4285_v21  ;;  %v4305_v4 = vsel %vm1397_vm2, %v1443_v33, %v1444_v13  ;;  %v331_v21 = vld [vmem:[%s3541_s16 + $0x100] sm:$0x3] }
  0xd9   : > { %v4288_v56 = vpop.f32.mrf.mxu3  ;;  %v1125_v5 = vpop.f32.mrf.mxu1  ;;  %3201 = vmatmul.msk.f32.gmra.mxu0 %vm892_vm1, %v4283_v45  ;;  %5296 = vst [vmem:[#allocation42_spill] sm:$0xff] %v4305_v4 }
  0xda   : > { %5295 = vst [vmem:[#allocation41_spill] sm:$0xff] %v4288_v56  ;;  %v1126_v11 = vadd.f32 %v1125_v5, %v4089_v62  ;;  %v3220_v62 = vld [vmem:[%s5215_s3 + $0x1d0] sm:$0xff] }
  0xdb   : > { %1892 = vmatpush.msra.mxu1 %v3220_v62  ;;  %v4345_v62 = vld [vmem:[%s5214_s2] ss:$0 sm:$0xff] }
  0xdc   : > { %3084 = vmatmul.msk.f32.gmra.mxu1 %vm892_vm1, %v3877_v17  ;;  %3124 = vmatmul.msk.f32.gmra.mxu2 %vm892_vm1, %v3711_v30  ;;  %v4312_v17 = vsel %vm490_vm3, %v688_v50, 0.0  ;;  %v4324_v50 = vld [vmem:[%s5213_s1] ss:$0 sm:$0xff] }
  0xdd   : > { %5297 = vst [vmem:[#allocation43_spill] sm:$0xff] %v4312_v17  ;;  %v1446_v6 = vrot.slane %v4312_v17, 1  ;;  %v1449_v17 = vrot.slane %v3759_v57, 1 }
  0xde   : > { %3162 = vmatmul.msk.f32.gmra.mxu3 %vm892_vm1, %v4257_v55  ;;  %v1732_v26 = vpop.f32.mrf.mxu0 }
  0xdf   : > { %v1253_v56 = vpop.f32.mrf.mxu2 }
  0xe0   : > { %v1349_v7 = vadd.f32 %v1253_v56, %v1126_v11  ;;  %v580_v56 = vmul.f32 %v4324_v50, %v331_v21  ;;  %v3340_v21 = vld [vmem:[%s5215_s3 + $0x210] sm:$0xff] }
  0xe1   : > { %v1128_v5 = vpop.f32.mrf.mxu1  ;;  %v1568_v55 = vpop.f32.mrf.mxu3  ;;  %3202 = vmatmul.msk.f32.gmra.mxu0 %vm892_vm1, %v4305_v4 }
  0xe2   : > { %v1664_v33 = vadd.f32 %v1568_v55, %v1349_v7  ;;  %v1129_v58 = vadd.f32 %v1128_v5, %v4121_v38  ;;  %v4337_v7 = vsel %vm1397_vm2, %v1444_v13, %v1446_v6  ;;  %2517 = vmatpush.msra.mxu0 %v3340_v21  ;;  %v1448_v13 = vrot.slane %v3711_v30, 1 }
  0xe4   : > { %v4327_v11 = vadd.f32 %v1732_v26, %v1664_v33  ;;  %3085 = vmatmul.msk.f32.gmra.mxu1 %vm892_vm1, %v3905_v35  ;;  %3125 = vmatmul.msk.f32.gmra.mxu2 %vm892_vm1, %v3759_v57  ;;  %v637_v33 = vadd.f32 %v4345_v62, %v580_v56 }
  0xe6   : > { %5298 = vst [vmem:[#allocation44_spill] sm:$0xff] %v4327_v11  ;;  %3163 = vmatmul.msk.f32.gmra.mxu3 %vm892_vm1, %v4283_v45  ;;  %v1735_v55 = vpop.f32.mrf.mxu0  ;;  %v691_v45 = vmax.f32 %v637_v33, 0.0  ;;  %v334_v33 = vld [vmem:[%s3541_s16 + $0x118] sm:$0x3] }
  0xe7   : > { %v1256_v26 = vpop.f32.mrf.mxu2 }
  0xe8   : > { %v1350_v38 = vadd.f32 %v1256_v26, %v1129_v58 }
  0xe9   : > { %v1131_v5 = vpop.f32.mrf.mxu1  ;;  %v1571_v11 = vpop.f32.mrf.mxu3  ;;  %3203 = vmatmul.msk.f32.gmra.mxu0 %vm892_vm1, %v4337_v7 }
  0xea   : > { %v1665_v6 = vadd.f32 %v1571_v11, %v1350_v38  ;;  %v1132_v56 = vadd.f32 %v1131_v5, %v4146_v27  ;;  %v4362_v11 = vsel %vm1397_vm2, %v1448_v13, %v1449_v17 }
  0xec   : > { %v4352_v35 = vadd.f32 %v1735_v55, %v1665_v6  ;;  %3086 = vmatmul.msk.f32.gmra.mxu1 %vm892_vm1, %v3586_v34  ;;  %3126 = vmatmul.msk.f32.gmra.mxu2 %vm892_vm1, %v3802_v22  ;;  %v4366_v55 = vsel %vm490_vm3, %v691_v45, 0.0 }
  0xed   : > { %5300 = vst [vmem:[#allocation46_spill] sm:$0xff] %v4366_v55  ;;  %v1451_v5 = vrot.slane %v4366_v55, 1 }
  0xee   : > { %5299 = vst [vmem:[#allocation45_spill] sm:$0xff] %v4352_v35  ;;  %3164 = vmatmul.msk.f32.gmra.mxu3 %vm892_vm1, %v4305_v4  ;;  %v1738_v58 = vpop.f32.mrf.mxu0  ;;  %v583_v35 = vmul.f32 %v4324_v50, %v334_v33 }
  0xef   : > { %v1259_v21 = vpop.f32.mrf.mxu2 }
  0xf0   : > { %v1351_v26 = vadd.f32 %v1259_v21, %v1132_v56  ;;  %v4383_v56 = vsel %vm1397_vm2, %v1449_v17, %v1451_v5  ;;  %v3259_v17 = vld [vmem:[%s5215_s3 + $0x88] sm:$0xff] }
  0xf1   : > { %v1134_v38 = vpop.f32.mrf.mxu1  ;;  %v1574_v6 = vpop.f32.mrf.mxu3  ;;  %3204 = vmatmul.msk.f32.gmra.mxu0 %vm892_vm1, %v4362_v11  ;;  %2192 = vmatpush.msra.mxu2 %v3259_v17 }
  0xf2   : > { %v1666_v27 = vadd.f32 %v1574_v6, %v1351_v26  ;;  %v1135_v45 = vadd.f32 %v1134_v38, %v4172_v49  ;;  %v640_v26 = vadd.f32 %v4345_v62, %v583_v35  ;;  %v1454_v49 = vrot.slane %v3847_v52, 1 }
  0xf4   : > { %v4373_v4 = vadd.f32 %v1738_v58, %v1666_v27  ;;  %3087 = vmatmul.msk.f32.gmra.mxu1 %vm892_vm1, %v3638_v59  ;;  %3127 = vmatmul.msk.f32.gmra.mxu2 %vm892_vm1, %v3847_v52  ;;  %v694_v38 = vmax.f32 %v640_v26, 0.0 }
  0xf6   : > { %5301 = vst [vmem:[#allocation47_spill] sm:$0xff] %v4373_v4  ;;  %3165 = vmatmul.msk.f32.gmra.mxu3 %vm892_vm1, %v4337_v7  ;;  %v1741_v13 = vpop.f32.mrf.mxu0  ;;  %v1453_v4 = vrot.slane %v3802_v22, 1  ;;  %v4410_v26 = vsel %vm490_vm3, %v694_v38, 0.0 }
  0xf7   : > { %v1262_v21 = vpop.f32.mrf.mxu2  ;;  %5303 = vst [vmem:[#allocation49_spill] sm:$0xff] %v4410_v26  ;;  %v1456_v17 = vrot.slane %v4410_v26, 1 }
  0xf8   : > { %v1352_v58 = vadd.f32 %v1262_v21, %v1135_v45  ;;  %v4403_v45 = vsel %vm1397_vm2, %v1453_v4, %v1454_v49 }
  0xf9   : > { %v1137_v33 = vpop.f32.mrf.mxu1  ;;  %v1577_v6 = vpop.f32.mrf.mxu3  ;;  %3205 = vmatmul.msk.f32.gmra.mxu0 %vm892_vm1, %v4383_v56 }
  0xfa   : > { %v1667_v27 = vadd.f32 %v1577_v6, %v1352_v58  ;;  %v1138_v35 = vadd.f32 %v1137_v33, %v4197_v0  ;;  %v337_v6 = vld [vmem:[%s3541_s16 + $0x130] sm:$0x3]  ;;  %v3219_v0 = vld [vmem:[%s5215_s3 + $0x1c8] sm:$0xff] }
  0xfb   : > { %1893 = vmatpush.msra.mxu1 %v3219_v0 }
  0xfc   : > { %v4390_v55 = vadd.f32 %v1741_v13, %v1667_v27  ;;  %3088 = vmatmul.msk.f32.gmra.mxu1 %vm892_vm1, %v3711_v30  ;;  %3128 = vmatmul.msk.f32.gmra.mxu2 %vm892_vm1, %v3881_v18  ;;  %v3299_v13 = vld [vmem:[%s5215_s3 + $0x148] sm:$0xff] }
  0xfd   : > { %2355 = vmatpush.msra.mxu3 %v3299_v13 }
  0xfe   : > { %5302 = vst [vmem:[#allocation48_spill] sm:$0xff] %v4390_v55  ;;  %3166 = vmatmul.msk.f32.gmra.mxu3 %vm892_vm1, %v4362_v11  ;;  %v1744_v5 = vpop.f32.mrf.mxu0  ;;  %v586_v55 = vmul.f32 %v4324_v50, %v337_v6 }
  0xff   : > { %v1265_v21 = vpop.f32.mrf.mxu2 }
 0x100   : > { %v1353_v58 = vadd.f32 %v1265_v21, %v1138_v35  ;;  %v4430_v21 = vsel %vm1397_vm2, %v1454_v49, %v1456_v17  ;;  %v643_v6 = vadd.f32 %v4345_v62, %v586_v55  ;;  %v1459_v49 = vrot.slane %v3907_v36, 1 }
 0x101   : > { %v1140_v33 = vpop.f32.mrf.mxu1  ;;  %v1580_v27 = vpop.f32.mrf.mxu3  ;;  %3206 = vmatmul.msk.f32.gmra.mxu0 %vm892_vm1, %v4403_v45 }
 0x102   : > { %v1668_v4 = vadd.f32 %v1580_v27, %v1353_v58  ;;  %v1141_v35 = vadd.f32 %v1140_v33, %v4229_v19  ;;  %v1458_v33 = vrot.slane %v3881_v18, 1  ;;  %v697_v17 = vmax.f32 %v643_v6, 0.0 }
 0x104   : > { %v4420_v38 = vadd.f32 %v1744_v5, %v1668_v4  ;;  %3089 = vmatmul.msk.f32.gmra.mxu1 %vm892_vm1, %v3759_v57  ;;  %3129 = vmatmul.msk.f32.gmra.mxu2 %vm892_vm1, %v3907_v36  ;;  %v3339_v5 = vld [vmem:[%s5215_s3 + $0x208] sm:$0xff] }
 0x105   : > { %2518 = vmatpush.msra.mxu0 %v3339_v5  ;;  %v4450_v5 = vsel %vm1397_vm2, %v1458_v33, %v1459_v49 }
 0x106   : > { %5304 = vst [vmem:[#allocation50_spill] sm:$0xff] %v4420_v38  ;;  %3167 = vmatmul.msk.f32.gmra.mxu3 %vm892_vm1, %v4383_v56  ;;  %v1747_v13 = vpop.f32.mrf.mxu0 }
 0x107   : > { %v1268_v58 = vpop.f32.mrf.mxu2 }
 0x108   : > { %v1354_v0 = vadd.f32 %v1268_v58, %v1141_v35 }
 0x109   : > { %v1143_v27 = vpop.f32.mrf.mxu1  ;;  %v1583_v4 = vpop.f32.mrf.mxu3  ;;  %3207 = vmatmul.msk.f32.gmra.mxu0 %vm892_vm1, %v4430_v21 }
 0x10a   : > { %v1669_v19 = vadd.f32 %v1583_v4, %v1354_v0  ;;  %v1144_v55 = vadd.f32 %v1143_v27, %v4254_v44  ;;  %v340_v0 = vld [vmem:[%s3541_s16 + $0x148] sm:$0x3] }
 0x10c   : > { %v4440_v38 = vadd.f32 %v1747_v13, %v1669_v19  ;;  %3090 = vmatmul.msk.f32.gmra.mxu1 %vm892_vm1, %v3802_v22  ;;  %3130 = vmatmul.msk.f32.gmra.mxu2 %vm892_vm1, %v3594_v40  ;;  %v4454_v13 = vsel %vm490_vm3, %v697_v17, 0.0 }
 0x10d   : > { %5306 = vst [vmem:[#allocation52_spill] sm:$0xff] %v4454_v13  ;;  %v1461_v27 = vrot.slane %v4454_v13, 1 }
 0x10e   : > { %5305 = vst [vmem:[#allocation51_spill] sm:$0xff] %v4440_v38  ;;  %3168 = vmatmul.msk.f32.gmra.mxu3 %vm892_vm1, %v4403_v45  ;;  %v1750_v35 = vpop.f32.mrf.mxu0  ;;  %v589_v38 = vmul.f32 %v4324_v50, %v340_v0 }
 0x10f   : > { %v1271_v58 = vpop.f32.mrf.mxu2 }
 0x110   : > { %v1355_v6 = vadd.f32 %v1271_v58, %v1144_v55  ;;  %v4471_v55 = vsel %vm1397_vm2, %v1459_v49, %v1461_v27 }
 0x111   : > { %v1146_v4 = vpop.f32.mrf.mxu1  ;;  %v1586_v19 = vpop.f32.mrf.mxu3  ;;  %3208 = vmatmul.msk.f32.gmra.mxu0 %vm892_vm1, %v4450_v5 }
 0x112   : > { %v1670_v44 = vadd.f32 %v1586_v19, %v1355_v6  ;;  %v1147_v33 = vadd.f32 %v1146_v4, %v4280_v47  ;;  %v646_v6 = vadd.f32 %v4345_v62, %v589_v38  ;;  %v1464_v47 = vrot.slane %v3651_v1, 1  ;;  %v3258_v38 = vld [vmem:[%s5215_s3 + $0x80] sm:$0xff] }
 0x113   : > { %2193 = vmatpush.msra.mxu2 %v3258_v38 }
 0x114   : > { %v4461_v26 = vadd.f32 %v1750_v35, %v1670_v44  ;;  %3091 = vmatmul.msk.f32.gmra.mxu1 %vm892_vm1, %v3847_v52  ;;  %3131 = vmatmul.msk.f32.gmra.mxu2 %vm892_vm1, %v3651_v1  ;;  %v700_v4 = vmax.f32 %v646_v6, 0.0 }
 0x116   : > { %5307 = vst [vmem:[#allocation53_spill] sm:$0xff] %v4461_v26  ;;  %3169 = vmatmul.msk.f32.gmra.mxu3 %vm892_vm1, %v4430_v21  ;;  %v1753_v17 = vpop.f32.mrf.mxu0  ;;  %v1463_v26 = vrot.slane %v3594_v40, 1  ;;  %v4498_v6 = vsel %vm490_vm3, %v700_v4, 0.0 }
 0x117   : > { %v1274_v58 = vpop.f32.mrf.mxu2  ;;  %5309 = vst [vmem:[#allocation55_spill] sm:$0xff] %v4498_v6  ;;  %v1466_v38 = vrot.slane %v4498_v6, 1 }
 0x118   : > { %v1356_v35 = vadd.f32 %v1274_v58, %v1147_v33  ;;  %v4491_v33 = vsel %vm1397_vm2, %v1463_v26, %v1464_v47 }
 0x119   : > { %v1149_v0 = vpop.f32.mrf.mxu1  ;;  %v1589_v19 = vpop.f32.mrf.mxu3  ;;  %3209 = vmatmul.msk.f32.gmra.mxu0 %vm892_vm1, %v4471_v55 }
 0x11a   : > { %v1671_v44 = vadd.f32 %v1589_v19, %v1356_v35  ;;  %v1150_v49 = vadd.f32 %v1149_v0, %v4074_v43  ;;  %v343_v19 = vld [vmem:[%s3541_s16 + $0x160] sm:$0x3] }
 0x11b   : > { %v3218_v43 = vld [vmem:[%s5215_s3 + $0x1c0] sm:$0xff] }
 0x11c   : > { %v4478_v13 = vadd.f32 %v1753_v17, %v1671_v44  ;;  %3092 = vmatmul.msk.f32.gmra.mxu1 %vm892_vm1, %v3881_v18  ;;  %3132 = vmatmul.msk.f32.gmra.mxu2 %vm892_vm1, %v3724_v39  ;;  %v3298_v17 = vld [vmem:[%s5215_s3 + $0x140] sm:$0xff] }
 0x11d   : > { %2356 = vmatpush.msra.mxu3 %v3298_v17  ;;  %1894 = vmatpush.msra.mxu1 %v3218_v43 }
 0x11e   : > { %5308 = vst [vmem:[#allocation54_spill] sm:$0xff] %v4478_v13  ;;  %3170 = vmatmul.msk.f32.gmra.mxu3 %vm892_vm1, %v4450_v5  ;;  %v1756_v27 = vpop.f32.mrf.mxu0  ;;  %v592_v13 = vmul.f32 %v4324_v50, %v343_v19 }
 0x11f   : > { %v1277_v58 = vpop.f32.mrf.mxu2 }
 0x120   : > { %v1357_v35 = vadd.f32 %v1277_v58, %v1150_v49  ;;  %v4518_v58 = vsel %vm1397_vm2, %v1464_v47, %v1466_v38  ;;  %v649_v19 = vadd.f32 %v4345_v62, %v592_v13  ;;  %v1469_v47 = vrot.slane %v3766_v63, 1 }
 0x121   : > { %v1152_v0 = vpop.f32.mrf.mxu1  ;;  %v1592_v44 = vpop.f32.mrf.mxu3  ;;  %3210 = vmatmul.msk.f32.gmra.mxu0 %vm892_vm1, %v4491_v33 }
 0x122   : > { %v1672_v26 = vadd.f32 %v1592_v44, %v1357_v35  ;;  %v1153_v49 = vadd.f32 %v1152_v0, %v4107_v14  ;;  %v1468_v0 = vrot.slane %v3724_v39, 1  ;;  %v703_v38 = vmax.f32 %v649_v19, 0.0 }
 0x124   : > { %v4508_v4 = vadd.f32 %v1756_v27, %v1672_v26  ;;  %3093 = vmatmul.msk.f32.gmra.mxu1 %vm892_vm1, %v3907_v36  ;;  %3133 = vmatmul.msk.f32.gmra.mxu2 %vm892_vm1, %v3766_v63  ;;  %v3338_v27 = vld [vmem:[%s5215_s3 + $0x200] sm:$0xff] }
 0x125   : > { %2519 = vmatpush.msra.mxu0 %v3338_v27  ;;  %v4538_v27 = vsel %vm1397_vm2, %v1468_v0, %v1469_v47 }
 0x126   : > { %5310 = vst [vmem:[#allocation56_spill] sm:$0xff] %v4508_v4  ;;  %3171 = vmatmul.msk.f32.gmra.mxu3 %vm892_vm1, %v4471_v55  ;;  %v1759_v17 = vpop.f32.mrf.mxu0 }
 0x127   : > { %v1280_v35 = vpop.f32.mrf.mxu2 }
 0x128   : > { %v1358_v43 = vadd.f32 %v1280_v35, %v1153_v49 }
 0x129   : > { %v1155_v44 = vpop.f32.mrf.mxu1  ;;  %v1595_v26 = vpop.f32.mrf.mxu3  ;;  %3211 = vmatmul.msk.f32.gmra.mxu0 %vm892_vm1, %v4518_v58 }
 0x12a   : > { %v1673_v14 = vadd.f32 %v1595_v26, %v1358_v43  ;;  %v1156_v13 = vadd.f32 %v1155_v44, %v4132_v12  ;;  %v346_v43 = vld [vmem:[%s3541_s16 + $0x178] sm:$0x3] }
 0x12c   : > { %v4528_v4 = vadd.f32 %v1759_v17, %v1673_v14  ;;  %3094 = vmatmul.msk.f32.gmra.mxu1 %vm892_vm1, %v3594_v40  ;;  %3134 = vmatmul.msk.f32.gmra.mxu2 %vm892_vm1, %v3812_v28  ;;  %v4542_v17 = vsel %vm490_vm3, %v703_v38, 0.0 }
 0x12d   : > { %5312 = vst [vmem:[#allocation58_spill] sm:$0xff] %v4542_v17  ;;  %v1471_v44 = vrot.slane %v4542_v17, 1 }
 0x12e   : > { %5311 = vst [vmem:[#allocation57_spill] sm:$0xff] %v4528_v4  ;;  %3172 = vmatmul.msk.f32.gmra.mxu3 %vm892_vm1, %v4491_v33  ;;  %v1762_v49 = vpop.f32.mrf.mxu0  ;;  %v595_v4 = vmul.f32 %v4324_v50, %v346_v43 }
 0x12f   : > { %v1283_v35 = vpop.f32.mrf.mxu2 }
 0x130   : > { %v1359_v19 = vadd.f32 %v1283_v35, %v1156_v13  ;;  %v4559_v13 = vsel %vm1397_vm2, %v1469_v47, %v1471_v44 }
 0x131   : > { %v1158_v26 = vpop.f32.mrf.mxu1  ;;  %v1598_v14 = vpop.f32.mrf.mxu3  ;;  %3212 = vmatmul.msk.f32.gmra.mxu0 %vm892_vm1, %v4538_v27 }
 0x132   : > { %v1674_v12 = vadd.f32 %v1598_v14, %v1359_v19  ;;  %v1159_v0 = vadd.f32 %v1158_v26, %v4158_v25  ;;  %v652_v19 = vadd.f32 %v4345_v62, %v595_v4  ;;  %v1473_v25 = vrot.slane %v3812_v28, 1 }
 0x133   : > { %v1474_v26 = vrot.slane %v3854_v60, 1 }
 0x134   : > { %v4549_v6 = vadd.f32 %v1762_v49, %v1674_v12  ;;  %3095 = vmatmul.msk.f32.gmra.mxu1 %vm892_vm1, %v3651_v1  ;;  %3135 = vmatmul.msk.f32.gmra.mxu2 %vm892_vm1, %v3854_v60 }
 0x135   : > { %v4576_v44 = vsel %vm1397_vm2, %v1473_v25, %v1474_v26 }
 0x136   : > { %5313 = vst [vmem:[#allocation59_spill] sm:$0xff] %v4549_v6  ;;  %3173 = vmatmul.msk.f32.gmra.mxu3 %vm892_vm1, %v4518_v58  ;;  %v1765_v38 = vpop.f32.mrf.mxu0  ;;  %v706_v6 = vmax.f32 %v652_v19, 0.0  ;;  %v349_v19 = vld [vmem:[%s3541_s16 + $0x190] sm:$0x3]  ;;  %s3380_s16 = sshll.u32 %s5394_s21, 8 }
 0x137   : > { %v1286_v35 = vpop.f32.mrf.mxu2  ;;  %s4843_s8 = scalar_lea.vmem %s5217_s5, %s3380_s16 }
 0x138   : > { %v1360_v49 = vadd.f32 %v1286_v35, %v1159_v0 }
 0x139   : > { %v1161_v43 = vpop.f32.mrf.mxu1  ;;  %v1601_v14 = vpop.f32.mrf.mxu3  ;;  %3213 = vmatmul.msk.f32.gmra.mxu0 %vm892_vm1, %v4559_v13 }
 0x13a   : > { %v1675_v12 = vadd.f32 %v1601_v14, %v1360_v49  ;;  %v1162_v4 = vadd.f32 %v1161_v43, %v4180_v37 }
 0x13c   : > { %v4566_v17 = vadd.f32 %v1765_v38, %v1675_v12  ;;  %3096 = vmatmul.msk.f32.gmra.mxu1 %vm892_vm1, %v3724_v39  ;;  %3136 = vmatmul.msk.f32.gmra.mxu2 %vm892_vm1, %v3889_v24  ;;  %v4580_v38 = vsel %vm490_vm3, %v706_v6, 0.0  ;;  %v598_v12 = vmul.f32 %v4324_v50, %v349_v19 }
 0x13d   : > { %v1476_v43 = vrot.slane %v4580_v38, 1 }
 0x13e   : > { %5314 = vst [vmem:[#allocation60_spill] sm:$0xff] %v4566_v17  ;;  %3174 = vmatmul.msk.f32.gmra.mxu3 %vm892_vm1, %v4538_v27  ;;  %v1768_v47 = vpop.f32.mrf.mxu0  ;;  %v655_v50 = vadd.f32 %v4345_v62, %v598_v12 }
 0x13f   : > { %v1289_v0 = vpop.f32.mrf.mxu2 }
 0x140   : > { %v1361_v35 = vadd.f32 %v1289_v0, %v1162_v4  ;;  %v4597_v4 = vsel %vm1397_vm2, %v1474_v26, %v1476_v43  ;;  %v5316_v26 = vmov 0.0  }
 0x141   : > { %v1164_v49 = vpop.f32.mrf.mxu1  ;;  %v1604_v14 = vpop.f32.mrf.mxu3  ;;  %3214 = vmatmul.msk.f32.gmra.mxu0 %vm892_vm1, %v4576_v44 }
 0x142   : > { %v1676_v37 = vadd.f32 %v1604_v14, %v1361_v35  ;;  %v1165_v6 = vadd.f32 %v1164_v49, %v4215_v16  ;;  %v1697_v14 = vrot.slane %v3889_v24, 1  ;;  %v1698_v16 = vrot.slane %v3913_v41, 1 }
 0x143   : > { %v709_v49 = vmax.f32 %v655_v50, 0.0 }
 0x144   : > { %v4587_v17 = vadd.f32 %v1768_v47, %v1676_v37  ;;  %3097 = vmatmul.msk.f32.gmra.mxu1 %vm892_vm1, %v3766_v63  ;;  %3137 = vmatmul.msk.f32.gmra.mxu2 %vm892_vm1, %v3913_v41  ;;  %v4613_v12 = vsel %vm1397_vm2, %v1697_v14, %v1698_v16 }
 0x146   : > { %5315 = vst [vmem:[#allocation61_spill] sm:$0xff] %v4587_v17  ;;  %3175 = vmatmul.msk.f32.gmra.mxu3 %vm892_vm1, %v4559_v13  ;;  %v1771_v25 = vpop.f32.mrf.mxu0 }
 0x147   : > { %v1292_v0 = vpop.f32.mrf.mxu2 }
 0x148   : > { %v1362_v47 = vadd.f32 %v1292_v0, %v1165_v6  ;;  %v4617_v0 = vsel %vm490_vm3, %v709_v49, 0.0  ;;  %v2030_v49 = vrot.slane %v3622_v51, 2 }
 0x149   : > { %v1167_v35 = vpop.f32.mrf.mxu1  ;;  %v1607_v19 = vpop.f32.mrf.mxu3  ;;  %3215 = vmatmul.msk.f32.gmra.mxu0 %vm892_vm1, %v4597_v4 }
 0x14a   : > { %v1677_v37 = vadd.f32 %v1607_v19, %v1362_v47  ;;  %v1168_v62 = vadd.f32 %v1167_v35, %v4240_v29  ;;  %v1700_v29 = vrot.slane %v4617_v0, 1 }
 0x14c   : > { %v4604_v17 = vadd.f32 %v1771_v25, %v1677_v37  ;;  %3098 = vmatmul.msk.f32.gmra.mxu1 %vm892_vm1, %v3812_v28  ;;  %1342 = vmatmul.f32.gmra.mxu2 %v5316_v26  ;;  %v4631_v37 = vsel %vm1397_vm2, %v1698_v16, %v1700_v29  ;;  %v2036_v16 = vrot.slane %v3777_v8, 2  ;;  %v2033_v8 = vrot.slane %v3953_v2, 2 }
 0x14e   : > { %3176 = vmatmul.msk.f32.gmra.mxu3 %vm892_vm1, %v4576_v44  ;;  %v1774_v43 = vpop.f32.mrf.mxu0 }
 0x14f   : > { %v1295_v6 = vpop.f32.mrf.mxu2 }
 0x150   : > { %v1363_v25 = vadd.f32 %v1295_v6, %v1168_v62 }
 0x151   : > { %v1170_v50 = vpop.f32.mrf.mxu1  ;;  %v1610_v47 = vpop.f32.mrf.mxu3  ;;  %3216 = vmatmul.msk.f32.gmra.mxu0 %vm892_vm1, %v4613_v12 }
 0x152   : > { %v1678_v19 = vadd.f32 %v1610_v47, %v1363_v25  ;;  %v1171_v46 = vadd.f32 %v1170_v50, %v4266_v31  ;;  %v4636_v25 = vrot.slane %v5316_v26, 2  ;;  %v2035_v31 = vrot.slane %v3743_v48, 2 }
 0x154   : > { %v4622_v35 = vadd.f32 %v1774_v43, %v1678_v19  ;;  %3099 = vmatmul.msk.f32.gmra.mxu1 %vm892_vm1, %v3854_v60  ;;  %1345 = vmatmul.f32.gmra.mxu2 %v5316_v26  ;;  %v2031_v43 = vrot.slane %v3675_v15, 2  ;;  %v2037_v48 = vsel %vm2024_vm4, %v2035_v31, %v2036_v16 }
 0x156   : > { %3177 = vmatmul.msk.f32.gmra.mxu3 %vm892_vm1, %v4597_v4  ;;  %v1777_v14 = vpop.f32.mrf.mxu0  ;;  %v2032_v51 = vsel %vm2024_vm4, %v2030_v49, %v2031_v43 }
 0x157   : > { %v1298_v62 = vpop.f32.mrf.mxu2 }
 0x158   : > { %v1364_v6 = vadd.f32 %v1298_v62, %v1171_v46 }
 0x159   : > { %v1173_v47 = vpop.f32.mrf.mxu1  ;;  %v1613_v19 = vpop.f32.mrf.mxu3  ;;  %3217 = vmatmul.msk.f32.gmra.mxu0 %vm892_vm1, %v4631_v37 }
 0x15a   : > { %v1679_v50 = vadd.f32 %v1613_v19, %v1364_v6  ;;  %v1174_v15 = vadd.f32 %v1173_v47, %v4097_v10  ;;  %v2034_v19 = vsel %vm2024_vm4, %v2031_v43, %v2033_v8 }
 0x15c   : > { %v4643_v29 = vadd.f32 %v1777_v14, %v1679_v50  ;;  %3226 = vmatmul.msk.f32.vlgmr.msra.gmra.mxu1 %vm892_vm1, %v3978_v20  ;;  %3266 = vmatmul.msk.f32.vlgmr.msra.gmra.mxu2 %vm892_vm1, %v4636_v25  ;;  %v2038_v20 = vrot.slane %v3982_v23, 2 }
 0x15e   : > { %3306 = vmatmul.msk.f32.vlgmr.msra.gmra.mxu3 %vm892_vm1, %v2032_v51  ;;  %v1780_v26 = vpop.f32.mrf.mxu0  ;;  %v2039_v47 = vsel %vm2024_vm4, %v2036_v16, %v2038_v20  ;;  %v2043_v20 = vrot.slane %v4019_v9, 2 }
 0x15f   : > { %v1301_v46 = vpop.f32.mrf.mxu2 }
 0x160   : > { %v1365_v62 = vadd.f32 %v1301_v46, %v1174_v15 }
 0x161   : > { %v1176_v49 = vpop.f32.mrf.mxu1  ;;  %v1616_v14 = vpop.f32.mrf.mxu3  ;;  %3346 = vmatmul.msk.f32.vlgmr.msra.gmra.mxu0 %vm892_vm1, %v2037_v48 }
 0x162   : > { %v1680_v6 = vadd.f32 %v1616_v14, %v1365_v62  ;;  %v1177_v2 = vadd.f32 %v1176_v49, %v4129_v61 }
 0x164   : > { %v4656_v50 = vadd.f32 %v1780_v26, %v1680_v6  ;;  %3227 = vmatmul.msk.f32.gmra.mxu1 %vm892_vm1, %v3995_v32  ;;  %3267 = vmatmul.msk.f32.gmra.mxu2 %vm892_vm1, %v4636_v25  ;;  %v2040_v26 = vrot.slane %v3831_v42, 2  ;;  %v2041_v32 = vrot.slane %v3862_v3, 2 }
 0x166   : > { %3307 = vmatmul.msk.f32.gmra.mxu3 %vm892_vm1, %v2034_v19  ;;  %v1783_v10 = vpop.f32.mrf.mxu0  ;;  %v2042_v62 = vsel %vm2024_vm4, %v2040_v26, %v2041_v32  ;;  %v5319_v26 = vld [vmem:[#allocation9_spill] sm:$0xff] }
 0x167   : > { %v1304_v31 = vpop.f32.mrf.mxu2 }
 0x168   : > { %v1366_v15 = vadd.f32 %v1304_v31, %v1177_v2  ;;  %v2044_v31 = vsel %vm2024_vm4, %v2041_v32, %v2043_v20 }
 0x169   : > { %v1179_v23 = vpop.f32.mrf.mxu1  ;;  %v1619_v46 = vpop.f32.mrf.mxu3  ;;  %3347 = vmatmul.msk.f32.gmra.mxu0 %vm892_vm1, %v2039_v47 }
 0x16a   : > { %v1681_v43 = vadd.f32 %v1619_v46, %v1366_v15  ;;  %v1180_v61 = vadd.f32 %v1179_v23, %v4151_v53  ;;  %v5318_v53 = vld [vmem:[#allocation26_spill] sm:$0xff] }
 0x16c   : > { %v4668_v8 = vadd.f32 %v1783_v10, %v1681_v43  ;;  %3228 = vmatmul.msk.f32.gmra.mxu1 %vm892_vm1, %v4012_v54  ;;  %3268 = vmatmul.msk.f32.gmra.mxu2 %vm892_vm1, %v2032_v51  ;;  %v5317_v54 = vld [vmem:[#allocation13_spill] sm:$0xff] }
 0x16e   : > { %3308 = vmatmul.msk.f32.gmra.mxu3 %vm892_vm1, %v2037_v48  ;;  %v1786_v16 = vpop.f32.mrf.mxu0 }
 0x16f   : > { %v1307_v49 = vpop.f32.mrf.mxu2 }
 0x170   : > { %v1367_v14 = vadd.f32 %v1307_v49, %v1180_v61  ;;  %v2045_v61 = vrot.slane %v5319_v26, 2 }
 0x171   : > { %v1182_v6 = vpop.f32.mrf.mxu1  ;;  %v1622_v42 = vpop.f32.mrf.mxu3  ;;  %3348 = vmatmul.msk.f32.gmra.mxu0 %vm892_vm1, %v2042_v62 }
 0x172   : > { %v1682_v3 = vadd.f32 %v1622_v42, %v1367_v14  ;;  %v1183_v51 = vadd.f32 %v1182_v6, %v5318_v53  ;;  %v5322_v6 = vld [vmem:[#allocation29_spill] sm:$0xff] }
 0x174   : > { %v4678_v2 = vadd.f32 %v1786_v16, %v1682_v3  ;;  %3229 = vmatmul.msk.f32.gmra.mxu1 %vm892_vm1, %v5317_v54  ;;  %3269 = vmatmul.msk.f32.gmra.mxu2 %vm892_vm1, %v2034_v19  ;;  %v5320_v16 = vld [vmem:[#allocation11_spill] sm:$0xff]  ;;  %v5321_v19 = vld [vmem:[#allocation14_spill] sm:$0xff] }
 0x175   : > { %v2046_v49 = vrot.slane %v5320_v16, 2 }
 0x176   : > { %3309 = vmatmul.msk.f32.gmra.mxu3 %vm892_vm1, %v2039_v47  ;;  %v1789_v10 = vpop.f32.mrf.mxu0 }
 0x177   : > { %v1310_v15 = vpop.f32.mrf.mxu2  ;;  %v2047_v3 = vsel %vm2024_vm4, %v2045_v61, %v2046_v49 }
 0x178   : > { %v1368_v23 = vadd.f32 %v1310_v15, %v1183_v51  ;;  %v5323_v15 = vld [vmem:[#allocation15_spill] sm:$0xff] }
 0x179   : > { %v1185_v46 = vpop.f32.mrf.mxu1  ;;  %v1625_v43 = vpop.f32.mrf.mxu3  ;;  %3349 = vmatmul.msk.f32.gmra.mxu0 %vm892_vm1, %v2044_v31 }
 0x17a   : > { %v1683_v9 = vadd.f32 %v1625_v43, %v1368_v23  ;;  %v1186_v32 = vadd.f32 %v1185_v46, %v5322_v6  ;;  %v2048_v23 = vrot.slane %v5323_v15, 2 }
 0x17c   : > { %v4689_v14 = vadd.f32 %v1789_v10, %v1683_v9  ;;  %3230 = vmatmul.msk.f32.gmra.mxu1 %vm892_vm1, %v5321_v19  ;;  %3270 = vmatmul.msk.f32.gmra.mxu2 %vm892_vm1, %v2037_v48  ;;  %v5324_v9 = vld [vmem:[#allocation16_spill] sm:$0xff]  ;;  %v5325_v48 = vld [vmem:[#allocation33_spill] sm:$0xff]  ;;  %v2049_v61 = vsel %vm2024_vm4, %v2046_v49, %v2048_v23 }
 0x17e   : > { %3310 = vmatmul.msk.f32.gmra.mxu3 %vm892_vm1, %v2042_v62  ;;  %v1792_v42 = vpop.f32.mrf.mxu0 }
 0x17f   : > { %v1313_v20 = vpop.f32.mrf.mxu2 }
 0x180   : > { %v1369_v54 = vadd.f32 %v1313_v20, %v1186_v32  ;;  %v5326_v20 = vld [vmem:[#allocation2_spill] sm:$0xff] }
 0x181   : > { %v1188_v53 = vpop.f32.mrf.mxu1  ;;  %v1628_v51 = vpop.f32.mrf.mxu3  ;;  %3350 = vmatmul.msk.f32.gmra.mxu0 %vm892_vm1, %v2047_v3 }
 0x182   : > { %v1684_v10 = vadd.f32 %v1628_v51, %v1369_v54  ;;  %v1189_v46 = vadd.f32 %v1188_v53, %v5325_v48  ;;  %v2050_v54 = vrot.slane %v5326_v20, 2  ;;  %v5327_v51 = vld [vmem:[#allocation3_spill] sm:$0xff]  ;;  %v5329_v53 = vld [vmem:[#allocation36_spill] sm:$0xff] }
 0x184   : > { %v4699_v43 = vadd.f32 %v1792_v42, %v1684_v10  ;;  %3231 = vmatmul.msk.f32.gmra.mxu1 %vm892_vm1, %v5324_v9  ;;  %3271 = vmatmul.msk.f32.gmra.mxu2 %vm892_vm1, %v2039_v47  ;;  %v2051_v10 = vrot.slane %v5327_v51, 2  ;;  %v5328_v47 = vld [vmem:[#allocation17_spill] sm:$0xff]  ;;  %v5332_v51 = vld [vmem:[#allocation20_spill] sm:$0xff] }
 0x186   : > { %3311 = vmatmul.msk.f32.gmra.mxu3 %vm892_vm1, %v2044_v31  ;;  %v1795_v26 = vpop.f32.mrf.mxu0  ;;  %v2052_v9 = vsel %vm2024_vm4, %v2050_v54, %v2051_v10 }
 0x187   : > { %v1316_v16 = vpop.f32.mrf.mxu2 }
 0x188   : > { %v1370_v19 = vadd.f32 %v1316_v16, %v1189_v46 }
 0x189   : > { %v1191_v6 = vpop.f32.mrf.mxu1  ;;  %v1631_v32 = vpop.f32.mrf.mxu3  ;;  %3351 = vmatmul.msk.f32.gmra.mxu0 %vm892_vm1, %v2049_v61 }
 0x18a   : > { %v1685_v42 = vadd.f32 %v1631_v32, %v1370_v19  ;;  %v1192_v49 = vadd.f32 %v1191_v6, %v5329_v53  ;;  %v5330_v32 = vld [vmem:[#allocation18_spill] sm:$0xff] }
 0x18c   : > { %v4710_v15 = vadd.f32 %v1795_v26, %v1685_v42  ;;  %3232 = vmatmul.msk.f32.gmra.mxu1 %vm892_vm1, %v5328_v47  ;;  %3272 = vmatmul.msk.f32.gmra.mxu2 %vm892_vm1, %v2042_v62  ;;  %v2053_v42 = vrot.slane %v5330_v32, 2  ;;  %v5333_v62 = vld [vmem:[#allocation40_spill] sm:$0xff]  ;;  %v5335_v32 = vld [vmem:[#allocation5_spill] sm:$0xff] }
 0x18e   : > { %3312 = vmatmul.msk.f32.gmra.mxu3 %vm892_vm1, %v2047_v3  ;;  %v1798_v23 = vpop.f32.mrf.mxu0  ;;  %v2054_v47 = vsel %vm2024_vm4, %v2051_v10, %v2053_v42 }
 0x18f   : > { %v1319_v48 = vpop.f32.mrf.mxu2 }
 0x190   : > { %v1371_v46 = vadd.f32 %v1319_v48, %v1192_v49 }
 0x191   : > { %v1194_v16 = vpop.f32.mrf.mxu1  ;;  %v1634_v19 = vpop.f32.mrf.mxu3  ;;  %3352 = vmatmul.msk.f32.gmra.mxu0 %vm892_vm1, %v2052_v9 }
 0x192   : > { %v1686_v26 = vadd.f32 %v1634_v19, %v1371_v46  ;;  %v1195_v6 = vadd.f32 %v1194_v16, %v5333_v62  ;;  %v5334_v19 = vld [vmem:[#allocation4_spill] sm:$0xff]  ;;  %v5338_v16 = vld [vmem:[#allocation19_spill] sm:$0xff] }
 0x194   : > { %v4720_v20 = vadd.f32 %v1798_v23, %v1686_v26  ;;  %3233 = vmatmul.msk.f32.gmra.mxu1 %vm892_vm1, %v5332_v51  ;;  %3273 = vmatmul.msk.f32.gmra.mxu2 %vm892_vm1, %v2044_v31  ;;  %v2055_v26 = vrot.slane %v5334_v19, 2  ;;  %v2056_v51 = vrot.slane %v5335_v32, 2  ;;  %v5337_v31 = vld [vmem:[#allocation22_spill] sm:$0xff] }
 0x196   : > { %5331 = vst [vmem:[#allocation13_spill] sm:$0xff] %v4720_v20  ;;  %3313 = vmatmul.msk.f32.gmra.mxu3 %vm892_vm1, %v2049_v61  ;;  %v1801_v54 = vpop.f32.mrf.mxu0  ;;  %v2057_v62 = vsel %vm2024_vm4, %v2055_v26, %v2056_v51 }
 0x197   : > { %v1322_v53 = vpop.f32.mrf.mxu2 }
 0x198   : > { %v1372_v49 = vadd.f32 %v1322_v53, %v1195_v6 }
 0x199   : > { %v1197_v48 = vpop.f32.mrf.mxu1  ;;  %v1637_v46 = vpop.f32.mrf.mxu3  ;;  %3353 = vmatmul.msk.f32.gmra.mxu0 %vm892_vm1, %v2054_v47 }
 0x19a   : > { %v1687_v23 = vadd.f32 %v1637_v46, %v1372_v49  ;;  %v1198_v10 = vadd.f32 %v1197_v48, %v5338_v16 }
 0x19c   : > { %v4731_v20 = vadd.f32 %v1801_v54, %v1687_v23  ;;  %3234 = vmatmul.msk.f32.gmra.mxu1 %vm892_vm1, %v5337_v31  ;;  %3274 = vmatmul.msk.f32.gmra.mxu2 %vm892_vm1, %v2047_v3  ;;  %v5339_v23 = vld [vmem:[#allocation23_spill] sm:$0xff]  ;;  %v5341_v31 = vld [vmem:[#allocation25_spill] sm:$0xff] }
 0x19d   : > { %v2058_v19 = vrot.slane %v5339_v23, 2  ;;  %v5342_v3 = vld [vmem:[#allocation21_spill] sm:$0xff]  ;;  %v5344_v23 = vld [vmem:[#allocation7_spill] sm:$0xff] }
 0x19e   : > { %5336 = vst [vmem:[#allocation26_spill] sm:$0xff] %v4731_v20  ;;  %3314 = vmatmul.msk.f32.gmra.mxu3 %vm892_vm1, %v2052_v9  ;;  %v1804_v42 = vpop.f32.mrf.mxu0 }
 0x19f   : > { %v1325_v6 = vpop.f32.mrf.mxu2  ;;  %v2059_v16 = vsel %vm2024_vm4, %v2056_v51, %v2058_v19 }
 0x1a0   : > { %v1373_v53 = vadd.f32 %v1325_v6, %v1198_v10 }
 0x1a1   : > { %v1200_v49 = vpop.f32.mrf.mxu1  ;;  %v1640_v46 = vpop.f32.mrf.mxu3  ;;  %3354 = vmatmul.msk.f32.gmra.mxu0 %vm892_vm1, %v2057_v62 }
 0x1a2   : > { %v1688_v54 = vadd.f32 %v1640_v46, %v1373_v53  ;;  %v1201_v48 = vadd.f32 %v1200_v49, %v5342_v3  ;;  %v5343_v46 = vld [vmem:[#allocation6_spill] sm:$0xff]  ;;  %v5347_v49 = vld [vmem:[#allocation24_spill] sm:$0xff] }
 0x1a4   : > { %v4741_v32 = vadd.f32 %v1804_v42, %v1688_v54  ;;  %3235 = vmatmul.msk.f32.gmra.mxu1 %vm892_vm1, %v5341_v31  ;;  %3275 = vmatmul.msk.f32.gmra.mxu2 %vm892_vm1, %v2049_v61  ;;  %v2060_v54 = vrot.slane %v5343_v46, 2  ;;  %v2061_v31 = vrot.slane %v5344_v23, 2  ;;  %v5346_v61 = vld [vmem:[#allocation28_spill] sm:$0xff] }
 0x1a6   : > { %5340 = vst [vmem:[#allocation9_spill] sm:$0xff] %v4741_v32  ;;  %3315 = vmatmul.msk.f32.gmra.mxu3 %vm892_vm1, %v2054_v47  ;;  %v1807_v26 = vpop.f32.mrf.mxu0  ;;  %v2062_v3 = vsel %vm2024_vm4, %v2060_v54, %v2061_v31 }
 0x1a7   : > { %v1328_v10 = vpop.f32.mrf.mxu2 }
 0x1a8   : > { %v1374_v6 = vadd.f32 %v1328_v10, %v1201_v48 }
 0x1a9   : > { %v1203_v20 = vpop.f32.mrf.mxu1  ;;  %v1643_v53 = vpop.f32.mrf.mxu3  ;;  %3355 = vmatmul.msk.f32.gmra.mxu0 %vm892_vm1, %v2059_v16 }
 0x1aa   : > { %v1689_v42 = vadd.f32 %v1643_v53, %v1374_v6  ;;  %v1204_v51 = vadd.f32 %v1203_v20, %v5347_v49 }
 0x1ac   : > { %v4752_v32 = vadd.f32 %v1807_v26, %v1689_v42  ;;  %3236 = vmatmul.msk.f32.gmra.mxu1 %vm892_vm1, %v5346_v61  ;;  %3276 = vmatmul.msk.f32.gmra.mxu2 %vm892_vm1, %v2052_v9  ;;  %v5348_v42 = vld [vmem:[#allocation30_spill] sm:$0xff]  ;;  %v5350_v61 = vld [vmem:[#allocation32_spill] sm:$0xff]  ;;  %v5351_v9 = vld [vmem:[#allocation27_spill] sm:$0xff] }
 0x1ad   : > { %v2063_v46 = vrot.slane %v5348_v42, 2  ;;  %v5353_v42 = vld [vmem:[#allocation10_spill] sm:$0xff] }
 0x1ae   : > { %5345 = vst [vmem:[#allocation11_spill] sm:$0xff] %v4752_v32  ;;  %3316 = vmatmul.msk.f32.gmra.mxu3 %vm892_vm1, %v2057_v62  ;;  %v1810_v19 = vpop.f32.mrf.mxu0 }
 0x1af   : > { %v1331_v48 = vpop.f32.mrf.mxu2  ;;  %v2064_v49 = vsel %vm2024_vm4, %v2061_v31, %v2063_v46 }
 0x1b0   : > { %v1375_v10 = vadd.f32 %v1331_v48, %v1204_v51 }
 0x1b1   : > { %v1206_v6 = vpop.f32.mrf.mxu1  ;;  %v1646_v53 = vpop.f32.mrf.mxu3  ;;  %3356 = vmatmul.msk.f32.gmra.mxu0 %vm892_vm1, %v2062_v3 }
 0x1b2   : > { %v1690_v26 = vadd.f32 %v1646_v53, %v1375_v10  ;;  %v1207_v20 = vadd.f32 %v1206_v6, %v5351_v9  ;;  %v5352_v53 = vld [vmem:[#allocation8_spill] sm:$0xff]  ;;  %v5356_v6 = vld [vmem:[#allocation31_spill] sm:$0xff] }
 0x1b4   : > { %v4762_v23 = vadd.f32 %v1810_v19, %v1690_v26  ;;  %3237 = vmatmul.msk.f32.gmra.mxu1 %vm892_vm1, %v5350_v61  ;;  %3277 = vmatmul.msk.f32.gmra.mxu2 %vm892_vm1, %v2054_v47  ;;  %v2065_v26 = vrot.slane %v5352_v53, 2  ;;  %v2066_v61 = vrot.slane %v5353_v42, 2  ;;  %v5355_v47 = vld [vmem:[#allocation35_spill] sm:$0xff] }
 0x1b6   : > { %5349 = vst [vmem:[#allocation14_spill] sm:$0xff] %v4762_v23  ;;  %3317 = vmatmul.msk.f32.gmra.mxu3 %vm892_vm1, %v2059_v16  ;;  %v1813_v54 = vpop.f32.mrf.mxu0  ;;  %v2067_v9 = vsel %vm2024_vm4, %v2065_v26, %v2066_v61 }
 0x1b7   : > { %v1334_v51 = vpop.f32.mrf.mxu2 }
 0x1b8   : > { %v1376_v48 = vadd.f32 %v1334_v51, %v1207_v20 }
 0x1b9   : > { %v1209_v32 = vpop.f32.mrf.mxu1  ;;  %v1649_v10 = vpop.f32.mrf.mxu3  ;;  %3357 = vmatmul.msk.f32.gmra.mxu0 %vm892_vm1, %v2064_v49 }
 0x1ba   : > { %v1691_v19 = vadd.f32 %v1649_v10, %v1376_v48  ;;  %v1210_v31 = vadd.f32 %v1209_v32, %v5356_v6 }
 0x1bc   : > { %v4773_v23 = vadd.f32 %v1813_v54, %v1691_v19  ;;  %3238 = vmatmul.msk.f32.gmra.mxu1 %vm892_vm1, %v5355_v47  ;;  %3278 = vmatmul.msk.f32.gmra.mxu2 %vm892_vm1, %v2057_v62  ;;  %v5357_v19 = vld [vmem:[#allocation37_spill] sm:$0xff]  ;;  %v5358_v47 = vld [vmem:[#allocation39_spill] sm:$0xff]  ;;  %v5359_v62 = vld [vmem:[#allocation34_spill] sm:$0xff] }
 0x1bd   : > { %v2068_v53 = vrot.slane %v5357_v19, 2 }
 0x1be   : > { %5354 = vst [vmem:[#allocation29_spill] sm:$0xff] %v4773_v23  ;;  %3318 = vmatmul.msk.f32.gmra.mxu3 %vm892_vm1, %v2062_v3  ;;  %v1816_v46 = vpop.f32.mrf.mxu0 }
 0x1bf   : > { %v1337_v20 = vpop.f32.mrf.mxu2  ;;  %v2069_v6 = vsel %vm2024_vm4, %v2066_v61, %v2068_v53 }
 0x1c0   : > { %v1377_v51 = vadd.f32 %v1337_v20, %v1210_v31 }
 0x1c1   : > { %v1212_v48 = vpop.f32.mrf.mxu1  ;;  %v1652_v10 = vpop.f32.mrf.mxu3  ;;  %3358 = vmatmul.msk.f32.gmra.mxu0 %vm892_vm1, %v2067_v9 }
 0x1c2   : > { %v1692_v54 = vadd.f32 %v1652_v10, %v1377_v51  ;;  %v1213_v32 = vadd.f32 %v1212_v48, %v5359_v62  ;;  %v2070_v10 = vrot.slane %v3586_v34, 2  ;;  %v5361_v48 = vld [vmem:[#allocation38_spill] sm:$0xff] }
 0x1c4   : > { %v4783_v42 = vadd.f32 %v1816_v46, %v1692_v54  ;;  %3239 = vmatmul.msk.f32.gmra.mxu1 %vm892_vm1, %v5358_v47  ;;  %3279 = vmatmul.msk.f32.gmra.mxu2 %vm892_vm1, %v2059_v16  ;;  %v2071_v54 = vrot.slane %v3638_v59, 2  ;;  %v5360_v16 = vld [vmem:[#allocation42_spill] sm:$0xff] }
 0x1c6   : > { %3319 = vmatmul.msk.f32.gmra.mxu3 %vm892_vm1, %v2064_v49  ;;  %v1819_v26 = vpop.f32.mrf.mxu0  ;;  %v2072_v47 = vsel %vm2024_vm4, %v2070_v10, %v2071_v54 }
 0x1c7   : > { %v1340_v31 = vpop.f32.mrf.mxu2 }
 0x1c8   : > { %v1378_v20 = vadd.f32 %v1340_v31, %v1213_v32 }
 0x1c9   : > { %v1215_v23 = vpop.f32.mrf.mxu1  ;;  %v1655_v51 = vpop.f32.mrf.mxu3  ;;  %3359 = vmatmul.msk.f32.gmra.mxu0 %vm892_vm1, %v2069_v6 }
 0x1ca   : > { %v1693_v46 = vadd.f32 %v1655_v51, %v1378_v20  ;;  %v1216_v61 = vadd.f32 %v1215_v23, %v5361_v48 }
 0x1cc   : > { %v4794_v19 = vadd.f32 %v1819_v26, %v1693_v46  ;;  %3240 = vmatmul.msk.f32.gmra.mxu1 %vm892_vm1, %v5360_v16  ;;  %3280 = vmatmul.msk.f32.gmra.mxu2 %vm892_vm1, %v2062_v3  ;;  %v5362_v26 = vld [vmem:[#allocation43_spill] sm:$0xff]  ;;  %v5363_v3 = vld [vmem:[#allocation41_spill] sm:$0xff] }
 0x1cd   : > { %v2073_v20 = vrot.slane %v5362_v26, 2 }
 0x1ce   : > { %3320 = vmatmul.msk.f32.gmra.mxu3 %vm892_vm1, %v2067_v9  ;;  %v1822_v53 = vpop.f32.mrf.mxu0 }
 0x1cf   : > { %v1343_v62 = vpop.f32.mrf.mxu2  ;;  %v4812_v10 = vsel %vm2024_vm4, %v2071_v54, %v2073_v20  ;;  %v5364_v54 = vld [vmem:[#allocation44_spill] sm:$0xff] }
 0x1d0   : > { %v1379_v32 = vadd.f32 %v1343_v62, %v1216_v61 }
 0x1d1   : > { %v1218_v31 = vpop.f32.mrf.mxu1  ;;  %v1658_v34 = vpop.f32.mrf.mxu3  ;;  %3360 = vmatmul.msk.f32.gmra.mxu0 %vm892_vm1, %v2072_v47 }
 0x1d2   : > { %v1694_v59 = vadd.f32 %v1658_v34, %v1379_v32  ;;  %v1219_v23 = vadd.f32 %v1218_v31, %v5363_v3 }
 0x1d4   : > { %v4804_v51 = vadd.f32 %v1822_v53, %v1694_v59  ;;  %3241 = vmatmul.msk.f32.gmra.mxu1 %vm892_vm1, %v4337_v7  ;;  %3281 = vmatmul.msk.f32.gmra.mxu2 %vm892_vm1, %v2064_v49  ;;  %v2075_v7 = vrot.slane %v3711_v30, 2  ;;  %v2076_v49 = vrot.slane %v3759_v57, 2 }
 0x1d6   : > { %3321 = vmatmul.msk.f32.gmra.mxu3 %vm892_vm1, %v2069_v6  ;;  %v1825_v46 = vpop.f32.mrf.mxu0  ;;  %v4826_v59 = vsel %vm2024_vm4, %v2075_v7, %v2076_v49 }
 0x1d7   : > { %v1346_v16 = vpop.f32.mrf.mxu2 }
 0x1d8   : > { %v1380_v48 = vadd.f32 %v1346_v16, %v1219_v23  ;;  %v5366_v16 = vld [vmem:[#allocation45_spill] sm:$0xff] }
 0x1d9   : > { %v1661_v61 = vpop.f32.mrf.mxu3  ;;  %v1896_v62 = vpop.f32.mrf.mxu1  ;;  %3361 = vmatmul.msk.f32.gmra.mxu0 %vm892_vm1, %v4812_v10 }
 0x1da   : > { %v1695_v53 = vadd.f32 %v1661_v61, %v1380_v48  ;;  %v1992_v31 = vadd.f32 %v1896_v62, %v5364_v54 }
 0x1dc   : > { %v4818_v32 = vadd.f32 %v1825_v46, %v1695_v53  ;;  %3242 = vmatmul.msk.f32.gmra.mxu1 %vm892_vm1, %v4362_v11  ;;  %3282 = vmatmul.msk.f32.gmra.mxu2 %vm892_vm1, %v2067_v9  ;;  %v4834_v11 = vld [vmem:[%s5216_s4] ss:$0 sm:$0xff] }
 0x1dd   : > { %v5365_v9 = vld [vmem:[#allocation46_spill] sm:$0xff] }
 0x1de   : > { %3322 = vmatmul.msk.f32.gmra.mxu3 %vm892_vm1, %v2072_v47  ;;  %v2521_v34 = vpop.f32.mrf.mxu0  ;;  %v2078_v23 = vrot.slane %v5365_v9, 2 }
 0x1df   : > { %v2195_v26 = vpop.f32.mrf.mxu2 }
 0x1e0   : > { %v2291_v20 = vadd.f32 %v2195_v26, %v1992_v31  ;;  %v4850_v53 = vsel %vm2024_vm4, %v2076_v49, %v2078_v23  ;;  %v2081_v26 = vrot.slane %v3847_v52, 2 }
 0x1e1   : > { %v1899_v30 = vpop.f32.mrf.mxu1  ;;  %v2358_v3 = vpop.f32.mrf.mxu3  ;;  %3362 = vmatmul.msk.f32.gmra.mxu0 %vm892_vm1, %v4826_v59 }
 0x1e2   : > { %v2454_v57 = vadd.f32 %v2358_v3, %v2291_v20  ;;  %v1993_v48 = vadd.f32 %v1899_v30, %v5366_v16  ;;  %v5367_v30 = vld [vmem:[#allocation47_spill] sm:$0xff] }
 0x1e4   : > { %v2617_v46 = vadd.f32 %v2521_v34, %v2454_v57  ;;  %3243 = vmatmul.msk.f32.gmra.mxu1 %vm892_vm1, %v4383_v56  ;;  %3283 = vmatmul.msk.f32.gmra.mxu2 %vm892_vm1, %v2069_v6  ;;  %v2080_v34 = vrot.slane %v3802_v22, 2 }
 0x1e6   : > { %v2653_v61 = vadd.f32 %v4834_v11, %v2617_v46  ;;  %3323 = vmatmul.msk.f32.gmra.mxu3 %vm892_vm1, %v4812_v10  ;;  %v2524_v62 = vpop.f32.mrf.mxu0  ;;  %v4866_v23 = vsel %vm2024_vm4, %v2080_v34, %v2081_v26 }
 0x1e7   : > { %v2198_v56 = vpop.f32.mrf.mxu2 }
 0x1e8   : > { %2859 = vst.msk [vmem:[%s4843_s8] sm:$0xff] %vm892_vm1, %v2653_v61  ;;  %v2292_v6 = vadd.f32 %v2198_v56, %v1993_v48  ;;  %v2754_v49 = vmul.f32 %v2653_v61, %v2653_v61  ;;  %v2685_v52 = vsel %vm892_vm1, %v2653_v61, 0.0 }
 0x1e9   : > { %v1902_v7 = vpop.f32.mrf.mxu1  ;;  %v2361_v54 = vpop.f32.mrf.mxu3  ;;  %3363 = vmatmul.msk.f32.gmra.mxu0 %vm892_vm1, %v4850_v53 }
 0x1ea   : > { %v2455_v31 = vadd.f32 %v2361_v54, %v2292_v6  ;;  %v1994_v3 = vadd.f32 %v1902_v7, %v5367_v30  ;;  %v2786_v56 = vsel %vm892_vm1, %v2754_v49, 0.0  ;;  %v5368_v54 = vld [vmem:[#allocation49_spill] sm:$0xff] }
 0x1eb   : > { %v2083_v61 = vrot.slane %v5368_v54, 2 }
 0x1ec   : > { %v2618_v20 = vadd.f32 %v2524_v62, %v2455_v31  ;;  %3244 = vmatmul.msk.f32.gmra.mxu1 %vm892_vm1, %v4403_v45  ;;  %3284 = vmatmul.msk.f32.gmra.mxu2 %vm892_vm1, %v2072_v47 }
 0x1ee   : > { %v2654_v57 = vadd.f32 %v4834_v11, %v2618_v20  ;;  %3324 = vmatmul.msk.f32.gmra.mxu3 %vm892_vm1, %v4826_v59  ;;  %v2527_v9 = vpop.f32.mrf.mxu0  ;;  %v5369_v20 = vld [vmem:[#allocation48_spill] sm:$0xff] }
 0x1ef   : > { %v2201_v22 = vpop.f32.mrf.mxu2 }
 0x1f0   : > { %v2686_v46 = vsel %vm892_vm1, %v2654_v57, 0.0  ;;  %v2755_v45 = vmul.f32 %v2654_v57, %v2654_v57  ;;  %2860 = vst.msk [vmem:[%s4843_s8 + $0x8] sm:$0xff] %vm892_vm1, %v2654_v57  ;;  %v2293_v47 = vadd.f32 %v2201_v22, %v1994_v3  ;;  %v4886_v57 = vsel %vm2024_vm4, %v2081_v26, %v2083_v61 }
 0x1f1   : > { %v2687_v16 = vadd.f32 %v2686_v46, %v2685_v52  ;;  %v1905_v48 = vpop.f32.mrf.mxu1  ;;  %v2364_v62 = vpop.f32.mrf.mxu3  ;;  %3364 = vmatmul.msk.f32.gmra.mxu0 %vm892_vm1, %v4866_v23  ;;  %v2085_v26 = vrot.slane %v3881_v18, 2 }
 0x1f2   : > { %v2787_v6 = vsel %vm892_vm1, %v2755_v45, 0.0  ;;  %v2456_v7 = vadd.f32 %v2364_v62, %v2293_v47  ;;  %v1995_v30 = vadd.f32 %v1905_v48, %v5369_v20  ;;  %v2086_v62 = vrot.slane %v3907_v36, 2 }
 0x1f3   : > { %v2788_v31 = vadd.f32 %v2787_v6, %v2786_v56 }
 0x1f4   : > { %v2619_v34 = vadd.f32 %v2527_v9, %v2456_v7  ;;  %3245 = vmatmul.msk.f32.gmra.mxu1 %vm892_vm1, %v4430_v21  ;;  %3285 = vmatmul.msk.f32.gmra.mxu2 %vm892_vm1, %v4812_v10  ;;  %v4905_v18 = vsel %vm2024_vm4, %v2085_v26, %v2086_v62 }
 0x1f6   : > { %v2655_v3 = vadd.f32 %v4834_v11, %v2619_v34  ;;  %3325 = vmatmul.msk.f32.gmra.mxu3 %vm892_vm1, %v4850_v53  ;;  %v2530_v49 = vpop.f32.mrf.mxu0 }
 0x1f7   : > { %v2204_v22 = vpop.f32.mrf.mxu2 }
 0x1f8   : > { %v2688_v9 = vsel %vm892_vm1, %v2655_v3, 0.0  ;;  %v2756_v52 = vmul.f32 %v2655_v3, %v2655_v3  ;;  %2861 = vst.msk [vmem:[%s4843_s8 + $0x10] sm:$0xff] %vm892_vm1, %v2655_v3  ;;  %v2294_v21 = vadd.f32 %v2204_v22, %v1995_v30  ;;  %v5371_v22 = vld [vmem:[#allocation52_spill] sm:$0xff] }
 0x1f9   : > { %v2689_v46 = vadd.f32 %v2688_v9, %v2687_v16  ;;  %v1908_v10 = vpop.f32.mrf.mxu1  ;;  %v2367_v45 = vpop.f32.mrf.mxu3  ;;  %3365 = vmatmul.msk.f32.gmra.mxu0 %vm892_vm1, %v4886_v57  ;;  %v5370_v16 = vld [vmem:[#allocation50_spill] sm:$0xff]  ;;  %v2088_v9 = vrot.slane %v5371_v22, 2 }
 0x1fa   : > { %v2789_v47 = vsel %vm892_vm1, %v2756_v52, 0.0  ;;  %v2457_v48 = vadd.f32 %v2367_v45, %v2294_v21  ;;  %v1996_v7 = vadd.f32 %v1908_v10, %v5370_v16 }
 0x1fb   : > { %v2790_v56 = vadd.f32 %v2789_v47, %v2788_v31 }
 0x1fc   : > { %v2620_v6 = vadd.f32 %v2530_v49, %v2457_v48  ;;  %3246 = vmatmul.msk.f32.gmra.mxu1 %vm892_vm1, %v4450_v5  ;;  %3286 = vmatmul.msk.f32.gmra.mxu2 %vm892_vm1, %v4826_v59  ;;  %v4923_v48 = vsel %vm2024_vm4, %v2086_v62, %v2088_v9  ;;  %v2090_v62 = vrot.slane %v3594_v40, 2 }
 0x1fe   : > { %v2656_v54 = vadd.f32 %v4834_v11, %v2620_v6  ;;  %3326 = vmatmul.msk.f32.gmra.mxu3 %vm892_vm1, %v4866_v23  ;;  %v2533_v61 = vpop.f32.mrf.mxu0 }
 0x1ff   : > { %v2207_v36 = vpop.f32.mrf.mxu2 }
 0x200   : > { %v2690_v31 = vsel %vm892_vm1, %v2656_v54, 0.0  ;;  %v2757_v34 = vmul.f32 %v2656_v54, %v2656_v54  ;;  %2862 = vst.msk [vmem:[%s4843_s8 + $0x18] sm:$0xff] %vm892_vm1, %v2656_v54  ;;  %v2295_v5 = vadd.f32 %v2207_v36, %v1996_v7  ;;  %v2091_v36 = vrot.slane %v3651_v1, 2 }
 0x201   : > { %v2691_v20 = vadd.f32 %v2690_v31, %v2689_v46  ;;  %v1911_v59 = vpop.f32.mrf.mxu1  ;;  %v2370_v30 = vpop.f32.mrf.mxu3  ;;  %3366 = vmatmul.msk.f32.gmra.mxu0 %vm892_vm1, %v4905_v18  ;;  %v5372_v46 = vld [vmem:[#allocation51_spill] sm:$0xff] }
 0x202   : > { %v2791_v3 = vsel %vm892_vm1, %v2757_v34, 0.0  ;;  %v2458_v49 = vadd.f32 %v2370_v30, %v2295_v5  ;;  %v1997_v10 = vadd.f32 %v1911_v59, %v5372_v46  ;;  %v5373_v5 = vld [vmem:[#allocation53_spill] sm:$0xff]  ;;  %v4942_v40 = vsel %vm2024_vm4, %v2090_v62, %v2091_v36  ;;  %v5374_v46 = vld [vmem:[#allocation55_spill] sm:$0xff] }
 0x203   : > { %v2792_v52 = vadd.f32 %v2791_v3, %v2790_v56 }
 0x204   : > { %v2621_v21 = vadd.f32 %v2533_v61, %v2458_v49  ;;  %3247 = vmatmul.msk.f32.gmra.mxu1 %vm892_vm1, %v4471_v55  ;;  %3287 = vmatmul.msk.f32.gmra.mxu2 %vm892_vm1, %v4850_v53 }
 0x206   : > { %v2657_v45 = vadd.f32 %v4834_v11, %v2621_v21  ;;  %3327 = vmatmul.msk.f32.gmra.mxu3 %vm892_vm1, %v4886_v57  ;;  %v2536_v47 = vpop.f32.mrf.mxu0 }
 0x207   : > { %v2210_v26 = vpop.f32.mrf.mxu2 }
 0x208   : > { %v2692_v56 = vsel %vm892_vm1, %v2657_v45, 0.0  ;;  %v2758_v6 = vmul.f32 %v2657_v45, %v2657_v45  ;;  %2863 = vst.msk [vmem:[%s4843_s8 + $0x20] sm:$0xff] %vm892_vm1, %v2657_v45  ;;  %v2296_v55 = vadd.f32 %v2210_v26, %v1997_v10  ;;  %v2093_v10 = vrot.slane %v5374_v46, 2  ;;  %v5375_v26 = vld [vmem:[#allocation54_spill] sm:$0xff] }
 0x209   : > { %v2693_v16 = vadd.f32 %v2692_v56, %v2691_v20  ;;  %v1914_v53 = vpop.f32.mrf.mxu1  ;;  %v2373_v7 = vpop.f32.mrf.mxu3  ;;  %3367 = vmatmul.msk.f32.gmra.mxu0 %vm892_vm1, %v4923_v48  ;;  %v5377_v46 = vld [vmem:[#allocation58_spill] sm:$0xff] }
 0x20a   : > { %v2793_v54 = vsel %vm892_vm1, %v2758_v6, 0.0  ;;  %v2459_v61 = vadd.f32 %v2373_v7, %v2296_v55  ;;  %v1998_v20 = vadd.f32 %v1914_v53, %v5373_v5  ;;  %v2096_v5 = vrot.slane %v3766_v63, 2 }
 0x20b   : > { %v2794_v31 = vadd.f32 %v2793_v54, %v2792_v52 }
 0x20c   : > { %v2622_v34 = vadd.f32 %v2536_v47, %v2459_v61  ;;  %3248 = vmatmul.msk.f32.gmra.mxu1 %vm892_vm1, %v4491_v33  ;;  %3288 = vmatmul.msk.f32.gmra.mxu2 %vm892_vm1, %v4866_v23 }
 0x20e   : > { %v2658_v59 = vadd.f32 %v4834_v11, %v2622_v34  ;;  %3328 = vmatmul.msk.f32.gmra.mxu3 %vm892_vm1, %v4905_v18  ;;  %v2539_v30 = vpop.f32.mrf.mxu0 }
 0x20f   : > { %v2213_v1 = vpop.f32.mrf.mxu2 }
 0x210   : > { %v2694_v3 = vsel %vm892_vm1, %v2658_v59, 0.0  ;;  %v2759_v49 = vmul.f32 %v2658_v59, %v2658_v59  ;;  %2864 = vst.msk [vmem:[%s4843_s8 + $0x28] sm:$0xff] %vm892_vm1, %v2658_v59  ;;  %v2297_v33 = vadd.f32 %v2213_v1, %v1998_v20 }
 0x211   : > { %v2695_v22 = vadd.f32 %v2694_v3, %v2693_v16  ;;  %v1917_v23 = vpop.f32.mrf.mxu1  ;;  %v2376_v9 = vpop.f32.mrf.mxu3  ;;  %3368 = vmatmul.msk.f32.gmra.mxu0 %vm892_vm1, %v4942_v40  ;;  %v4960_v16 = vsel %vm2024_vm4, %v2091_v36, %v2093_v10  ;;  %v2095_v36 = vrot.slane %v3724_v39, 2  ;;  %v2098_v10 = vrot.slane %v5377_v46, 2 }
 0x212   : > { %v2795_v52 = vsel %vm892_vm1, %v2759_v49, 0.0  ;;  %v2460_v21 = vadd.f32 %v2376_v9, %v2297_v33  ;;  %v1999_v56 = vadd.f32 %v1917_v23, %v5375_v26  ;;  %v5378_v26 = vld [vmem:[#allocation57_spill] sm:$0xff] }
 0x213   : > { %v2796_v45 = vadd.f32 %v2795_v52, %v2794_v31  ;;  %v4979_v39 = vsel %vm2024_vm4, %v2095_v36, %v2096_v5  ;;  %v2101_v36 = vrot.slane %v3854_v60, 2 }
 0x214   : > { %v2623_v47 = vadd.f32 %v2539_v30, %v2460_v21  ;;  %3249 = vmatmul.msk.f32.gmra.mxu1 %vm892_vm1, %v4518_v58  ;;  %3289 = vmatmul.msk.f32.gmra.mxu2 %vm892_vm1, %v4886_v57  ;;  %v5376_v30 = vld [vmem:[#allocation56_spill] sm:$0xff] }
 0x216   : > { %v2659_v6 = vadd.f32 %v4834_v11, %v2623_v47  ;;  %3329 = vmatmul.msk.f32.gmra.mxu3 %vm892_vm1, %v4923_v48  ;;  %v2542_v55 = vpop.f32.mrf.mxu0 }
 0x217   : > { %v2216_v53 = vpop.f32.mrf.mxu2 }
 0x218   : > { %v2696_v7 = vsel %vm892_vm1, %v2659_v6, 0.0  ;;  %v2760_v54 = vmul.f32 %v2659_v6, %v2659_v6  ;;  %2865 = vst.msk [vmem:[%s4843_s8 + $0x30] sm:$0xff] %vm892_vm1, %v2659_v6  ;;  %v2298_v58 = vadd.f32 %v2216_v53, %v1999_v56  ;;  %v4997_v53 = vsel %vm2024_vm4, %v2096_v5, %v2098_v10 }
 0x219   : > { %v2697_v61 = vadd.f32 %v2696_v7, %v2695_v22  ;;  %v1920_v57 = vpop.f32.mrf.mxu1  ;;  %v2379_v62 = vpop.f32.mrf.mxu3  ;;  %3369 = vmatmul.msk.f32.gmra.mxu0 %vm892_vm1, %v4960_v16 }
 0x21a   : > { %v2797_v31 = vsel %vm892_vm1, %v2760_v54, 0.0  ;;  %v2461_v34 = vadd.f32 %v2379_v62, %v2298_v58  ;;  %v2000_v1 = vadd.f32 %v1920_v57, %v5376_v30 }
 0x21b   : > { %v2798_v20 = vadd.f32 %v2797_v31, %v2796_v45 }
 0x21c   : > { %v2624_v59 = vadd.f32 %v2542_v55, %v2461_v34  ;;  %3250 = vmatmul.msk.f32.gmra.mxu1 %vm892_vm1, %v4538_v27  ;;  %3290 = vmatmul.msk.f32.gmra.mxu2 %vm892_vm1, %v4905_v18  ;;  %v2100_v34 = vrot.slane %v3812_v28, 2 }
 0x21e   : > { %v2660_v3 = vadd.f32 %v4834_v11, %v2624_v59  ;;  %3330 = vmatmul.msk.f32.gmra.mxu3 %vm892_vm1, %v4942_v40  ;;  %v2545_v49 = vpop.f32.mrf.mxu0  ;;  %v5379_v59 = vld [vmem:[#allocation59_spill] sm:$0xff]  ;;  %v5016_v28 = vsel %vm2024_vm4, %v2100_v34, %v2101_v36 }
 0x21f   : > { %v2219_v63 = vpop.f32.mrf.mxu2 }
 0x220   : > { %v2698_v33 = vsel %vm892_vm1, %v2660_v3, 0.0  ;;  %v2761_v22 = vmul.f32 %v2660_v3, %v2660_v3  ;;  %2866 = vst.msk [vmem:[%s4843_s8 + $0x38] sm:$0xff] %vm892_vm1, %v2660_v3  ;;  %v2299_v27 = vadd.f32 %v2219_v63, %v2000_v1 }
 0x221   : > { %v2699_v23 = vadd.f32 %v2698_v33, %v2697_v61  ;;  %v1923_v18 = vpop.f32.mrf.mxu1  ;;  %v2382_v9 = vpop.f32.mrf.mxu3  ;;  %3370 = vmatmul.msk.f32.gmra.mxu0 %vm892_vm1, %v4979_v39 }
 0x222   : > { %v2799_v52 = vsel %vm892_vm1, %v2761_v22, 0.0  ;;  %v2462_v21 = vadd.f32 %v2382_v9, %v2299_v27  ;;  %v2001_v56 = vadd.f32 %v1923_v18, %v5378_v26  ;;  %v2103_v18 = vrot.slane %v4580_v38, 2 }
 0x223   : > { %v2800_v45 = vadd.f32 %v2799_v52, %v2798_v20 }
 0x224   : > { %v2625_v47 = vadd.f32 %v2545_v49, %v2462_v21  ;;  %3251 = vmatmul.msk.f32.gmra.mxu1 %vm892_vm1, %v4559_v13  ;;  %3291 = vmatmul.msk.f32.gmra.mxu2 %vm892_vm1, %v4923_v48  ;;  %v5380_v21 = vld [vmem:[#allocation60_spill] sm:$0xff] }
 0x226   : > { %v2661_v6 = vadd.f32 %v4834_v11, %v2625_v47  ;;  %3331 = vmatmul.msk.f32.gmra.mxu3 %vm892_vm1, %v4960_v16  ;;  %v2548_v55 = vpop.f32.mrf.mxu0  ;;  %v5034_v47 = vsel %vm2024_vm4, %v2101_v36, %v2103_v18 }
 0x227   : > { %v2222_v7 = vpop.f32.mrf.mxu2 }
 0x228   : > { %v2700_v54 = vsel %vm892_vm1, %v2661_v6, 0.0  ;;  %v2762_v58 = vmul.f32 %v2661_v6, %v2661_v6  ;;  %2867 = vst.msk [vmem:[%s4843_s8 + $0x40] sm:$0xff] %vm892_vm1, %v2661_v6  ;;  %v2300_v13 = vadd.f32 %v2222_v7, %v2001_v56  ;;  %v2323_v7 = vrot.slane %v3889_v24, 2 }
 0x229   : > { %v2701_v61 = vadd.f32 %v2700_v54, %v2699_v23  ;;  %v1926_v48 = vpop.f32.mrf.mxu1  ;;  %v2385_v57 = vpop.f32.mrf.mxu3  ;;  %3371 = vmatmul.msk.f32.gmra.mxu0 %vm892_vm1, %v4997_v53 }
 0x22a   : > { %v2801_v62 = vsel %vm892_vm1, %v2762_v58, 0.0  ;;  %v2463_v31 = vadd.f32 %v2385_v57, %v2300_v13  ;;  %v2002_v30 = vadd.f32 %v1926_v48, %v5379_v59  ;;  %v2324_v13 = vrot.slane %v3913_v41, 2  ;;  %v5381_v57 = vld [vmem:[#allocation61_spill] sm:$0xff] }
 0x22b   : > { %v2802_v5 = vadd.f32 %v2801_v62, %v2800_v45 }
 0x22c   : > { %v2626_v20 = vadd.f32 %v2548_v55, %v2463_v31  ;;  %3252 = vmatmul.msk.f32.gmra.mxu1 %vm892_vm1, %v4576_v44  ;;  %3292 = vmatmul.msk.f32.gmra.mxu2 %vm892_vm1, %v4942_v40  ;;  %v2325_v34 = vsel %vm2024_vm4, %v2323_v7, %v2324_v13 }
 0x22e   : > { %v2662_v1 = vadd.f32 %v4834_v11, %v2626_v20  ;;  %3332 = vmatmul.msk.f32.gmra.mxu3 %vm892_vm1, %v4979_v39  ;;  %v2551_v3 = vpop.f32.mrf.mxu0 }
 0x22f   : > { %v2225_v60 = vpop.f32.mrf.mxu2 }
 0x230   : > { %v2702_v49 = vsel %vm892_vm1, %v2662_v1, 0.0  ;;  %v2763_v63 = vmul.f32 %v2662_v1, %v2662_v1  ;;  %2868 = vst.msk [vmem:[%s4843_s8 + $0x48] sm:$0xff] %vm892_vm1, %v2662_v1  ;;  %v2301_v44 = vadd.f32 %v2225_v60, %v2002_v30 }
 0x231   : > { %v2703_v33 = vadd.f32 %v2702_v49, %v2701_v61  ;;  %v1929_v40 = vpop.f32.mrf.mxu1  ;;  %v2388_v22 = vpop.f32.mrf.mxu3  ;;  %3372 = vmatmul.msk.f32.gmra.mxu0 %vm892_vm1, %v5016_v28 }
 0x232   : > { %v2803_v27 = vsel %vm892_vm1, %v2763_v63, 0.0  ;;  %v2464_v23 = vadd.f32 %v2388_v22, %v2301_v44  ;;  %v2003_v46 = vadd.f32 %v1929_v40, %v5380_v21 }
 0x233   : > { %v2804_v9 = vadd.f32 %v2803_v27, %v2802_v5 }
 0x234   : > { %v2627_v52 = vadd.f32 %v2551_v3, %v2464_v23  ;;  %3253 = vmatmul.msk.f32.gmra.mxu1 %vm892_vm1, %v4597_v4  ;;  %3293 = vmatmul.msk.f32.gmra.mxu2 %vm892_vm1, %v4960_v16  ;;  %v2326_v3 = vrot.slane %v4617_v0, 2 }
 0x236   : > { %v2663_v10 = vadd.f32 %v4834_v11, %v2627_v52  ;;  %3333 = vmatmul.msk.f32.gmra.mxu3 %vm892_vm1, %v4997_v53  ;;  %v2554_v45 = vpop.f32.mrf.mxu0  ;;  %v2327_v40 = vsel %vm2024_vm4, %v2324_v13, %v2326_v3 }
 0x237   : > { %v2228_v38 = vpop.f32.mrf.mxu2 }
 0x238   : > { %v2704_v26 = vsel %vm892_vm1, %v2663_v10, 0.0  ;;  %v2764_v56 = vmul.f32 %v2663_v10, %v2663_v10  ;;  %2869 = vst.msk [vmem:[%s4843_s8 + $0x50] sm:$0xff] %vm892_vm1, %v2663_v10  ;;  %v2302_v4 = vadd.f32 %v2228_v38, %v2003_v46  ;;  %v5382_v46 = vld [vmem:[#allocation12_spill] sm:$0xff] }
 0x239   : > { %v2705_v6 = vadd.f32 %v2704_v26, %v2703_v33  ;;  %v1932_v16 = vpop.f32.mrf.mxu1  ;;  %v2391_v55 = vpop.f32.mrf.mxu3  ;;  %3373 = vmatmul.msk.f32.gmra.mxu0 %vm892_vm1, %v5034_v47 }
 0x23a   : > { %v2805_v54 = vsel %vm892_vm1, %v2764_v56, 0.0  ;;  %v2465_v58 = vadd.f32 %v2391_v55, %v2302_v4  ;;  %v2004_v62 = vadd.f32 %v1932_v16, %v5381_v57 }
 0x23b   : > { %v2806_v61 = vadd.f32 %v2805_v54, %v2804_v9 }
 0x23c   : > { %v2628_v48 = vadd.f32 %v2554_v45, %v2465_v58  ;;  %3254 = vmatmul.msk.f32.gmra.mxu1 %vm892_vm1, %v4613_v12  ;;  %3294 = vmatmul.msk.f32.gmra.mxu2 %vm892_vm1, %v4979_v39 }
 0x23e   : > { %v2664_v31 = vadd.f32 %v4834_v11, %v2628_v48  ;;  %3334 = vmatmul.msk.f32.gmra.mxu3 %vm892_vm1, %v5016_v28  ;;  %v2557_v24 = vpop.f32.mrf.mxu0 }
 0x23f   : > { %v2231_v36 = vpop.f32.mrf.mxu2 }
 0x240   : > { %v2706_v41 = vsel %vm892_vm1, %v2664_v31, 0.0  ;;  %v2765_v5 = vmul.f32 %v2664_v31, %v2664_v31  ;;  %2870 = vst.msk [vmem:[%s4843_s8 + $0x58] sm:$0xff] %vm892_vm1, %v2664_v31  ;;  %v2303_v12 = vadd.f32 %v2231_v36, %v2004_v62 }
 0x241   : > { %v2707_v20 = vadd.f32 %v2706_v41, %v2705_v6  ;;  %v1935_v59 = vpop.f32.mrf.mxu1  ;;  %v2394_v39 = vpop.f32.mrf.mxu3  ;;  %3374 = vmatmul.msk.f32.gmra.mxu0 %vm892_vm1, %v2325_v34 }
 0x242   : > { %v2807_v30 = vsel %vm892_vm1, %v2765_v5, 0.0  ;;  %v2466_v1 = vadd.f32 %v2394_v39, %v2303_v12  ;;  %v2005_v63 = vadd.f32 %v1935_v59, %v4604_v17 }
 0x243   : > { %v2808_v60 = vadd.f32 %v2807_v30, %v2806_v61 }
 0x244   : > { %v2629_v49 = vadd.f32 %v2557_v24, %v2466_v1  ;;  %3255 = vmatmul.msk.f32.gmra.mxu1 %vm892_vm1, %v4631_v37  ;;  %3295 = vmatmul.msk.f32.gmra.mxu2 %vm892_vm1, %v4997_v53 }
 0x246   : > { %v2665_v44 = vadd.f32 %v4834_v11, %v2629_v49  ;;  %3335 = vmatmul.msk.f32.gmra.mxu3 %vm892_vm1, %v5034_v47  ;;  %v2560_v33 = vpop.f32.mrf.mxu0 }
 0x247   : > { %v2234_v22 = vpop.f32.mrf.mxu2 }
 0x248   : > { %v2708_v0 = vsel %vm892_vm1, %v2665_v44, 0.0  ;;  %v2766_v27 = vmul.f32 %v2665_v44, %v2665_v44  ;;  %2871 = vst.msk [vmem:[%s4843_s8 + $0x60] sm:$0xff] %vm892_vm1, %v2665_v44  ;;  %v2304_v37 = vadd.f32 %v2234_v22, %v2005_v63 }
 0x249   : > { %v2709_v23 = vadd.f32 %v2708_v0, %v2707_v20  ;;  %v1938_v18 = vpop.f32.mrf.mxu1  ;;  %v2397_v53 = vpop.f32.mrf.mxu3  ;;  %3375 = vmatmul.msk.f32.gmra.mxu0 %vm892_vm1, %v2327_v40 }
 0x24a   : > { %v2809_v17 = vsel %vm892_vm1, %v2766_v27, 0.0  ;;  %v2467_v9 = vadd.f32 %v2397_v53, %v2304_v37  ;;  %v2006_v10 = vadd.f32 %v1938_v18, %v4622_v35 }
 0x24b   : > { %v2810_v52 = vadd.f32 %v2809_v17, %v2808_v60 }
 0x24c   : > { %v2630_v21 = vadd.f32 %v2560_v33, %v2467_v9  ;;  %3256 = vmatmul.msk.f32.gmra.mxu1 %vm892_vm1, %v5382_v46  ;;  %3296 = vmatmul.msk.f32.gmra.mxu2 %vm892_vm1, %v5016_v28 }
 0x24e   : > { %v2666_v45 = vadd.f32 %v4834_v11, %v2630_v21  ;;  %3336 = vmatmul.msk.f32.gmra.mxu3 %vm892_vm1, %v2325_v34  ;;  %v2563_v38 = vpop.f32.mrf.mxu0 }
 0x24f   : > { %v2237_v26 = vpop.f32.mrf.mxu2 }
 0x250   : > { %v2710_v56 = vsel %vm892_vm1, %v2666_v45, 0.0  ;;  %v2767_v4 = vmul.f32 %v2666_v45, %v2666_v45  ;;  %2872 = vst.msk [vmem:[%s4843_s8 + $0x68] sm:$0xff] %vm892_vm1, %v2666_v45  ;;  %v2305_v6 = vadd.f32 %v2237_v26, %v2006_v10 }
 0x251   : > { %v2711_v16 = vadd.f32 %v2710_v56, %v2709_v23  ;;  %v1941_v55 = vpop.f32.mrf.mxu1  ;;  %v2400_v7 = vpop.f32.mrf.mxu3  ;;  %3376 = vmatmul.msk.f32.gmra.mxu0 %vm892_vm1, %v4636_v25 }
 0x252   : > { %v2811_v35 = vsel %vm892_vm1, %v2767_v4, 0.0  ;;  %v2468_v28 = vadd.f32 %v2400_v7, %v2305_v6  ;;  %v2007_v13 = vadd.f32 %v1941_v55, %v4643_v29 }
 0x253   : > { %v2812_v54 = vadd.f32 %v2811_v35, %v2810_v52 }
 0x254   : > { %v2631_v58 = vadd.f32 %v2563_v38, %v2468_v28  ;;  %3257 = vmatmul.msk.f32.gmra.mxu1 %vm892_vm1, %v5382_v46  ;;  %3297 = vmatmul.msk.f32.gmra.mxu2 %vm892_vm1, %v5034_v47 }
 0x256   : > { %v2667_v61 = vadd.f32 %v4834_v11, %v2631_v58  ;;  %3337 = vmatmul.msk.f32.gmra.mxu3 %vm892_vm1, %v2327_v40  ;;  %v2566_v48 = vpop.f32.mrf.mxu0 }
 0x257   : > { %v2240_v57 = vpop.f32.mrf.mxu2 }
 0x258   : > { %v2712_v62 = vsel %vm892_vm1, %v2667_v61, 0.0  ;;  %v2768_v31 = vmul.f32 %v2667_v61, %v2667_v61  ;;  %2873 = vst.msk [vmem:[%s4843_s8 + $0x70] sm:$0xff] %vm892_vm1, %v2667_v61  ;;  %v2306_v24 = vadd.f32 %v2240_v57, %v2007_v13 }
 0x259   : > { %v2713_v34 = vadd.f32 %v2712_v62, %v2711_v16  ;;  %v1944_v36 = vpop.f32.mrf.mxu1  ;;  %v2403_v41 = vpop.f32.mrf.mxu3  ;;  %3377 = vmatmul.msk.f32.gmra.mxu0 %vm892_vm1, %v4636_v25 }
 0x25a   : > { %v2813_v29 = vsel %vm892_vm1, %v2768_v31, 0.0  ;;  %v2469_v47 = vadd.f32 %v2403_v41, %v2306_v24  ;;  %v2008_v20 = vadd.f32 %v1944_v36, %v4656_v50 }
 0x25b   : > { %v2814_v5 = vadd.f32 %v2813_v29, %v2812_v54 }
 0x25c   : > { %v2632_v12 = vadd.f32 %v2566_v48, %v2469_v47 }
 0x25e   : > { %v2668_v59 = vadd.f32 %v4834_v11, %v2632_v12  ;;  %v2569_v39 = vpop.f32.mrf.mxu0 }
 0x25f   : > { %v2243_v30 = vpop.f32.mrf.mxu2 }
 0x260   : > { %v2714_v1 = vsel %vm892_vm1, %v2668_v59, 0.0  ;;  %v2769_v3 = vmul.f32 %v2668_v59, %v2668_v59  ;;  %2874 = vst.msk [vmem:[%s4843_s8 + $0x78] sm:$0xff] %vm892_vm1, %v2668_v59  ;;  %v2307_v60 = vadd.f32 %v2243_v30, %v2008_v20 }
 0x261   : > { %v2715_v49 = vadd.f32 %v2714_v1, %v2713_v34  ;;  %v1947_v25 = vpop.f32.mrf.mxu1  ;;  %v2406_v63 = vpop.f32.mrf.mxu3 }
 0x262   : > { %v2815_v44 = vsel %vm892_vm1, %v2769_v3, 0.0  ;;  %v2470_v33 = vadd.f32 %v2406_v63, %v2307_v60  ;;  %v2009_v50 = vadd.f32 %v1947_v25, %v4668_v8 }
 0x263   : > { %v2816_v40 = vadd.f32 %v2815_v44, %v2814_v5 }
 0x264   : > { %v2633_v22 = vadd.f32 %v2569_v39, %v2470_v33 }
 0x266   : > { %v2669_v0 = vadd.f32 %v4834_v11, %v2633_v22  ;;  %v2572_v27 = vpop.f32.mrf.mxu0 }
 0x267   : > { %v2246_v37 = vpop.f32.mrf.mxu2 }
 0x268   : > { %v2716_v23 = vsel %vm892_vm1, %v2669_v0, 0.0  ;;  %v2770_v18 = vmul.f32 %v2669_v0, %v2669_v0  ;;  %2875 = vst.msk [vmem:[%s4843_s8 + $0x80] sm:$0xff] %vm892_vm1, %v2669_v0  ;;  %v2308_v53 = vadd.f32 %v2246_v37, %v2009_v50 }
 0x269   : > { %v2717_v17 = vadd.f32 %v2716_v23, %v2715_v49  ;;  %v1950_v9 = vpop.f32.mrf.mxu1  ;;  %v2409_v52 = vpop.f32.mrf.mxu3 }
 0x26a   : > { %v2817_v21 = vsel %vm892_vm1, %v2770_v18, 0.0  ;;  %v2471_v46 = vadd.f32 %v2409_v52, %v2308_v53  ;;  %v2010_v8 = vadd.f32 %v1950_v9, %v4678_v2 }
 0x26b   : > { %v2818_v10 = vadd.f32 %v2817_v21, %v2816_v40 }
 0x26c   : > { %v2634_v45 = vadd.f32 %v2572_v27, %v2471_v46 }
 0x26e   : > { %v2670_v38 = vadd.f32 %v4834_v11, %v2634_v45  ;;  %v2575_v26 = vpop.f32.mrf.mxu0 }
 0x26f   : > { %v2249_v56 = vpop.f32.mrf.mxu2 }
 0x270   : > { %v2718_v4 = vsel %vm892_vm1, %v2670_v38, 0.0  ;;  %v2771_v6 = vmul.f32 %v2670_v38, %v2670_v38  ;;  %2876 = vst.msk [vmem:[%s4843_s8 + $0x88] sm:$0xff] %vm892_vm1, %v2670_v38  ;;  %v2309_v16 = vadd.f32 %v2249_v56, %v2010_v8 }
 0x271   : > { %v2719_v55 = vadd.f32 %v2718_v4, %v2717_v17  ;;  %v1953_v7 = vpop.f32.mrf.mxu1  ;;  %v2412_v35 = vpop.f32.mrf.mxu3 }
 0x272   : > { %v2819_v28 = vsel %vm892_vm1, %v2771_v6, 0.0  ;;  %v2472_v54 = vadd.f32 %v2412_v35, %v2309_v16  ;;  %v2011_v2 = vadd.f32 %v1953_v7, %v4689_v14 }
 0x273   : > { %v2820_v58 = vadd.f32 %v2819_v28, %v2818_v10 }
 0x274   : > { %v2635_v13 = vadd.f32 %v2575_v26, %v2472_v54 }
 0x276   : > { %v2671_v61 = vadd.f32 %v4834_v11, %v2635_v13  ;;  %v2578_v48 = vpop.f32.mrf.mxu0 }
 0x277   : > { %v2252_v57 = vpop.f32.mrf.mxu2 }
 0x278   : > { %v2720_v62 = vsel %vm892_vm1, %v2671_v61, 0.0  ;;  %v2772_v31 = vmul.f32 %v2671_v61, %v2671_v61  ;;  %2877 = vst.msk [vmem:[%s4843_s8 + $0x90] sm:$0xff] %vm892_vm1, %v2671_v61  ;;  %v2310_v24 = vadd.f32 %v2252_v57, %v2011_v2 }
 0x279   : > { %v2721_v34 = vadd.f32 %v2720_v62, %v2719_v55  ;;  %v1956_v36 = vpop.f32.mrf.mxu1  ;;  %v2415_v41 = vpop.f32.mrf.mxu3 }
 0x27a   : > { %v2821_v29 = vsel %vm892_vm1, %v2772_v31, 0.0  ;;  %v2473_v47 = vadd.f32 %v2415_v41, %v2310_v24  ;;  %v2012_v14 = vadd.f32 %v1956_v36, %v4699_v43 }
 0x27b   : > { %v2822_v5 = vadd.f32 %v2821_v29, %v2820_v58  ;;  %v5384_v58 = vld [vmem:[#allocation26_spill] sm:$0xff] }
 0x27c   : > { %v2636_v12 = vadd.f32 %v2578_v48, %v2473_v47 }
 0x27e   : > { %v2672_v20 = vadd.f32 %v4834_v11, %v2636_v12  ;;  %v2581_v59 = vpop.f32.mrf.mxu0  ;;  %v5385_v12 = vld [vmem:[#allocation9_spill] sm:$0xff] }
 0x27f   : > { %v2255_v39 = vpop.f32.mrf.mxu2 }
 0x280   : > { %v2722_v30 = vsel %vm892_vm1, %v2672_v20, 0.0  ;;  %v2773_v1 = vmul.f32 %v2672_v20, %v2672_v20  ;;  %2878 = vst.msk [vmem:[%s4843_s8 + $0x98] sm:$0xff] %vm892_vm1, %v2672_v20  ;;  %v2311_v3 = vadd.f32 %v2255_v39, %v2012_v14 }
 0x281   : > { %v2723_v60 = vadd.f32 %v2722_v30, %v2721_v34  ;;  %v1959_v49 = vpop.f32.mrf.mxu1  ;;  %v2418_v25 = vpop.f32.mrf.mxu3 }
 0x282   : > { %v2823_v63 = vsel %vm892_vm1, %v2773_v1, 0.0  ;;  %v2474_v44 = vadd.f32 %v2418_v25, %v2311_v3  ;;  %v2013_v43 = vadd.f32 %v1959_v49, %v4710_v15  ;;  %v5383_v15 = vld [vmem:[#allocation13_spill] sm:$0xff] }
 0x283   : > { %v2824_v33 = vadd.f32 %v2823_v63, %v2822_v5 }
 0x284   : > { %v2637_v40 = vadd.f32 %v2581_v59, %v2474_v44 }
 0x286   : > { %v2673_v22 = vadd.f32 %v4834_v11, %v2637_v40  ;;  %v2584_v50 = vpop.f32.mrf.mxu0 }
 0x287   : > { %v2258_v0 = vpop.f32.mrf.mxu2 }
 0x288   : > { %v2724_v27 = vsel %vm892_vm1, %v2673_v22, 0.0  ;;  %v2774_v37 = vmul.f32 %v2673_v22, %v2673_v22  ;;  %2879 = vst.msk [vmem:[%s4843_s8 + $0xa0] sm:$0xff] %vm892_vm1, %v2673_v22  ;;  %v2312_v23 = vadd.f32 %v2258_v0, %v2013_v43  ;;  %v5386_v43 = vld [vmem:[#allocation11_spill] sm:$0xff] }
 0x289   : > { %v2725_v18 = vadd.f32 %v2724_v27, %v2723_v60  ;;  %v1962_v53 = vpop.f32.mrf.mxu1  ;;  %v2421_v17 = vpop.f32.mrf.mxu3 }
 0x28a   : > { %v2825_v9 = vsel %vm892_vm1, %v2774_v37, 0.0  ;;  %v2475_v52 = vadd.f32 %v2421_v17, %v2312_v23  ;;  %v2014_v10 = vadd.f32 %v1962_v53, %v5383_v15 }
 0x28b   : > { %v2826_v21 = vadd.f32 %v2825_v9, %v2824_v33 }
 0x28c   : > { %v2638_v46 = vadd.f32 %v2584_v50, %v2475_v52 }
 0x28e   : > { %v2674_v45 = vadd.f32 %v4834_v11, %v2638_v46  ;;  %v2587_v8 = vpop.f32.mrf.mxu0 }
 0x28f   : > { %v2261_v38 = vpop.f32.mrf.mxu2 }
 0x290   : > { %v2726_v26 = vsel %vm892_vm1, %v2674_v45, 0.0  ;;  %v2775_v56 = vmul.f32 %v2674_v45, %v2674_v45  ;;  %2880 = vst.msk [vmem:[%s4843_s8 + $0xa8] sm:$0xff] %vm892_vm1, %v2674_v45  ;;  %v2313_v4 = vadd.f32 %v2261_v38, %v2014_v10  ;;  %v5387_v10 = vld [vmem:[#allocation14_spill] sm:$0xff] }
 0x291   : > { %v2727_v6 = vadd.f32 %v2726_v26, %v2725_v18  ;;  %v1965_v16 = vpop.f32.mrf.mxu1  ;;  %v2424_v55 = vpop.f32.mrf.mxu3 }
 0x292   : > { %v2827_v7 = vsel %vm892_vm1, %v2775_v56, 0.0  ;;  %v2476_v35 = vadd.f32 %v2424_v55, %v2313_v4  ;;  %v2015_v13 = vadd.f32 %v1965_v16, %v5384_v58 }
 0x293   : > { %v2828_v28 = vadd.f32 %v2827_v7, %v2826_v21 }
 0x294   : > { %v2639_v54 = vadd.f32 %v2587_v8, %v2476_v35 }
 0x296   : > { %v2675_v2 = vadd.f32 %v4834_v11, %v2639_v54  ;;  %v2590_v61 = vpop.f32.mrf.mxu0 }
 0x297   : > { %v2264_v48 = vpop.f32.mrf.mxu2 }
 0x298   : > { %v2728_v57 = vsel %vm892_vm1, %v2675_v2, 0.0  ;;  %v2776_v62 = vmul.f32 %v2675_v2, %v2675_v2  ;;  %2881 = vst.msk [vmem:[%s4843_s8 + $0xb0] sm:$0xff] %vm892_vm1, %v2675_v2  ;;  %v2314_v31 = vadd.f32 %v2264_v48, %v2015_v13  ;;  %v5388_v13 = vld [vmem:[#allocation29_spill] sm:$0xff] }
 0x299   : > { %v2729_v24 = vadd.f32 %v2728_v57, %v2727_v6  ;;  %v1968_v34 = vpop.f32.mrf.mxu1  ;;  %v2427_v36 = vpop.f32.mrf.mxu3 }
 0x29a   : > { %v2829_v41 = vsel %vm892_vm1, %v2776_v62, 0.0  ;;  %v2477_v29 = vadd.f32 %v2427_v36, %v2314_v31  ;;  %v2016_v14 = vadd.f32 %v1968_v34, %v5385_v12 }
 0x29b   : > { %v2830_v47 = vadd.f32 %v2829_v41, %v2828_v28 }
 0x29c   : > { %v2640_v5 = vadd.f32 %v2590_v61, %v2477_v29 }
 0x29e   : > { %v2676_v20 = vadd.f32 %v4834_v11, %v2640_v5  ;;  %v2593_v59 = vpop.f32.mrf.mxu0 }
 0x29f   : > { %v2267_v39 = vpop.f32.mrf.mxu2 }
 0x2a0   : > { %v2730_v30 = vsel %vm892_vm1, %v2676_v20, 0.0  ;;  %v2777_v1 = vmul.f32 %v2676_v20, %v2676_v20  ;;  %2882 = vst.msk [vmem:[%s4843_s8 + $0xb8] sm:$0xff] %vm892_vm1, %v2676_v20  ;;  %v2315_v3 = vadd.f32 %v2267_v39, %v2016_v14 }
 0x2a1   : > { %v2731_v60 = vadd.f32 %v2730_v30, %v2729_v24  ;;  %v1971_v49 = vpop.f32.mrf.mxu1  ;;  %v2430_v25 = vpop.f32.mrf.mxu3 }
 0x2a2   : > { %v2831_v63 = vsel %vm892_vm1, %v2777_v1, 0.0  ;;  %v2478_v44 = vadd.f32 %v2430_v25, %v2315_v3  ;;  %v2017_v22 = vadd.f32 %v1971_v49, %v5386_v43 }
 0x2a3   : > { %v2832_v33 = vadd.f32 %v2831_v63, %v2830_v47 }
 0x2a4   : > { %v2641_v40 = vadd.f32 %v2593_v59, %v2478_v44 }
 0x2a6   : > { %v2677_v50 = vadd.f32 %v4834_v11, %v2641_v40  ;;  %v2596_v0 = vpop.f32.mrf.mxu0 }
 0x2a7   : > { %v2270_v27 = vpop.f32.mrf.mxu2 }
 0x2a8   : > { %v2732_v37 = vsel %vm892_vm1, %v2677_v50, 0.0  ;;  %v2778_v23 = vmul.f32 %v2677_v50, %v2677_v50  ;;  %2883 = vst.msk [vmem:[%s4843_s8 + $0xc0] sm:$0xff] %vm892_vm1, %v2677_v50  ;;  %v2316_v18 = vadd.f32 %v2270_v27, %v2017_v22 }
 0x2a9   : > { %v2733_v53 = vadd.f32 %v2732_v37, %v2731_v60  ;;  %v1974_v17 = vpop.f32.mrf.mxu1  ;;  %v2433_v9 = vpop.f32.mrf.mxu3 }
 0x2aa   : > { %v2833_v52 = vsel %vm892_vm1, %v2778_v23, 0.0  ;;  %v2479_v21 = vadd.f32 %v2433_v9, %v2316_v18  ;;  %v2018_v45 = vadd.f32 %v1974_v17, %v5387_v10 }
 0x2ab   : > { %v2834_v46 = vadd.f32 %v2833_v52, %v2832_v33 }
 0x2ac   : > { %v2642_v15 = vadd.f32 %v2596_v0, %v2479_v21 }
 0x2ae   : > { %v2678_v8 = vadd.f32 %v4834_v11, %v2642_v15  ;;  %v2599_v38 = vpop.f32.mrf.mxu0 }
 0x2af   : > { %v2273_v26 = vpop.f32.mrf.mxu2 }
 0x2b0   : > { %v2734_v56 = vsel %vm892_vm1, %v2678_v8, 0.0  ;;  %v2779_v4 = vmul.f32 %v2678_v8, %v2678_v8  ;;  %2884 = vst.msk [vmem:[%s4843_s8 + $0xc8] sm:$0xff] %vm892_vm1, %v2678_v8  ;;  %v2317_v6 = vadd.f32 %v2273_v26, %v2018_v45 }
 0x2b1   : > { %v2735_v16 = vadd.f32 %v2734_v56, %v2733_v53  ;;  %v1977_v55 = vpop.f32.mrf.mxu1  ;;  %v2436_v7 = vpop.f32.mrf.mxu3 }
 0x2b2   : > { %v2835_v35 = vsel %vm892_vm1, %v2779_v4, 0.0  ;;  %v2480_v28 = vadd.f32 %v2436_v7, %v2317_v6  ;;  %v2019_v2 = vadd.f32 %v1977_v55, %v5388_v13 }
 0x2b3   : > { %v2836_v54 = vadd.f32 %v2835_v35, %v2834_v46 }
 0x2b4   : > { %v2643_v58 = vadd.f32 %v2599_v38, %v2480_v28 }
 0x2b6   : > { %v2679_v61 = vadd.f32 %v4834_v11, %v2643_v58  ;;  %v2602_v48 = vpop.f32.mrf.mxu0 }
 0x2b7   : > { %v2276_v57 = vpop.f32.mrf.mxu2 }
 0x2b8   : > { %v2736_v62 = vsel %vm892_vm1, %v2679_v61, 0.0  ;;  %v2780_v31 = vmul.f32 %v2679_v61, %v2679_v61  ;;  %2885 = vst.msk [vmem:[%s4843_s8 + $0xd0] sm:$0xff] %vm892_vm1, %v2679_v61  ;;  %v2318_v24 = vadd.f32 %v2276_v57, %v2019_v2 }
 0x2b9   : > { %v2737_v34 = vadd.f32 %v2736_v62, %v2735_v16  ;;  %v1980_v36 = vpop.f32.mrf.mxu1  ;;  %v2439_v41 = vpop.f32.mrf.mxu3 }
 0x2ba   : > { %v2837_v29 = vsel %vm892_vm1, %v2780_v31, 0.0  ;;  %v2481_v47 = vadd.f32 %v2439_v41, %v2318_v24  ;;  %v2020_v14 = vadd.f32 %v1980_v36, %v4783_v42 }
 0x2bb   : > { %v2838_v5 = vadd.f32 %v2837_v29, %v2836_v54 }
 0x2bc   : > { %v2644_v12 = vadd.f32 %v2602_v48, %v2481_v47 }
 0x2be   : > { %v2680_v20 = vadd.f32 %v4834_v11, %v2644_v12  ;;  %v2605_v59 = vpop.f32.mrf.mxu0  ;;  %v3436_v11 = vld [vmem:[%s5216_s4] ss:$0 sm:$0xff] }
 0x2bf   : > { %v2279_v39 = vpop.f32.mrf.mxu2 }
 0x2c0   : > { %v2738_v30 = vsel %vm892_vm1, %v2680_v20, 0.0  ;;  %v2781_v1 = vmul.f32 %v2680_v20, %v2680_v20  ;;  %2886 = vst.msk [vmem:[%s4843_s8 + $0xd8] sm:$0xff] %vm892_vm1, %v2680_v20  ;;  %v2319_v3 = vadd.f32 %v2279_v39, %v2020_v14 }
 0x2c1   : > { %v2739_v60 = vadd.f32 %v2738_v30, %v2737_v34  ;;  %v1983_v49 = vpop.f32.mrf.mxu1  ;;  %v2442_v25 = vpop.f32.mrf.mxu3 }
 0x2c2   : > { %v2839_v63 = vsel %vm892_vm1, %v2781_v1, 0.0  ;;  %v2482_v44 = vadd.f32 %v2442_v25, %v2319_v3  ;;  %v2021_v42 = vadd.f32 %v1983_v49, %v4794_v19 }
 0x2c3   : > { %v2840_v33 = vadd.f32 %v2839_v63, %v2838_v5 }
 0x2c4   : > { %v2645_v40 = vadd.f32 %v2605_v59, %v2482_v44 }
 0x2c6   : > { %v2681_v43 = vadd.f32 %v3436_v11, %v2645_v40  ;;  %v2608_v22 = vpop.f32.mrf.mxu0 }
 0x2c7   : > { %v2282_v50 = vpop.f32.mrf.mxu2 }
 0x2c8   : > { %v2740_v0 = vsel %vm892_vm1, %v2681_v43, 0.0  ;;  %v2782_v27 = vmul.f32 %v2681_v43, %v2681_v43  ;;  %2887 = vst.msk [vmem:[%s4843_s8 + $0xe0] sm:$0xff] %vm892_vm1, %v2681_v43  ;;  %v2320_v37 = vadd.f32 %v2282_v50, %v2021_v42 }
 0x2c9   : > { %v2741_v23 = vadd.f32 %v2740_v0, %v2739_v60  ;;  %v1986_v18 = vpop.f32.mrf.mxu1  ;;  %v2445_v53 = vpop.f32.mrf.mxu3 }
 0x2ca   : > { %v2841_v17 = vsel %vm892_vm1, %v2782_v27, 0.0  ;;  %v2483_v19 = vadd.f32 %v2445_v53, %v2320_v37  ;;  %v2022_v21 = vadd.f32 %v1986_v18, %v4804_v51 }
 0x2cb   : > { %v2842_v9 = vadd.f32 %v2841_v17, %v2840_v33 }
 0x2cc   : > { %v2646_v52 = vadd.f32 %v2608_v22, %v2483_v19 }
 0x2ce   : > { %v2682_v46 = vadd.f32 %v3436_v11, %v2646_v52  ;;  %v2611_v10 = vpop.f32.mrf.mxu0 }
 0x2cf   : > { %v2285_v15 = vpop.f32.mrf.mxu2 }
 0x2d0   : > { %v2742_v45 = vsel %vm892_vm1, %v2682_v46, 0.0  ;;  %v2783_v8 = vmul.f32 %v2682_v46, %v2682_v46  ;;  %2888 = vst.msk [vmem:[%s4843_s8 + $0xe8] sm:$0xff] %vm892_vm1, %v2682_v46  ;;  %v2321_v38 = vadd.f32 %v2285_v15, %v2022_v21 }
 0x2d1   : > { %v2743_v26 = vadd.f32 %v2742_v45, %v2741_v23  ;;  %v2448_v56 = vpop.f32.mrf.mxu3  ;;  %v1989_v55 = vpop.f32.mrf.mxu1 }
 0x2d2   : > { %v2843_v4 = vsel %vm892_vm1, %v2783_v8, 0.0  ;;  %v2484_v6 = vadd.f32 %v2448_v56, %v2321_v38  ;;  %v2023_v51 = vadd.f32 %v1989_v55, %v4818_v32 }
 0x2d3   : > { %v2844_v16 = vadd.f32 %v2843_v4, %v2842_v9 }
 0x2d4   : > { %v2647_v7 = vadd.f32 %v2611_v10, %v2484_v6 }
 0x2d6   : > { %v2683_v35 = vadd.f32 %v3436_v11, %v2647_v7  ;;  %v2614_v48 = vpop.f32.mrf.mxu0 }
 0x2d7   : > { %v2288_v28 = vpop.f32.mrf.mxu2 }
 0x2d8   : > { %v2744_v54 = vsel %vm892_vm1, %v2683_v35, 0.0  ;;  %v2784_v58 = vmul.f32 %v2683_v35, %v2683_v35  ;;  %2889 = vst.msk [vmem:[%s4843_s8 + $0xf0] sm:$0xff] %vm892_vm1, %v2683_v35  ;;  %v2322_v13 = vadd.f32 %v2288_v28, %v2023_v51 }
 0x2d9   : > { %v2745_v2 = vadd.f32 %v2744_v54, %v2743_v26  ;;  %v2451_v61 = vpop.f32.mrf.mxu3 }
 0x2da   : > { %v2845_v57 = vsel %vm892_vm1, %v2784_v58, 0.0  ;;  %v2485_v62 = vadd.f32 %v2451_v61, %v2322_v13 }
 0x2db   : > { %v2846_v31 = vadd.f32 %v2845_v57, %v2844_v16 }
 0x2dc   : > { %v2648_v24 = vadd.f32 %v2614_v48, %v2485_v62 }
 0x2de   : > { %v2684_v34 = vadd.f32 %v3436_v11, %v2648_v24 }
 0x2e0   : > { %v2746_v32 = vsel %vm892_vm1, %v2684_v34, 0.0  ;;  %v2785_v36 = vmul.f32 %v2684_v34, %v2684_v34  ;;  %2890 = vst.msk [vmem:[%s4843_s8 + $0xf8] sm:$0xff] %vm892_vm1, %v2684_v34 }
 0x2e1   : > { %v2747_v41 = vadd.f32 %v2746_v32, %v2745_v2 }
 0x2e2   : > { %v2847_v29 = vsel %vm892_vm1, %v2785_v36, 0.0 }
 0x2e3   : > { %v2748_v47 = vrot.slane %v2747_v41, 4  ;;  %v2848_v5 = vadd.f32 %v2847_v29, %v2846_v31 }
 0x2e5   : > { %v2749_v12 = vadd.f32 %v2748_v47, %v2747_v41  ;;  %v2849_v14 = vrot.slane %v2848_v5, 4 }
 0x2e7   : > { %v2750_v20 = vrot.slane %v2749_v12, 2  ;;  %v2850_v59 = vadd.f32 %v2849_v14, %v2848_v5 }
 0x2e9   : > { %v2751_v39 = vadd.f32 %v2750_v20, %v2749_v12  ;;  %v2851_v30 = vrot.slane %v2850_v59, 2 }
 0x2eb   : > { %v2752_v1 = vrot.slane %v2751_v39, 1  ;;  %v2852_v3 = vadd.f32 %v2851_v30, %v2850_v59 }
 0x2ed   : > { %v2853_v60 = vrot.slane %v2852_v3, 1  ;;  %v2753_v49 = vadd.f32 %v2752_v1, %v2751_v39 }
 0x2ef   : > { %v2854_v25 = vadd.f32 %v2853_v60, %v2852_v3 }
 0x2f1   : > { %v2856_v63 = vsel %vm2855_vm5, %v2753_v49, %v2854_v25 }
 0x2f2   : > { %2858 = vst.msk [vmem:[%s295_s14] sm:$0x3] %vm2857_vm6, %v2856_v63 }
 0x2f3 PF: > { %s17_s23 = sadd.s32 1, %s3459_s23   ;;  %s5389_s21 = smov %s3455_s22 }
 0x2f4   : > { %p14_p5 = scmp.ge.s32.totalorder %s17_s23, 4   ;;  %s5390_s22 = smov %s5392_s24 }
 0x2f6   :  { %16 = sbr.rel (!%p14_p5) target bundleno = 2 (0x2), region = 91 }

</bundles_post_ra>
